<compile_context>
chip_gen: v7x
topology: tpu7x:2x2x1
jax: 0.10.0
libtpu: 0.0.40
codegen_flags: <defaults>
</compile_context>

<pallas_src>
import numpy as np
import jax
import jax.numpy as jnp
from jax import lax
from jax.experimental import pallas as pl
from jax.experimental.pallas import tpu as pltpu

_MIB = 1024 * 1024


def make_dwt_inverse_filters():
    """Same deterministic filter construction as the PyTorch module __init__ (for the ref check)."""
    ll = np.array([[0.5, 0.5], [0.5, 0.5]])
    lh = np.array([[-0.5, -0.5], [0.5, 0.5]])
    hl = np.array([[-0.5, 0.5], [-0.5, 0.5]])
    hh = np.array([[0.5, -0.5], [-0.5, 0.5]])
    filts = np.stack(
        [ll[None, ::-1, ::-1], lh[None, ::-1, ::-1],
         hl[None, ::-1, ::-1], hh[None, ::-1, ::-1]],
        axis=0,
    ).astype(np.float32)  # (4, 1, 2, 2)
    return filts


def _butterfly(x0, x1, x2, x3):
    # Haar synthesis butterfly; all filter taps are +/-0.5 and baked in as constants.
    t0 = x0 + x1
    t1 = x0 - x1
    t2 = x2 + x3
    t3 = x2 - x3
    y00 = 0.5 * (t0 + t2)   # -> output row 2i,   col 2j
    y01 = 0.5 * (t0 - t2)   # -> output row 2i,   col 2j+1
    y10 = 0.5 * (t1 + t3)   # -> output row 2i+1, col 2j
    y11 = 0.5 * (t1 - t3)   # -> output row 2i+1, col 2j+1
    return y00, y01, y10, y11


def _interleave_lanes(a, b):
    # (..., L), (..., L) -> (..., 2L): a in even lanes, b in odd lanes (column upsample).
    *lead, L = a.shape
    return jnp.stack([a, b], axis=-1).reshape(*lead, 2 * L)


# ----------------------------------------------------------------------------------------------
# Path A (general): in (G, 4, Th, W) -> out (G, Th, 4W); output row pair fused into lanes.
# Compute runs in 8-row strips (fori_loop) so vreg live ranges stay bounded for large blocks.
# ----------------------------------------------------------------------------------------------
def _dwt_inv_kernel_rowpack(x_ref, o_ref):
    G, _, Th, W = x_ref.shape

    def do_rows(g, r0, nrows):
        x0 = x_ref[pl.ds(g, 1), 0, pl.ds(r0, nrows), :]
        x1 = x_ref[pl.ds(g, 1), 1, pl.ds(r0, nrows), :]
        x2 = x_ref[pl.ds(g, 1), 2, pl.ds(r0, nrows), :]
        x3 = x_ref[pl.ds(g, 1), 3, pl.ds(r0, nrows), :]
        y00, y01, y10, y11 = _butterfly(x0, x1, x2, x3)
        row_e = _interleave_lanes(y00, y01)   # output row 2i   (2W lanes)
        row_o = _interleave_lanes(y10, y11)   # output row 2i+1 (2W lanes)
        o_ref[pl.ds(g, 1), pl.ds(r0, nrows), :] = jnp.concatenate(
            [row_e, row_o], axis=-1).astype(o_ref.dtype)

    n_full = Th // 8
    tail = Th - n_full * 8

    if n_full:
        def strip(s, carry):
            g = s // n_full
            r0 = pl.multiple_of((s % n_full) * 8, 8)
            do_rows(g, r0, 8)
            return carry
        lax.fori_loop(0, G * n_full, strip, 0)
    if tail:
        def tail_strip(g, carry):
            do_rows(g, n_full * 8, tail)
            return carry
        lax.fori_loop(0, G, tail_strip, 0)


# ----------------------------------------------------------------------------------------------
# Path B (small images, W < 64 and H <= 32): in (G, 4, H, W) -> out (G, 4*H*W).
# Each group's entire (2H, 2W) output image becomes one dense lane row; groups pack the
# sublanes (processed 8 at a time), so stores and DMAs are fully dense even for W = 16.
# ----------------------------------------------------------------------------------------------
def _dwt_inv_kernel_smallimg(x_ref, o_ref):
    G, _, H, W = x_ref.shape

    def do_groups(g0, ng):
        pieces = []
        for i in range(H):                       # static unroll; H <= 32 on this path
            x0 = x_ref[pl.ds(g0, ng), 0, i, :]
            x1 = x_ref[pl.ds(g0, ng), 1, i, :]
            x2 = x_ref[pl.ds(g0, ng), 2, i, :]
            x3 = x_ref[pl.ds(g0, ng), 3, i, :]
            y00, y01, y10, y11 = _butterfly(x0, x1, x2, x3)
            pieces.append(_interleave_lanes(y00, y01))   # output row 2i
            pieces.append(_interleave_lanes(y10, y11))   # output row 2i+1
        o_ref[pl.ds(g0, ng), :] = jnp.concatenate(pieces, axis=-1).astype(o_ref.dtype)

    n_full = G // 8
    tail = G - n_full * 8
    if n_full:
        def strip(s, carry):
            do_groups(pl.multiple_of(s * 8, 8), 8)
            return carry
        lax.fori_loop(0, n_full, strip, 0)
    if tail:
        do_groups(n_full * 8, tail)


# ----------------------------------------------------------------------------------------------
# Path C (very wide W, rare): lane-tiled fallback in the original (2H, 2W) spatial layout.
# 2*Wt >= 256 lanes here, so stores are dense even with the sublane interleave.
# ----------------------------------------------------------------------------------------------
def _dwt_inv_kernel_spatial(x_ref, o_ref):
    x0 = x_ref[:, 0, :, :]
    x1 = x_ref[:, 1, :, :]
    x2 = x_ref[:, 2, :, :]
    x3 = x_ref[:, 3, :, :]
    y00, y01, y10, y11 = _butterfly(x0, x1, x2, x3)
    g, th, w = y00.shape
    row_e = _interleave_lanes(y00, y01)
    row_o = _interleave_lanes(y10, y11)
    out = jnp.stack([row_e, row_o], axis=-2).reshape(g, 2 * th, 2 * w)
    o_ref[...] = out.astype(o_ref.dtype)


# ----------------------------------------------------------------------------------------------
# Tiling helpers (generation-aware).
# ----------------------------------------------------------------------------------------------
def _vmem_budget():
    try:
        cap = int(pltpu.get_tpu_info().vmem_capacity_bytes)
    except Exception:
        cap = 64 * _MIB  # conservative (v7x-sized) fallback
    # Live set ~= 2 buffers x (in block + out block) ~= 4x the input block.
    target = int(max(2 * _MIB, min(8 * _MIB, cap // 12)))     # ~5.3 MiB on v7x, 8 MiB on v5e/v6e
    limit = int(min((3 * cap) // 4, 6 * target + 16 * _MIB))  # ~48 MiB on v7x, ~64 MiB on v5e/v6e
    return target, limit


def _pack_groups(nc, group_bytes, target):
    g = int(max(1, min(nc, target // max(group_bytes, 1))))
    while nc % g:
        g -= 1
    return g


def _row_tile(n_rows, row_bytes, target):
    """Rows per block: multiple of 8 (or full).  Bounded divisor search; ragged tail is OK."""
    if n_rows <= 8:
        return n_rows
    tr = (target // max(row_bytes, 1)) // 8 * 8
    tr = int(max(8, min(tr, n_rows)))
    if tr < n_rows and n_rows % tr:
        for cand in range(tr, max(tr // 2, 8) - 1, -8):
            if n_rows % cand == 0:
                tr = cand
                break
    return tr


def dwt_inverse(x, *, max_block_bytes=None):
    """x: (N, 4C, H, W) -> (N, C, 2H, 2W); matches torch DWTInverse.forward."""
    N, C4, H, W = x.shape
    assert C4 % 4 == 0, "channel count must be a multiple of 4"
    C = C4 // 4
    NC = N * C
    itemsize = int(jnp.dtype(x.dtype).itemsize)

    target, vmem_limit = _vmem_budget()
    if max_block_bytes is not None:
        target = int(max_block_bytes)

    # groups=C with contiguous channel grouping: channel 4g+k belongs to group g (free reshape).
    x_r = x.reshape(NC, 4, H, W)
    group_bytes = 4 * H * W * itemsize
    row_bytes = 4 * W * itemsize
    cost = pl.CostEstimate(flops=12 * NC * H * W,
                           bytes_accessed=2 * NC * 4 * H * W * itemsize,
                           transcendentals=0)
    # TODO(synk): on v7x, confirm with xprof that both TensorCores pick up the grid; if a single
    # core cannot saturate HBM, shard the leading grid axis with pltpu.CORE_PARALLEL / core_map.

    # ---- Path B: small images -> whole output image per group as one dense lane row. --------
    if W < 64 and H <= 32:
        G = int(max(1, min(NC, target // max(group_bytes, 1))))
        if NC >= 8:
            G = min(NC, max(8, (G // 8) * 8))   # keep the sublane (group) dim 8-aligned
        grid = (pl.cdiv(NC, G),)
        out = pl.pallas_call(
            _dwt_inv_kernel_smallimg,
            out_shape=jax.ShapeDtypeStruct((NC, 4 * H * W), x.dtype),
            grid=grid,
            in_specs=[pl.BlockSpec((G, 4, H, W), lambda g: (g, 0, 0, 0))],
            out_specs=pl.BlockSpec((G, 4 * H * W), lambda g: (g, 0)),
            compiler_params=pltpu.CompilerParams(
                dimension_semantics=("parallel",),
                vmem_limit_bytes=vmem_limit),
            cost_estimate=cost,
        )(x_r)
        # Pure metadata reshape: lanes are ordered (row-pair, parity, col-pair) == row-major.
        return out.reshape(N, C, 2 * H, 2 * W)

    # ---- Path C: very wide W -> lane-tile W (robustness; original spatial layout). ----------
    if W > 4096 or 8 * row_bytes > target:
        Th = H if H <= 8 else 8
        Wt = (target // max(4 * Th * itemsize, 1)) // 128 * 128
        Wt = int(min(4096, max(128, Wt)))
        if Wt >= W:
            Wt = W
        grid = (NC, pl.cdiv(H, Th), pl.cdiv(W, Wt))
        out = pl.pallas_call(
            _dwt_inv_kernel_spatial,
            out_shape=jax.ShapeDtypeStruct((NC, 2 * H, 2 * W), x.dtype),
            grid=grid,
            in_specs=[pl.BlockSpec((1, 4, Th, Wt), lambda g, h, w: (g, 0, h, w))],
            out_specs=pl.BlockSpec((1, 2 * Th, 2 * Wt), lambda g, h, w: (g, h, w)),
            compiler_params=pltpu.CompilerParams(
                dimension_semantics=("parallel", "parallel", "parallel"),
                vmem_limit_bytes=vmem_limit),
            cost_estimate=cost,
        )(x_r)
        return out.reshape(N, C, 2 * H, 2 * W)

    # ---- Path A (general): lane-dense (NC, H, 4W) output, row pair fused into lanes. --------
    # TODO(synk): tall small-W inputs (W < 64, H > 32) would additionally benefit from a partial
    # row->lane fold; that needs a sublane<->lane relayout whose lowering should be
    # bundle-verified first, so such shapes currently take this general path.
    G = _pack_groups(NC, group_bytes, target)
    if G == 1 and group_bytes > target:
        Th = _row_tile(H, row_bytes, target)
    else:
        Th = H
    grid = (NC // G, pl.cdiv(H, Th))
    out = pl.pallas_call(
        _dwt_inv_kernel_rowpack,
        out_shape=jax.ShapeDtypeStruct((NC, H, 4 * W), x.dtype),
        grid=grid,
        in_specs=[pl.BlockSpec((G, 4, Th, W), lambda g, h: (g, 0, h, 0))],
        out_specs=pl.BlockSpec((G, Th, 4 * W), lambda g, h: (g, h, 0)),
        compiler_params=pltpu.CompilerParams(
            dimension_semantics=("parallel", "parallel"),
            vmem_limit_bytes=vmem_limit),
        cost_estimate=cost,
    )(x_r)
    # (NC, H, 4W) == (NC, H, [row 2i | row 2i+1]) -> free reshape to (N, C, 2H, 2W).
    return out.reshape(N, C, 2 * H, 2 * W)


# ----------------------------------------------------------------------------------------------
# Reference + self-test
# ----------------------------------------------------------------------------------------------
def _reference_numpy(x_np, filts):
    """Direct re-implementation of F.conv_transpose2d(x, cat([w]*C), groups=C, stride=2)."""
    N, C4, H, W = x_np.shape
    C = C4 // 4
    xg = x_np.reshape(N, C, 4, H, W)
    y = np.zeros((N, C, 2 * H, 2 * W), dtype=np.float32)
    for k in range(4):
        for a in range(2):
            for b in range(2):
                y[:, :, a::2, b::2] += xg[:, :, k] * filts[k, 0, a, b]
    return y


if __name__ == "__main__":
    key = jax.random.PRNGKey(0)
    filts = make_dwt_inverse_filters()

    # (shape, forced max_block_bytes) -- forces exercise of every path incl. ragged tiles.
    cases = [
        ((2, 8, 16, 16), None),         # required shape -> small-image dense-lane path
        ((1, 4, 16, 128), None),        # general lane-dense path
        ((1, 4, 20, 128), 16 * 1024),   # general path with ragged row tiling (H % Th != 0)
        ((1, 4, 16, 640), 32 * 1024),   # wide-W lane-tiled fallback path (forced, ragged W)
    ]
    keys = jax.random.split(key, len(cases))
    for (shape, mbb), k in zip(cases, keys):
        x = jax.random.normal(k, shape, dtype=jnp.float32)
        y = jax.block_until_ready(dwt_inverse(x, max_block_bytes=mbb))
        N, C4, H, W = shape
        assert y.shape == (N, C4 // 4, 2 * H, 2 * W), (shape, y.shape)
        y_ref = _reference_numpy(np.asarray(x), filts)
        np.testing.assert_allclose(np.asarray(y), y_ref, rtol=1e-5, atol=1e-5)

    print("KERNEL_OK")
</pallas_src>

<mosaic_0001>
module attributes {stable_mosaic.version = 11 : i64} {
  func.func @_dwt_inv_kernel_smallimg(%arg0: i32, %arg1: memref<4x4x16x16xf32, #tpu.memory_space<vmem>>, %arg2: memref<4x1024xf32, #tpu.memory_space<vmem>>) attributes {dimension_semantics = [#tpu.dimension_semantics<parallel>], iteration_bounds = array<i64: 1>, scalar_prefetch = 0 : i64, scratch_operands = 0 : i64, tpu.core_type = #tpu.core_type<tc>, window_params = [{transform_indices = @transform_0, window_bounds = array<i64: 4, 4, 16, 16>}, {transform_indices = @transform_1, window_bounds = array<i64: 4, 1024>}]} {
    %c0 = arith.constant 0 : index
    %c0_0 = arith.constant 0 : index
    %c0_1 = arith.constant 0 : index
    %c0_2 = arith.constant 0 : index
    %0 = vector.load %arg1[%c0, %c0_0, %c0_1, %c0_2] : memref<4x4x16x16xf32, #tpu.memory_space<vmem>>, vector<4x1x1x16xf32>
    %1 = vector.shape_cast %0 : vector<4x1x1x16xf32> to vector<4x16xf32>
    %c0_3 = arith.constant 0 : index
    %c1 = arith.constant 1 : index
    %c0_4 = arith.constant 0 : index
    %c0_5 = arith.constant 0 : index
    %2 = vector.load %arg1[%c0_3, %c1, %c0_4, %c0_5] : memref<4x4x16x16xf32, #tpu.memory_space<vmem>>, vector<4x1x1x16xf32>
    %3 = vector.shape_cast %2 : vector<4x1x1x16xf32> to vector<4x16xf32>
    %c0_6 = arith.constant 0 : index
    %c2 = arith.constant 2 : index
    %c0_7 = arith.constant 0 : index
    %c0_8 = arith.constant 0 : index
    %4 = vector.load %arg1[%c0_6, %c2, %c0_7, %c0_8] : memref<4x4x16x16xf32, #tpu.memory_space<vmem>>, vector<4x1x1x16xf32>
    %5 = vector.shape_cast %4 : vector<4x1x1x16xf32> to vector<4x16xf32>
    %c0_9 = arith.constant 0 : index
    %c3 = arith.constant 3 : index
    %c0_10 = arith.constant 0 : index
    %c0_11 = arith.constant 0 : index
    %6 = vector.load %arg1[%c0_9, %c3, %c0_10, %c0_11] : memref<4x4x16x16xf32, #tpu.memory_space<vmem>>, vector<4x1x1x16xf32>
    %7 = vector.shape_cast %6 : vector<4x1x1x16xf32> to vector<4x16xf32>
    %8 = arith.addf %1, %3 : vector<4x16xf32>
    %9 = arith.subf %1, %3 : vector<4x16xf32>
    %10 = arith.addf %5, %7 : vector<4x16xf32>
    %11 = arith.subf %5, %7 : vector<4x16xf32>
    %12 = arith.addf %8, %10 : vector<4x16xf32>
    %cst = arith.constant 5.000000e-01 : f32
    %13 = vector.broadcast %cst : f32 to vector<4x16xf32>
    %14 = arith.mulf %13, %12 : vector<4x16xf32>
    %15 = arith.subf %8, %10 : vector<4x16xf32>
    %cst_12 = arith.constant 5.000000e-01 : f32
    %16 = vector.broadcast %cst_12 : f32 to vector<4x16xf32>
    %17 = arith.mulf %16, %15 : vector<4x16xf32>
    %18 = arith.addf %9, %11 : vector<4x16xf32>
    %cst_13 = arith.constant 5.000000e-01 : f32
    %19 = vector.broadcast %cst_13 : f32 to vector<4x16xf32>
    %20 = arith.mulf %19, %18 : vector<4x16xf32>
    %21 = arith.subf %9, %11 : vector<4x16xf32>
    %cst_14 = arith.constant 5.000000e-01 : f32
    %22 = vector.broadcast %cst_14 : f32 to vector<4x16xf32>
    %23 = arith.mulf %22, %21 : vector<4x16xf32>
    %24 = vector.shape_cast %14 : vector<4x16xf32> to vector<4x16x1xf32>
    %25 = vector.shape_cast %17 : vector<4x16xf32> to vector<4x16x1xf32>
    %26 = tpu.concatenate %24, %25 in 2 : vector<4x16x1xf32>, vector<4x16x1xf32> -> vector<4x16x2xf32>
    %27 = vector.shape_cast %26 : vector<4x16x2xf32> to vector<4x32xf32>
    %28 = vector.shape_cast %20 : vector<4x16xf32> to vector<4x16x1xf32>
    %29 = vector.shape_cast %23 : vector<4x16xf32> to vector<4x16x1xf32>
    %30 = tpu.concatenate %28, %29 in 2 : vector<4x16x1xf32>, vector<4x16x1xf32> -> vector<4x16x2xf32>
    %31 = vector.shape_cast %30 : vector<4x16x2xf32> to vector<4x32xf32>
    %c0_15 = arith.constant 0 : index
    %c0_16 = arith.constant 0 : index
    %c1_17 = arith.constant 1 : index
    %c0_18 = arith.constant 0 : index
    %32 = vector.load %arg1[%c0_15, %c0_16, %c1_17, %c0_18] : memref<4x4x16x16xf32, #tpu.memory_space<vmem>>, vector<4x1x1x16xf32>
    %33 = vector.shape_cast %32 : vector<4x1x1x16xf32> to vector<4x16xf32>
    %c0_19 = arith.constant 0 : index
    %c1_20 = arith.constant 1 : index
    %c1_21 = arith.constant 1 : index
    %c0_22 = arith.constant 0 : index
    %34 = vector.load %arg1[%c0_19, %c1_20, %c1_21, %c0_22] : memref<4x4x16x16xf32, #tpu.memory_space<vmem>>, vector<4x1x1x16xf32>
    %35 = vector.shape_cast %34 : vector<4x1x1x16xf32> to vector<4x16xf32>
    %c0_23 = arith.constant 0 : index
    %c2_24 = arith.constant 2 : index
    %c1_25 = arith.constant 1 : index
    %c0_26 = arith.constant 0 : index
    %36 = vector.load %arg1[%c0_23, %c2_24, %c1_25, %c0_26] : memref<4x4x16x16xf32, #tpu.memory_space<vmem>>, vector<4x1x1x16xf32>
    %37 = vector.shape_cast %36 : vector<4x1x1x16xf32> to vector<4x16xf32>
    %c0_27 = arith.constant 0 : index
    %c3_28 = arith.constant 3 : index
    %c1_29 = arith.constant 1 : index
    %c0_30 = arith.constant 0 : index
    %38 = vector.load %arg1[%c0_27, %c3_28, %c1_29, %c0_30] : memref<4x4x16x16xf32, #tpu.memory_space<vmem>>, vector<4x1x1x16xf32>
    %39 = vector.shape_cast %38 : vector<4x1x1x16xf32> to vector<4x16xf32>
    %40 = arith.addf %33, %35 : vector<4x16xf32>
    %41 = arith.subf %33, %35 : vector<4x16xf32>
    %42 = arith.addf %37, %39 : vector<4x16xf32>
    %43 = arith.subf %37, %39 : vector<4x16xf32>
    %44 = arith.addf %40, %42 : vector<4x16xf32>
    %cst_31 = arith.constant 5.000000e-01 : f32
    %45 = vector.broadcast %cst_31 : f32 to vector<4x16xf32>
    %46 = arith.mulf %45, %44 : vector<4x16xf32>
    %47 = arith.subf %40, %42 : vector<4x16xf32>
    %cst_32 = arith.constant 5.000000e-01 : f32
    %48 = vector.broadcast %cst_32 : f32 to vector<4x16xf32>
    %49 = arith.mulf %48, %47 : vector<4x16xf32>
    %50 = arith.addf %41, %43 : vector<4x16xf32>
    %cst_33 = arith.constant 5.000000e-01 : f32
    %51 = vector.broadcast %cst_33 : f32 to vector<4x16xf32>
    %52 = arith.mulf %51, %50 : vector<4x16xf32>
    %53 = arith.subf %41, %43 : vector<4x16xf32>
    %cst_34 = arith.constant 5.000000e-01 : f32
    %54 = vector.broadcast %cst_34 : f32 to vector<4x16xf32>
    %55 = arith.mulf %54, %53 : vector<4x16xf32>
    %56 = vector.shape_cast %46 : vector<4x16xf32> to vector<4x16x1xf32>
    %57 = vector.shape_cast %49 : vector<4x16xf32> to vector<4x16x1xf32>
    %58 = tpu.concatenate %56, %57 in 2 : vector<4x16x1xf32>, vector<4x16x1xf32> -> vector<4x16x2xf32>
    %59 = vector.shape_cast %58 : vector<4x16x2xf32> to vector<4x32xf32>
    %60 = vector.shape_cast %52 : vector<4x16xf32> to vector<4x16x1xf32>
    %61 = vector.shape_cast %55 : vector<4x16xf32> to vector<4x16x1xf32>
    %62 = tpu.concatenate %60, %61 in 2 : vector<4x16x1xf32>, vector<4x16x1xf32> -> vector<4x16x2xf32>
    %63 = vector.shape_cast %62 : vector<4x16x2xf32> to vector<4x32xf32>
    %c0_35 = arith.constant 0 : index
    %c0_36 = arith.constant 0 : index
    %c2_37 = arith.constant 2 : index
    %c0_38 = arith.constant 0 : index
    %64 = vector.load %arg1[%c0_35, %c0_36, %c2_37, %c0_38] : memref<4x4x16x16xf32, #tpu.memory_space<vmem>>, vector<4x1x1x16xf32>
    %65 = vector.shape_cast %64 : vector<4x1x1x16xf32> to vector<4x16xf32>
    %c0_39 = arith.constant 0 : index
    %c1_40 = arith.constant 1 : index
    %c2_41 = arith.constant 2 : index
    %c0_42 = arith.constant 0 : index
    %66 = vector.load %arg1[%c0_39, %c1_40, %c2_41, %c0_42] : memref<4x4x16x16xf32, #tpu.memory_space<vmem>>, vector<4x1x1x16xf32>
    %67 = vector.shape_cast %66 : vector<4x1x1x16xf32> to vector<4x16xf32>
    %c0_43 = arith.constant 0 : index
    %c2_44 = arith.constant 2 : index
    %c2_45 = arith.constant 2 : index
    %c0_46 = arith.constant 0 : index
    %68 = vector.load %arg1[%c0_43, %c2_44, %c2_45, %c0_46] : memref<4x4x16x16xf32, #tpu.memory_space<vmem>>, vector<4x1x1x16xf32>
    %69 = vector.shape_cast %68 : vector<4x1x1x16xf32> to vector<4x16xf32>
    %c0_47 = arith.constant 0 : index
    %c3_48 = arith.constant 3 : index
    %c2_49 = arith.constant 2 : index
    %c0_50 = arith.constant 0 : index
    %70 = vector.load %arg1[%c0_47, %c3_48, %c2_49, %c0_50] : memref<4x4x16x16xf32, #tpu.memory_space<vmem>>, vector<4x1x1x16xf32>
    %71 = vector.shape_cast %70 : vector<4x1x1x16xf32> to vector<4x16xf32>
    %72 = arith.addf %65, %67 : vector<4x16xf32>
    %73 = arith.subf %65, %67 : vector<4x16xf32>
    %74 = arith.addf %69, %71 : vector<4x16xf32>
    %75 = arith.subf %69, %71 : vector<4x16xf32>
    %76 = arith.addf %72, %74 : vector<4x16xf32>
    %cst_51 = arith.constant 5.000000e-01 : f32
    %77 = vector.broadcast %cst_51 : f32 to vector<4x16xf32>
    %78 = arith.mulf %77, %76 : vector<4x16xf32>
    %79 = arith.subf %72, %74 : vector<4x16xf32>
    %cst_52 = arith.constant 5.000000e-01 : f32
    %80 = vector.broadcast %cst_52 : f32 to vector<4x16xf32>
    %81 = arith.mulf %80, %79 : vector<4x16xf32>
    %82 = arith.addf %73, %75 : vector<4x16xf32>
    %cst_53 = arith.constant 5.000000e-01 : f32
    %83 = vector.broadcast %cst_53 : f32 to vector<4x16xf32>
    %84 = arith.mulf %83, %82 : vector<4x16xf32>
    %85 = arith.subf %73, %75 : vector<4x16xf32>
    %cst_54 = arith.constant 5.000000e-01 : f32
    %86 = vector.broadcast %cst_54 : f32 to vector<4x16xf32>
    %87 = arith.mulf %86, %85 : vector<4x16xf32>
    %88 = vector.shape_cast %78 : vector<4x16xf32> to vector<4x16x1xf32>
    %89 = vector.shape_cast %81 : vector<4x16xf32> to vector<4x16x1xf32>
    %90 = tpu.concatenate %88, %89 in 2 : vector<4x16x1xf32>, vector<4x16x1xf32> -> vector<4x16x2xf32>
    %91 = vector.shape_cast %90 : vector<4x16x2xf32> to vector<4x32xf32>
    %92 = vector.shape_cast %84 : vector<4x16xf32> to vector<4x16x1xf32>
    %93 = vector.shape_cast %87 : vector<4x16xf32> to vector<4x16x1xf32>
    %94 = tpu.concatenate %92, %93 in 2 : vector<4x16x1xf32>, vector<4x16x1xf32> -> vector<4x16x2xf32>
    %95 = vector.shape_cast %94 : vector<4x16x2xf32> to vector<4x32xf32>
    %c0_55 = arith.constant 0 : index
    %c0_56 = arith.constant 0 : index
    %c3_57 = arith.constant 3 : index
    %c0_58 = arith.constant 0 : index
    %96 = vector.load %arg1[%c0_55, %c0_56, %c3_57, %c0_58] : memref<4x4x16x16xf32, #tpu.memory_space<vmem>>, vector<4x1x1x16xf32>
    %97 = vector.shape_cast %96 : vector<4x1x1x16xf32> to vector<4x16xf32>
    %c0_59 = arith.constant 0 : index
    %c1_60 = arith.constant 1 : index
    %c3_61 = arith.constant 3 : index
    %c0_62 = arith.constant 0 : index
    %98 = vector.load %arg1[%c0_59, %c1_60, %c3_61, %c0_62] : memref<4x4x16x16xf32, #tpu.memory_space<vmem>>, vector<4x1x1x16xf32>
    %99 = vector.shape_cast %98 : vector<4x1x1x16xf32> to vector<4x16xf32>
    %c0_63 = arith.constant 0 : index
    %c2_64 = arith.constant 2 : index
    %c3_65 = arith.constant 3 : index
    %c0_66 = arith.constant 0 : index
    %100 = vector.load %arg1[%c0_63, %c2_64, %c3_65, %c0_66] : memref<4x4x16x16xf32, #tpu.memory_space<vmem>>, vector<4x1x1x16xf32>
    %101 = vector.shape_cast %100 : vector<4x1x1x16xf32> to vector<4x16xf32>
    %c0_67 = arith.constant 0 : index
    %c3_68 = arith.constant 3 : index
    %c3_69 = arith.constant 3 : index
    %c0_70 = arith.constant 0 : index
    %102 = vector.load %arg1[%c0_67, %c3_68, %c3_69, %c0_70] : memref<4x4x16x16xf32, #tpu.memory_space<vmem>>, vector<4x1x1x16xf32>
    %103 = vector.shape_cast %102 : vector<4x1x1x16xf32> to vector<4x16xf32>
    %104 = arith.addf %97, %99 : vector<4x16xf32>
    %105 = arith.subf %97, %99 : vector<4x16xf32>
    %106 = arith.addf %101, %103 : vector<4x16xf32>
    %107 = arith.subf %101, %103 : vector<4x16xf32>
    %108 = arith.addf %104, %106 : vector<4x16xf32>
    %cst_71 = arith.constant 5.000000e-01 : f32
    %109 = vector.broadcast %cst_71 : f32 to vector<4x16xf32>
    %110 = arith.mulf %109, %108 : vector<4x16xf32>
    %111 = arith.subf %104, %106 : vector<4x16xf32>
    %cst_72 = arith.constant 5.000000e-01 : f32
    %112 = vector.broadcast %cst_72 : f32 to vector<4x16xf32>
    %113 = arith.mulf %112, %111 : vector<4x16xf32>
    %114 = arith.addf %105, %107 : vector<4x16xf32>
    %cst_73 = arith.constant 5.000000e-01 : f32
    %115 = vector.broadcast %cst_73 : f32 to vector<4x16xf32>
    %116 = arith.mulf %115, %114 : vector<4x16xf32>
    %117 = arith.subf %105, %107 : vector<4x16xf32>
    %cst_74 = arith.constant 5.000000e-01 : f32
    %118 = vector.broadcast %cst_74 : f32 to vector<4x16xf32>
    %119 = arith.mulf %118, %117 : vector<4x16xf32>
    %120 = vector.shape_cast %110 : vector<4x16xf32> to vector<4x16x1xf32>
    %121 = vector.shape_cast %113 : vector<4x16xf32> to vector<4x16x1xf32>
    %122 = tpu.concatenate %120, %121 in 2 : vector<4x16x1xf32>, vector<4x16x1xf32> -> vector<4x16x2xf32>
    %123 = vector.shape_cast %122 : vector<4x16x2xf32> to vector<4x32xf32>
    %124 = vector.shape_cast %116 : vector<4x16xf32> to vector<4x16x1xf32>
    %125 = vector.shape_cast %119 : vector<4x16xf32> to vector<4x16x1xf32>
    %126 = tpu.concatenate %124, %125 in 2 : vector<4x16x1xf32>, vector<4x16x1xf32> -> vector<4x16x2xf32>
    %127 = vector.shape_cast %126 : vector<4x16x2xf32> to vector<4x32xf32>
    %c0_75 = arith.constant 0 : index
    %c0_76 = arith.constant 0 : index
    %c4 = arith.constant 4 : index
    %c0_77 = arith.constant 0 : index
    %128 = vector.load %arg1[%c0_75, %c0_76, %c4, %c0_77] : memref<4x4x16x16xf32, #tpu.memory_space<vmem>>, vector<4x1x1x16xf32>
    %129 = vector.shape_cast %128 : vector<4x1x1x16xf32> to vector<4x16xf32>
    %c0_78 = arith.constant 0 : index
    %c1_79 = arith.constant 1 : index
    %c4_80 = arith.constant 4 : index
    %c0_81 = arith.constant 0 : index
    %130 = vector.load %arg1[%c0_78, %c1_79, %c4_80, %c0_81] : memref<4x4x16x16xf32, #tpu.memory_space<vmem>>, vector<4x1x1x16xf32>
    %131 = vector.shape_cast %130 : vector<4x1x1x16xf32> to vector<4x16xf32>
    %c0_82 = arith.constant 0 : index
    %c2_83 = arith.constant 2 : index
    %c4_84 = arith.constant 4 : index
    %c0_85 = arith.constant 0 : index
    %132 = vector.load %arg1[%c0_82, %c2_83, %c4_84, %c0_85] : memref<4x4x16x16xf32, #tpu.memory_space<vmem>>, vector<4x1x1x16xf32>
    %133 = vector.shape_cast %132 : vector<4x1x1x16xf32> to vector<4x16xf32>
    %c0_86 = arith.constant 0 : index
    %c3_87 = arith.constant 3 : index
    %c4_88 = arith.constant 4 : index
    %c0_89 = arith.constant 0 : index
    %134 = vector.load %arg1[%c0_86, %c3_87, %c4_88, %c0_89] : memref<4x4x16x16xf32, #tpu.memory_space<vmem>>, vector<4x1x1x16xf32>
    %135 = vector.shape_cast %134 : vector<4x1x1x16xf32> to vector<4x16xf32>
    %136 = arith.addf %129, %131 : vector<4x16xf32>
    %137 = arith.subf %129, %131 : vector<4x16xf32>
    %138 = arith.addf %133, %135 : vector<4x16xf32>
    %139 = arith.subf %133, %135 : vector<4x16xf32>
    %140 = arith.addf %136, %138 : vector<4x16xf32>
    %cst_90 = arith.constant 5.000000e-01 : f32
    %141 = vector.broadcast %cst_90 : f32 to vector<4x16xf32>
    %142 = arith.mulf %141, %140 : vector<4x16xf32>
    %143 = arith.subf %136, %138 : vector<4x16xf32>
    %cst_91 = arith.constant 5.000000e-01 : f32
    %144 = vector.broadcast %cst_91 : f32 to vector<4x16xf32>
    %145 = arith.mulf %144, %143 : vector<4x16xf32>
    %146 = arith.addf %137, %139 : vector<4x16xf32>
    %cst_92 = arith.constant 5.000000e-01 : f32
    %147 = vector.broadcast %cst_92 : f32 to vector<4x16xf32>
    %148 = arith.mulf %147, %146 : vector<4x16xf32>
    %149 = arith.subf %137, %139 : vector<4x16xf32>
    %cst_93 = arith.constant 5.000000e-01 : f32
    %150 = vector.broadcast %cst_93 : f32 to vector<4x16xf32>
    %151 = arith.mulf %150, %149 : vector<4x16xf32>
    %152 = vector.shape_cast %142 : vector<4x16xf32> to vector<4x16x1xf32>
    %153 = vector.shape_cast %145 : vector<4x16xf32> to vector<4x16x1xf32>
    %154 = tpu.concatenate %152, %153 in 2 : vector<4x16x1xf32>, vector<4x16x1xf32> -> vector<4x16x2xf32>
    %155 = vector.shape_cast %154 : vector<4x16x2xf32> to vector<4x32xf32>
    %156 = vector.shape_cast %148 : vector<4x16xf32> to vector<4x16x1xf32>
    %157 = vector.shape_cast %151 : vector<4x16xf32> to vector<4x16x1xf32>
    %158 = tpu.concatenate %156, %157 in 2 : vector<4x16x1xf32>, vector<4x16x1xf32> -> vector<4x16x2xf32>
    %159 = vector.shape_cast %158 : vector<4x16x2xf32> to vector<4x32xf32>
    %c0_94 = arith.constant 0 : index
    %c0_95 = arith.constant 0 : index
    %c5 = arith.constant 5 : index
    %c0_96 = arith.constant 0 : index
    %160 = vector.load %arg1[%c0_94, %c0_95, %c5, %c0_96] : memref<4x4x16x16xf32, #tpu.memory_space<vmem>>, vector<4x1x1x16xf32>
    %161 = vector.shape_cast %160 : vector<4x1x1x16xf32> to vector<4x16xf32>
    %c0_97 = arith.constant 0 : index
    %c1_98 = arith.constant 1 : index
    %c5_99 = arith.constant 5 : index
    %c0_100 = arith.constant 0 : index
    %162 = vector.load %arg1[%c0_97, %c1_98, %c5_99, %c0_100] : memref<4x4x16x16xf32, #tpu.memory_space<vmem>>, vector<4x1x1x16xf32>
    %163 = vector.shape_cast %162 : vector<4x1x1x16xf32> to vector<4x16xf32>
    %c0_101 = arith.constant 0 : index
    %c2_102 = arith.constant 2 : index
    %c5_103 = arith.constant 5 : index
    %c0_104 = arith.constant 0 : index
    %164 = vector.load %arg1[%c0_101, %c2_102, %c5_103, %c0_104] : memref<4x4x16x16xf32, #tpu.memory_space<vmem>>, vector<4x1x1x16xf32>
    %165 = vector.shape_cast %164 : vector<4x1x1x16xf32> to vector<4x16xf32>
    %c0_105 = arith.constant 0 : index
    %c3_106 = arith.constant 3 : index
    %c5_107 = arith.constant 5 : index
    %c0_108 = arith.constant 0 : index
    %166 = vector.load %arg1[%c0_105, %c3_106, %c5_107, %c0_108] : memref<4x4x16x16xf32, #tpu.memory_space<vmem>>, vector<4x1x1x16xf32>
    %167 = vector.shape_cast %166 : vector<4x1x1x16xf32> to vector<4x16xf32>
    %168 = arith.addf %161, %163 : vector<4x16xf32>
    %169 = arith.subf %161, %163 : vector<4x16xf32>
    %170 = arith.addf %165, %167 : vector<4x16xf32>
    %171 = arith.subf %165, %167 : vector<4x16xf32>
    %172 = arith.addf %168, %170 : vector<4x16xf32>
    %cst_109 = arith.constant 5.000000e-01 : f32
    %173 = vector.broadcast %cst_109 : f32 to vector<4x16xf32>
    %174 = arith.mulf %173, %172 : vector<4x16xf32>
    %175 = arith.subf %168, %170 : vector<4x16xf32>
    %cst_110 = arith.constant 5.000000e-01 : f32
    %176 = vector.broadcast %cst_110 : f32 to vector<4x16xf32>
    %177 = arith.mulf %176, %175 : vector<4x16xf32>
    %178 = arith.addf %169, %171 : vector<4x16xf32>
    %cst_111 = arith.constant 5.000000e-01 : f32
    %179 = vector.broadcast %cst_111 : f32 to vector<4x16xf32>
    %180 = arith.mulf %179, %178 : vector<4x16xf32>
    %181 = arith.subf %169, %171 : vector<4x16xf32>
    %cst_112 = arith.constant 5.000000e-01 : f32
    %182 = vector.broadcast %cst_112 : f32 to vector<4x16xf32>
    %183 = arith.mulf %182, %181 : vector<4x16xf32>
    %184 = vector.shape_cast %174 : vector<4x16xf32> to vector<4x16x1xf32>
    %185 = vector.shape_cast %177 : vector<4x16xf32> to vector<4x16x1xf32>
    %186 = tpu.concatenate %184, %185 in 2 : vector<4x16x1xf32>, vector<4x16x1xf32> -> vector<4x16x2xf32>
    %187 = vector.shape_cast %186 : vector<4x16x2xf32> to vector<4x32xf32>
    %188 = vector.shape_cast %180 : vector<4x16xf32> to vector<4x16x1xf32>
    %189 = vector.shape_cast %183 : vector<4x16xf32> to vector<4x16x1xf32>
    %190 = tpu.concatenate %188, %189 in 2 : vector<4x16x1xf32>, vector<4x16x1xf32> -> vector<4x16x2xf32>
    %191 = vector.shape_cast %190 : vector<4x16x2xf32> to vector<4x32xf32>
    %c0_113 = arith.constant 0 : index
    %c0_114 = arith.constant 0 : index
    %c6 = arith.constant 6 : index
    %c0_115 = arith.constant 0 : index
    %192 = vector.load %arg1[%c0_113, %c0_114, %c6, %c0_115] : memref<4x4x16x16xf32, #tpu.memory_space<vmem>>, vector<4x1x1x16xf32>
    %193 = vector.shape_cast %192 : vector<4x1x1x16xf32> to vector<4x16xf32>
    %c0_116 = arith.constant 0 : index
    %c1_117 = arith.constant 1 : index
    %c6_118 = arith.constant 6 : index
    %c0_119 = arith.constant 0 : index
    %194 = vector.load %arg1[%c0_116, %c1_117, %c6_118, %c0_119] : memref<4x4x16x16xf32, #tpu.memory_space<vmem>>, vector<4x1x1x16xf32>
    %195 = vector.shape_cast %194 : vector<4x1x1x16xf32> to vector<4x16xf32>
    %c0_120 = arith.constant 0 : index
    %c2_121 = arith.constant 2 : index
    %c6_122 = arith.constant 6 : index
    %c0_123 = arith.constant 0 : index
    %196 = vector.load %arg1[%c0_120, %c2_121, %c6_122, %c0_123] : memref<4x4x16x16xf32, #tpu.memory_space<vmem>>, vector<4x1x1x16xf32>
    %197 = vector.shape_cast %196 : vector<4x1x1x16xf32> to vector<4x16xf32>
    %c0_124 = arith.constant 0 : index
    %c3_125 = arith.constant 3 : index
    %c6_126 = arith.constant 6 : index
    %c0_127 = arith.constant 0 : index
    %198 = vector.load %arg1[%c0_124, %c3_125, %c6_126, %c0_127] : memref<4x4x16x16xf32, #tpu.memory_space<vmem>>, vector<4x1x1x16xf32>
    %199 = vector.shape_cast %198 : vector<4x1x1x16xf32> to vector<4x16xf32>
    %200 = arith.addf %193, %195 : vector<4x16xf32>
    %201 = arith.subf %193, %195 : vector<4x16xf32>
    %202 = arith.addf %197, %199 : vector<4x16xf32>
    %203 = arith.subf %197, %199 : vector<4x16xf32>
    %204 = arith.addf %200, %202 : vector<4x16xf32>
    %cst_128 = arith.constant 5.000000e-01 : f32
    %205 = vector.broadcast %cst_128 : f32 to vector<4x16xf32>
    %206 = arith.mulf %205, %204 : vector<4x16xf32>
    %207 = arith.subf %200, %202 : vector<4x16xf32>
    %cst_129 = arith.constant 5.000000e-01 : f32
    %208 = vector.broadcast %cst_129 : f32 to vector<4x16xf32>
    %209 = arith.mulf %208, %207 : vector<4x16xf32>
    %210 = arith.addf %201, %203 : vector<4x16xf32>
    %cst_130 = arith.constant 5.000000e-01 : f32
    %211 = vector.broadcast %cst_130 : f32 to vector<4x16xf32>
    %212 = arith.mulf %211, %210 : vector<4x16xf32>
    %213 = arith.subf %201, %203 : vector<4x16xf32>
    %cst_131 = arith.constant 5.000000e-01 : f32
    %214 = vector.broadcast %cst_131 : f32 to vector<4x16xf32>
    %215 = arith.mulf %214, %213 : vector<4x16xf32>
    %216 = vector.shape_cast %206 : vector<4x16xf32> to vector<4x16x1xf32>
    %217 = vector.shape_cast %209 : vector<4x16xf32> to vector<4x16x1xf32>
    %218 = tpu.concatenate %216, %217 in 2 : vector<4x16x1xf32>, vector<4x16x1xf32> -> vector<4x16x2xf32>
    %219 = vector.shape_cast %218 : vector<4x16x2xf32> to vector<4x32xf32>
    %220 = vector.shape_cast %212 : vector<4x16xf32> to vector<4x16x1xf32>
    %221 = vector.shape_cast %215 : vector<4x16xf32> to vector<4x16x1xf32>
    %222 = tpu.concatenate %220, %221 in 2 : vector<4x16x1xf32>, vector<4x16x1xf32> -> vector<4x16x2xf32>
    %223 = vector.shape_cast %222 : vector<4x16x2xf32> to vector<4x32xf32>
    %c0_132 = arith.constant 0 : index
    %c0_133 = arith.constant 0 : index
    %c7 = arith.constant 7 : index
    %c0_134 = arith.constant 0 : index
    %224 = vector.load %arg1[%c0_132, %c0_133, %c7, %c0_134] : memref<4x4x16x16xf32, #tpu.memory_space<vmem>>, vector<4x1x1x16xf32>
    %225 = vector.shape_cast %224 : vector<4x1x1x16xf32> to vector<4x16xf32>
    %c0_135 = arith.constant 0 : index
    %c1_136 = arith.constant 1 : index
    %c7_137 = arith.constant 7 : index
    %c0_138 = arith.constant 0 : index
    %226 = vector.load %arg1[%c0_135, %c1_136, %c7_137, %c0_138] : memref<4x4x16x16xf32, #tpu.memory_space<vmem>>, vector<4x1x1x16xf32>
    %227 = vector.shape_cast %226 : vector<4x1x1x16xf32> to vector<4x16xf32>
    %c0_139 = arith.constant 0 : index
    %c2_140 = arith.constant 2 : index
    %c7_141 = arith.constant 7 : index
    %c0_142 = arith.constant 0 : index
    %228 = vector.load %arg1[%c0_139, %c2_140, %c7_141, %c0_142] : memref<4x4x16x16xf32, #tpu.memory_space<vmem>>, vector<4x1x1x16xf32>
    %229 = vector.shape_cast %228 : vector<4x1x1x16xf32> to vector<4x16xf32>
    %c0_143 = arith.constant 0 : index
    %c3_144 = arith.constant 3 : index
    %c7_145 = arith.constant 7 : index
    %c0_146 = arith.constant 0 : index
    %230 = vector.load %arg1[%c0_143, %c3_144, %c7_145, %c0_146] : memref<4x4x16x16xf32, #tpu.memory_space<vmem>>, vector<4x1x1x16xf32>
    %231 = vector.shape_cast %230 : vector<4x1x1x16xf32> to vector<4x16xf32>
    %232 = arith.addf %225, %227 : vector<4x16xf32>
    %233 = arith.subf %225, %227 : vector<4x16xf32>
    %234 = arith.addf %229, %231 : vector<4x16xf32>
    %235 = arith.subf %229, %231 : vector<4x16xf32>
    %236 = arith.addf %232, %234 : vector<4x16xf32>
    %cst_147 = arith.constant 5.000000e-01 : f32
    %237 = vector.broadcast %cst_147 : f32 to vector<4x16xf32>
    %238 = arith.mulf %237, %236 : vector<4x16xf32>
    %239 = arith.subf %232, %234 : vector<4x16xf32>
    %cst_148 = arith.constant 5.000000e-01 : f32
    %240 = vector.broadcast %cst_148 : f32 to vector<4x16xf32>
    %241 = arith.mulf %240, %239 : vector<4x16xf32>
    %242 = arith.addf %233, %235 : vector<4x16xf32>
    %cst_149 = arith.constant 5.000000e-01 : f32
    %243 = vector.broadcast %cst_149 : f32 to vector<4x16xf32>
    %244 = arith.mulf %243, %242 : vector<4x16xf32>
    %245 = arith.subf %233, %235 : vector<4x16xf32>
    %cst_150 = arith.constant 5.000000e-01 : f32
    %246 = vector.broadcast %cst_150 : f32 to vector<4x16xf32>
    %247 = arith.mulf %246, %245 : vector<4x16xf32>
    %248 = vector.shape_cast %238 : vector<4x16xf32> to vector<4x16x1xf32>
    %249 = vector.shape_cast %241 : vector<4x16xf32> to vector<4x16x1xf32>
    %250 = tpu.concatenate %248, %249 in 2 : vector<4x16x1xf32>, vector<4x16x1xf32> -> vector<4x16x2xf32>
    %251 = vector.shape_cast %250 : vector<4x16x2xf32> to vector<4x32xf32>
    %252 = vector.shape_cast %244 : vector<4x16xf32> to vector<4x16x1xf32>
    %253 = vector.shape_cast %247 : vector<4x16xf32> to vector<4x16x1xf32>
    %254 = tpu.concatenate %252, %253 in 2 : vector<4x16x1xf32>, vector<4x16x1xf32> -> vector<4x16x2xf32>
    %255 = vector.shape_cast %254 : vector<4x16x2xf32> to vector<4x32xf32>
    %c0_151 = arith.constant 0 : index
    %c0_152 = arith.constant 0 : index
    %c8 = arith.constant 8 : index
    %c0_153 = arith.constant 0 : index
    %256 = vector.load %arg1[%c0_151, %c0_152, %c8, %c0_153] : memref<4x4x16x16xf32, #tpu.memory_space<vmem>>, vector<4x1x1x16xf32>
    %257 = vector.shape_cast %256 : vector<4x1x1x16xf32> to vector<4x16xf32>
    %c0_154 = arith.constant 0 : index
    %c1_155 = arith.constant 1 : index
    %c8_156 = arith.constant 8 : index
    %c0_157 = arith.constant 0 : index
    %258 = vector.load %arg1[%c0_154, %c1_155, %c8_156, %c0_157] : memref<4x4x16x16xf32, #tpu.memory_space<vmem>>, vector<4x1x1x16xf32>
    %259 = vector.shape_cast %258 : vector<4x1x1x16xf32> to vector<4x16xf32>
    %c0_158 = arith.constant 0 : index
    %c2_159 = arith.constant 2 : index
    %c8_160 = arith.constant 8 : index
    %c0_161 = arith.constant 0 : index
    %260 = vector.load %arg1[%c0_158, %c2_159, %c8_160, %c0_161] : memref<4x4x16x16xf32, #tpu.memory_space<vmem>>, vector<4x1x1x16xf32>
    %261 = vector.shape_cast %260 : vector<4x1x1x16xf32> to vector<4x16xf32>
    %c0_162 = arith.constant 0 : index
    %c3_163 = arith.constant 3 : index
    %c8_164 = arith.constant 8 : index
    %c0_165 = arith.constant 0 : index
    %262 = vector.load %arg1[%c0_162, %c3_163, %c8_164, %c0_165] : memref<4x4x16x16xf32, #tpu.memory_space<vmem>>, vector<4x1x1x16xf32>
    %263 = vector.shape_cast %262 : vector<4x1x1x16xf32> to vector<4x16xf32>
    %264 = arith.addf %257, %259 : vector<4x16xf32>
    %265 = arith.subf %257, %259 : vector<4x16xf32>
    %266 = arith.addf %261, %263 : vector<4x16xf32>
    %267 = arith.subf %261, %263 : vector<4x16xf32>
    %268 = arith.addf %264, %266 : vector<4x16xf32>
    %cst_166 = arith.constant 5.000000e-01 : f32
    %269 = vector.broadcast %cst_166 : f32 to vector<4x16xf32>
    %270 = arith.mulf %269, %268 : vector<4x16xf32>
    %271 = arith.subf %264, %266 : vector<4x16xf32>
    %cst_167 = arith.constant 5.000000e-01 : f32
    %272 = vector.broadcast %cst_167 : f32 to vector<4x16xf32>
    %273 = arith.mulf %272, %271 : vector<4x16xf32>
    %274 = arith.addf %265, %267 : vector<4x16xf32>
    %cst_168 = arith.constant 5.000000e-01 : f32
    %275 = vector.broadcast %cst_168 : f32 to vector<4x16xf32>
    %276 = arith.mulf %275, %274 : vector<4x16xf32>
    %277 = arith.subf %265, %267 : vector<4x16xf32>
    %cst_169 = arith.constant 5.000000e-01 : f32
    %278 = vector.broadcast %cst_169 : f32 to vector<4x16xf32>
    %279 = arith.mulf %278, %277 : vector<4x16xf32>
    %280 = vector.shape_cast %270 : vector<4x16xf32> to vector<4x16x1xf32>
    %281 = vector.shape_cast %273 : vector<4x16xf32> to vector<4x16x1xf32>
    %282 = tpu.concatenate %280, %281 in 2 : vector<4x16x1xf32>, vector<4x16x1xf32> -> vector<4x16x2xf32>
    %283 = vector.shape_cast %282 : vector<4x16x2xf32> to vector<4x32xf32>
    %284 = vector.shape_cast %276 : vector<4x16xf32> to vector<4x16x1xf32>
    %285 = vector.shape_cast %279 : vector<4x16xf32> to vector<4x16x1xf32>
    %286 = tpu.concatenate %284, %285 in 2 : vector<4x16x1xf32>, vector<4x16x1xf32> -> vector<4x16x2xf32>
    %287 = vector.shape_cast %286 : vector<4x16x2xf32> to vector<4x32xf32>
    %c0_170 = arith.constant 0 : index
    %c0_171 = arith.constant 0 : index
    %c9 = arith.constant 9 : index
    %c0_172 = arith.constant 0 : index
    %288 = vector.load %arg1[%c0_170, %c0_171, %c9, %c0_172] : memref<4x4x16x16xf32, #tpu.memory_space<vmem>>, vector<4x1x1x16xf32>
    %289 = vector.shape_cast %288 : vector<4x1x1x16xf32> to vector<4x16xf32>
    %c0_173 = arith.constant 0 : index
    %c1_174 = arith.constant 1 : index
    %c9_175 = arith.constant 9 : index
    %c0_176 = arith.constant 0 : index
    %290 = vector.load %arg1[%c0_173, %c1_174, %c9_175, %c0_176] : memref<4x4x16x16xf32, #tpu.memory_space<vmem>>, vector<4x1x1x16xf32>
    %291 = vector.shape_cast %290 : vector<4x1x1x16xf32> to vector<4x16xf32>
    %c0_177 = arith.constant 0 : index
    %c2_178 = arith.constant 2 : index
    %c9_179 = arith.constant 9 : index
    %c0_180 = arith.constant 0 : index
    %292 = vector.load %arg1[%c0_177, %c2_178, %c9_179, %c0_180] : memref<4x4x16x16xf32, #tpu.memory_space<vmem>>, vector<4x1x1x16xf32>
    %293 = vector.shape_cast %292 : vector<4x1x1x16xf32> to vector<4x16xf32>
    %c0_181 = arith.constant 0 : index
    %c3_182 = arith.constant 3 : index
    %c9_183 = arith.constant 9 : index
    %c0_184 = arith.constant 0 : index
    %294 = vector.load %arg1[%c0_181, %c3_182, %c9_183, %c0_184] : memref<4x4x16x16xf32, #tpu.memory_space<vmem>>, vector<4x1x1x16xf32>
    %295 = vector.shape_cast %294 : vector<4x1x1x16xf32> to vector<4x16xf32>
    %296 = arith.addf %289, %291 : vector<4x16xf32>
    %297 = arith.subf %289, %291 : vector<4x16xf32>
    %298 = arith.addf %293, %295 : vector<4x16xf32>
    %299 = arith.subf %293, %295 : vector<4x16xf32>
    %300 = arith.addf %296, %298 : vector<4x16xf32>
    %cst_185 = arith.constant 5.000000e-01 : f32
    %301 = vector.broadcast %cst_185 : f32 to vector<4x16xf32>
    %302 = arith.mulf %301, %300 : vector<4x16xf32>
    %303 = arith.subf %296, %298 : vector<4x16xf32>
    %cst_186 = arith.constant 5.000000e-01 : f32
    %304 = vector.broadcast %cst_186 : f32 to vector<4x16xf32>
    %305 = arith.mulf %304, %303 : vector<4x16xf32>
    %306 = arith.addf %297, %299 : vector<4x16xf32>
    %cst_187 = arith.constant 5.000000e-01 : f32
    %307 = vector.broadcast %cst_187 : f32 to vector<4x16xf32>
    %308 = arith.mulf %307, %306 : vector<4x16xf32>
    %309 = arith.subf %297, %299 : vector<4x16xf32>
    %cst_188 = arith.constant 5.000000e-01 : f32
    %310 = vector.broadcast %cst_188 : f32 to vector<4x16xf32>
    %311 = arith.mulf %310, %309 : vector<4x16xf32>
    %312 = vector.shape_cast %302 : vector<4x16xf32> to vector<4x16x1xf32>
    %313 = vector.shape_cast %305 : vector<4x16xf32> to vector<4x16x1xf32>
    %314 = tpu.concatenate %312, %313 in 2 : vector<4x16x1xf32>, vector<4x16x1xf32> -> vector<4x16x2xf32>
    %315 = vector.shape_cast %314 : vector<4x16x2xf32> to vector<4x32xf32>
    %316 = vector.shape_cast %308 : vector<4x16xf32> to vector<4x16x1xf32>
    %317 = vector.shape_cast %311 : vector<4x16xf32> to vector<4x16x1xf32>
    %318 = tpu.concatenate %316, %317 in 2 : vector<4x16x1xf32>, vector<4x16x1xf32> -> vector<4x16x2xf32>
    %319 = vector.shape_cast %318 : vector<4x16x2xf32> to vector<4x32xf32>
    %c0_189 = arith.constant 0 : index
    %c0_190 = arith.constant 0 : index
    %c10 = arith.constant 10 : index
    %c0_191 = arith.constant 0 : index
    %320 = vector.load %arg1[%c0_189, %c0_190, %c10, %c0_191] : memref<4x4x16x16xf32, #tpu.memory_space<vmem>>, vector<4x1x1x16xf32>
    %321 = vector.shape_cast %320 : vector<4x1x1x16xf32> to vector<4x16xf32>
    %c0_192 = arith.constant 0 : index
    %c1_193 = arith.constant 1 : index
    %c10_194 = arith.constant 10 : index
    %c0_195 = arith.constant 0 : index
    %322 = vector.load %arg1[%c0_192, %c1_193, %c10_194, %c0_195] : memref<4x4x16x16xf32, #tpu.memory_space<vmem>>, vector<4x1x1x16xf32>
    %323 = vector.shape_cast %322 : vector<4x1x1x16xf32> to vector<4x16xf32>
    %c0_196 = arith.constant 0 : index
    %c2_197 = arith.constant 2 : index
    %c10_198 = arith.constant 10 : index
    %c0_199 = arith.constant 0 : index
    %324 = vector.load %arg1[%c0_196, %c2_197, %c10_198, %c0_199] : memref<4x4x16x16xf32, #tpu.memory_space<vmem>>, vector<4x1x1x16xf32>
    %325 = vector.shape_cast %324 : vector<4x1x1x16xf32> to vector<4x16xf32>
    %c0_200 = arith.constant 0 : index
    %c3_201 = arith.constant 3 : index
    %c10_202 = arith.constant 10 : index
    %c0_203 = arith.constant 0 : index
    %326 = vector.load %arg1[%c0_200, %c3_201, %c10_202, %c0_203] : memref<4x4x16x16xf32, #tpu.memory_space<vmem>>, vector<4x1x1x16xf32>
    %327 = vector.shape_cast %326 : vector<4x1x1x16xf32> to vector<4x16xf32>
    %328 = arith.addf %321, %323 : vector<4x16xf32>
    %329 = arith.subf %321, %323 : vector<4x16xf32>
    %330 = arith.addf %325, %327 : vector<4x16xf32>
    %331 = arith.subf %325, %327 : vector<4x16xf32>
    %332 = arith.addf %328, %330 : vector<4x16xf32>
    %cst_204 = arith.constant 5.000000e-01 : f32
    %333 = vector.broadcast %cst_204 : f32 to vector<4x16xf32>
    %334 = arith.mulf %333, %332 : vector<4x16xf32>
    %335 = arith.subf %328, %330 : vector<4x16xf32>
    %cst_205 = arith.constant 5.000000e-01 : f32
    %336 = vector.broadcast %cst_205 : f32 to vector<4x16xf32>
    %337 = arith.mulf %336, %335 : vector<4x16xf32>
    %338 = arith.addf %329, %331 : vector<4x16xf32>
    %cst_206 = arith.constant 5.000000e-01 : f32
    %339 = vector.broadcast %cst_206 : f32 to vector<4x16xf32>
    %340 = arith.mulf %339, %338 : vector<4x16xf32>
    %341 = arith.subf %329, %331 : vector<4x16xf32>
    %cst_207 = arith.constant 5.000000e-01 : f32
    %342 = vector.broadcast %cst_207 : f32 to vector<4x16xf32>
    %343 = arith.mulf %342, %341 : vector<4x16xf32>
    %344 = vector.shape_cast %334 : vector<4x16xf32> to vector<4x16x1xf32>
    %345 = vector.shape_cast %337 : vector<4x16xf32> to vector<4x16x1xf32>
    %346 = tpu.concatenate %344, %345 in 2 : vector<4x16x1xf32>, vector<4x16x1xf32> -> vector<4x16x2xf32>
    %347 = vector.shape_cast %346 : vector<4x16x2xf32> to vector<4x32xf32>
    %348 = vector.shape_cast %340 : vector<4x16xf32> to vector<4x16x1xf32>
    %349 = vector.shape_cast %343 : vector<4x16xf32> to vector<4x16x1xf32>
    %350 = tpu.concatenate %348, %349 in 2 : vector<4x16x1xf32>, vector<4x16x1xf32> -> vector<4x16x2xf32>
    %351 = vector.shape_cast %350 : vector<4x16x2xf32> to vector<4x32xf32>
    %c0_208 = arith.constant 0 : index
    %c0_209 = arith.constant 0 : index
    %c11 = arith.constant 11 : index
    %c0_210 = arith.constant 0 : index
    %352 = vector.load %arg1[%c0_208, %c0_209, %c11, %c0_210] : memref<4x4x16x16xf32, #tpu.memory_space<vmem>>, vector<4x1x1x16xf32>
    %353 = vector.shape_cast %352 : vector<4x1x1x16xf32> to vector<4x16xf32>
    %c0_211 = arith.constant 0 : index
    %c1_212 = arith.constant 1 : index
    %c11_213 = arith.constant 11 : index
    %c0_214 = arith.constant 0 : index
    %354 = vector.load %arg1[%c0_211, %c1_212, %c11_213, %c0_214] : memref<4x4x16x16xf32, #tpu.memory_space<vmem>>, vector<4x1x1x16xf32>
    %355 = vector.shape_cast %354 : vector<4x1x1x16xf32> to vector<4x16xf32>
    %c0_215 = arith.constant 0 : index
    %c2_216 = arith.constant 2 : index
    %c11_217 = arith.constant 11 : index
    %c0_218 = arith.constant 0 : index
    %356 = vector.load %arg1[%c0_215, %c2_216, %c11_217, %c0_218] : memref<4x4x16x16xf32, #tpu.memory_space<vmem>>, vector<4x1x1x16xf32>
    %357 = vector.shape_cast %356 : vector<4x1x1x16xf32> to vector<4x16xf32>
    %c0_219 = arith.constant 0 : index
    %c3_220 = arith.constant 3 : index
    %c11_221 = arith.constant 11 : index
    %c0_222 = arith.constant 0 : index
    %358 = vector.load %arg1[%c0_219, %c3_220, %c11_221, %c0_222] : memref<4x4x16x16xf32, #tpu.memory_space<vmem>>, vector<4x1x1x16xf32>
    %359 = vector.shape_cast %358 : vector<4x1x1x16xf32> to vector<4x16xf32>
    %360 = arith.addf %353, %355 : vector<4x16xf32>
    %361 = arith.subf %353, %355 : vector<4x16xf32>
    %362 = arith.addf %357, %359 : vector<4x16xf32>
    %363 = arith.subf %357, %359 : vector<4x16xf32>
    %364 = arith.addf %360, %362 : vector<4x16xf32>
    %cst_223 = arith.constant 5.000000e-01 : f32
    %365 = vector.broadcast %cst_223 : f32 to vector<4x16xf32>
    %366 = arith.mulf %365, %364 : vector<4x16xf32>
    %367 = arith.subf %360, %362 : vector<4x16xf32>
    %cst_224 = arith.constant 5.000000e-01 : f32
    %368 = vector.broadcast %cst_224 : f32 to vector<4x16xf32>
    %369 = arith.mulf %368, %367 : vector<4x16xf32>
    %370 = arith.addf %361, %363 : vector<4x16xf32>
    %cst_225 = arith.constant 5.000000e-01 : f32
    %371 = vector.broadcast %cst_225 : f32 to vector<4x16xf32>
    %372 = arith.mulf %371, %370 : vector<4x16xf32>
    %373 = arith.subf %361, %363 : vector<4x16xf32>
    %cst_226 = arith.constant 5.000000e-01 : f32
    %374 = vector.broadcast %cst_226 : f32 to vector<4x16xf32>
    %375 = arith.mulf %374, %373 : vector<4x16xf32>
    %376 = vector.shape_cast %366 : vector<4x16xf32> to vector<4x16x1xf32>
    %377 = vector.shape_cast %369 : vector<4x16xf32> to vector<4x16x1xf32>
    %378 = tpu.concatenate %376, %377 in 2 : vector<4x16x1xf32>, vector<4x16x1xf32> -> vector<4x16x2xf32>
    %379 = vector.shape_cast %378 : vector<4x16x2xf32> to vector<4x32xf32>
    %380 = vector.shape_cast %372 : vector<4x16xf32> to vector<4x16x1xf32>
    %381 = vector.shape_cast %375 : vector<4x16xf32> to vector<4x16x1xf32>
    %382 = tpu.concatenate %380, %381 in 2 : vector<4x16x1xf32>, vector<4x16x1xf32> -> vector<4x16x2xf32>
    %383 = vector.shape_cast %382 : vector<4x16x2xf32> to vector<4x32xf32>
    %c0_227 = arith.constant 0 : index
    %c0_228 = arith.constant 0 : index
    %c12 = arith.constant 12 : index
    %c0_229 = arith.constant 0 : index
    %384 = vector.load %arg1[%c0_227, %c0_228, %c12, %c0_229] : memref<4x4x16x16xf32, #tpu.memory_space<vmem>>, vector<4x1x1x16xf32>
    %385 = vector.shape_cast %384 : vector<4x1x1x16xf32> to vector<4x16xf32>
    %c0_230 = arith.constant 0 : index
    %c1_231 = arith.constant 1 : index
    %c12_232 = arith.constant 12 : index
    %c0_233 = arith.constant 0 : index
    %386 = vector.load %arg1[%c0_230, %c1_231, %c12_232, %c0_233] : memref<4x4x16x16xf32, #tpu.memory_space<vmem>>, vector<4x1x1x16xf32>
    %387 = vector.shape_cast %386 : vector<4x1x1x16xf32> to vector<4x16xf32>
    %c0_234 = arith.constant 0 : index
    %c2_235 = arith.constant 2 : index
    %c12_236 = arith.constant 12 : index
    %c0_237 = arith.constant 0 : index
    %388 = vector.load %arg1[%c0_234, %c2_235, %c12_236, %c0_237] : memref<4x4x16x16xf32, #tpu.memory_space<vmem>>, vector<4x1x1x16xf32>
    %389 = vector.shape_cast %388 : vector<4x1x1x16xf32> to vector<4x16xf32>
    %c0_238 = arith.constant 0 : index
    %c3_239 = arith.constant 3 : index
    %c12_240 = arith.constant 12 : index
    %c0_241 = arith.constant 0 : index
    %390 = vector.load %arg1[%c0_238, %c3_239, %c12_240, %c0_241] : memref<4x4x16x16xf32, #tpu.memory_space<vmem>>, vector<4x1x1x16xf32>
    %391 = vector.shape_cast %390 : vector<4x1x1x16xf32> to vector<4x16xf32>
    %392 = arith.addf %385, %387 : vector<4x16xf32>
    %393 = arith.subf %385, %387 : vector<4x16xf32>
    %394 = arith.addf %389, %391 : vector<4x16xf32>
    %395 = arith.subf %389, %391 : vector<4x16xf32>
    %396 = arith.addf %392, %394 : vector<4x16xf32>
    %cst_242 = arith.constant 5.000000e-01 : f32
    %397 = vector.broadcast %cst_242 : f32 to vector<4x16xf32>
    %398 = arith.mulf %397, %396 : vector<4x16xf32>
    %399 = arith.subf %392, %394 : vector<4x16xf32>
    %cst_243 = arith.constant 5.000000e-01 : f32
    %400 = vector.broadcast %cst_243 : f32 to vector<4x16xf32>
    %401 = arith.mulf %400, %399 : vector<4x16xf32>
    %402 = arith.addf %393, %395 : vector<4x16xf32>
    %cst_244 = arith.constant 5.000000e-01 : f32
    %403 = vector.broadcast %cst_244 : f32 to vector<4x16xf32>
    %404 = arith.mulf %403, %402 : vector<4x16xf32>
    %405 = arith.subf %393, %395 : vector<4x16xf32>
    %cst_245 = arith.constant 5.000000e-01 : f32
    %406 = vector.broadcast %cst_245 : f32 to vector<4x16xf32>
    %407 = arith.mulf %406, %405 : vector<4x16xf32>
    %408 = vector.shape_cast %398 : vector<4x16xf32> to vector<4x16x1xf32>
    %409 = vector.shape_cast %401 : vector<4x16xf32> to vector<4x16x1xf32>
    %410 = tpu.concatenate %408, %409 in 2 : vector<4x16x1xf32>, vector<4x16x1xf32> -> vector<4x16x2xf32>
    %411 = vector.shape_cast %410 : vector<4x16x2xf32> to vector<4x32xf32>
    %412 = vector.shape_cast %404 : vector<4x16xf32> to vector<4x16x1xf32>
    %413 = vector.shape_cast %407 : vector<4x16xf32> to vector<4x16x1xf32>
    %414 = tpu.concatenate %412, %413 in 2 : vector<4x16x1xf32>, vector<4x16x1xf32> -> vector<4x16x2xf32>
    %415 = vector.shape_cast %414 : vector<4x16x2xf32> to vector<4x32xf32>
    %c0_246 = arith.constant 0 : index
    %c0_247 = arith.constant 0 : index
    %c13 = arith.constant 13 : index
    %c0_248 = arith.constant 0 : index
    %416 = vector.load %arg1[%c0_246, %c0_247, %c13, %c0_248] : memref<4x4x16x16xf32, #tpu.memory_space<vmem>>, vector<4x1x1x16xf32>
    %417 = vector.shape_cast %416 : vector<4x1x1x16xf32> to vector<4x16xf32>
    %c0_249 = arith.constant 0 : index
    %c1_250 = arith.constant 1 : index
    %c13_251 = arith.constant 13 : index
    %c0_252 = arith.constant 0 : index
    %418 = vector.load %arg1[%c0_249, %c1_250, %c13_251, %c0_252] : memref<4x4x16x16xf32, #tpu.memory_space<vmem>>, vector<4x1x1x16xf32>
    %419 = vector.shape_cast %418 : vector<4x1x1x16xf32> to vector<4x16xf32>
    %c0_253 = arith.constant 0 : index
    %c2_254 = arith.constant 2 : index
    %c13_255 = arith.constant 13 : index
    %c0_256 = arith.constant 0 : index
    %420 = vector.load %arg1[%c0_253, %c2_254, %c13_255, %c0_256] : memref<4x4x16x16xf32, #tpu.memory_space<vmem>>, vector<4x1x1x16xf32>
    %421 = vector.shape_cast %420 : vector<4x1x1x16xf32> to vector<4x16xf32>
    %c0_257 = arith.constant 0 : index
    %c3_258 = arith.constant 3 : index
    %c13_259 = arith.constant 13 : index
    %c0_260 = arith.constant 0 : index
    %422 = vector.load %arg1[%c0_257, %c3_258, %c13_259, %c0_260] : memref<4x4x16x16xf32, #tpu.memory_space<vmem>>, vector<4x1x1x16xf32>
    %423 = vector.shape_cast %422 : vector<4x1x1x16xf32> to vector<4x16xf32>
    %424 = arith.addf %417, %419 : vector<4x16xf32>
    %425 = arith.subf %417, %419 : vector<4x16xf32>
    %426 = arith.addf %421, %423 : vector<4x16xf32>
    %427 = arith.subf %421, %423 : vector<4x16xf32>
    %428 = arith.addf %424, %426 : vector<4x16xf32>
    %cst_261 = arith.constant 5.000000e-01 : f32
    %429 = vector.broadcast %cst_261 : f32 to vector<4x16xf32>
    %430 = arith.mulf %429, %428 : vector<4x16xf32>
    %431 = arith.subf %424, %426 : vector<4x16xf32>
    %cst_262 = arith.constant 5.000000e-01 : f32
    %432 = vector.broadcast %cst_262 : f32 to vector<4x16xf32>
    %433 = arith.mulf %432, %431 : vector<4x16xf32>
    %434 = arith.addf %425, %427 : vector<4x16xf32>
    %cst_263 = arith.constant 5.000000e-01 : f32
    %435 = vector.broadcast %cst_263 : f32 to vector<4x16xf32>
    %436 = arith.mulf %435, %434 : vector<4x16xf32>
    %437 = arith.subf %425, %427 : vector<4x16xf32>
    %cst_264 = arith.constant 5.000000e-01 : f32
    %438 = vector.broadcast %cst_264 : f32 to vector<4x16xf32>
    %439 = arith.mulf %438, %437 : vector<4x16xf32>
    %440 = vector.shape_cast %430 : vector<4x16xf32> to vector<4x16x1xf32>
    %441 = vector.shape_cast %433 : vector<4x16xf32> to vector<4x16x1xf32>
    %442 = tpu.concatenate %440, %441 in 2 : vector<4x16x1xf32>, vector<4x16x1xf32> -> vector<4x16x2xf32>
    %443 = vector.shape_cast %442 : vector<4x16x2xf32> to vector<4x32xf32>
    %444 = vector.shape_cast %436 : vector<4x16xf32> to vector<4x16x1xf32>
    %445 = vector.shape_cast %439 : vector<4x16xf32> to vector<4x16x1xf32>
    %446 = tpu.concatenate %444, %445 in 2 : vector<4x16x1xf32>, vector<4x16x1xf32> -> vector<4x16x2xf32>
    %447 = vector.shape_cast %446 : vector<4x16x2xf32> to vector<4x32xf32>
    %c0_265 = arith.constant 0 : index
    %c0_266 = arith.constant 0 : index
    %c14 = arith.constant 14 : index
    %c0_267 = arith.constant 0 : index
    %448 = vector.load %arg1[%c0_265, %c0_266, %c14, %c0_267] : memref<4x4x16x16xf32, #tpu.memory_space<vmem>>, vector<4x1x1x16xf32>
    %449 = vector.shape_cast %448 : vector<4x1x1x16xf32> to vector<4x16xf32>
    %c0_268 = arith.constant 0 : index
    %c1_269 = arith.constant 1 : index
    %c14_270 = arith.constant 14 : index
    %c0_271 = arith.constant 0 : index
    %450 = vector.load %arg1[%c0_268, %c1_269, %c14_270, %c0_271] : memref<4x4x16x16xf32, #tpu.memory_space<vmem>>, vector<4x1x1x16xf32>
    %451 = vector.shape_cast %450 : vector<4x1x1x16xf32> to vector<4x16xf32>
    %c0_272 = arith.constant 0 : index
    %c2_273 = arith.constant 2 : index
    %c14_274 = arith.constant 14 : index
    %c0_275 = arith.constant 0 : index
    %452 = vector.load %arg1[%c0_272, %c2_273, %c14_274, %c0_275] : memref<4x4x16x16xf32, #tpu.memory_space<vmem>>, vector<4x1x1x16xf32>
    %453 = vector.shape_cast %452 : vector<4x1x1x16xf32> to vector<4x16xf32>
    %c0_276 = arith.constant 0 : index
    %c3_277 = arith.constant 3 : index
    %c14_278 = arith.constant 14 : index
    %c0_279 = arith.constant 0 : index
    %454 = vector.load %arg1[%c0_276, %c3_277, %c14_278, %c0_279] : memref<4x4x16x16xf32, #tpu.memory_space<vmem>>, vector<4x1x1x16xf32>
    %455 = vector.shape_cast %454 : vector<4x1x1x16xf32> to vector<4x16xf32>
    %456 = arith.addf %449, %451 : vector<4x16xf32>
    %457 = arith.subf %449, %451 : vector<4x16xf32>
    %458 = arith.addf %453, %455 : vector<4x16xf32>
    %459 = arith.subf %453, %455 : vector<4x16xf32>
    %460 = arith.addf %456, %458 : vector<4x16xf32>
    %cst_280 = arith.constant 5.000000e-01 : f32
    %461 = vector.broadcast %cst_280 : f32 to vector<4x16xf32>
    %462 = arith.mulf %461, %460 : vector<4x16xf32>
    %463 = arith.subf %456, %458 : vector<4x16xf32>
    %cst_281 = arith.constant 5.000000e-01 : f32
    %464 = vector.broadcast %cst_281 : f32 to vector<4x16xf32>
    %465 = arith.mulf %464, %463 : vector<4x16xf32>
    %466 = arith.addf %457, %459 : vector<4x16xf32>
    %cst_282 = arith.constant 5.000000e-01 : f32
    %467 = vector.broadcast %cst_282 : f32 to vector<4x16xf32>
    %468 = arith.mulf %467, %466 : vector<4x16xf32>
    %469 = arith.subf %457, %459 : vector<4x16xf32>
    %cst_283 = arith.constant 5.000000e-01 : f32
    %470 = vector.broadcast %cst_283 : f32 to vector<4x16xf32>
    %471 = arith.mulf %470, %469 : vector<4x16xf32>
    %472 = vector.shape_cast %462 : vector<4x16xf32> to vector<4x16x1xf32>
    %473 = vector.shape_cast %465 : vector<4x16xf32> to vector<4x16x1xf32>
    %474 = tpu.concatenate %472, %473 in 2 : vector<4x16x1xf32>, vector<4x16x1xf32> -> vector<4x16x2xf32>
    %475 = vector.shape_cast %474 : vector<4x16x2xf32> to vector<4x32xf32>
    %476 = vector.shape_cast %468 : vector<4x16xf32> to vector<4x16x1xf32>
    %477 = vector.shape_cast %471 : vector<4x16xf32> to vector<4x16x1xf32>
    %478 = tpu.concatenate %476, %477 in 2 : vector<4x16x1xf32>, vector<4x16x1xf32> -> vector<4x16x2xf32>
    %479 = vector.shape_cast %478 : vector<4x16x2xf32> to vector<4x32xf32>
    %c0_284 = arith.constant 0 : index
    %c0_285 = arith.constant 0 : index
    %c15 = arith.constant 15 : index
    %c0_286 = arith.constant 0 : index
    %480 = vector.load %arg1[%c0_284, %c0_285, %c15, %c0_286] : memref<4x4x16x16xf32, #tpu.memory_space<vmem>>, vector<4x1x1x16xf32>
    %481 = vector.shape_cast %480 : vector<4x1x1x16xf32> to vector<4x16xf32>
    %c0_287 = arith.constant 0 : index
    %c1_288 = arith.constant 1 : index
    %c15_289 = arith.constant 15 : index
    %c0_290 = arith.constant 0 : index
    %482 = vector.load %arg1[%c0_287, %c1_288, %c15_289, %c0_290] : memref<4x4x16x16xf32, #tpu.memory_space<vmem>>, vector<4x1x1x16xf32>
    %483 = vector.shape_cast %482 : vector<4x1x1x16xf32> to vector<4x16xf32>
    %c0_291 = arith.constant 0 : index
    %c2_292 = arith.constant 2 : index
    %c15_293 = arith.constant 15 : index
    %c0_294 = arith.constant 0 : index
    %484 = vector.load %arg1[%c0_291, %c2_292, %c15_293, %c0_294] : memref<4x4x16x16xf32, #tpu.memory_space<vmem>>, vector<4x1x1x16xf32>
    %485 = vector.shape_cast %484 : vector<4x1x1x16xf32> to vector<4x16xf32>
    %c0_295 = arith.constant 0 : index
    %c3_296 = arith.constant 3 : index
    %c15_297 = arith.constant 15 : index
    %c0_298 = arith.constant 0 : index
    %486 = vector.load %arg1[%c0_295, %c3_296, %c15_297, %c0_298] : memref<4x4x16x16xf32, #tpu.memory_space<vmem>>, vector<4x1x1x16xf32>
    %487 = vector.shape_cast %486 : vector<4x1x1x16xf32> to vector<4x16xf32>
    %488 = arith.addf %481, %483 : vector<4x16xf32>
    %489 = arith.subf %481, %483 : vector<4x16xf32>
    %490 = arith.addf %485, %487 : vector<4x16xf32>
    %491 = arith.subf %485, %487 : vector<4x16xf32>
    %492 = arith.addf %488, %490 : vector<4x16xf32>
    %cst_299 = arith.constant 5.000000e-01 : f32
    %493 = vector.broadcast %cst_299 : f32 to vector<4x16xf32>
    %494 = arith.mulf %493, %492 : vector<4x16xf32>
    %495 = arith.subf %488, %490 : vector<4x16xf32>
    %cst_300 = arith.constant 5.000000e-01 : f32
    %496 = vector.broadcast %cst_300 : f32 to vector<4x16xf32>
    %497 = arith.mulf %496, %495 : vector<4x16xf32>
    %498 = arith.addf %489, %491 : vector<4x16xf32>
    %cst_301 = arith.constant 5.000000e-01 : f32
    %499 = vector.broadcast %cst_301 : f32 to vector<4x16xf32>
    %500 = arith.mulf %499, %498 : vector<4x16xf32>
    %501 = arith.subf %489, %491 : vector<4x16xf32>
    %cst_302 = arith.constant 5.000000e-01 : f32
    %502 = vector.broadcast %cst_302 : f32 to vector<4x16xf32>
    %503 = arith.mulf %502, %501 : vector<4x16xf32>
    %504 = vector.shape_cast %494 : vector<4x16xf32> to vector<4x16x1xf32>
    %505 = vector.shape_cast %497 : vector<4x16xf32> to vector<4x16x1xf32>
    %506 = tpu.concatenate %504, %505 in 2 : vector<4x16x1xf32>, vector<4x16x1xf32> -> vector<4x16x2xf32>
    %507 = vector.shape_cast %506 : vector<4x16x2xf32> to vector<4x32xf32>
    %508 = vector.shape_cast %500 : vector<4x16xf32> to vector<4x16x1xf32>
    %509 = vector.shape_cast %503 : vector<4x16xf32> to vector<4x16x1xf32>
    %510 = tpu.concatenate %508, %509 in 2 : vector<4x16x1xf32>, vector<4x16x1xf32> -> vector<4x16x2xf32>
    %511 = vector.shape_cast %510 : vector<4x16x2xf32> to vector<4x32xf32>
    %512 = tpu.concatenate %27, %31, %59, %63, %91, %95, %123, %127, %155, %159, %187, %191, %219, %223, %251, %255 in 1 : vector<4x32xf32>, vector<4x32xf32>, vector<4x32xf32>, vector<4x32xf32>, vector<4x32xf32>, vector<4x32xf32>, vector<4x32xf32>, vector<4x32xf32>, vector<4x32xf32>, vector<4x32xf32>, vector<4x32xf32>, vector<4x32xf32>, vector<4x32xf32>, vector<4x32xf32>, vector<4x32xf32>, vector<4x32xf32> -> vector<4x512xf32>
    %513 = tpu.concatenate %283, %287, %315, %319, %347, %351, %379, %383, %411, %415, %443, %447, %475, %479, %507, %511 in 1 : vector<4x32xf32>, vector<4x32xf32>, vector<4x32xf32>, vector<4x32xf32>, vector<4x32xf32>, vector<4x32xf32>, vector<4x32xf32>, vector<4x32xf32>, vector<4x32xf32>, vector<4x32xf32>, vector<4x32xf32>, vector<4x32xf32>, vector<4x32xf32>, vector<4x32xf32>, vector<4x32xf32>, vector<4x32xf32> -> vector<4x512xf32>
    %514 = tpu.concatenate %512, %513 in 1 : vector<4x512xf32>, vector<4x512xf32> -> vector<4x1024xf32>
    %c0_303 = arith.constant 0 : index
    %c0_304 = arith.constant 0 : index
    %515 = vector.load %arg2[%c0_303, %c0_304] : memref<4x1024xf32, #tpu.memory_space<vmem>>, vector<4x1024xf32>
    tpu.vector_store %arg2[%c0_303, %c0_304], %514 {strides = array<i32>} : memref<4x1024xf32, #tpu.memory_space<vmem>>, vector<4x1024xf32>,
    return
  }
  func.func @transform_0(%arg0: i32) -> (i32, i32, i32, i32) {
    %c0_i32 = arith.constant 0 : i32
    %c0_i32_0 = arith.constant 0 : i32
    %c0_i32_1 = arith.constant 0 : i32
    %c0_i32_2 = arith.constant 0 : i32
    return %arg0, %c0_i32, %c0_i32_0, %c0_i32_1 : i32, i32, i32, i32
  }
  func.func @transform_1(%arg0: i32) -> (i32, i32) {
    %c0_i32 = arith.constant 0 : i32
    %c0_i32_0 = arith.constant 0 : i32
    return %arg0, %c0_i32 : i32, i32
  }
}

</mosaic_0001>

<bundles_post_ra>
// kernel: tpu_custom_call.1
= control target key start
LH: loop header
LB: loop body
LE: loop exit
PB: predicated region body
PF: predicated region fallthrough
CT: control target
= control target key end

     0   :  { %6 = vsyncpa [#allocation3], 0  ;;  %s16119_s0 = inlined_call_operand.hbm [shape: f32[4,4,16,16], index: 0, kind: input, shape index: {}]   ;;  %s16120_s1 = inlined_call_operand.hbm [shape: f32[4,1024], index: 1, kind: output, shape index: {}]  }
   0x1   :  { %7 = vsyncpa [#allocation4], 0  ;;  %s11120_s6 = smov [#allocation2]   ;;  %s11072_s10 = scalar_lea.hbm %s16119_s0, 4096 }
   0x2   :  { %s13_s7 = sshll.u32 %s11120_s6, 4  ;;  %p11073_p0 = scmp.ne.s32.totalorder %s16119_s0, %s11072_s10  ;;  %s14_s7 = int_to_ptr.vmem [resolvable:$true] %s13_s7 }
   0x3   :  { %p11076_p1 = scmp.lt.u32.totalorder %s11072_s10, %s16119_s0 }
   0x5   :  { %p11078_p2 = pnand %p11076_p1, %p11073_p0 }
   0x7   :  { %11081 = shalt.err (!%p11078_p2)
}
   0x8   :  { %s11082_s15 = scalar_lea.vmem %s14_s7, 4096  ;;  %p11087_p4 = scmp.lt.s32.totalorder %s14_s7, %s14_s7 }
   0x9   :  { %p11083_p3 = scmp.ne.s32.totalorder %s14_s7, %s11082_s15  ;;  %p11088_p5 = scmp.lt.s32.totalorder %s11082_s15, %s11082_s15 }
   0xb   :  { %p11089_p6 = por %p11088_p5, %p11087_p4 }
   0xd   :  { %p11090_p7 = pnand %p11089_p6, %p11083_p3 }
   0xf   :  { %11093 = shalt.err (!%p11090_p7)
}
  0x10   :  { %s11121_s16 = smov 128   ;;  %s11122_s17 = smov 8  }
  0x11   :  { %19 = dma.hbm_to_vmem [thread:$0]  %s16119_s0, 4096, %s14_s7, [#allocation3], %s11121_s16, %s11121_s16, %s11122_s17  }
  0x12   :  { %11116 = dma.done.wait [#allocation3], 4096  }
  0x13   :  { %11117 = vsyncadd [#allocation3], 4294963200  ;;  %v90_v0 = vlaneseq  ;;  %v11172_v3 = vld [vmem:[#allocation2 + $0x40] sm:$0x1]  ;;  %v29_v4 = vld [vmem:[#allocation2 + $0x50] sm:$0x1] }
  0x14   :  { %v34_v5 = vld [vmem:[#allocation2 + $0x60] sm:$0x1]  ;;  %v39_v6 = vld [vmem:[#allocation2 + $0x70] sm:$0x1]  ;;  %v43_v7 = vadd.f32 %v29_v4, %v11172_v3  ;;  %v11184_v51 = vld [vmem:[#allocation2 + $0xc1] sm:$0x1]  ;;  %v47_v55 = vsub.f32 %v11172_v3, %v29_v4 }
  0x15   :  { %v11167_v1 = vshrl.u32 %v90_v0, 7  ;;  %v23_v8 = vld [vmem:[#allocation2] sm:$0x1]  ;;  %v28_v9 = vld [vmem:[#allocation2 + $0x10] sm:$0x1]  ;;  %v51_v10 = vadd.f32 %v39_v6, %v34_v5  ;;  %v55_v56 = vsub.f32 %v34_v5, %v39_v6  ;;  %vm178_vm0 = vcmask 7168  }
  0x16   :  { %v33_v11 = vld [vmem:[#allocation2 + $0x20] sm:$0x1]  ;;  %v38_v12 = vld [vmem:[#allocation2 + $0x30] sm:$0x1]  ;;  %v42_v13 = vadd.f32 %v28_v9, %v23_v8  ;;  %v46_v45 = vsub.f32 %v23_v8, %v28_v9  ;;  %v11186_v52 = vld [vmem:[#allocation2 + $0xd1] sm:$0x1] }
  0x17   :  { %v11170_v2 = vsub.s32 0, %v11167_v1  ;;  %v11175_v14 = vld [vmem:[#allocation2 + $0x80] sm:$0x1]  ;;  %v50_v15 = vadd.f32 %v38_v12, %v33_v11  ;;  %v30_v16 = vld [vmem:[#allocation2 + $0x90] sm:$0x1]  ;;  %v59_v19 = vadd.f32 %v51_v10, %v43_v7  ;;  %v67_v41 = vsub.f32 %v43_v7, %v51_v10  ;;  %s11125_s0 = smov 4  }
  0x18   :  { %v35_v17 = vld [vmem:[#allocation2 + $0xa0] sm:$0x1]  ;;  %v40_v18 = vld [vmem:[#allocation2 + $0xb0] sm:$0x1]  ;;  %v44_v20 = vadd.f32 %v30_v16, %v11175_v14  ;;  %v54_v46 = vsub.f32 %v33_v11, %v38_v12  ;;  %v11190_v57 = vld [vmem:[#allocation2 + $0xe1] sm:$0x1]  ;;  %v11196_v59 = vsub.f32 %v11184_v51, %v11186_v52  ;;  %v75_v63 = vadd.f32 %v55_v56, %v47_v55 }
  0x19   :  { %v52_v21 = vadd.f32 %v40_v18, %v35_v17  ;;  %v26_v22 = vld [vmem:[#allocation2 + $0xc0] sm:$0x1]  ;;  %v31_v23 = vld [vmem:[#allocation2 + $0xd0] sm:$0x1]  ;;  %v58_v25 = vadd.f32 %v50_v15, %v42_v13  ;;  %v63_v27 = vmul.f32 0.5, %v59_v19  ;;  %v66_v38 = vsub.f32 %v42_v13, %v50_v15  ;;  %s11126_s20 = smov 12  }
  0x1a   :  { %v36_v24 = vld [vmem:[#allocation2 + $0xe0] sm:$0x1]  ;;  %v41_v26 = vld [vmem:[#allocation2 + $0xf0] sm:$0x1]  ;;  %v45_v29 = vadd.f32 %v31_v23, %v26_v22  ;;  %v71_v43 = vmul.f32 0.5, %v67_v41  ;;  %v74_v50 = vadd.f32 %v54_v46, %v46_v45  ;;  %v48_v0 = vsub.f32 %v11175_v14, %v30_v16  ;;  %s11127_s21 = smov 16  }
  0x1b   :  { %v60_v28 = vadd.f32 %v52_v21, %v44_v20  ;;  %v53_v30 = vadd.f32 %v41_v26, %v36_v24  ;;  %v62_v31 = vmul.f32 0.5, %v58_v25  ;;  %v104_v32 = vrot.slane %v63_v27, %v11170_v2  ;;  %v11192_v58 = vld [vmem:[#allocation2 + $0xf1] sm:$0x1]  ;;  %v11243_v41 = vld [vmem:[#allocation2 + $0xa1] sm:$0x1]  ;;  %s11128_s22 = smov 20  }
  0x1c   :  { %v70_v40 = vmul.f32 0.5, %v66_v38  ;;  %v68_v44 = vsub.f32 %v44_v20, %v52_v21  ;;  %v148_v47 = vrot.slane %v71_v43, %v11170_v2  ;;  %v11200_v60 = vsub.f32 %v11190_v57, %v11192_v58  ;;  %v11209_v21 = vld [vmem:[#allocation2 + $0x1] sm:$0x1]  ;;  %s11129_s23 = smov 24   ;;  %s11130_s24 = smov 28  }
  0x1d   :  { %v93_v33 = vrot.slane %v62_v31, %v11170_v2  ;;  %106 = vbcast.lane.b32.xlu1 %v104_v32, 256  ;;  %v64_v34 = vmul.f32 0.5, %v60_v28  ;;  %v61_v35 = vadd.f32 %v53_v30, %v45_v29  ;;  %v69_v49 = vsub.f32 %v45_v29, %v53_v30  ;;  %v11222_v30 = vld [vmem:[#allocation2 + $0x41] sm:$0x1]  ;;  %v11224_v31 = vld [vmem:[#allocation2 + $0x51] sm:$0x1] }
  0x1e   :  { %v137_v42 = vrot.slane %v70_v40, %v11170_v2  ;;  %v72_v48 = vmul.f32 0.5, %v68_v44  ;;  %v78_v61 = vmul.f32 0.5, %v74_v50  ;;  %v56_v3 = vsub.f32 %v35_v17, %v40_v18  ;;  %v11241_v40 = vld [vmem:[#allocation2 + $0x91] sm:$0x1]  ;;  %s11132_s25 = smov 2   ;;  %s11133_s26 = smov 6  }
  0x1f   :  { %95 = vbcast.lane.b32.xlu0 %v93_v33, 256  ;;  %v115_v36 = vrot.slane %v64_v34, %v11170_v2  ;;  %v65_v37 = vmul.f32 0.5, %v61_v35  ;;  %v73_v54 = vmul.f32 0.5, %v69_v49  ;;  %v79_v5 = vmul.f32 0.5, %v75_v63  ;;  %s11134_s27 = smov 10   ;;  %s11135_s28 = smov 14  }
  0x20   :  { %v159_v53 = vrot.slane %v72_v48, %v11170_v2  ;;  %v416_v4 = vrot.slane %v78_v61, %v11170_v2  ;;  %v76_v6 = vadd.f32 %v56_v3, %v48_v0  ;;  %v49_v7 = vsub.f32 %v26_v22, %v31_v23  ;;  %v11211_v22 = vld [vmem:[#allocation2 + $0x11] sm:$0x1]  ;;  %v11213_v23 = vld [vmem:[#allocation2 + $0x21] sm:$0x1]  ;;  %s11136_s29 = smov 18   ;;  %s11137_s30 = smov 22  }
  0x21   :  { %110 = vbcast.lane.b32.xlu1 %v104_v32, 264  ;;  %v126_v39 = vrot.slane %v65_v37, %v11170_v2  ;;  %v170_v62 = vrot.slane %v73_v54, %v11170_v2  ;;  %v57_v8 = vsub.f32 %v36_v24, %v41_v26  ;;  %v427_v9 = vrot.slane %v79_v5, %v11170_v2  ;;  %v11215_v24 = vld [vmem:[#allocation2 + $0x31] sm:$0x1]  ;;  %v11226_v32 = vld [vmem:[#allocation2 + $0x61] sm:$0x1]  ;;  %s11138_s2 = smov 26  }
  0x22   :  { %v80_v10 = vmul.f32 0.5, %v76_v6  ;;  %v82_v14 = vsub.f32 %v46_v45, %v54_v46  ;;  %v83_v17 = vsub.f32 %v47_v55, %v55_v56  ;;  %v84_v20 = vsub.f32 %v48_v0, %v56_v3  ;;  %s11139_s3 = smov 30   ;;  %s11140_s4 = smov 32  }
  0x23   :  { %99 = vbcast.lane.b32.xlu0 %v93_v33, 264  ;;  %v77_v11 = vadd.f32 %v57_v8, %v49_v7  ;;  %v85_v25 = vsub.f32 %v49_v7, %v57_v8  ;;  %v736_v28 = vadd.f32 %v11211_v22, %v11209_v21  ;;  %v744_v29 = vadd.f32 %v11215_v24, %v11213_v23  ;;  %v11228_v33 = vld [vmem:[#allocation2 + $0x71] sm:$0x1]  ;;  %s11141_s5 = smov 64   ;;  %s11142_s6 = smov 96  }
  0x24   :  { %v438_v12 = vrot.slane %v80_v10, %v11170_v2  ;;  %v86_v16 = vmul.f32 0.5, %v82_v14  ;;  %v87_v19 = vmul.f32 0.5, %v83_v17  ;;  %v88_v27 = vmul.f32 0.5, %v84_v20  ;;  %s11143_s7 = smov [#allocation5]  }
  0x25   :  { %121 = vbcast.lane.b32.xlu1 %v115_v36, 264  ;;  %v81_v13 = vmul.f32 0.5, %v77_v11  ;;  %v89_v34 = vmul.f32 0.5, %v85_v25  ;;  %v11233_v37 = vadd.f32 %v11224_v31, %v11222_v30  ;;  %v11237_v38 = vadd.f32 %v11228_v33, %v11226_v32  ;;  %s11039_s8 = sshll.u32 %s11143_s7, 4  ;;  %s11040_s8 = int_to_ptr.vmem [resolvable:$true] %s11039_s8 }
  0x26   :  { %v460_v18 = vrot.slane %v86_v16, %v11170_v2  ;;  %v471_v26 = vrot.slane %v87_v19, %v11170_v2  ;;  %v482_v35 = vrot.slane %v88_v27, %v11170_v2  ;;  %v11260_v48 = vadd.f32 %v11186_v52, %v11184_v51  ;;  %s11094_s9 = scalar_lea.vmem %s11040_s8, 512  ;;  %p11099_p9 = scmp.lt.s32.totalorder %s11040_s8, %s11040_s8 }
  0x27   :  { %117 = vbcast.lane.b32.xlu0 %v115_v36, 256  ;;  %v449_v15 = vrot.slane %v81_v13, %v11170_v2  ;;  %v752_v36 = vadd.f32 %v744_v29, %v736_v28  ;;  %v493_v43 = vrot.slane %v89_v34, %v11170_v2  ;;  %v753_v45 = vadd.f32 %v11237_v38, %v11233_v37  ;;  %p11095_p8 = scmp.ne.s32.totalorder %s11040_s8, %s11094_s9  ;;  %p11100_p10 = scmp.lt.s32.totalorder %s11094_s9, %s11094_s9 }
  0x28   :  { %v11267_v54 = vadd.f32 %v11192_v58, %v11190_v57  ;;  %v11123_v14 = vmov 1983009808   ;;  %v11124_v19 = vmov 1934713408   ;;  %vm383_vm1 = vcmask 15360  }
  0x29   :  { %132 = vbcast.lane.b32.xlu1 %v126_v39, 264  ;;  %v756_v44 = vmul.f32 0.5, %v752_v36  ;;  %v757_v50 = vmul.f32 0.5, %v753_v45  ;;  %v222_v20 = vunpack.c.l.s4 %v11124_v19  ;;  %vm385_vm2 = vcmask 31744   ;;  %p11101_p11 = por %p11100_p10, %p11099_p9 }
  0x2a   :  { %v755_v51 = vadd.f32 %v11267_v54, %v11260_v48  ;;  %vm387_vm3 = vcmask 48128   ;;  %vm389_vm4 = vcmask 64512   ;;  %vm391_vm5 = vcmask 80896  }
  0x2b   :  { %128 = vbcast.lane.b32.xlu0 %v126_v39, 256  ;;  %v11239_v39 = vld [vmem:[#allocation2 + $0x81] sm:$0x1]  ;;  %v787_v49 = vrot.slane %v756_v44, %v11170_v2  ;;  %v798_v55 = vrot.slane %v757_v50, %v11170_v2  ;;  %vm393_vm6 = vcmask 97280   ;;  %vm395_vm7 = vcmask 113664   ;;  %p11102_p12 = pnand %p11101_p11, %p11095_p8 }
  0x2c   :  { %v11252_v46 = vadd.f32 %v11241_v40, %v11239_v39  ;;  %v759_v61 = vmul.f32 0.5, %v755_v51  ;;  %vm397_vm8 = vcmask 130048   ;;  %vm399_vm9 = vcmask 146432  }
  0x2d   :  { %143 = vbcast.lane.b32.xlu1 %v137_v42, 264  ;;  %vm401_vm10 = vcmask 162816   ;;  %vm403_vm11 = vcmask 179200   ;;  %vm405_vm12 = vcmask 195584   ;;  %vm407_vm13 = vcmask 211968  }
  0x2e   :  { %v820_v63 = vrot.slane %v759_v61, %v11170_v2  ;;  %vm409_vm14 = vcmask 228352   ;;  %vm411_vm15 = vcmask 244736  }
  0x2f   :  { %139 = vbcast.lane.b32.xlu0 %v137_v42, 256  ;;  %v11245_v42 = vld [vmem:[#allocation2 + $0xb1] sm:$0x1] }
  0x31   :  { %154 = vbcast.lane.b32.xlu1 %v148_v47, 264 }
  0x33   :  { %150 = vbcast.lane.b32.xlu0 %v148_v47, 256  ;;  %v11256_v47 = vadd.f32 %v11245_v42, %v11243_v41 }
  0x35   :  { %165 = vbcast.lane.b32.xlu1 %v159_v53, 264 }
  0x37   :  { %161 = vbcast.lane.b32.xlu0 %v159_v53, 256  ;;  %v754_v53 = vadd.f32 %v11256_v47, %v11252_v46 }
  0x39   :  { %176 = vbcast.lane.b32.xlu1 %v170_v62, 264  ;;  %v758_v56 = vmul.f32 0.5, %v754_v53 }
  0x3b   :  { %172 = vbcast.lane.b32.xlu0 %v170_v62, 256  ;;  %v809_v52 = vrot.slane %v758_v56, %v11170_v2  ;;  %v760_v62 = vsub.f32 %v736_v28, %v744_v29 }
  0x3d   :  { %418 = vbcast.lane.b32.xlu1 %v416_v4, 256  ;;  %v764_v57 = vmul.f32 0.5, %v760_v62 }
  0x3f   :  { %422 = vbcast.lane.b32.xlu0 %v416_v4, 264  ;;  %v831_v58 = vrot.slane %v764_v57, %v11170_v2 }
  0x41   :  { %429 = vbcast.lane.b32.xlu1 %v427_v9, 256 }
  0x43   :  { %433 = vbcast.lane.b32.xlu0 %v427_v9, 264 }
  0x45   :  { %440 = vbcast.lane.b32.xlu1 %v438_v12, 256 }
  0x47   :  { %444 = vbcast.lane.b32.xlu0 %v438_v12, 264 }
  0x49   :  { %451 = vbcast.lane.b32.xlu1 %v449_v15, 256 }
  0x4b   :  { %455 = vbcast.lane.b32.xlu0 %v449_v15, 264  ;;  %v190_v15 = vunpack.c.l.s4 %v11123_v14 }
  0x4d   :  { %462 = vbcast.lane.b32.xlu1 %v460_v18, 256  ;;  %v191_v17 = vunpack.c.0.s8 %v190_v15 }
  0x4f   :  { %466 = vbcast.lane.b32.xlu0 %v460_v18, 264  ;;  %v11278_v28 = vsub.s32 %v191_v17, %v11167_v1 }
  0x51   :  { %473 = vbcast.lane.b32.xlu1 %v471_v26, 256 }
  0x53   :  { %477 = vbcast.lane.b32.xlu0 %v471_v26, 264 }
  0x55   :  { %484 = vbcast.lane.b32.xlu1 %v482_v35, 256 }
  0x57   :  { %488 = vbcast.lane.b32.xlu0 %v482_v35, 264  ;;  %v223_v35 = vunpack.c.0.s8 %v222_v20 }
  0x59   :  { %495 = vbcast.lane.b32.xlu1 %v493_v43, 256 }
  0x5b   :  { %499 = vbcast.lane.b32.xlu0 %v493_v43, 264 }
  0x5d   :  { %793 = vbcast.lane.b32.xlu1 %v787_v49, 264 }
  0x5f   :  { %789 = vbcast.lane.b32.xlu0 %v787_v49, 256 }
  0x61   :  { %804 = vbcast.lane.b32.xlu1 %v798_v55, 264 }
  0x63   :  { %800 = vbcast.lane.b32.xlu0 %v798_v55, 256 }
  0x65   :  { %815 = vbcast.lane.b32.xlu1 %v809_v52, 264 }
  0x67   :  { %811 = vbcast.lane.b32.xlu0 %v809_v52, 256  ;;  %v11292_v52 = vsub.s32 %v223_v35, %v11167_v1 }
  0x69   :  { %826 = vbcast.lane.b32.xlu1 %v820_v63, 264 }
  0x6b   :  { %822 = vbcast.lane.b32.xlu0 %v820_v63, 256 }
  0x6d   :  { %837 = vbcast.lane.b32.xlu1 %v831_v58, 264 }
  0x6f   :  { %833 = vbcast.lane.b32.xlu0 %v831_v58, 256 }
  0x8f   :  { %v107_v0 = vpop.permute.xlu1 %106 }
  0x91   :  { %v96_v3 = vpop.permute.xlu0 %95 }
  0x93   :  { %v111_v4 = vpop.permute.xlu1 %110 }
  0x95   :  { %v100_v5 = vpop.permute.xlu0 %99 }
  0x97   :  { %v122_v6 = vpop.permute.xlu1 %121 }
  0x99   :  { %v118_v7 = vpop.permute.xlu0 %117 }
  0x9b   :  { %v133_v8 = vpop.permute.xlu1 %132 }
  0x9d   :  { %v129_v9 = vpop.permute.xlu0 %128 }
  0x9f   :  { %v144_v10 = vpop.permute.xlu1 %143 }
  0xa1   :  { %v140_v11 = vpop.permute.xlu0 %139 }
  0xa2   :  { %v179_v26 = vsel %vm178_vm0, %v96_v3, %v140_v11  ;;  %v180_v11 = vsel %vm178_vm0, %v100_v5, %v144_v10 }
  0xa3   :  { %v155_v12 = vpop.permute.xlu1 %154 }
  0xa4   :  { %v182_v57 = vsel %vm178_vm0, %v111_v4, %v155_v12 }
  0xa5   :  { %v151_v13 = vpop.permute.xlu0 %150 }
  0xa6   :  { %v181_v36 = vsel %vm178_vm0, %v107_v0, %v151_v13 }
  0xa7   :  { %v166_v16 = vpop.permute.xlu1 %165 }
  0xa8   :  { %v184_v58 = vsel %vm178_vm0, %v122_v6, %v166_v16 }
  0xa9   :  { %v162_v18 = vpop.permute.xlu0 %161  ;;  %v256_v19 = vcombine.high %v180_v11, %v184_v58 }
  0xaa   :  { %v183_v25 = vsel %vm178_vm0, %v118_v7, %v162_v18 }
  0xab   :  { %v177_v27 = vpop.permute.xlu1 %176  ;;  %v187_v29 = vcombine.low %v179_v26, %v183_v25  ;;  %v188_v44 = vcombine.high %v179_v26, %v183_v25 }
  0xac   :  { %v186_v61 = vsel %vm178_vm0, %v133_v8, %v177_v27  ;;  %v255_v8 = vcombine.low %v180_v11, %v184_v58 }
  0xad   :  { %v173_v34 = vpop.permute.xlu0 %172  ;;  %v11283_v53 = vrot.slane %v187_v29, %v11278_v28  ;;  %v202_v62 = vrot.slane %v188_v44, %v11278_v28  ;;  %v271_v3 = vcombine.low %v182_v57, %v186_v61  ;;  %v272_v5 = vcombine.high %v182_v57, %v186_v61 }
  0xae   :  { %v185_v43 = vsel %vm178_vm0, %v129_v9, %v173_v34  ;;  %v263_v15 = vrot.slane %v255_v8, %v11278_v28  ;;  %v270_v34 = vrot.slane %v256_v19, %v11278_v28 }
  0xaf   :  { %v203_v45 = vcombine.low %v181_v36, %v185_v43  ;;  %v204_v49 = vcombine.high %v181_v36, %v185_v43  ;;  %v419_v50 = vpop.permute.xlu1 %418  ;;  %v279_v4 = vrot.slane %v271_v3, %v11278_v28  ;;  %v286_v25 = vrot.slane %v272_v5, %v11278_v28 }
  0xb1   :  { %v11286_v55 = vrot.slane %v203_v45, %v11278_v28  ;;  %v218_v56 = vrot.slane %v204_v49, %v11278_v28  ;;  %v11289_v51 = vpop.permute.xlu0 %422  ;;  %v287_v18 = vcombine.low %v263_v15, %v279_v4  ;;  %v288_v29 = vcombine.high %v263_v15, %v279_v4 }
  0xb2   :  { %v303_v44 = vcombine.low %v270_v34, %v286_v25 }
  0xb3   :  { %v220_v63 = vcombine.high %v11283_v53, %v11286_v55  ;;  %v430_v0 = vpop.permute.xlu1 %429  ;;  %v235_v1 = vcombine.low %v202_v62, %v218_v56  ;;  %v236_v14 = vcombine.high %v202_v62, %v218_v56  ;;  %v11322_v27 = vrot.slane %v287_v18, %v11292_v52 }
  0xb4   :  { %v11328_v43 = vrot.slane %v288_v29, %v11292_v52  ;;  %v11334_v61 = vrot.slane %v303_v44, %v11292_v52  ;;  %v304_v62 = vcombine.high %v270_v34, %v286_v25 }
  0xb5   :  { %v11300_v7 = vpop.permute.xlu0 %433  ;;  %v11303_v9 = vrot.slane %v220_v63, %v11292_v52  ;;  %v11310_v6 = vrot.slane %v235_v1, %v11292_v52  ;;  %v11316_v17 = vrot.slane %v236_v14, %v11292_v52 }
  0xb6   :  { %v11342_v11 = vrot.slane %v304_v62, %v11292_v52 }
  0xb7   :  { %328 = vrot.lane.b32.xlu1 %v11303_v9, %s11125_s0  ;;  %v441_v13 = vpop.permute.xlu1 %440 }
  0xb9   :  { %v445_v12 = vpop.permute.xlu0 %444 }
  0xbb   :  { %336 = vrot.lane.b32.xlu1 %v11310_v6, %s11122_s17  ;;  %v452_v16 = vpop.permute.xlu1 %451 }
  0xbd   :  { %v456_v10 = vpop.permute.xlu0 %455 }
  0xbf   :  { %344 = vrot.lane.b32.xlu1 %v11316_v17, %s11126_s20  ;;  %v463_v20 = vpop.permute.xlu1 %462 }
  0xc0   :  { %v501_v63 = vsel %vm178_vm0, %v419_v50, %v463_v20 }
  0xc1   :  { %v467_v26 = vpop.permute.xlu0 %466 }
  0xc3   :  { %352 = vrot.lane.b32.xlu1 %v11322_v27, %s11127_s21  ;;  %v474_v35 = vpop.permute.xlu1 %473 }
  0xc4   :  { %v503_v3 = vsel %vm178_vm0, %v430_v0, %v474_v35 }
  0xc5   :  { %v478_v36 = vpop.permute.xlu0 %477 }
  0xc6   :  { %v504_v20 = vsel %vm178_vm0, %v11300_v7, %v478_v36 }
  0xc7   :  { %360 = vrot.lane.b32.xlu1 %v11328_v43, %s11128_s22  ;;  %v485_v45 = vpop.permute.xlu1 %484 }
  0xc8   :  { %v505_v49 = vsel %vm178_vm0, %v441_v13, %v485_v45  ;;  %v502_v45 = vsel %vm178_vm0, %v11289_v51, %v467_v26 }
  0xc9   :  { %v489_v56 = vpop.permute.xlu0 %488  ;;  %v509_v57 = vcombine.low %v501_v63, %v505_v49  ;;  %v510_v8 = vcombine.high %v501_v63, %v505_v49  ;;  %v16121_v49 = vmov 0.0  }
  0xca   :  { %v506_v25 = vsel %vm178_vm0, %v445_v12, %v489_v56 }
  0xcb   :  { %368 = vrot.lane.b32.xlu1 %v11334_v61, %s11129_s23  ;;  %v496_v58 = vpop.permute.xlu1 %495  ;;  %v517_v50 = vrot.slane %v509_v57, %v11278_v28 }
  0xcc   :  { %v507_v1 = vsel %vm178_vm0, %v452_v16, %v496_v58  ;;  %v524_v16 = vrot.slane %v510_v8, %v11278_v28  ;;  %v578_v58 = vcombine.high %v502_v45, %v506_v25 }
  0xcd   :  { %v525_v13 = vcombine.low %v503_v3, %v507_v1  ;;  %v526_v4 = vcombine.high %v503_v3, %v507_v1  ;;  %v500_v14 = vpop.permute.xlu0 %499 }
  0xce   :  { %v508_v0 = vsel %vm178_vm0, %v456_v10, %v500_v14  ;;  %v577_v10 = vcombine.low %v502_v45, %v506_v25 }
  0xcf   :  { %376 = vrot.lane.b32.xlu1 %v11342_v11, %s11130_s24  ;;  %v533_v15 = vrot.slane %v525_v13, %v11278_v28  ;;  %v540_v5 = vrot.slane %v526_v4, %v11278_v28  ;;  %v593_v29 = vcombine.low %v504_v20, %v508_v0  ;;  %v594_v26 = vcombine.high %v504_v20, %v508_v0 }
  0xd0   :  { %v585_v56 = vrot.slane %v577_v10, %v11278_v28  ;;  %v592_v4 = vrot.slane %v578_v58, %v11278_v28  ;;  %v219_v0 = vcombine.low %v11283_v53, %v11286_v55  ;;  %v761_v53 = vsub.f32 %v11233_v37, %v11237_v38 }
  0xd1   :  { %v541_v18 = vcombine.low %v517_v50, %v533_v15  ;;  %v542_v19 = vcombine.high %v517_v50, %v533_v15  ;;  %v557_v44 = vcombine.low %v524_v16, %v540_v5  ;;  %v601_v7 = vrot.slane %v593_v29, %v11278_v28 }
  0xd2   :  { %v558_v36 = vcombine.high %v524_v16, %v540_v5  ;;  %v608_v1 = vrot.slane %v594_v26, %v11278_v28  ;;  %v11392_v25 = vrot.slane %v219_v0, %v11292_v52  ;;  %v252_v37 = vcombine.high %v11303_v9, %v16121_v49  ;;  %v790_v26 = vpop.permute.xlu0 %789 }
  0xd3   :  { %v556_v34 = vrot.slane %v542_v19, %v11292_v52  ;;  %v11356_v35 = vrot.slane %v541_v18, %v11292_v52  ;;  %v565_v12 = vrot.slane %v557_v44, %v11292_v52  ;;  %v609_v57 = vcombine.low %v585_v56, %v601_v7 }
  0xd4   :  { %v572_v63 = vrot.slane %v558_v36, %v11292_v52  ;;  %v610_v13 = vcombine.high %v585_v56, %v601_v7  ;;  %v625_v15 = vcombine.low %v592_v4, %v608_v1  ;;  %v626_v18 = vcombine.high %v592_v4, %v608_v1  ;;  %16148 = vst [vmem:[#allocation8_spill] sm:$0xff] %v11392_v25  ;;  %v11431_v36 = vpop.permute.xlu1 %793 }
  0xd5   :  { %650 = vrot.lane.b32.xlu0 %v556_v34, %s11125_s0  ;;  %v573_v62 = vcombine.high %v11356_v35, %v16121_v49  ;;  %v574_v51 = vcombine.high %v556_v34, %v16121_v49  ;;  %v575_v3 = vcombine.high %v565_v12, %v16121_v49  ;;  %v617_v8 = vrot.slane %v609_v57, %v11292_v52 }
  0xd6   :  { %v576_v14 = vcombine.high %v572_v63, %v16121_v49  ;;  %v624_v50 = vrot.slane %v610_v13, %v11292_v52  ;;  %v633_v16 = vrot.slane %v625_v15, %v11292_v52  ;;  %v640_v20 = vrot.slane %v626_v18, %v11292_v52 }
  0xd7   :  { %646 = vrot.lane.b32.xlu1 %v573_v62, %s11132_s25  ;;  %v641_v5 = vcombine.high %v617_v8, %v16121_v49  ;;  %v251_v29 = vcombine.high %v11392_v25, %v16121_v49  ;;  %v765_v34 = vmul.f32 0.5, %v761_v53  ;;  %v762_v44 = vsub.f32 %v11252_v46, %v11256_v47 }
  0xd8   :  { %v642_v19 = vcombine.high %v624_v50, %v16121_v49  ;;  %v643_v55 = vcombine.high %v633_v16, %v16121_v49  ;;  %v644_v45 = vcombine.high %v640_v20, %v16121_v49  ;;  %v763_v62 = vsub.f32 %v11260_v48, %v11267_v54 }
  0xd9   :  { %658 = vrot.lane.b32.xlu0 %v565_v12, %s11122_s17  ;;  %v842_v38 = vrot.slane %v765_v34, %v11170_v2  ;;  %v766_v10 = vmul.f32 0.5, %v762_v44  ;;  %v253_v46 = vcombine.high %v11310_v6, %v16121_v49  ;;  %v254_v9 = vcombine.high %v11316_v17, %v16121_v49 }
  0xda   :  { %v767_v7 = vmul.f32 0.5, %v763_v62  ;;  %v319_v48 = vcombine.high %v11322_v27, %v16121_v49  ;;  %v320_v54 = vcombine.high %v11328_v43, %v16121_v49  ;;  %v321_v6 = vcombine.high %v11334_v61, %v16121_v49  ;;  %v11434_v27 = vpop.permute.xlu1 %804 }
  0xdb   :  { %654 = vrot.lane.b32.xlu1 %v574_v51, %s11133_s26  ;;  %v853_v47 = vrot.slane %v766_v10, %v11170_v2  ;;  %v322_v17 = vcombine.high %v11342_v11, %v16121_v49  ;;  %v801_v11 = vpop.permute.xlu0 %800 }
  0xdc   :  { %v864_v12 = vrot.slane %v767_v7, %v11170_v2 }
  0xdd   :  { %666 = vrot.lane.b32.xlu0 %v572_v63, %s11126_s20 }
  0xde   :  { %v11436_v56 = vpop.permute.xlu1 %815 }
  0xdf   :  { %662 = vrot.lane.b32.xlu1 %v575_v3, %s11134_s27  ;;  %v812_v58 = vpop.permute.xlu0 %811  ;;  %v11448_v3 = vadd.f32 %v11200_v60, %v11196_v59 }
  0xe1   :  { %674 = vrot.lane.b32.xlu0 %v617_v8, %s11127_s21 }
  0xe2   :  { %v827_v43 = vpop.permute.xlu1 %826 }
  0xe3   :  { %670 = vrot.lane.b32.xlu1 %v576_v14, %s11135_s28  ;;  %v823_v8 = vpop.permute.xlu0 %822 }
  0xe5   :  { %682 = vrot.lane.b32.xlu0 %v624_v50, %s11128_s22 }
  0xe6   :  { %v11438_v51 = vpop.permute.xlu1 %837 }
  0xe7   :  { %678 = vrot.lane.b32.xlu1 %v641_v5, %s11136_s29  ;;  %v834_v4 = vpop.permute.xlu0 %833 }
  0xe9   :  { %690 = vrot.lane.b32.xlu0 %v633_v16, %s11129_s23 }
  0xeb   :  { %686 = vrot.lane.b32.xlu1 %v642_v19, %s11137_s30 }
  0xed   :  { %698 = vrot.lane.b32.xlu0 %v640_v20, %s11130_s24 }
  0xef   :  { %694 = vrot.lane.b32.xlu1 %v643_v55, %s11138_s2 }
  0xf1   :  { %324 = vrot.lane.b32.xlu0 %v251_v29, %s11132_s25 }
  0xf3   :  { %702 = vrot.lane.b32.xlu1 %v644_v45, %s11139_s3 }
  0xf5   :  { %332 = vrot.lane.b32.xlu0 %v252_v37, %s11133_s26 }
  0xf7   :  { %848 = vbcast.lane.b32.xlu1 %v842_v38, 264 }
  0xf9   :  { %340 = vrot.lane.b32.xlu0 %v253_v46, %s11134_s27 }
  0xfb   :  { %859 = vbcast.lane.b32.xlu1 %v853_v47, 264 }
  0xfd   :  { %348 = vrot.lane.b32.xlu0 %v254_v9, %s11135_s28 }
  0xff   :  { %870 = vbcast.lane.b32.xlu1 %v864_v12, 264 }
 0x101   :  { %356 = vrot.lane.b32.xlu0 %v319_v48, %s11136_s29 }
 0x105   :  { %364 = vrot.lane.b32.xlu0 %v320_v54, %s11137_s30 }
 0x109   :  { %372 = vrot.lane.b32.xlu0 %v321_v6, %s11138_s2 }
 0x10d   :  { %380 = vrot.lane.b32.xlu0 %v322_v17, %s11139_s3 }
 0x111   :  { %844 = vbcast.lane.b32.xlu0 %v842_v38, 256 }
 0x115   :  { %855 = vbcast.lane.b32.xlu0 %v853_v47, 256 }
 0x119   :  { %866 = vbcast.lane.b32.xlu0 %v864_v12, 256 }
 0x129   :  { %v11440_v61 = vpop.permute.xlu1 %328 }
 0x12a   :  { %16149 = vst [vmem:[#allocation9_spill] sm:$0xff] %v11440_v61 }
 0x12d   :  { %v11442_v63 = vpop.permute.xlu1 %336 }
 0x12e   :  { %16150 = vst [vmem:[#allocation10_spill] sm:$0xff] %v11442_v63 }
 0x131   :  { %v11444_v57 = vpop.permute.xlu1 %344 }
 0x132   :  { %16151 = vst [vmem:[#allocation11_spill] sm:$0xff] %v11444_v57 }
 0x135   :  { %v11450_v1 = vpop.permute.xlu1 %352 }
 0x136   :  { %16152 = vst [vmem:[#allocation12_spill] sm:$0xff] %v11450_v1 }
 0x139   :  { %v11452_v13 = vpop.permute.xlu1 %360 }
 0x13a   :  { %16153 = vst [vmem:[#allocation13_spill] sm:$0xff] %v11452_v13 }
 0x13d   :  { %v11454_v14 = vpop.permute.xlu1 %368 }
 0x13e   :  { %16154 = vst [vmem:[#allocation14_spill] sm:$0xff] %v11454_v14  ;;  %v872_v14 = vsel %vm178_vm0, %v790_v26, %v834_v4 }
 0x141   :  { %v11462_v0 = vpop.permute.xlu1 %376 }
 0x142   :  { %16155 = vst [vmem:[#allocation15_spill] sm:$0xff] %v11462_v0 }
 0x147   :  { %v11456_v50 = vpop.permute.xlu0 %650 }
 0x149   :  { %v11466_v18 = vpop.permute.xlu1 %646 }
 0x14b   :  { %v11460_v5 = vpop.permute.xlu0 %658 }
 0x14d   :  { %v11470_v20 = vpop.permute.xlu1 %654 }
 0x14f   :  { %v11464_v16 = vpop.permute.xlu0 %666 }
 0x151   :  { %v11476_v29 = vpop.permute.xlu1 %662 }
 0x153   :  { %v11468_v19 = vpop.permute.xlu0 %674 }
 0x155   :  { %v11480_v44 = vpop.permute.xlu1 %670 }
 0x157   :  { %v11472_v53 = vpop.permute.xlu0 %682 }
 0x158   :  { %16156 = vst [vmem:[#allocation16_spill] sm:$0xff] %v11472_v53 }
 0x159   :  { %v11486_v38 = vpop.permute.xlu1 %678 }
 0x15b   :  { %v11474_v55 = vpop.permute.xlu0 %690 }
 0x15c   :  { %16157 = vst [vmem:[#allocation17_spill] sm:$0xff] %v11474_v55 }
 0x15d   :  { %v11490_v62 = vpop.permute.xlu1 %686 }
 0x15e   :  { %16162 = vst [vmem:[#allocation22_spill] sm:$0xff] %v11490_v62 }
 0x15f   :  { %v11478_v34 = vpop.permute.xlu0 %698 }
 0x160   :  { %16158 = vst [vmem:[#allocation18_spill] sm:$0xff] %v11478_v34 }
 0x161   :  { %v11496_v7 = vpop.permute.xlu1 %694 }
 0x162   :  { %16165 = vst [vmem:[#allocation25_spill] sm:$0xff] %v11496_v7 }
 0x163   :  { %v11482_v45 = vpop.permute.xlu0 %324 }
 0x164   :  { %16159 = vst [vmem:[#allocation19_spill] sm:$0xff] %v11482_v45 }
 0x165   :  { %v11500_v12 = vpop.permute.xlu1 %702 }
 0x166   :  { %16167 = vst [vmem:[#allocation27_spill] sm:$0xff] %v11500_v12 }
 0x167   :  { %v11484_v37 = vpop.permute.xlu0 %332 }
 0x168   :  { %16160 = vst [vmem:[#allocation20_spill] sm:$0xff] %v11484_v37 }
 0x169   :  { %v849_v6 = vpop.permute.xlu1 %848 }
 0x16b   :  { %v11488_v10 = vpop.permute.xlu0 %340 }
 0x16c   :  { %16161 = vst [vmem:[#allocation21_spill] sm:$0xff] %v11488_v10 }
 0x16d   :  { %v860_v15 = vpop.permute.xlu1 %859 }
 0x16f   :  { %v11492_v46 = vpop.permute.xlu0 %348 }
 0x170   :  { %16163 = vst [vmem:[#allocation23_spill] sm:$0xff] %v11492_v46 }
 0x171   :  { %v871_v46 = vpop.permute.xlu1 %870 }
 0x173   :  { %v11494_v47 = vpop.permute.xlu0 %356 }
 0x174   :  { %16164 = vst [vmem:[#allocation24_spill] sm:$0xff] %v11494_v47 }
 0x177   :  { %v11498_v9 = vpop.permute.xlu0 %364 }
 0x178   :  { %16166 = vst [vmem:[#allocation26_spill] sm:$0xff] %v11498_v9 }
 0x17b   :  { %v11502_v48 = vpop.permute.xlu0 %372 }
 0x17c   :  { %16168 = vst [vmem:[#allocation28_spill] sm:$0xff] %v11502_v48 }
 0x17f   :  { %v11504_v54 = vpop.permute.xlu0 %380 }
 0x180   :  { %16169 = vst [vmem:[#allocation29_spill] sm:$0xff] %v11504_v54 }
 0x183   :  { %v845_v17 = vpop.permute.xlu0 %844 }
 0x184   :  { %v874_v1 = vsel %vm178_vm0, %v801_v11, %v845_v17  ;;  %v875_v11 = vsel %vm178_vm0, %v11434_v27, %v849_v6 }
 0x187   :  { %v856_v49 = vpop.permute.xlu0 %855 }
 0x188   :  { %v876_v0 = vsel %vm178_vm0, %v812_v58, %v856_v49  ;;  %v879_v49 = vsel %vm178_vm0, %v827_v43, %v871_v46  ;;  %v873_v43 = vsel %vm178_vm0, %v11431_v36, %v11438_v51 }
 0x189   :  { %v880_v13 = vcombine.low %v872_v14, %v876_v0  ;;  %v881_v57 = vcombine.high %v872_v14, %v876_v0  ;;  %v964_v14 = vcombine.low %v875_v11, %v879_v49  ;;  %v965_v36 = vcombine.high %v875_v11, %v879_v49 }
 0x18a   :  { %v740_v49 = vsub.f32 %v11209_v21, %v11211_v22  ;;  %v741_v21 = vsub.f32 %v11222_v30, %v11224_v31  ;;  %v749_v22 = vsub.f32 %v11226_v32, %v11228_v33  ;;  %v750_v30 = vsub.f32 %v11243_v41, %v11245_v42 }
 0x18b   :  { %v867_v47 = vpop.permute.xlu0 %866  ;;  %v888_v54 = vrot.slane %v880_v13, %v11278_v28  ;;  %v895_v26 = vrot.slane %v881_v57, %v11278_v28  ;;  %v979_v6 = vrot.slane %v965_v36, %v11278_v28 }
 0x18c   :  { %v878_v9 = vsel %vm178_vm0, %v823_v8, %v867_v47  ;;  %v877_v8 = vsel %vm178_vm0, %v11436_v56, %v860_v15 }
 0x18d   :  { %v896_v10 = vcombine.low %v874_v1, %v878_v9  ;;  %v897_v48 = vcombine.high %v874_v1, %v878_v9  ;;  %v948_v57 = vcombine.low %v873_v43, %v877_v8 }
 0x18f   :  { %v904_v63 = vrot.slane %v896_v10, %v11278_v28  ;;  %v911_v37 = vrot.slane %v897_v48, %v11278_v28  ;;  %v972_v10 = vrot.slane %v964_v14, %v11278_v28  ;;  %v956_v46 = vrot.slane %v948_v57, %v11278_v28 }
 0x190   :  { %v949_v48 = vcombine.high %v873_v43, %v877_v8  ;;  %v769_v57 = vadd.f32 %v749_v22, %v741_v21 }
 0x191   :  { %v912_v58 = vcombine.low %v888_v54, %v904_v63  ;;  %v913_v4 = vcombine.high %v888_v54, %v904_v63  ;;  %v928_v0 = vcombine.low %v895_v26, %v911_v37  ;;  %v16171_v63 = vmov 0.0  }
 0x192   :  { %v929_v15 = vcombine.high %v895_v26, %v911_v37  ;;  %v980_v9 = vcombine.low %v956_v46, %v972_v10  ;;  %v981_v17 = vcombine.high %v956_v46, %v972_v10  ;;  %v748_v26 = vsub.f32 %v11213_v23, %v11215_v24 }
 0x193   :  { %v927_v1 = vrot.slane %v913_v4, %v11292_v52  ;;  %v11521_v13 = vrot.slane %v912_v58, %v11292_v52  ;;  %v936_v56 = vrot.slane %v928_v0, %v11292_v52  ;;  %v963_v58 = vrot.slane %v949_v48, %v11278_v28 }
 0x194   :  { %v943_v51 = vrot.slane %v929_v15, %v11292_v52  ;;  %v988_v37 = vrot.slane %v980_v9, %v11292_v52  ;;  %v995_v11 = vrot.slane %v981_v17, %v11292_v52  ;;  %v768_v14 = vadd.f32 %v748_v26, %v740_v49 }
 0x195   :  { %16170 = vst [vmem:[#allocation30_spill] sm:$0xff] %v11521_v13  ;;  %1021 = vrot.lane.b32.xlu1 %v927_v1, %s11125_s0  ;;  %v944_v27 = vcombine.high %v11521_v13, %v16171_v63  ;;  %v945_v47 = vcombine.high %v927_v1, %v16171_v63  ;;  %v946_v54 = vcombine.high %v936_v56, %v16171_v63  ;;  %v773_v10 = vmul.f32 0.5, %v769_v57 }
 0x196   :  { %v947_v4 = vcombine.high %v943_v51, %v16171_v63  ;;  %v996_v8 = vcombine.low %v963_v58, %v979_v6  ;;  %v1012_v1 = vcombine.high %v988_v37, %v16171_v63  ;;  %v997_v24 = vcombine.high %v963_v58, %v979_v6 }
 0x197   :  { %1017 = vrot.lane.b32.xlu0 %v944_v27, %s11132_s25  ;;  %v772_v0 = vmul.f32 0.5, %v768_v14  ;;  %v1013_v43 = vcombine.high %v995_v11, %v16171_v63  ;;  %v742_v27 = vsub.f32 %v11239_v39, %v11241_v40  ;;  %v1105_v40 = vrot.slane %v773_v10, %v11170_v2 }
 0x198   :  { %v1004_v23 = vrot.slane %v996_v8, %v11292_v52  ;;  %v1011_v31 = vrot.slane %v997_v24, %v11292_v52  ;;  %v775_v15 = vmul.f32 0.5, %v11448_v3  ;;  %v776_v46 = vsub.f32 %v740_v49, %v748_v26 }
 0x199   :  { %1029 = vrot.lane.b32.xlu1 %v936_v56, %s11122_s17  ;;  %v1094_v33 = vrot.slane %v772_v0, %v11170_v2  ;;  %v770_v56 = vadd.f32 %v750_v30, %v742_v27  ;;  %v16172_v17 = vsub.f32 %v11196_v59, %v11200_v60 }
 0x19a   :  { %v1014_v32 = vcombine.high %v1004_v23, %v16171_v63  ;;  %v1015_v39 = vcombine.high %v1011_v31, %v16171_v63  ;;  %v780_v36 = vmul.f32 0.5, %v776_v46 }
 0x19b   :  { %1025 = vrot.lane.b32.xlu0 %v945_v47, %s11133_s26  ;;  %v774_v41 = vmul.f32 0.5, %v770_v56  ;;  %v1127_v47 = vrot.slane %v775_v15, %v11170_v2  ;;  %v783_v49 = vmul.f32 0.5, %v16172_v17 }
 0x19c   :  { %v1138_v9 = vrot.slane %v780_v36, %v11170_v2 }
 0x19d   :  { %1037 = vrot.lane.b32.xlu1 %v943_v51, %s11126_s20  ;;  %v1116_v42 = vrot.slane %v774_v41, %v11170_v2  ;;  %v777_v51 = vsub.f32 %v741_v21, %v749_v22  ;;  %v1171_v26 = vrot.slane %v783_v49, %v11170_v2 }
 0x19f   :  { %1033 = vrot.lane.b32.xlu0 %v946_v54, %s11134_s27  ;;  %v781_v48 = vmul.f32 0.5, %v777_v51  ;;  %v778_v54 = vsub.f32 %v742_v27, %v750_v30 }
 0x1a1   :  { %1045 = vrot.lane.b32.xlu1 %v988_v37, %s11127_s21  ;;  %v1149_v6 = vrot.slane %v781_v48, %v11170_v2  ;;  %v782_v37 = vmul.f32 0.5, %v778_v54 }
 0x1a3   :  { %1041 = vrot.lane.b32.xlu0 %v947_v4, %s11135_s28  ;;  %v1160_v3 = vrot.slane %v782_v37, %v11170_v2 }
 0x1a5   :  { %1053 = vrot.lane.b32.xlu1 %v995_v11, %s11128_s22 }
 0x1a7   :  { %1049 = vrot.lane.b32.xlu0 %v1012_v1, %s11136_s29 }
 0x1a9   :  { %1061 = vrot.lane.b32.xlu1 %v1004_v23, %s11129_s23 }
 0x1ab   :  { %1057 = vrot.lane.b32.xlu0 %v1013_v43, %s11137_s30 }
 0x1ad   :  { %1069 = vrot.lane.b32.xlu1 %v1011_v31, %s11130_s24 }
 0x1af   :  { %1065 = vrot.lane.b32.xlu0 %v1014_v32, %s11138_s2 }
 0x1b1   :  { %1096 = vbcast.lane.b32.xlu1 %v1094_v33, 256 }
 0x1b3   :  { %1073 = vrot.lane.b32.xlu0 %v1015_v39, %s11139_s3 }
 0x1b5   :  { %1107 = vbcast.lane.b32.xlu1 %v1105_v40, 256 }
 0x1b7   :  { %1100 = vbcast.lane.b32.xlu0 %v1094_v33, 264 }
 0x1b9   :  { %1118 = vbcast.lane.b32.xlu1 %v1116_v42, 256 }
 0x1bb   :  { %1111 = vbcast.lane.b32.xlu0 %v1105_v40, 264 }
 0x1bd   :  { %1129 = vbcast.lane.b32.xlu1 %v1127_v47, 256 }
 0x1bf   :  { %1122 = vbcast.lane.b32.xlu0 %v1116_v42, 264 }
 0x1c1   :  { %1140 = vbcast.lane.b32.xlu1 %v1138_v9, 256 }
 0x1c3   :  { %1133 = vbcast.lane.b32.xlu0 %v1127_v47, 264 }
 0x1c5   :  { %1151 = vbcast.lane.b32.xlu1 %v1149_v6, 256 }
 0x1c7   :  { %1144 = vbcast.lane.b32.xlu0 %v1138_v9, 264 }
 0x1c9   :  { %1162 = vbcast.lane.b32.xlu1 %v1160_v3, 256 }
 0x1cb   :  { %1155 = vbcast.lane.b32.xlu0 %v1149_v6, 264 }
 0x1cd   :  { %1173 = vbcast.lane.b32.xlu1 %v1171_v26, 256 }
 0x1cf   :  { %1166 = vbcast.lane.b32.xlu0 %v1160_v3, 264 }
 0x1d3   :  { %1177 = vbcast.lane.b32.xlu0 %v1171_v26, 264 }
 0x207   :  { %v11584_v58 = vpop.permute.xlu1 %1021 }
 0x208   :  { %16173 = vst [vmem:[#allocation31_spill] sm:$0xff] %v11584_v58 }
 0x209   :  { %v11586_v4 = vpop.permute.xlu0 %1017 }
 0x20a   :  { %16174 = vst [vmem:[#allocation32_spill] sm:$0xff] %v11586_v4 }
 0x20b   :  { %v11588_v11 = vpop.permute.xlu1 %1029 }
 0x20c   :  { %16175 = vst [vmem:[#allocation33_spill] sm:$0xff] %v11588_v11 }
 0x20d   :  { %v11590_v8 = vpop.permute.xlu0 %1025 }
 0x20e   :  { %16176 = vst [vmem:[#allocation34_spill] sm:$0xff] %v11590_v8 }
 0x20f   :  { %v11592_v14 = vpop.permute.xlu1 %1037 }
 0x210   :  { %16177 = vst [vmem:[#allocation35_spill] sm:$0xff] %v11592_v14 }
 0x211   :  { %v11594_v59 = vpop.permute.xlu0 %1033 }
 0x212   :  { %16178 = vst [vmem:[#allocation36_spill] sm:$0xff] %v11594_v59 }
 0x213   :  { %v11596_v60 = vpop.permute.xlu1 %1045 }
 0x214   :  { %16179 = vst [vmem:[#allocation37_spill] sm:$0xff] %v11596_v60 }
 0x215   :  { %v11598_v1 = vpop.permute.xlu0 %1041 }
 0x216   :  { %16180 = vst [vmem:[#allocation38_spill] sm:$0xff] %v11598_v1 }
 0x217   :  { %v11600_v21 = vpop.permute.xlu1 %1053 }
 0x218   :  { %16181 = vst [vmem:[#allocation39_spill] sm:$0xff] %v11600_v21 }
 0x219   :  { %v11602_v22 = vpop.permute.xlu0 %1049 }
 0x21a   :  { %16182 = vst [vmem:[#allocation40_spill] sm:$0xff] %v11602_v22 }
 0x21b   :  { %v11604_v23 = vpop.permute.xlu1 %1061 }
 0x21c   :  { %16183 = vst [vmem:[#allocation41_spill] sm:$0xff] %v11604_v23  ;;  %v11695_v23 = vld [vmem:[#allocation2 + $0xd2] sm:$0x1] }
 0x21d   :  { %v11606_v24 = vpop.permute.xlu0 %1057 }
 0x21e   :  { %16184 = vst [vmem:[#allocation42_spill] sm:$0xff] %v11606_v24 }
 0x21f   :  { %v11608_v0 = vpop.permute.xlu1 %1069 }
 0x220   :  { %16185 = vst [vmem:[#allocation43_spill] sm:$0xff] %v11608_v0 }
 0x221   :  { %v11610_v43 = vpop.permute.xlu0 %1065 }
 0x222   :  { %16186 = vst [vmem:[#allocation44_spill] sm:$0xff] %v11610_v43  ;;  %v11693_v43 = vld [vmem:[#allocation2 + $0xc2] sm:$0x1] }
 0x223   :  { %v1097_v57 = vpop.permute.xlu1 %1096  ;;  %v1417_v21 = vadd.f32 %v11695_v23, %v11693_v43 }
 0x225   :  { %v11612_v27 = vpop.permute.xlu0 %1073 }
 0x226   :  { %16187 = vst [vmem:[#allocation45_spill] sm:$0xff] %v11612_v27 }
 0x227   :  { %v1108_v30 = vpop.permute.xlu1 %1107 }
 0x229   :  { %v1101_v31 = vpop.permute.xlu0 %1100 }
 0x22b   :  { %v1119_v32 = vpop.permute.xlu1 %1118 }
 0x22d   :  { %v1112_v33 = vpop.permute.xlu0 %1111 }
 0x22f   :  { %v1130_v10 = vpop.permute.xlu1 %1129 }
 0x231   :  { %v1123_v56 = vpop.permute.xlu0 %1122 }
 0x233   :  { %v1141_v39 = vpop.permute.xlu1 %1140 }
 0x234   :  { %v1179_v36 = vsel %vm178_vm0, %v1097_v57, %v1141_v39 }
 0x235   :  { %v1134_v40 = vpop.permute.xlu0 %1133 }
 0x237   :  { %v1152_v41 = vpop.permute.xlu1 %1151 }
 0x238   :  { %v1181_v48 = vsel %vm178_vm0, %v1108_v30, %v1152_v41 }
 0x239   :  { %v1145_v42 = vpop.permute.xlu0 %1144 }
 0x23b   :  { %v1163_v15 = vpop.permute.xlu1 %1162 }
 0x23c   :  { %v1183_v46 = vsel %vm178_vm0, %v1119_v32, %v1163_v15 }
 0x23d   :  { %v1156_v47 = vpop.permute.xlu0 %1155  ;;  %v1187_v51 = vcombine.low %v1179_v36, %v1183_v46  ;;  %v1188_v6 = vcombine.high %v1179_v36, %v1183_v46 }
 0x23e   :  { %v1182_v25 = vsel %vm178_vm0, %v1112_v33, %v1156_v47 }
 0x23f   :  { %v1174_v9 = vpop.permute.xlu1 %1173  ;;  %v1195_v49 = vrot.slane %v1187_v51, %v11278_v28  ;;  %v1202_v32 = vrot.slane %v1188_v6, %v11278_v28 }
 0x240   :  { %v1185_v54 = vsel %vm178_vm0, %v1130_v10, %v1174_v9  ;;  %v1180_v9 = vsel %vm178_vm0, %v1101_v31, %v1145_v42 }
 0x241   :  { %v1203_v37 = vcombine.low %v1181_v48, %v1185_v54  ;;  %v1204_v3 = vcombine.high %v1181_v48, %v1185_v54  ;;  %v1167_v17 = vpop.permute.xlu0 %1166 }
 0x242   :  { %v1184_v30 = vsel %vm178_vm0, %v1123_v56, %v1167_v17 }
 0x243   :  { %v1211_v26 = vrot.slane %v1203_v37, %v11278_v28  ;;  %v1218_v61 = vrot.slane %v1204_v3, %v11278_v28  ;;  %v1255_v48 = vcombine.low %v1180_v9, %v1184_v30  ;;  %v11641_v3 = vld [vmem:[#allocation2 + $0x2] sm:$0x1] }
 0x245   :  { %v1219_v15 = vcombine.low %v1195_v49, %v1211_v26  ;;  %v1220_v57 = vcombine.high %v1195_v49, %v1211_v26  ;;  %v1178_v39 = vpop.permute.xlu0 %1177  ;;  %v1235_v51 = vcombine.low %v1202_v32, %v1218_v61  ;;  %v1236_v33 = vcombine.high %v1202_v32, %v1218_v61  ;;  %v11645_v49 = vld [vmem:[#allocation2 + $0x12] sm:$0x1]  ;;  %v11647_v26 = vld [vmem:[#allocation2 + $0x22] sm:$0x1] }
 0x246   :  { %v1186_v10 = vsel %vm178_vm0, %v1134_v40, %v1178_v39  ;;  %v1263_v47 = vrot.slane %v1255_v48, %v11278_v28  ;;  %v1256_v61 = vcombine.high %v1180_v9, %v1184_v30  ;;  %v11649_v32 = vld [vmem:[#allocation2 + $0x32] sm:$0x1]  ;;  %v1414_v39 = vadd.f32 %v11645_v49, %v11641_v3  ;;  %v11665_v9 = vld [vmem:[#allocation2 + $0x62] sm:$0x1] }
 0x247   :  { %v11626_v41 = vrot.slane %v1219_v15, %v11292_v52  ;;  %v1271_v46 = vcombine.low %v1182_v25, %v1186_v10  ;;  %v1234_v36 = vrot.slane %v1220_v57, %v11292_v52  ;;  %v1243_v40 = vrot.slane %v1235_v51, %v11292_v52  ;;  %v11663_v51 = vld [vmem:[#allocation2 + $0x52] sm:$0x1] }
 0x248   :  { %v1272_v31 = vcombine.high %v1182_v25, %v1186_v10  ;;  %v1250_v37 = vrot.slane %v1236_v33, %v11292_v52  ;;  %v1422_v30 = vadd.f32 %v11649_v32, %v11647_v26  ;;  %v11658_v10 = vld [vmem:[#allocation2 + $0x42] sm:$0x1]  ;;  %v11667_v48 = vld [vmem:[#allocation2 + $0x72] sm:$0x1] }
 0x249   :  { %16188 = vst [vmem:[#allocation46_spill] sm:$0xff] %v11626_v41  ;;  %1328 = vrot.lane.b32.xlu0 %v1234_v36, %s11125_s0  ;;  %v1251_v54 = vcombine.high %v11626_v41, %v16171_v63  ;;  %v1279_v56 = vrot.slane %v1271_v46, %v11278_v28  ;;  %v1252_v6 = vcombine.high %v1234_v36, %v16171_v63 }
 0x24a   :  { %v1253_v17 = vcombine.high %v1243_v40, %v16171_v63  ;;  %v1286_v25 = vrot.slane %v1272_v31, %v11278_v28  ;;  %v1270_v46 = vrot.slane %v1256_v61, %v11278_v28  ;;  %v1254_v36 = vcombine.high %v1250_v37, %v16171_v63  ;;  %v11677_v31 = vld [vmem:[#allocation2 + $0x82] sm:$0x1]  ;;  %v11683_v61 = vld [vmem:[#allocation2 + $0xb2] sm:$0x1] }
 0x24b   :  { %1324 = vrot.lane.b32.xlu1 %v1251_v54, %s11132_s25  ;;  %v1287_v42 = vcombine.low %v1263_v47, %v1279_v56  ;;  %v1288_v15 = vcombine.high %v1263_v47, %v1279_v56  ;;  %v1430_v56 = vadd.f32 %v1422_v30, %v1414_v39  ;;  %v1423_v47 = vadd.f32 %v11667_v48, %v11665_v9 }
 0x24c   :  { %v1303_v54 = vcombine.low %v1270_v46, %v1286_v25  ;;  %v1438_v60 = vsub.f32 %v1414_v39, %v1422_v30 }
 0x24d   :  { %1336 = vrot.lane.b32.xlu0 %v1243_v40, %s11122_s17  ;;  %v1295_v57 = vrot.slane %v1287_v42, %v11292_v52  ;;  %v1302_v33 = vrot.slane %v1288_v15, %v11292_v52  ;;  %v1415_v40 = vadd.f32 %v11663_v51, %v11658_v10  ;;  %v11679_v42 = vld [vmem:[#allocation2 + $0x92] sm:$0x1] }
 0x24e   :  { %v1311_v15 = vrot.slane %v1303_v54, %v11292_v52  ;;  %v1442_v14 = vmul.f32 0.5, %v1438_v60 }
 0x24f   :  { %1332 = vrot.lane.b32.xlu1 %v1252_v6, %s11133_s26  ;;  %v1319_v6 = vcombine.high %v1295_v57, %v16171_v63  ;;  %v1431_v45 = vadd.f32 %v1423_v47, %v1415_v40  ;;  %v1320_v27 = vcombine.high %v1302_v33, %v16171_v63 }
 0x251   :  { %1344 = vrot.lane.b32.xlu0 %v1250_v37, %s11126_s20  ;;  %v11681_v37 = vld [vmem:[#allocation2 + $0xa2] sm:$0x1] }
 0x252   :  { %v1424_v0 = vadd.f32 %v11683_v61, %v11681_v37 }
 0x253   :  { %1340 = vrot.lane.b32.xlu1 %v1253_v17, %s11134_s27  ;;  %v1304_v17 = vcombine.high %v1270_v46, %v1286_v25  ;;  %v11697_v25 = vld [vmem:[#allocation2 + $0xe2] sm:$0x1]  ;;  %v11699_v46 = vld [vmem:[#allocation2 + $0xf2] sm:$0x1] }
 0x254   :  { %v1425_v41 = vadd.f32 %v11699_v46, %v11697_v25 }
 0x255   :  { %1352 = vrot.lane.b32.xlu0 %v1295_v57, %s11127_s21  ;;  %v1416_v57 = vadd.f32 %v11679_v42, %v11677_v31  ;;  %v1318_v54 = vrot.slane %v1304_v17, %v11292_v52 }
 0x257   :  { %1348 = vrot.lane.b32.xlu1 %v1254_v36, %s11135_s28  ;;  %v1434_v36 = vmul.f32 0.5, %v1430_v56  ;;  %v1435_v56 = vmul.f32 0.5, %v1431_v45  ;;  %v1432_v24 = vadd.f32 %v1424_v0, %v1416_v57  ;;  %v1433_v45 = vadd.f32 %v1425_v41, %v1417_v21 }
 0x259   :  { %1360 = vrot.lane.b32.xlu0 %v1302_v33, %s11128_s22  ;;  %v1465_v33 = vrot.slane %v1434_v36, %v11170_v2  ;;  %v1476_v17 = vrot.slane %v1435_v56, %v11170_v2  ;;  %v1436_v36 = vmul.f32 0.5, %v1432_v24  ;;  %v1437_v22 = vmul.f32 0.5, %v1433_v45 }
 0x25a   :  { %v1440_v24 = vsub.f32 %v1416_v57, %v1424_v0 }
 0x25b   :  { %1356 = vrot.lane.b32.xlu1 %v1319_v6, %s11136_s29  ;;  %v1321_v6 = vcombine.high %v1311_v15, %v16171_v63  ;;  %v1498_v1 = vrot.slane %v1437_v22, %v11170_v2 }
 0x25c   :  { %v1444_v59 = vmul.f32 0.5, %v1440_v24 }
 0x25d   :  { %1368 = vrot.lane.b32.xlu0 %v1311_v15, %s11129_s23  ;;  %v1487_v15 = vrot.slane %v1436_v36, %v11170_v2  ;;  %v1441_v36 = vsub.f32 %v1417_v21, %v1425_v41 }
 0x25e   :  { %v1531_v39 = vrot.slane %v1444_v59, %v11170_v2 }
 0x25f   :  { %1364 = vrot.lane.b32.xlu1 %v1320_v27, %s11137_s30  ;;  %v1322_v27 = vcombine.high %v1318_v54, %v16171_v63  ;;  %v1445_v30 = vmul.f32 0.5, %v1441_v36 }
 0x261   :  { %1376 = vrot.lane.b32.xlu0 %v1318_v54, %s11130_s24  ;;  %v1509_v54 = vrot.slane %v1442_v14, %v11170_v2  ;;  %v1542_v60 = vrot.slane %v1445_v30, %v11170_v2 }
 0x263   :  { %1372 = vrot.lane.b32.xlu1 %v1321_v6, %s11138_s2  ;;  %v1439_v6 = vsub.f32 %v1415_v40, %v1423_v47 }
 0x265   :  { %1467 = vbcast.lane.b32.xlu0 %v1465_v33, 256  ;;  %v1443_v56 = vmul.f32 0.5, %v1439_v6 }
 0x267   :  { %1380 = vrot.lane.b32.xlu1 %v1322_v27, %s11139_s3  ;;  %v1520_v27 = vrot.slane %v1443_v56, %v11170_v2 }
 0x269   :  { %1478 = vbcast.lane.b32.xlu0 %v1476_v17, 256 }
 0x26b   :  { %1471 = vbcast.lane.b32.xlu1 %v1465_v33, 264 }
 0x26d   :  { %1489 = vbcast.lane.b32.xlu0 %v1487_v15, 256 }
 0x26f   :  { %1482 = vbcast.lane.b32.xlu1 %v1476_v17, 264 }
 0x271   :  { %1500 = vbcast.lane.b32.xlu0 %v1498_v1, 256 }
 0x273   :  { %1493 = vbcast.lane.b32.xlu1 %v1487_v15, 264 }
 0x275   :  { %1511 = vbcast.lane.b32.xlu0 %v1509_v54, 256 }
 0x277   :  { %1504 = vbcast.lane.b32.xlu1 %v1498_v1, 264 }
 0x279   :  { %1522 = vbcast.lane.b32.xlu0 %v1520_v27, 256 }
 0x27b   :  { %1515 = vbcast.lane.b32.xlu1 %v1509_v54, 264 }
 0x27d   :  { %1533 = vbcast.lane.b32.xlu0 %v1531_v39, 256 }
 0x27f   :  { %1526 = vbcast.lane.b32.xlu1 %v1520_v27, 264 }
 0x281   :  { %1544 = vbcast.lane.b32.xlu0 %v1542_v60, 256 }
 0x283   :  { %1537 = vbcast.lane.b32.xlu1 %v1531_v39, 264 }
 0x287   :  { %1548 = vbcast.lane.b32.xlu1 %v1542_v60, 264 }
 0x2bb   :  { %v11720_v14 = vpop.permute.xlu0 %1328 }
 0x2bc   :  { %16189 = vst [vmem:[#allocation47_spill] sm:$0xff] %v11720_v14 }
 0x2bd   :  { %v11722_v22 = vpop.permute.xlu1 %1324 }
 0x2be   :  { %16190 = vst [vmem:[#allocation48_spill] sm:$0xff] %v11722_v22 }
 0x2bf   :  { %v11724_v0 = vpop.permute.xlu0 %1336 }
 0x2c0   :  { %16191 = vst [vmem:[#allocation49_spill] sm:$0xff] %v11724_v0 }
 0x2c1   :  { %v11726_v21 = vpop.permute.xlu1 %1332 }
 0x2c2   :  { %16192 = vst [vmem:[#allocation50_spill] sm:$0xff] %v11726_v21 }
 0x2c3   :  { %v11728_v1 = vpop.permute.xlu0 %1344 }
 0x2c4   :  { %16193 = vst [vmem:[#allocation51_spill] sm:$0xff] %v11728_v1 }
 0x2c5   :  { %v11730_v59 = vpop.permute.xlu1 %1340 }
 0x2c6   :  { %16194 = vst [vmem:[#allocation52_spill] sm:$0xff] %v11730_v59 }
 0x2c7   :  { %v11732_v41 = vpop.permute.xlu0 %1352 }
 0x2c8   :  { %16195 = vst [vmem:[#allocation53_spill] sm:$0xff] %v11732_v41 }
 0x2c9   :  { %v11734_v40 = vpop.permute.xlu1 %1348 }
 0x2ca   :  { %16196 = vst [vmem:[#allocation54_spill] sm:$0xff] %v11734_v40 }
 0x2cb   :  { %v11736_v47 = vpop.permute.xlu0 %1360 }
 0x2cc   :  { %16197 = vst [vmem:[#allocation55_spill] sm:$0xff] %v11736_v47 }
 0x2cd   :  { %v11738_v57 = vpop.permute.xlu1 %1356 }
 0x2ce   :  { %16198 = vst [vmem:[#allocation56_spill] sm:$0xff] %v11738_v57 }
 0x2cf   :  { %v11740_v33 = vpop.permute.xlu0 %1368 }
 0x2d0   :  { %16199 = vst [vmem:[#allocation57_spill] sm:$0xff] %v11740_v33 }
 0x2d1   :  { %v11742_v17 = vpop.permute.xlu1 %1364 }
 0x2d2   :  { %16200 = vst [vmem:[#allocation58_spill] sm:$0xff] %v11742_v17 }
 0x2d3   :  { %v11744_v45 = vpop.permute.xlu0 %1376 }
 0x2d4   :  { %16201 = vst [vmem:[#allocation59_spill] sm:$0xff] %v11744_v45 }
 0x2d5   :  { %v11746_v15 = vpop.permute.xlu1 %1372 }
 0x2d6   :  { %16202 = vst [vmem:[#allocation60_spill] sm:$0xff] %v11746_v15 }
 0x2d7   :  { %v1468_v6 = vpop.permute.xlu0 %1467 }
 0x2d9   :  { %v11748_v54 = vpop.permute.xlu1 %1380 }
 0x2da   :  { %16203 = vst [vmem:[#allocation61_spill] sm:$0xff] %v11748_v54 }
 0x2db   :  { %v1479_v56 = vpop.permute.xlu0 %1478 }
 0x2dd   :  { %v1472_v24 = vpop.permute.xlu1 %1471 }
 0x2df   :  { %v1490_v27 = vpop.permute.xlu0 %1489 }
 0x2e1   :  { %v1483_v36 = vpop.permute.xlu1 %1482 }
 0x2e3   :  { %v1501_v39 = vpop.permute.xlu0 %1500 }
 0x2e5   :  { %v1494_v30 = vpop.permute.xlu1 %1493 }
 0x2e7   :  { %v1512_v60 = vpop.permute.xlu0 %1511 }
 0x2e8   :  { %v1550_v45 = vsel %vm178_vm0, %v1468_v6, %v1512_v60 }
 0x2e9   :  { %v1505_v47 = vpop.permute.xlu1 %1504 }
 0x2eb   :  { %v1523_v57 = vpop.permute.xlu0 %1522 }
 0x2ec   :  { %v1552_v54 = vsel %vm178_vm0, %v1479_v56, %v1523_v57 }
 0x2ed   :  { %v1516_v41 = vpop.permute.xlu1 %1515 }
 0x2ef   :  { %v1534_v33 = vpop.permute.xlu0 %1533 }
 0x2f0   :  { %v1554_v17 = vsel %vm178_vm0, %v1490_v27, %v1534_v33 }
 0x2f1   :  { %v1527_v40 = vpop.permute.xlu1 %1526  ;;  %v1558_v15 = vcombine.low %v1550_v45, %v1554_v17  ;;  %v1559_v0 = vcombine.high %v1550_v45, %v1554_v17 }
 0x2f2   :  { %v1553_v58 = vsel %vm178_vm0, %v1483_v36, %v1527_v40 }
 0x2f3   :  { %v1545_v1 = vpop.permute.xlu0 %1544  ;;  %v1566_v11 = vrot.slane %v1558_v15, %v11278_v28  ;;  %v1573_v33 = vrot.slane %v1559_v0, %v11278_v28 }
 0x2f4   :  { %v1556_v59 = vsel %vm178_vm0, %v1501_v39, %v1545_v1 }
 0x2f5   :  { %v1574_v21 = vcombine.low %v1552_v54, %v1556_v59  ;;  %v1575_v14 = vcombine.high %v1552_v54, %v1556_v59  ;;  %v1538_v22 = vpop.permute.xlu1 %1537 }
 0x2f6   :  { %v1555_v57 = vsel %vm178_vm0, %v1494_v30, %v1538_v22 }
 0x2f7   :  { %v1582_v12 = vrot.slane %v1574_v21, %v11278_v28  ;;  %v1589_v8 = vrot.slane %v1575_v14, %v11278_v28  ;;  %v1551_v14 = vsel %vm178_vm0, %v1472_v24, %v1516_v41 }
 0x2f8   :  { %v1626_v15 = vcombine.low %v1551_v14, %v1555_v57  ;;  %v1627_v24 = vcombine.high %v1551_v14, %v1555_v57 }
 0x2f9   :  { %v1590_v27 = vcombine.low %v1566_v11, %v1582_v12  ;;  %v1591_v6 = vcombine.high %v1566_v11, %v1582_v12  ;;  %v1549_v60 = vpop.permute.xlu1 %1548  ;;  %v1606_v21 = vcombine.low %v1573_v33, %v1589_v8  ;;  %v1607_v11 = vcombine.high %v1573_v33, %v1589_v8 }
 0x2fa   :  { %v1557_v1 = vsel %vm178_vm0, %v1505_v47, %v1549_v60  ;;  %v1634_v40 = vrot.slane %v1626_v15, %v11278_v28  ;;  %v1426_v33 = vsub.f32 %v11647_v26, %v11649_v32 }
 0x2fb   :  { %v11762_v59 = vrot.slane %v1590_v27, %v11292_v52  ;;  %v1642_v17 = vcombine.low %v1553_v58, %v1557_v1  ;;  %v1605_v45 = vrot.slane %v1591_v6, %v11292_v52  ;;  %v1614_v0 = vrot.slane %v1606_v21, %v11292_v52 }
 0x2fc   :  { %v1643_v41 = vcombine.high %v1553_v58, %v1557_v1  ;;  %v1621_v56 = vrot.slane %v1607_v11, %v11292_v52  ;;  %v1418_v58 = vsub.f32 %v11641_v3, %v11645_v49  ;;  %v1641_v27 = vrot.slane %v1627_v24, %v11278_v28 }
 0x2fd   :  { %16204 = vst [vmem:[#allocation62_spill] sm:$0xff] %v11762_v59  ;;  %1699 = vrot.lane.b32.xlu1 %v1605_v45, %s11125_s0  ;;  %v1622_v12 = vcombine.high %v11762_v59, %v16171_v63  ;;  %v1650_v22 = vrot.slane %v1642_v17, %v11278_v28  ;;  %v1623_v47 = vcombine.high %v1605_v45, %v16171_v63 }
 0x2fe   :  { %v1624_v8 = vcombine.high %v1614_v0, %v16171_v63  ;;  %v1657_v36 = vrot.slane %v1643_v41, %v11278_v28  ;;  %v1625_v6 = vcombine.high %v1621_v56, %v16171_v63  ;;  %v1446_v1 = vadd.f32 %v1426_v33, %v1418_v58 }
 0x2ff   :  { %1695 = vrot.lane.b32.xlu0 %v1622_v12, %s11132_s25  ;;  %v1658_v54 = vcombine.low %v1634_v40, %v1650_v22  ;;  %v1659_v39 = vcombine.high %v1634_v40, %v1650_v22  ;;  %v1419_v17 = vsub.f32 %v11658_v10, %v11663_v51  ;;  %v1427_v3 = vsub.f32 %v11665_v9, %v11667_v48 }
 0x300   :  { %v1674_v60 = vcombine.low %v1641_v27, %v1657_v36  ;;  %v1675_v26 = vcombine.high %v1641_v27, %v1657_v36  ;;  %v1450_v45 = vmul.f32 0.5, %v1446_v1  ;;  %v1420_v10 = vsub.f32 %v11677_v31, %v11679_v42 }
 0x301   :  { %1707 = vrot.lane.b32.xlu1 %v1614_v0, %s11122_s17  ;;  %v1666_v30 = vrot.slane %v1658_v54, %v11292_v52  ;;  %v1673_v57 = vrot.slane %v1659_v39, %v11292_v52  ;;  %v1447_v21 = vadd.f32 %v1427_v3, %v1419_v17  ;;  %v1428_v51 = vsub.f32 %v11681_v37, %v11683_v61 }
 0x302   :  { %v1682_v32 = vrot.slane %v1674_v60, %v11292_v52  ;;  %v1689_v9 = vrot.slane %v1675_v26, %v11292_v52  ;;  %v1772_v48 = vrot.slane %v1450_v45, %v11170_v2  ;;  %v1421_v22 = vsub.f32 %v11693_v43, %v11695_v23 }
 0x303   :  { %1703 = vrot.lane.b32.xlu0 %v1623_v47, %s11133_s26  ;;  %v1690_v49 = vcombine.high %v1666_v30, %v16171_v63  ;;  %v1691_v14 = vcombine.high %v1673_v57, %v16171_v63  ;;  %v1451_v15 = vmul.f32 0.5, %v1447_v21  ;;  %v1448_v11 = vadd.f32 %v1428_v51, %v1420_v10 }
 0x304   :  { %v1692_v12 = vcombine.high %v1682_v32, %v16171_v63  ;;  %v1429_v31 = vsub.f32 %v11697_v25, %v11699_v46  ;;  %v1693_v42 = vcombine.high %v1689_v9, %v16171_v63  ;;  %v1454_v41 = vsub.f32 %v1418_v58, %v1426_v33 }
 0x305   :  { %1715 = vrot.lane.b32.xlu1 %v1621_v56, %s11126_s20  ;;  %v1783_v37 = vrot.slane %v1451_v15, %v11170_v2  ;;  %v1452_v61 = vmul.f32 0.5, %v1448_v11  ;;  %v1455_v25 = vsub.f32 %v1419_v17, %v1427_v3  ;;  %v1456_v56 = vsub.f32 %v1420_v10, %v1428_v51 }
 0x306   :  { %v1449_v0 = vadd.f32 %v1429_v31, %v1421_v22  ;;  %v1458_v43 = vmul.f32 0.5, %v1454_v41  ;;  %v1457_v36 = vsub.f32 %v1421_v22, %v1429_v31 }
 0x307   :  { %1711 = vrot.lane.b32.xlu0 %v1624_v8, %s11134_s27  ;;  %v1794_v40 = vrot.slane %v1452_v61, %v11170_v2  ;;  %v1459_v54 = vmul.f32 0.5, %v1455_v25  ;;  %v1460_v8 = vmul.f32 0.5, %v1456_v56 }
 0x308   :  { %v1453_v47 = vmul.f32 0.5, %v1449_v0  ;;  %v1816_v46 = vrot.slane %v1458_v43, %v11170_v2 }
 0x309   :  { %1723 = vrot.lane.b32.xlu1 %v1666_v30, %s11127_s21  ;;  %v1827_v24 = vrot.slane %v1459_v54, %v11170_v2  ;;  %v1838_v39 = vrot.slane %v1460_v8, %v11170_v2  ;;  %v1461_v30 = vmul.f32 0.5, %v1457_v36 }
 0x30a   :  { %v1805_v23 = vrot.slane %v1453_v47, %v11170_v2 }
 0x30b   :  { %1719 = vrot.lane.b32.xlu0 %v1625_v6, %s11135_s28  ;;  %v1849_v58 = vrot.slane %v1461_v30, %v11170_v2 }
 0x30d   :  { %1731 = vrot.lane.b32.xlu1 %v1673_v57, %s11128_s22 }
 0x30f   :  { %1727 = vrot.lane.b32.xlu0 %v1690_v49, %s11136_s29 }
 0x311   :  { %1739 = vrot.lane.b32.xlu1 %v1682_v32, %s11129_s23 }
 0x313   :  { %1735 = vrot.lane.b32.xlu0 %v1691_v14, %s11137_s30 }
 0x315   :  { %1747 = vrot.lane.b32.xlu1 %v1689_v9, %s11130_s24 }
 0x317   :  { %1743 = vrot.lane.b32.xlu0 %v1692_v12, %s11138_s2 }
 0x319   :  { %1774 = vbcast.lane.b32.xlu1 %v1772_v48, 256 }
 0x31b   :  { %1751 = vrot.lane.b32.xlu0 %v1693_v42, %s11139_s3 }
 0x31d   :  { %1785 = vbcast.lane.b32.xlu1 %v1783_v37, 256 }
 0x31f   :  { %1778 = vbcast.lane.b32.xlu0 %v1772_v48, 264 }
 0x321   :  { %1796 = vbcast.lane.b32.xlu1 %v1794_v40, 256 }
 0x323   :  { %1789 = vbcast.lane.b32.xlu0 %v1783_v37, 264 }
 0x325   :  { %1807 = vbcast.lane.b32.xlu1 %v1805_v23, 256 }
 0x327   :  { %1800 = vbcast.lane.b32.xlu0 %v1794_v40, 264 }
 0x329   :  { %1818 = vbcast.lane.b32.xlu1 %v1816_v46, 256 }
 0x32b   :  { %1811 = vbcast.lane.b32.xlu0 %v1805_v23, 264 }
 0x32d   :  { %1829 = vbcast.lane.b32.xlu1 %v1827_v24, 256 }
 0x32f   :  { %1822 = vbcast.lane.b32.xlu0 %v1816_v46, 264 }
 0x331   :  { %1840 = vbcast.lane.b32.xlu1 %v1838_v39, 256 }
 0x333   :  { %1833 = vbcast.lane.b32.xlu0 %v1827_v24, 264 }
 0x335   :  { %1851 = vbcast.lane.b32.xlu1 %v1849_v58, 256 }
 0x337   :  { %1844 = vbcast.lane.b32.xlu0 %v1838_v39, 264 }
 0x33b   :  { %1855 = vbcast.lane.b32.xlu0 %v1849_v58, 264 }
 0x36f   :  { %v11824_v33 = vpop.permute.xlu1 %1699 }
 0x370   :  { %16205 = vst [vmem:[#allocation63_spill] sm:$0xff] %v11824_v33 }
 0x371   :  { %v11826_v27 = vpop.permute.xlu0 %1695 }
 0x372   :  { %16206 = vst [vmem:[#allocation64_spill] sm:$0xff] %v11826_v27 }
 0x373   :  { %v11828_v6 = vpop.permute.xlu1 %1707 }
 0x374   :  { %16207 = vst [vmem:[#allocation65_spill] sm:$0xff] %v11828_v6 }
 0x375   :  { %v11830_v60 = vpop.permute.xlu0 %1703 }
 0x376   :  { %16208 = vst [vmem:[#allocation66_spill] sm:$0xff] %v11830_v60 }
 0x377   :  { %v11832_v57 = vpop.permute.xlu1 %1715 }
 0x378   :  { %16209 = vst [vmem:[#allocation67_spill] sm:$0xff] %v11832_v57 }
 0x379   :  { %v11834_v1 = vpop.permute.xlu0 %1711 }
 0x37a   :  { %16210 = vst [vmem:[#allocation68_spill] sm:$0xff] %v11834_v1 }
 0x37b   :  { %v11836_v17 = vpop.permute.xlu1 %1723 }
 0x37c   :  { %16211 = vst [vmem:[#allocation69_spill] sm:$0xff] %v11836_v17 }
 0x37d   :  { %v11838_v3 = vpop.permute.xlu0 %1719 }
 0x37e   :  { %16212 = vst [vmem:[#allocation70_spill] sm:$0xff] %v11838_v3 }
 0x37f   :  { %v11840_v49 = vpop.permute.xlu1 %1731 }
 0x380   :  { %16213 = vst [vmem:[#allocation71_spill] sm:$0xff] %v11840_v49 }
 0x381   :  { %v11842_v26 = vpop.permute.xlu0 %1727 }
 0x382   :  { %16214 = vst [vmem:[#allocation72_spill] sm:$0xff] %v11842_v26 }
 0x383   :  { %v11844_v32 = vpop.permute.xlu1 %1739 }
 0x384   :  { %16215 = vst [vmem:[#allocation73_spill] sm:$0xff] %v11844_v32  ;;  %v11933_v32 = vld [vmem:[#allocation2 + $0xc3] sm:$0x1] }
 0x385   :  { %v11846_v45 = vpop.permute.xlu0 %1735 }
 0x386   :  { %16216 = vst [vmem:[#allocation74_spill] sm:$0xff] %v11846_v45  ;;  %v11935_v45 = vld [vmem:[#allocation2 + $0xd3] sm:$0x1] }
 0x387   :  { %v11848_v21 = vpop.permute.xlu1 %1747  ;;  %v2095_v26 = vadd.f32 %v11935_v45, %v11933_v32 }
 0x388   :  { %16217 = vst [vmem:[#allocation75_spill] sm:$0xff] %v11848_v21 }
 0x389   :  { %v11850_v14 = vpop.permute.xlu0 %1743 }
 0x38a   :  { %16218 = vst [vmem:[#allocation76_spill] sm:$0xff] %v11850_v14 }
 0x38b   :  { %v1775_v10 = vpop.permute.xlu1 %1774 }
 0x38d   :  { %v11852_v51 = vpop.permute.xlu0 %1751 }
 0x38e   :  { %16219 = vst [vmem:[#allocation77_spill] sm:$0xff] %v11852_v51 }
 0x38f   :  { %v1786_v9 = vpop.permute.xlu1 %1785 }
 0x391   :  { %v1779_v48 = vpop.permute.xlu0 %1778 }
 0x393   :  { %v1797_v15 = vpop.permute.xlu1 %1796 }
 0x395   :  { %v1790_v12 = vpop.permute.xlu0 %1789 }
 0x397   :  { %v1808_v11 = vpop.permute.xlu1 %1807 }
 0x399   :  { %v1801_v22 = vpop.permute.xlu0 %1800 }
 0x39b   :  { %v1819_v31 = vpop.permute.xlu1 %1818 }
 0x39c   :  { %v1857_v41 = vsel %vm178_vm0, %v1775_v10, %v1819_v31 }
 0x39d   :  { %v1812_v42 = vpop.permute.xlu0 %1811 }
 0x39f   :  { %v1830_v37 = vpop.permute.xlu1 %1829 }
 0x3a0   :  { %v1859_v25 = vsel %vm178_vm0, %v1786_v9, %v1830_v37 }
 0x3a1   :  { %v1823_v61 = vpop.permute.xlu0 %1822 }
 0x3a3   :  { %v1841_v0 = vpop.permute.xlu1 %1840 }
 0x3a4   :  { %v1861_v40 = vsel %vm178_vm0, %v1797_v15, %v1841_v0 }
 0x3a5   :  { %v1834_v47 = vpop.permute.xlu0 %1833  ;;  %v1865_v23 = vcombine.low %v1857_v41, %v1861_v40  ;;  %v1866_v54 = vcombine.high %v1857_v41, %v1861_v40 }
 0x3a6   :  { %v1860_v0 = vsel %vm178_vm0, %v1790_v12, %v1834_v47 }
 0x3a7   :  { %v1852_v43 = vpop.permute.xlu1 %1851  ;;  %v1873_v36 = vrot.slane %v1865_v23, %v11278_v28  ;;  %v1880_v58 = vrot.slane %v1866_v54, %v11278_v28 }
 0x3a8   :  { %v1863_v46 = vsel %vm178_vm0, %v1808_v11, %v1852_v43  ;;  %v1858_v43 = vsel %vm178_vm0, %v1779_v48, %v1823_v61 }
 0x3a9   :  { %v1881_v56 = vcombine.low %v1859_v25, %v1863_v46  ;;  %v1882_v24 = vcombine.high %v1859_v25, %v1863_v46  ;;  %v1845_v8 = vpop.permute.xlu0 %1844 }
 0x3aa   :  { %v1862_v9 = vsel %vm178_vm0, %v1801_v22, %v1845_v8 }
 0x3ab   :  { %v1889_v39 = vrot.slane %v1881_v56, %v11278_v28  ;;  %v1896_v30 = vrot.slane %v1882_v24, %v11278_v28  ;;  %v1933_v25 = vcombine.low %v1858_v43, %v1862_v9  ;;  %v11881_v24 = vld [vmem:[#allocation2 + $0x3] sm:$0x1]  ;;  %v1934_v8 = vcombine.high %v1858_v43, %v1862_v9 }
 0x3ac   :  { %v11905_v43 = vld [vmem:[#allocation2 + $0x63] sm:$0x1] }
 0x3ad   :  { %v1897_v15 = vcombine.low %v1873_v36, %v1889_v39  ;;  %v1898_v10 = vcombine.high %v1873_v36, %v1889_v39  ;;  %v1856_v31 = vpop.permute.xlu0 %1855  ;;  %v1913_v23 = vcombine.low %v1880_v58, %v1896_v30  ;;  %v1914_v12 = vcombine.high %v1880_v58, %v1896_v30  ;;  %v11885_v39 = vld [vmem:[#allocation2 + $0x13] sm:$0x1]  ;;  %v11887_v30 = vld [vmem:[#allocation2 + $0x23] sm:$0x1] }
 0x3ae   :  { %v1864_v11 = vsel %vm178_vm0, %v1812_v42, %v1856_v31  ;;  %v1941_v47 = vrot.slane %v1933_v25, %v11278_v28  ;;  %v11889_v58 = vld [vmem:[#allocation2 + $0x33] sm:$0x1] }
 0x3af   :  { %v11866_v37 = vrot.slane %v1897_v15, %v11292_v52  ;;  %v1949_v40 = vcombine.low %v1860_v0, %v1864_v11  ;;  %v1912_v41 = vrot.slane %v1898_v10, %v11292_v52  ;;  %v1921_v42 = vrot.slane %v1913_v23, %v11292_v52  ;;  %v11903_v23 = vld [vmem:[#allocation2 + $0x53] sm:$0x1] }
 0x3b0   :  { %v1950_v48 = vcombine.high %v1860_v0, %v1864_v11  ;;  %v1928_v56 = vrot.slane %v1914_v12, %v11292_v52  ;;  %v2092_v0 = vadd.f32 %v11885_v39, %v11881_v24  ;;  %v2100_v9 = vadd.f32 %v11889_v58, %v11887_v30  ;;  %v11898_v11 = vld [vmem:[#allocation2 + $0x43] sm:$0x1]  ;;  %v11907_v25 = vld [vmem:[#allocation2 + $0x73] sm:$0x1] }
 0x3b1   :  { %2006 = vrot.lane.b32.xlu0 %v1912_v41, %s11125_s0  ;;  %v1929_v46 = vcombine.high %v11866_v37, %v16171_v63  ;;  %v1957_v22 = vrot.slane %v1949_v40, %v11278_v28  ;;  %v1930_v54 = vcombine.high %v1912_v41, %v16171_v63  ;;  %v1931_v36 = vcombine.high %v1921_v42, %v16171_v63 }
 0x3b2   :  { %v1964_v15 = vrot.slane %v1950_v48, %v11278_v28  ;;  %v1948_v40 = vrot.slane %v1934_v8, %v11278_v28  ;;  %v1932_v41 = vcombine.high %v1928_v56, %v16171_v63  ;;  %v11917_v48 = vld [vmem:[#allocation2 + $0x83] sm:$0x1]  ;;  %v11923_v8 = vld [vmem:[#allocation2 + $0xb3] sm:$0x1]  ;;  %v2116_v57 = vsub.f32 %v2092_v0, %v2100_v9 }
 0x3b3   :  { %2002 = vrot.lane.b32.xlu1 %v1929_v46, %s11132_s25  ;;  %v1965_v61 = vcombine.low %v1941_v47, %v1957_v22  ;;  %v1966_v10 = vcombine.high %v1941_v47, %v1957_v22  ;;  %v2108_v22 = vadd.f32 %v2100_v9, %v2092_v0  ;;  %v2101_v47 = vadd.f32 %v11907_v25, %v11905_v43 }
 0x3b4   :  { %v1981_v46 = vcombine.low %v1948_v40, %v1964_v15  ;;  %v2120_v6 = vmul.f32 0.5, %v2116_v57 }
 0x3b5   :  { %2014 = vrot.lane.b32.xlu0 %v1921_v42, %s11122_s17  ;;  %v1973_v31 = vrot.slane %v1965_v61, %v11292_v52  ;;  %v1980_v12 = vrot.slane %v1966_v10, %v11292_v52  ;;  %v2093_v42 = vadd.f32 %v11903_v23, %v11898_v11  ;;  %v11919_v61 = vld [vmem:[#allocation2 + $0x93] sm:$0x1] }
 0x3b6   :  { %v1989_v10 = vrot.slane %v1981_v46, %v11292_v52 }
 0x3b7   :  { %2010 = vrot.lane.b32.xlu1 %v1930_v54, %s11133_s26  ;;  %v1997_v54 = vcombine.high %v1973_v31, %v16171_v63  ;;  %v2109_v51 = vadd.f32 %v2101_v47, %v2093_v42  ;;  %v1998_v21 = vcombine.high %v1980_v12, %v16171_v63 }
 0x3b9   :  { %2022 = vrot.lane.b32.xlu0 %v1928_v56, %s11126_s20  ;;  %v11921_v56 = vld [vmem:[#allocation2 + $0xa3] sm:$0x1] }
 0x3ba   :  { %v2102_v14 = vadd.f32 %v11923_v8, %v11921_v56 }
 0x3bb   :  { %2018 = vrot.lane.b32.xlu1 %v1931_v36, %s11134_s27  ;;  %v1982_v36 = vcombine.high %v1948_v40, %v1964_v15  ;;  %v11937_v15 = vld [vmem:[#allocation2 + $0xe3] sm:$0x1]  ;;  %v11939_v40 = vld [vmem:[#allocation2 + $0xf3] sm:$0x1] }
 0x3bc   :  { %v2103_v17 = vadd.f32 %v11939_v40, %v11937_v15 }
 0x3bd   :  { %2030 = vrot.lane.b32.xlu0 %v1973_v31, %s11127_s21  ;;  %v2094_v31 = vadd.f32 %v11919_v61, %v11917_v48  ;;  %v1996_v46 = vrot.slane %v1982_v36, %v11292_v52 }
 0x3bf   :  { %2026 = vrot.lane.b32.xlu1 %v1932_v41, %s11135_s28  ;;  %v2112_v41 = vmul.f32 0.5, %v2108_v22  ;;  %v2113_v22 = vmul.f32 0.5, %v2109_v51  ;;  %v2110_v49 = vadd.f32 %v2102_v14, %v2094_v31  ;;  %v2111_v51 = vadd.f32 %v2103_v17, %v2095_v26 }
 0x3c1   :  { %2038 = vrot.lane.b32.xlu0 %v1980_v12, %s11128_s22  ;;  %v2143_v12 = vrot.slane %v2112_v41, %v11170_v2  ;;  %v2154_v36 = vrot.slane %v2113_v22, %v11170_v2  ;;  %v2114_v41 = vmul.f32 0.5, %v2110_v49  ;;  %v2115_v3 = vmul.f32 0.5, %v2111_v51 }
 0x3c2   :  { %v2118_v49 = vsub.f32 %v2094_v31, %v2102_v14 }
 0x3c3   :  { %2034 = vrot.lane.b32.xlu1 %v1997_v54, %s11136_s29  ;;  %v1999_v54 = vcombine.high %v1989_v10, %v16171_v63  ;;  %v2176_v1 = vrot.slane %v2115_v3, %v11170_v2 }
 0x3c4   :  { %v2122_v60 = vmul.f32 0.5, %v2118_v49 }
 0x3c5   :  { %2046 = vrot.lane.b32.xlu0 %v1989_v10, %s11129_s23  ;;  %v2165_v10 = vrot.slane %v2114_v41, %v11170_v2  ;;  %v2119_v41 = vsub.f32 %v2095_v26, %v2103_v17 }
 0x3c6   :  { %v2209_v0 = vrot.slane %v2122_v60, %v11170_v2 }
 0x3c7   :  { %2042 = vrot.lane.b32.xlu1 %v1998_v21, %s11137_s30  ;;  %v2000_v21 = vcombine.high %v1996_v46, %v16171_v63  ;;  %v2123_v9 = vmul.f32 0.5, %v2119_v41 }
 0x3c9   :  { %2054 = vrot.lane.b32.xlu0 %v1996_v46, %s11130_s24  ;;  %v2187_v46 = vrot.slane %v2120_v6, %v11170_v2  ;;  %v2220_v57 = vrot.slane %v2123_v9, %v11170_v2 }
 0x3cb   :  { %2050 = vrot.lane.b32.xlu1 %v1999_v54, %s11138_s2  ;;  %v2117_v54 = vsub.f32 %v2093_v42, %v2101_v47 }
 0x3cd   :  { %2145 = vbcast.lane.b32.xlu0 %v2143_v12, 256  ;;  %v2121_v22 = vmul.f32 0.5, %v2117_v54 }
 0x3cf   :  { %2058 = vrot.lane.b32.xlu1 %v2000_v21, %s11139_s3  ;;  %v2198_v21 = vrot.slane %v2121_v22, %v11170_v2 }
 0x3d1   :  { %2156 = vbcast.lane.b32.xlu0 %v2154_v36, 256 }
 0x3d3   :  { %2149 = vbcast.lane.b32.xlu1 %v2143_v12, 264 }
 0x3d5   :  { %2167 = vbcast.lane.b32.xlu0 %v2165_v10, 256 }
 0x3d7   :  { %2160 = vbcast.lane.b32.xlu1 %v2154_v36, 264 }
 0x3d9   :  { %2178 = vbcast.lane.b32.xlu0 %v2176_v1, 256 }
 0x3db   :  { %2171 = vbcast.lane.b32.xlu1 %v2165_v10, 264 }
 0x3dd   :  { %2189 = vbcast.lane.b32.xlu0 %v2187_v46, 256 }
 0x3df   :  { %2182 = vbcast.lane.b32.xlu1 %v2176_v1, 264 }
 0x3e1   :  { %2200 = vbcast.lane.b32.xlu0 %v2198_v21, 256 }
 0x3e3   :  { %2193 = vbcast.lane.b32.xlu1 %v2187_v46, 264 }
 0x3e5   :  { %2211 = vbcast.lane.b32.xlu0 %v2209_v0, 256 }
 0x3e7   :  { %2204 = vbcast.lane.b32.xlu1 %v2198_v21, 264 }
 0x3e9   :  { %2222 = vbcast.lane.b32.xlu0 %v2220_v57, 256 }
 0x3eb   :  { %2215 = vbcast.lane.b32.xlu1 %v2209_v0, 264 }
 0x3ef   :  { %2226 = vbcast.lane.b32.xlu1 %v2220_v57, 264 }
 0x423   :  { %v11960_v6 = vpop.permute.xlu0 %2006 }
 0x425   :  { %v11962_v3 = vpop.permute.xlu1 %2002 }
 0x427   :  { %v11964_v14 = vpop.permute.xlu0 %2014 }
 0x429   :  { %v11966_v17 = vpop.permute.xlu1 %2010 }
 0x42b   :  { %v11968_v1 = vpop.permute.xlu0 %2022 }
 0x42c   :  { %16220 = vst [vmem:[#allocation78_spill] sm:$0xff] %v11968_v1 }
 0x42d   :  { %v11970_v60 = vpop.permute.xlu1 %2018 }
 0x42e   :  { %16221 = vst [vmem:[#allocation79_spill] sm:$0xff] %v11970_v60 }
 0x42f   :  { %v11972_v26 = vpop.permute.xlu0 %2030 }
 0x430   :  { %16222 = vst [vmem:[#allocation80_spill] sm:$0xff] %v11972_v26 }
 0x431   :  { %v11974_v42 = vpop.permute.xlu1 %2026 }
 0x432   :  { %16223 = vst [vmem:[#allocation81_spill] sm:$0xff] %v11974_v42 }
 0x433   :  { %v11976_v47 = vpop.permute.xlu0 %2038 }
 0x434   :  { %16224 = vst [vmem:[#allocation82_spill] sm:$0xff] %v11976_v47 }
 0x435   :  { %v11978_v31 = vpop.permute.xlu1 %2034 }
 0x436   :  { %16225 = vst [vmem:[#allocation83_spill] sm:$0xff] %v11978_v31 }
 0x437   :  { %v11980_v12 = vpop.permute.xlu0 %2046 }
 0x438   :  { %16226 = vst [vmem:[#allocation84_spill] sm:$0xff] %v11980_v12 }
 0x439   :  { %v11982_v36 = vpop.permute.xlu1 %2042 }
 0x43a   :  { %16227 = vst [vmem:[#allocation85_spill] sm:$0xff] %v11982_v36 }
 0x43b   :  { %v11984_v51 = vpop.permute.xlu0 %2054 }
 0x43c   :  { %16228 = vst [vmem:[#allocation86_spill] sm:$0xff] %v11984_v51 }
 0x43d   :  { %v11986_v10 = vpop.permute.xlu1 %2050 }
 0x43e   :  { %16229 = vst [vmem:[#allocation87_spill] sm:$0xff] %v11986_v10 }
 0x43f   :  { %v2146_v54 = vpop.permute.xlu0 %2145 }
 0x441   :  { %v11988_v46 = vpop.permute.xlu1 %2058 }
 0x442   :  { %16230 = vst [vmem:[#allocation88_spill] sm:$0xff] %v11988_v46 }
 0x443   :  { %v2157_v22 = vpop.permute.xlu0 %2156 }
 0x445   :  { %v2150_v49 = vpop.permute.xlu1 %2149 }
 0x447   :  { %v2168_v21 = vpop.permute.xlu0 %2167 }
 0x449   :  { %v2161_v41 = vpop.permute.xlu1 %2160 }
 0x44b   :  { %v2179_v0 = vpop.permute.xlu0 %2178 }
 0x44d   :  { %v2172_v9 = vpop.permute.xlu1 %2171 }
 0x44f   :  { %v2190_v57 = vpop.permute.xlu0 %2189 }
 0x450   :  { %v2228_v51 = vsel %vm178_vm0, %v2146_v54, %v2190_v57 }
 0x451   :  { %v2183_v33 = vpop.permute.xlu1 %2182 }
 0x453   :  { %v2201_v59 = vpop.permute.xlu0 %2200 }
 0x454   :  { %v2230_v46 = vsel %vm178_vm0, %v2157_v22, %v2201_v59 }
 0x455   :  { %v2194_v27 = vpop.permute.xlu1 %2193 }
 0x457   :  { %v2212_v12 = vpop.permute.xlu0 %2211 }
 0x458   :  { %v2232_v36 = vsel %vm178_vm0, %v2168_v21, %v2212_v12 }
 0x459   :  { %v2205_v47 = vpop.permute.xlu1 %2204  ;;  %v2236_v10 = vcombine.low %v2228_v51, %v2232_v36  ;;  %v2237_v13 = vcombine.high %v2228_v51, %v2232_v36 }
 0x45a   :  { %v2231_v62 = vsel %vm178_vm0, %v2161_v41, %v2205_v47 }
 0x45b   :  { %v2223_v34 = vpop.permute.xlu0 %2222  ;;  %v2244_v55 = vrot.slane %v2236_v10, %v11278_v28  ;;  %v2251_v12 = vrot.slane %v2237_v13, %v11278_v28 }
 0x45c   :  { %v2234_v31 = vsel %vm178_vm0, %v2179_v0, %v2223_v34 }
 0x45d   :  { %v2252_v4 = vcombine.low %v2230_v46, %v2234_v31  ;;  %v2253_v26 = vcombine.high %v2230_v46, %v2234_v31  ;;  %v2216_v7 = vpop.permute.xlu1 %2215 }
 0x45e   :  { %v2233_v59 = vsel %vm178_vm0, %v2172_v9, %v2216_v7 }
 0x45f   :  { %v2260_v42 = vrot.slane %v2252_v4, %v11278_v28  ;;  %v2267_v1 = vrot.slane %v2253_v26, %v11278_v28  ;;  %v2229_v26 = vsel %vm178_vm0, %v2150_v49, %v2194_v27 }
 0x460   :  { %v2304_v10 = vcombine.low %v2229_v26, %v2233_v59  ;;  %v2305_v49 = vcombine.high %v2229_v26, %v2233_v59 }
 0x461   :  { %v2268_v21 = vcombine.low %v2244_v55, %v2260_v42  ;;  %v2269_v54 = vcombine.high %v2244_v55, %v2260_v42  ;;  %v2227_v57 = vpop.permute.xlu1 %2226  ;;  %v2284_v4 = vcombine.low %v2251_v12, %v2267_v1  ;;  %v2285_v13 = vcombine.high %v2251_v12, %v2267_v1 }
 0x462   :  { %v2235_v34 = vsel %vm178_vm0, %v2183_v33, %v2227_v57  ;;  %v2312_v42 = vrot.slane %v2304_v10, %v11278_v28  ;;  %v2104_v12 = vsub.f32 %v11887_v30, %v11889_v58 }
 0x463   :  { %v12002_v31 = vrot.slane %v2268_v21, %v11292_v52  ;;  %v2320_v36 = vcombine.low %v2231_v62, %v2235_v34  ;;  %v2283_v51 = vrot.slane %v2269_v54, %v11292_v52  ;;  %v2292_v33 = vrot.slane %v2284_v4, %v11292_v52 }
 0x464   :  { %v2321_v27 = vcombine.high %v2231_v62, %v2235_v34  ;;  %v2299_v22 = vrot.slane %v2285_v13, %v11292_v52  ;;  %v2096_v62 = vsub.f32 %v11881_v24, %v11885_v39  ;;  %v2319_v21 = vrot.slane %v2305_v49, %v11278_v28 }
 0x465   :  { %16231 = vst [vmem:[#allocation89_spill] sm:$0xff] %v12002_v31  ;;  %2377 = vrot.lane.b32.xlu1 %v2283_v51, %s11125_s0  ;;  %v2300_v55 = vcombine.high %v12002_v31, %v16171_v63  ;;  %v2328_v7 = vrot.slane %v2320_v36, %v11278_v28  ;;  %v2301_v47 = vcombine.high %v2283_v51, %v16171_v63 }
 0x466   :  { %v2302_v1 = vcombine.high %v2292_v33, %v16171_v63  ;;  %v2335_v41 = vrot.slane %v2321_v27, %v11278_v28  ;;  %v2303_v54 = vcombine.high %v2299_v22, %v16171_v63  ;;  %v2124_v34 = vadd.f32 %v2104_v12, %v2096_v62 }
 0x467   :  { %2373 = vrot.lane.b32.xlu0 %v2300_v55, %s11132_s25  ;;  %v2336_v46 = vcombine.low %v2312_v42, %v2328_v7  ;;  %v2337_v0 = vcombine.high %v2312_v42, %v2328_v7  ;;  %v2097_v36 = vsub.f32 %v11898_v11, %v11903_v23  ;;  %v2105_v24 = vsub.f32 %v11905_v43, %v11907_v25 }
 0x468   :  { %v2352_v57 = vcombine.low %v2319_v21, %v2335_v41  ;;  %v2353_v30 = vcombine.high %v2319_v21, %v2335_v41  ;;  %v2128_v51 = vmul.f32 0.5, %v2124_v34  ;;  %v2098_v11 = vsub.f32 %v11917_v48, %v11919_v61 }
 0x469   :  { %2385 = vrot.lane.b32.xlu1 %v2292_v33, %s11122_s17  ;;  %v2344_v9 = vrot.slane %v2336_v46, %v11292_v52  ;;  %v2351_v59 = vrot.slane %v2337_v0, %v11292_v52  ;;  %v2125_v4 = vadd.f32 %v2105_v24, %v2097_v36  ;;  %v2106_v23 = vsub.f32 %v11921_v56, %v11923_v8 }
 0x46a   :  { %v2360_v58 = vrot.slane %v2352_v57, %v11292_v52  ;;  %v2367_v43 = vrot.slane %v2353_v30, %v11292_v52  ;;  %v2450_v25 = vrot.slane %v2128_v51, %v11170_v2  ;;  %v2099_v7 = vsub.f32 %v11933_v32, %v11935_v45 }
 0x46b   :  { %2381 = vrot.lane.b32.xlu0 %v2301_v47, %s11133_s26  ;;  %v2368_v39 = vcombine.high %v2344_v9, %v16171_v63  ;;  %v2369_v26 = vcombine.high %v2351_v59, %v16171_v63  ;;  %v2129_v10 = vmul.f32 0.5, %v2125_v4  ;;  %v2126_v13 = vadd.f32 %v2106_v23, %v2098_v11 }
 0x46c   :  { %v2370_v55 = vcombine.high %v2360_v58, %v16171_v63  ;;  %v2107_v48 = vsub.f32 %v11937_v15, %v11939_v40  ;;  %v2371_v61 = vcombine.high %v2367_v43, %v16171_v63  ;;  %v2132_v27 = vsub.f32 %v2096_v62, %v2104_v12 }
 0x46d   :  { %2393 = vrot.lane.b32.xlu1 %v2299_v22, %s11126_s20  ;;  %v2461_v56 = vrot.slane %v2129_v10, %v11170_v2  ;;  %v2130_v8 = vmul.f32 0.5, %v2126_v13  ;;  %v2133_v15 = vsub.f32 %v2097_v36, %v2105_v24  ;;  %v2134_v22 = vsub.f32 %v2098_v11, %v2106_v23 }
 0x46e   :  { %v2127_v33 = vadd.f32 %v2107_v48, %v2099_v7  ;;  %v2136_v45 = vmul.f32 0.5, %v2132_v27  ;;  %v2135_v41 = vsub.f32 %v2099_v7, %v2107_v48 }
 0x46f   :  { %2389 = vrot.lane.b32.xlu0 %v2302_v1, %s11134_s27  ;;  %v2472_v42 = vrot.slane %v2130_v8, %v11170_v2  ;;  %v2137_v46 = vmul.f32 0.5, %v2133_v15  ;;  %v2138_v1 = vmul.f32 0.5, %v2134_v22 }
 0x470   :  { %v2131_v47 = vmul.f32 0.5, %v2127_v33  ;;  %v2494_v40 = vrot.slane %v2136_v45, %v11170_v2 }
 0x471   :  { %2401 = vrot.lane.b32.xlu1 %v2344_v9, %s11127_s21  ;;  %v2505_v49 = vrot.slane %v2137_v46, %v11170_v2  ;;  %v2516_v0 = vrot.slane %v2138_v1, %v11170_v2  ;;  %v2139_v9 = vmul.f32 0.5, %v2135_v41 }
 0x472   :  { %v2483_v32 = vrot.slane %v2131_v47, %v11170_v2 }
 0x473   :  { %2397 = vrot.lane.b32.xlu0 %v2303_v54, %s11135_s28  ;;  %v2527_v62 = vrot.slane %v2139_v9, %v11170_v2 }
 0x475   :  { %2409 = vrot.lane.b32.xlu1 %v2351_v59, %s11128_s22 }
 0x477   :  { %2405 = vrot.lane.b32.xlu0 %v2368_v39, %s11136_s29 }
 0x479   :  { %2417 = vrot.lane.b32.xlu1 %v2360_v58, %s11129_s23 }
 0x47b   :  { %2413 = vrot.lane.b32.xlu0 %v2369_v26, %s11137_s30 }
 0x47d   :  { %2425 = vrot.lane.b32.xlu1 %v2367_v43, %s11130_s24 }
 0x47f   :  { %2421 = vrot.lane.b32.xlu0 %v2370_v55, %s11138_s2 }
 0x481   :  { %2452 = vbcast.lane.b32.xlu1 %v2450_v25, 256 }
 0x483   :  { %2429 = vrot.lane.b32.xlu0 %v2371_v61, %s11139_s3 }
 0x485   :  { %2463 = vbcast.lane.b32.xlu1 %v2461_v56, 256 }
 0x487   :  { %2456 = vbcast.lane.b32.xlu0 %v2450_v25, 264 }
 0x489   :  { %2474 = vbcast.lane.b32.xlu1 %v2472_v42, 256 }
 0x48b   :  { %2467 = vbcast.lane.b32.xlu0 %v2461_v56, 264 }
 0x48d   :  { %2485 = vbcast.lane.b32.xlu1 %v2483_v32, 256 }
 0x48f   :  { %2478 = vbcast.lane.b32.xlu0 %v2472_v42, 264 }
 0x491   :  { %2496 = vbcast.lane.b32.xlu1 %v2494_v40, 256 }
 0x493   :  { %2489 = vbcast.lane.b32.xlu0 %v2483_v32, 264 }
 0x495   :  { %2507 = vbcast.lane.b32.xlu1 %v2505_v49, 256 }
 0x497   :  { %2500 = vbcast.lane.b32.xlu0 %v2494_v40, 264 }
 0x499   :  { %2518 = vbcast.lane.b32.xlu1 %v2516_v0, 256 }
 0x49b   :  { %2511 = vbcast.lane.b32.xlu0 %v2505_v49, 264 }
 0x49d   :  { %2529 = vbcast.lane.b32.xlu1 %v2527_v62, 256 }
 0x49f   :  { %2522 = vbcast.lane.b32.xlu0 %v2516_v0, 264 }
 0x4a3   :  { %2533 = vbcast.lane.b32.xlu0 %v2527_v62, 264 }
 0x4d7   :  { %v12064_v12 = vpop.permute.xlu1 %2377 }
 0x4d8   :  { %16232 = vst [vmem:[#allocation90_spill] sm:$0xff] %v12064_v12 }
 0x4d9   :  { %v12066_v21 = vpop.permute.xlu0 %2373 }
 0x4da   :  { %16233 = vst [vmem:[#allocation91_spill] sm:$0xff] %v12066_v21 }
 0x4db   :  { %v12068_v54 = vpop.permute.xlu1 %2385 }
 0x4dc   :  { %16234 = vst [vmem:[#allocation92_spill] sm:$0xff] %v12068_v54 }
 0x4dd   :  { %v12070_v57 = vpop.permute.xlu0 %2381 }
 0x4de   :  { %16235 = vst [vmem:[#allocation93_spill] sm:$0xff] %v12070_v57 }
 0x4df   :  { %v12072_v59 = vpop.permute.xlu1 %2393 }
 0x4e0   :  { %16236 = vst [vmem:[#allocation94_spill] sm:$0xff] %v12072_v59 }
 0x4e1   :  { %v12074_v34 = vpop.permute.xlu0 %2389 }
 0x4e2   :  { %16237 = vst [vmem:[#allocation95_spill] sm:$0xff] %v12074_v34 }
 0x4e3   :  { %v12076_v36 = vpop.permute.xlu1 %2401 }
 0x4e4   :  { %16238 = vst [vmem:[#allocation96_spill] sm:$0xff] %v12076_v36 }
 0x4e5   :  { %v12078_v24 = vpop.permute.xlu0 %2397 }
 0x4e6   :  { %16239 = vst [vmem:[#allocation97_spill] sm:$0xff] %v12078_v24 }
 0x4e7   :  { %v12080_v39 = vpop.permute.xlu1 %2409 }
 0x4e8   :  { %16240 = vst [vmem:[#allocation98_spill] sm:$0xff] %v12080_v39 }
 0x4e9   :  { %v12082_v30 = vpop.permute.xlu0 %2405 }
 0x4ea   :  { %16241 = vst [vmem:[#allocation99_spill] sm:$0xff] %v12082_v30 }
 0x4eb   :  { %v12084_v58 = vpop.permute.xlu1 %2417 }
 0x4ec   :  { %16242 = vst [vmem:[#allocation100_spill] sm:$0xff] %v12084_v58  ;;  %v12173_v58 = vld [vmem:[#allocation2 + $0xc4] sm:$0x1] }
 0x4ed   :  { %v12086_v51 = vpop.permute.xlu0 %2413 }
 0x4ee   :  { %16243 = vst [vmem:[#allocation101_spill] sm:$0xff] %v12086_v51  ;;  %v12175_v51 = vld [vmem:[#allocation2 + $0xd4] sm:$0x1] }
 0x4ef   :  { %v12088_v4 = vpop.permute.xlu1 %2425 }
 0x4f0   :  { %16244 = vst [vmem:[#allocation102_spill] sm:$0xff] %v12088_v4 }
 0x4f1   :  { %v12090_v26 = vpop.permute.xlu0 %2421 }
 0x4f2   :  { %16245 = vst [vmem:[#allocation103_spill] sm:$0xff] %v12090_v26 }
 0x4f3   :  { %v2453_v11 = vpop.permute.xlu1 %2452 }
 0x4f5   :  { %v12092_v23 = vpop.permute.xlu0 %2429 }
 0x4f6   :  { %16246 = vst [vmem:[#allocation104_spill] sm:$0xff] %v12092_v23 }
 0x4f7   :  { %v2464_v43 = vpop.permute.xlu1 %2463 }
 0x4f9   :  { %v2457_v25 = vpop.permute.xlu0 %2456 }
 0x4fb   :  { %v2475_v10 = vpop.permute.xlu1 %2474 }
 0x4fd   :  { %v2468_v55 = vpop.permute.xlu0 %2467 }
 0x4ff   :  { %v2486_v13 = vpop.permute.xlu1 %2485 }
 0x501   :  { %v2479_v7 = vpop.permute.xlu0 %2478 }
 0x503   :  { %v2497_v48 = vpop.permute.xlu1 %2496 }
 0x504   :  { %v2535_v27 = vsel %vm178_vm0, %v2453_v11, %v2497_v48 }
 0x505   :  { %v2490_v61 = vpop.permute.xlu0 %2489 }
 0x507   :  { %v2508_v56 = vpop.permute.xlu1 %2507 }
 0x508   :  { %v2537_v15 = vsel %vm178_vm0, %v2464_v43, %v2508_v56 }
 0x509   :  { %v2501_v8 = vpop.permute.xlu0 %2500 }
 0x50b   :  { %v2519_v33 = vpop.permute.xlu1 %2518 }
 0x50c   :  { %v2539_v42 = vsel %vm178_vm0, %v2475_v10, %v2519_v33 }
 0x50d   :  { %v2512_v47 = vpop.permute.xlu0 %2511  ;;  %v2543_v32 = vcombine.low %v2535_v27, %v2539_v42  ;;  %v2544_v46 = vcombine.high %v2535_v27, %v2539_v42 }
 0x50e   :  { %v2538_v33 = vsel %vm178_vm0, %v2468_v55, %v2512_v47 }
 0x50f   :  { %v2530_v45 = vpop.permute.xlu1 %2529  ;;  %v2551_v41 = vrot.slane %v2543_v32, %v11278_v28  ;;  %v2558_v62 = vrot.slane %v2544_v46, %v11278_v28 }
 0x510   :  { %v2541_v40 = vsel %vm178_vm0, %v2486_v13, %v2530_v45  ;;  %v2536_v45 = vsel %vm178_vm0, %v2457_v25, %v2501_v8 }
 0x511   :  { %v2559_v22 = vcombine.low %v2537_v15, %v2541_v40  ;;  %v2560_v49 = vcombine.high %v2537_v15, %v2541_v40  ;;  %v2523_v1 = vpop.permute.xlu0 %2522 }
 0x512   :  { %v2540_v43 = vsel %vm178_vm0, %v2479_v7, %v2523_v1 }
 0x513   :  { %v2567_v0 = vrot.slane %v2559_v22, %v11278_v28  ;;  %v2574_v9 = vrot.slane %v2560_v49, %v11278_v28  ;;  %v2611_v15 = vcombine.low %v2536_v45, %v2540_v43  ;;  %v12121_v49 = vld [vmem:[#allocation2 + $0x4] sm:$0x1]  ;;  %v2612_v1 = vcombine.high %v2536_v45, %v2540_v43 }
 0x514   :  { %v12145_v45 = vld [vmem:[#allocation2 + $0x64] sm:$0x1] }
 0x515   :  { %v2575_v10 = vcombine.low %v2551_v41, %v2567_v0  ;;  %v2576_v11 = vcombine.high %v2551_v41, %v2567_v0  ;;  %v2534_v48 = vpop.permute.xlu0 %2533  ;;  %v2591_v32 = vcombine.low %v2558_v62, %v2574_v9  ;;  %v2592_v55 = vcombine.high %v2558_v62, %v2574_v9  ;;  %v12125_v0 = vld [vmem:[#allocation2 + $0x14] sm:$0x1]  ;;  %v12127_v9 = vld [vmem:[#allocation2 + $0x24] sm:$0x1] }
 0x516   :  { %v2542_v13 = vsel %vm178_vm0, %v2490_v61, %v2534_v48  ;;  %v2619_v47 = vrot.slane %v2611_v15, %v11278_v28  ;;  %v12129_v62 = vld [vmem:[#allocation2 + $0x34] sm:$0x1] }
 0x517   :  { %v12106_v56 = vrot.slane %v2575_v10, %v11292_v52  ;;  %v2627_v42 = vcombine.low %v2538_v33, %v2542_v13  ;;  %v2590_v27 = vrot.slane %v2576_v11, %v11292_v52  ;;  %v2599_v61 = vrot.slane %v2591_v32, %v11292_v52  ;;  %v12143_v32 = vld [vmem:[#allocation2 + $0x54] sm:$0x1] }
 0x518   :  { %v2628_v25 = vcombine.high %v2538_v33, %v2542_v13  ;;  %v2606_v22 = vrot.slane %v2592_v55, %v11292_v52  ;;  %v2770_v33 = vadd.f32 %v12125_v0, %v12121_v49  ;;  %v2778_v43 = vadd.f32 %v12129_v62, %v12127_v9  ;;  %v12138_v13 = vld [vmem:[#allocation2 + $0x44] sm:$0x1]  ;;  %v12147_v15 = vld [vmem:[#allocation2 + $0x74] sm:$0x1] }
 0x519   :  { %16247 = vst [vmem:[#allocation105_spill] sm:$0xff] %v12106_v56  ;;  %2684 = vrot.lane.b32.xlu0 %v2590_v27, %s11125_s0  ;;  %v2607_v40 = vcombine.high %v12106_v56, %v16171_v63  ;;  %v2635_v7 = vrot.slane %v2627_v42, %v11278_v28  ;;  %v2608_v46 = vcombine.high %v2590_v27, %v16171_v63 }
 0x51a   :  { %v2609_v41 = vcombine.high %v2599_v61, %v16171_v63  ;;  %v2642_v10 = vrot.slane %v2628_v25, %v11278_v28  ;;  %v2626_v42 = vrot.slane %v2612_v1, %v11278_v28  ;;  %v2610_v27 = vcombine.high %v2606_v22, %v16171_v63  ;;  %v12157_v25 = vld [vmem:[#allocation2 + $0x84] sm:$0x1]  ;;  %v12163_v1 = vld [vmem:[#allocation2 + $0xb4] sm:$0x1] }
 0x51b   :  { %2680 = vrot.lane.b32.xlu1 %v2607_v40, %s11132_s25  ;;  %v2643_v8 = vcombine.low %v2619_v47, %v2635_v7  ;;  %v2644_v11 = vcombine.high %v2619_v47, %v2635_v7  ;;  %v2786_v7 = vadd.f32 %v2778_v43, %v2770_v33  ;;  %v2779_v47 = vadd.f32 %v12147_v15, %v12145_v45 }
 0x51c   :  { %v2659_v40 = vcombine.low %v2626_v42, %v2642_v10  ;;  %v2773_v56 = vadd.f32 %v12175_v51, %v12173_v58  ;;  %v2794_v24 = vsub.f32 %v2770_v33, %v2778_v43 }
 0x51d   :  { %2692 = vrot.lane.b32.xlu0 %v2599_v61, %s11122_s17  ;;  %v2651_v48 = vrot.slane %v2643_v8, %v11292_v52  ;;  %v2658_v55 = vrot.slane %v2644_v11, %v11292_v52  ;;  %v2771_v61 = vadd.f32 %v12143_v32, %v12138_v13  ;;  %v12159_v8 = vld [vmem:[#allocation2 + $0x94] sm:$0x1] }
 0x51e   :  { %v2667_v11 = vrot.slane %v2659_v40, %v11292_v52  ;;  %v2798_v34 = vmul.f32 0.5, %v2794_v24 }
 0x51f   :  { %2688 = vrot.lane.b32.xlu1 %v2608_v46, %s11133_s26  ;;  %v2675_v46 = vcombine.high %v2651_v48, %v16171_v63  ;;  %v2787_v23 = vadd.f32 %v2779_v47, %v2771_v61  ;;  %v2676_v4 = vcombine.high %v2658_v55, %v16171_v63 }
 0x521   :  { %2700 = vrot.lane.b32.xlu0 %v2606_v22, %s11126_s20  ;;  %v12161_v22 = vld [vmem:[#allocation2 + $0xa4] sm:$0x1] }
 0x522   :  { %v2780_v26 = vadd.f32 %v12163_v1, %v12161_v22 }
 0x523   :  { %2696 = vrot.lane.b32.xlu1 %v2609_v41, %s11134_s27  ;;  %v2660_v41 = vcombine.high %v2626_v42, %v2642_v10  ;;  %v12177_v10 = vld [vmem:[#allocation2 + $0xe4] sm:$0x1]  ;;  %v12179_v42 = vld [vmem:[#allocation2 + $0xf4] sm:$0x1] }
 0x524   :  { %v2781_v30 = vadd.f32 %v12179_v42, %v12177_v10 }
 0x525   :  { %2708 = vrot.lane.b32.xlu0 %v2651_v48, %s11127_s21  ;;  %v2772_v48 = vadd.f32 %v12159_v8, %v12157_v25  ;;  %v2674_v40 = vrot.slane %v2660_v41, %v11292_v52 }
 0x527   :  { %2704 = vrot.lane.b32.xlu1 %v2610_v27, %s11135_s28  ;;  %v2790_v27 = vmul.f32 0.5, %v2786_v7  ;;  %v2791_v7 = vmul.f32 0.5, %v2787_v23  ;;  %v2788_v39 = vadd.f32 %v2780_v26, %v2772_v48  ;;  %v2789_v23 = vadd.f32 %v2781_v30, %v2773_v56 }
 0x529   :  { %2716 = vrot.lane.b32.xlu0 %v2658_v55, %s11128_s22  ;;  %v2821_v55 = vrot.slane %v2790_v27, %v11170_v2  ;;  %v2832_v41 = vrot.slane %v2791_v7, %v11170_v2  ;;  %v2792_v27 = vmul.f32 0.5, %v2788_v39  ;;  %v2793_v36 = vmul.f32 0.5, %v2789_v23 }
 0x52a   :  { %v2796_v39 = vsub.f32 %v2772_v48, %v2780_v26 }
 0x52b   :  { %2712 = vrot.lane.b32.xlu1 %v2675_v46, %s11136_s29  ;;  %v2677_v46 = vcombine.high %v2667_v11, %v16171_v63  ;;  %v2854_v59 = vrot.slane %v2793_v36, %v11170_v2 }
 0x52c   :  { %v2800_v54 = vmul.f32 0.5, %v2796_v39 }
 0x52d   :  { %2724 = vrot.lane.b32.xlu0 %v2667_v11, %s11129_s23  ;;  %v2843_v11 = vrot.slane %v2792_v27, %v11170_v2  ;;  %v2797_v27 = vsub.f32 %v2773_v56, %v2781_v30 }
 0x52e   :  { %v2887_v33 = vrot.slane %v2800_v54, %v11170_v2 }
 0x52f   :  { %2720 = vrot.lane.b32.xlu1 %v2676_v4, %s11137_s30  ;;  %v2678_v4 = vcombine.high %v2674_v40, %v16171_v63  ;;  %v2801_v43 = vmul.f32 0.5, %v2797_v27 }
 0x531   :  { %2732 = vrot.lane.b32.xlu0 %v2674_v40, %s11130_s24  ;;  %v2865_v40 = vrot.slane %v2798_v34, %v11170_v2  ;;  %v2898_v36 = vrot.slane %v2801_v43, %v11170_v2 }
 0x533   :  { %2728 = vrot.lane.b32.xlu1 %v2677_v46, %s11138_s2  ;;  %v2795_v46 = vsub.f32 %v2771_v61, %v2779_v47 }
 0x535   :  { %2823 = vbcast.lane.b32.xlu0 %v2821_v55, 256  ;;  %v2799_v7 = vmul.f32 0.5, %v2795_v46 }
 0x537   :  { %2736 = vrot.lane.b32.xlu1 %v2678_v4, %s11139_s3  ;;  %v2876_v4 = vrot.slane %v2799_v7, %v11170_v2 }
 0x539   :  { %2834 = vbcast.lane.b32.xlu0 %v2832_v41, 256 }
 0x53b   :  { %2827 = vbcast.lane.b32.xlu1 %v2821_v55, 264 }
 0x53d   :  { %2845 = vbcast.lane.b32.xlu0 %v2843_v11, 256 }
 0x53f   :  { %2838 = vbcast.lane.b32.xlu1 %v2832_v41, 264 }
 0x541   :  { %2856 = vbcast.lane.b32.xlu0 %v2854_v59, 256 }
 0x543   :  { %2849 = vbcast.lane.b32.xlu1 %v2843_v11, 264 }
 0x545   :  { %2867 = vbcast.lane.b32.xlu0 %v2865_v40, 256 }
 0x547   :  { %2860 = vbcast.lane.b32.xlu1 %v2854_v59, 264 }
 0x549   :  { %2878 = vbcast.lane.b32.xlu0 %v2876_v4, 256 }
 0x54b   :  { %2871 = vbcast.lane.b32.xlu1 %v2865_v40, 264 }
 0x54d   :  { %2889 = vbcast.lane.b32.xlu0 %v2887_v33, 256 }
 0x54f   :  { %2882 = vbcast.lane.b32.xlu1 %v2876_v4, 264 }
 0x551   :  { %2900 = vbcast.lane.b32.xlu0 %v2898_v36, 256 }
 0x553   :  { %2893 = vbcast.lane.b32.xlu1 %v2887_v33, 264 }
 0x557   :  { %2904 = vbcast.lane.b32.xlu1 %v2898_v36, 264 }
 0x58b   :  { %v12200_v34 = vpop.permute.xlu0 %2684 }
 0x58c   :  { %16248 = vst [vmem:[#allocation106_spill] sm:$0xff] %v12200_v34 }
 0x58d   :  { %v12202_v24 = vpop.permute.xlu1 %2680 }
 0x58e   :  { %16249 = vst [vmem:[#allocation107_spill] sm:$0xff] %v12202_v24 }
 0x58f   :  { %v12204_v26 = vpop.permute.xlu0 %2692 }
 0x590   :  { %16250 = vst [vmem:[#allocation108_spill] sm:$0xff] %v12204_v26 }
 0x591   :  { %v12206_v30 = vpop.permute.xlu1 %2688 }
 0x592   :  { %16251 = vst [vmem:[#allocation109_spill] sm:$0xff] %v12206_v30 }
 0x593   :  { %v12208_v59 = vpop.permute.xlu0 %2700 }
 0x594   :  { %16252 = vst [vmem:[#allocation110_spill] sm:$0xff] %v12208_v59 }
 0x595   :  { %v12210_v54 = vpop.permute.xlu1 %2696 }
 0x596   :  { %16253 = vst [vmem:[#allocation111_spill] sm:$0xff] %v12210_v54 }
 0x597   :  { %v12212_v56 = vpop.permute.xlu0 %2708 }
 0x598   :  { %16254 = vst [vmem:[#allocation112_spill] sm:$0xff] %v12212_v56 }
 0x599   :  { %v12214_v61 = vpop.permute.xlu1 %2704 }
 0x59a   :  { %16255 = vst [vmem:[#allocation113_spill] sm:$0xff] %v12214_v61 }
 0x59b   :  { %v12216_v47 = vpop.permute.xlu0 %2716 }
 0x59c   :  { %16256 = vst [vmem:[#allocation114_spill] sm:$0xff] %v12216_v47 }
 0x59d   :  { %v12218_v48 = vpop.permute.xlu1 %2712 }
 0x59e   :  { %16257 = vst [vmem:[#allocation115_spill] sm:$0xff] %v12218_v48 }
 0x59f   :  { %v12220_v55 = vpop.permute.xlu0 %2724 }
 0x5a0   :  { %16258 = vst [vmem:[#allocation116_spill] sm:$0xff] %v12220_v55 }
 0x5a1   :  { %v12222_v41 = vpop.permute.xlu1 %2720 }
 0x5a2   :  { %16259 = vst [vmem:[#allocation117_spill] sm:$0xff] %v12222_v41 }
 0x5a3   :  { %v12224_v23 = vpop.permute.xlu0 %2732 }
 0x5a4   :  { %16260 = vst [vmem:[#allocation118_spill] sm:$0xff] %v12224_v23 }
 0x5a5   :  { %v12226_v11 = vpop.permute.xlu1 %2728 }
 0x5a6   :  { %16261 = vst [vmem:[#allocation119_spill] sm:$0xff] %v12226_v11 }
 0x5a7   :  { %v2824_v46 = vpop.permute.xlu0 %2823 }
 0x5a9   :  { %v12228_v40 = vpop.permute.xlu1 %2736 }
 0x5aa   :  { %16262 = vst [vmem:[#allocation120_spill] sm:$0xff] %v12228_v40 }
 0x5ab   :  { %v2835_v7 = vpop.permute.xlu0 %2834 }
 0x5ad   :  { %v2828_v39 = vpop.permute.xlu1 %2827 }
 0x5af   :  { %v2846_v4 = vpop.permute.xlu0 %2845 }
 0x5b1   :  { %v2839_v27 = vpop.permute.xlu1 %2838 }
 0x5b3   :  { %v2857_v33 = vpop.permute.xlu0 %2856 }
 0x5b5   :  { %v2850_v43 = vpop.permute.xlu1 %2849 }
 0x5b7   :  { %v2868_v36 = vpop.permute.xlu0 %2867 }
 0x5b8   :  { %v2906_v23 = vsel %vm178_vm0, %v2824_v46, %v2868_v36 }
 0x5b9   :  { %v2861_v47 = vpop.permute.xlu1 %2860 }
 0x5bb   :  { %v2879_v48 = vpop.permute.xlu0 %2878 }
 0x5bc   :  { %v2908_v40 = vsel %vm178_vm0, %v2835_v7, %v2879_v48 }
 0x5bd   :  { %v2872_v56 = vpop.permute.xlu1 %2871 }
 0x5bf   :  { %v2890_v55 = vpop.permute.xlu0 %2889 }
 0x5c0   :  { %v2910_v41 = vsel %vm178_vm0, %v2846_v4, %v2890_v55 }
 0x5c1   :  { %v2883_v61 = vpop.permute.xlu1 %2882  ;;  %v2914_v11 = vcombine.low %v2906_v23, %v2910_v41  ;;  %v2915_v26 = vcombine.high %v2906_v23, %v2910_v41 }
 0x5c2   :  { %v2909_v21 = vsel %vm178_vm0, %v2839_v27, %v2883_v61 }
 0x5c3   :  { %v2901_v59 = vpop.permute.xlu0 %2900  ;;  %v2922_v57 = vrot.slane %v2914_v11, %v11278_v28  ;;  %v2929_v55 = vrot.slane %v2915_v26, %v11278_v28 }
 0x5c4   :  { %v2912_v54 = vsel %vm178_vm0, %v2857_v33, %v2901_v59 }
 0x5c5   :  { %v2930_v30 = vcombine.low %v2908_v40, %v2912_v54  ;;  %v2931_v34 = vcombine.high %v2908_v40, %v2912_v54  ;;  %v2894_v24 = vpop.permute.xlu1 %2893 }
 0x5c6   :  { %v2911_v48 = vsel %vm178_vm0, %v2850_v43, %v2894_v24 }
 0x5c7   :  { %v2938_v12 = vrot.slane %v2930_v30, %v11278_v28  ;;  %v2945_v31 = vrot.slane %v2931_v34, %v11278_v28  ;;  %v2907_v34 = vsel %vm178_vm0, %v2828_v39, %v2872_v56 }
 0x5c8   :  { %v2982_v11 = vcombine.low %v2907_v34, %v2911_v48  ;;  %v2983_v39 = vcombine.high %v2907_v34, %v2911_v48 }
 0x5c9   :  { %v2946_v4 = vcombine.low %v2922_v57, %v2938_v12  ;;  %v2947_v46 = vcombine.high %v2922_v57, %v2938_v12  ;;  %v2905_v36 = vpop.permute.xlu1 %2904  ;;  %v2962_v30 = vcombine.low %v2929_v55, %v2945_v31  ;;  %v2963_v57 = vcombine.high %v2929_v55, %v2945_v31 }
 0x5ca   :  { %v2913_v59 = vsel %vm178_vm0, %v2861_v47, %v2905_v36  ;;  %v2990_v61 = vrot.slane %v2982_v11, %v11278_v28  ;;  %v2782_v55 = vsub.f32 %v12127_v9, %v12129_v62 }
 0x5cb   :  { %v12242_v54 = vrot.slane %v2946_v4, %v11292_v52  ;;  %v2998_v41 = vcombine.low %v2909_v21, %v2913_v59  ;;  %v2961_v23 = vrot.slane %v2947_v46, %v11292_v52  ;;  %v2970_v26 = vrot.slane %v2962_v30, %v11292_v52 }
 0x5cc   :  { %v2999_v56 = vcombine.high %v2909_v21, %v2913_v59  ;;  %v2977_v7 = vrot.slane %v2963_v57, %v11292_v52  ;;  %v2774_v21 = vsub.f32 %v12121_v49, %v12125_v0  ;;  %v2997_v4 = vrot.slane %v2983_v39, %v11278_v28 }
 0x5cd   :  { %16263 = vst [vmem:[#allocation121_spill] sm:$0xff] %v12242_v54  ;;  %3055 = vrot.lane.b32.xlu1 %v2961_v23, %s11125_s0  ;;  %v2978_v12 = vcombine.high %v12242_v54, %v16171_v63  ;;  %v3006_v24 = vrot.slane %v2998_v41, %v11278_v28  ;;  %v2979_v47 = vcombine.high %v2961_v23, %v16171_v63 }
 0x5ce   :  { %v2980_v31 = vcombine.high %v2970_v26, %v16171_v63  ;;  %v3013_v27 = vrot.slane %v2999_v56, %v11278_v28  ;;  %v2981_v46 = vcombine.high %v2977_v7, %v16171_v63  ;;  %v2802_v59 = vadd.f32 %v2782_v55, %v2774_v21 }
 0x5cf   :  { %3051 = vrot.lane.b32.xlu0 %v2978_v12, %s11132_s25  ;;  %v3014_v40 = vcombine.low %v2990_v61, %v3006_v24  ;;  %v3015_v33 = vcombine.high %v2990_v61, %v3006_v24  ;;  %v2775_v41 = vsub.f32 %v12138_v13, %v12143_v32  ;;  %v2783_v49 = vsub.f32 %v12145_v45, %v12147_v15 }
 0x5d0   :  { %v3030_v36 = vcombine.low %v2997_v4, %v3013_v27  ;;  %v3031_v9 = vcombine.high %v2997_v4, %v3013_v27  ;;  %v2806_v23 = vmul.f32 0.5, %v2802_v59  ;;  %v2776_v13 = vsub.f32 %v12157_v25, %v12159_v8 }
 0x5d1   :  { %3063 = vrot.lane.b32.xlu1 %v2970_v26, %s11122_s17  ;;  %v3022_v43 = vrot.slane %v3014_v40, %v11292_v52  ;;  %v3029_v48 = vrot.slane %v3015_v33, %v11292_v52  ;;  %v2803_v30 = vadd.f32 %v2783_v49, %v2775_v41  ;;  %v2784_v32 = vsub.f32 %v12161_v22, %v12163_v1 }
 0x5d2   :  { %v3038_v62 = vrot.slane %v3030_v36, %v11292_v52  ;;  %v3045_v45 = vrot.slane %v3031_v9, %v11292_v52  ;;  %v3128_v15 = vrot.slane %v2806_v23, %v11170_v2  ;;  %v2777_v24 = vsub.f32 %v12173_v58, %v12175_v51 }
 0x5d3   :  { %3059 = vrot.lane.b32.xlu0 %v2979_v47, %s11133_s26  ;;  %v3046_v0 = vcombine.high %v3022_v43, %v16171_v63  ;;  %v3047_v34 = vcombine.high %v3029_v48, %v16171_v63  ;;  %v2807_v11 = vmul.f32 0.5, %v2803_v30  ;;  %v2804_v57 = vadd.f32 %v2784_v32, %v2776_v13 }
 0x5d4   :  { %v3048_v12 = vcombine.high %v3038_v62, %v16171_v63  ;;  %v2785_v25 = vsub.f32 %v12177_v10, %v12179_v42  ;;  %v3049_v8 = vcombine.high %v3045_v45, %v16171_v63  ;;  %v2810_v56 = vsub.f32 %v2774_v21, %v2782_v55 }
 0x5d5   :  { %3071 = vrot.lane.b32.xlu1 %v2977_v7, %s11126_s20  ;;  %v3139_v22 = vrot.slane %v2807_v11, %v11170_v2  ;;  %v2808_v1 = vmul.f32 0.5, %v2804_v57  ;;  %v2811_v10 = vsub.f32 %v2775_v41, %v2783_v49  ;;  %v2812_v7 = vsub.f32 %v2776_v13, %v2784_v32 }
 0x5d6   :  { %v2805_v26 = vadd.f32 %v2785_v25, %v2777_v24  ;;  %v2814_v51 = vmul.f32 0.5, %v2810_v56  ;;  %v2813_v27 = vsub.f32 %v2777_v24, %v2785_v25 }
 0x5d7   :  { %3067 = vrot.lane.b32.xlu0 %v2980_v31, %s11134_s27  ;;  %v3150_v61 = vrot.slane %v2808_v1, %v11170_v2  ;;  %v2815_v40 = vmul.f32 0.5, %v2811_v10  ;;  %v2816_v31 = vmul.f32 0.5, %v2812_v7 }
 0x5d8   :  { %v2809_v47 = vmul.f32 0.5, %v2805_v26  ;;  %v3172_v42 = vrot.slane %v2814_v51, %v11170_v2 }
 0x5d9   :  { %3079 = vrot.lane.b32.xlu1 %v3022_v43, %s11127_s21  ;;  %v3183_v39 = vrot.slane %v2815_v40, %v11170_v2  ;;  %v3194_v33 = vrot.slane %v2816_v31, %v11170_v2  ;;  %v2817_v43 = vmul.f32 0.5, %v2813_v27 }
 0x5da   :  { %v3161_v58 = vrot.slane %v2809_v47, %v11170_v2 }
 0x5db   :  { %3075 = vrot.lane.b32.xlu0 %v2981_v46, %s11135_s28  ;;  %v3205_v21 = vrot.slane %v2817_v43, %v11170_v2 }
 0x5dd   :  { %3087 = vrot.lane.b32.xlu1 %v3029_v48, %s11128_s22 }
 0x5df   :  { %3083 = vrot.lane.b32.xlu0 %v3046_v0, %s11136_s29 }
 0x5e1   :  { %3095 = vrot.lane.b32.xlu1 %v3038_v62, %s11129_s23 }
 0x5e3   :  { %3091 = vrot.lane.b32.xlu0 %v3047_v34, %s11137_s30 }
 0x5e5   :  { %3103 = vrot.lane.b32.xlu1 %v3045_v45, %s11130_s24 }
 0x5e7   :  { %3099 = vrot.lane.b32.xlu0 %v3048_v12, %s11138_s2 }
 0x5e9   :  { %3130 = vbcast.lane.b32.xlu1 %v3128_v15, 256 }
 0x5eb   :  { %3107 = vrot.lane.b32.xlu0 %v3049_v8, %s11139_s3 }
 0x5ed   :  { %3141 = vbcast.lane.b32.xlu1 %v3139_v22, 256 }
 0x5ef   :  { %3134 = vbcast.lane.b32.xlu0 %v3128_v15, 264 }
 0x5f1   :  { %3152 = vbcast.lane.b32.xlu1 %v3150_v61, 256 }
 0x5f3   :  { %3145 = vbcast.lane.b32.xlu0 %v3139_v22, 264 }
 0x5f5   :  { %3163 = vbcast.lane.b32.xlu1 %v3161_v58, 256 }
 0x5f7   :  { %3156 = vbcast.lane.b32.xlu0 %v3150_v61, 264 }
 0x5f9   :  { %3174 = vbcast.lane.b32.xlu1 %v3172_v42, 256 }
 0x5fb   :  { %3167 = vbcast.lane.b32.xlu0 %v3161_v58, 264 }
 0x5fd   :  { %3185 = vbcast.lane.b32.xlu1 %v3183_v39, 256 }
 0x5ff   :  { %3178 = vbcast.lane.b32.xlu0 %v3172_v42, 264 }
 0x601   :  { %3196 = vbcast.lane.b32.xlu1 %v3194_v33, 256 }
 0x603   :  { %3189 = vbcast.lane.b32.xlu0 %v3183_v39, 264 }
 0x605   :  { %3207 = vbcast.lane.b32.xlu1 %v3205_v21, 256 }
 0x607   :  { %3200 = vbcast.lane.b32.xlu0 %v3194_v33, 264 }
 0x60b   :  { %3211 = vbcast.lane.b32.xlu0 %v3205_v21, 264 }
 0x63f   :  { %v12304_v55 = vpop.permute.xlu1 %3055 }
 0x640   :  { %16264 = vst [vmem:[#allocation122_spill] sm:$0xff] %v12304_v55 }
 0x641   :  { %v12306_v4 = vpop.permute.xlu0 %3051 }
 0x642   :  { %16265 = vst [vmem:[#allocation123_spill] sm:$0xff] %v12306_v4 }
 0x643   :  { %v12308_v46 = vpop.permute.xlu1 %3063 }
 0x644   :  { %16266 = vst [vmem:[#allocation124_spill] sm:$0xff] %v12308_v46 }
 0x645   :  { %v12310_v36 = vpop.permute.xlu0 %3059 }
 0x646   :  { %16267 = vst [vmem:[#allocation125_spill] sm:$0xff] %v12310_v36 }
 0x647   :  { %v12312_v48 = vpop.permute.xlu1 %3071 }
 0x648   :  { %16268 = vst [vmem:[#allocation126_spill] sm:$0xff] %v12312_v48 }
 0x649   :  { %v12314_v59 = vpop.permute.xlu0 %3067 }
 0x64a   :  { %16269 = vst [vmem:[#allocation127_spill] sm:$0xff] %v12314_v59 }
 0x64b   :  { %v12316_v41 = vpop.permute.xlu1 %3079 }
 0x64c   :  { %16270 = vst [vmem:[#allocation128_spill] sm:$0xff] %v12316_v41 }
 0x64d   :  { %v12318_v49 = vpop.permute.xlu0 %3075 }
 0x64e   :  { %16271 = vst [vmem:[#allocation129_spill] sm:$0xff] %v12318_v49 }
 0x64f   :  { %v12320_v0 = vpop.permute.xlu1 %3087 }
 0x650   :  { %16272 = vst [vmem:[#allocation130_spill] sm:$0xff] %v12320_v0 }
 0x651   :  { %v12322_v9 = vpop.permute.xlu0 %3083 }
 0x652   :  { %16273 = vst [vmem:[#allocation131_spill] sm:$0xff] %v12322_v9 }
 0x653   :  { %v12324_v62 = vpop.permute.xlu1 %3095 }
 0x654   :  { %16274 = vst [vmem:[#allocation132_spill] sm:$0xff] %v12324_v62  ;;  %v12413_v62 = vld [vmem:[#allocation2 + $0xc5] sm:$0x1] }
 0x655   :  { %v12326_v23 = vpop.permute.xlu0 %3091 }
 0x656   :  { %16275 = vst [vmem:[#allocation133_spill] sm:$0xff] %v12326_v23  ;;  %v12415_v23 = vld [vmem:[#allocation2 + $0xd5] sm:$0x1] }
 0x657   :  { %v12328_v30 = vpop.permute.xlu1 %3103  ;;  %v3451_v9 = vadd.f32 %v12415_v23, %v12413_v62 }
 0x658   :  { %16276 = vst [vmem:[#allocation134_spill] sm:$0xff] %v12328_v30 }
 0x659   :  { %v12330_v34 = vpop.permute.xlu0 %3099 }
 0x65a   :  { %16277 = vst [vmem:[#allocation135_spill] sm:$0xff] %v12330_v34 }
 0x65b   :  { %v3131_v13 = vpop.permute.xlu1 %3130 }
 0x65d   :  { %v12332_v32 = vpop.permute.xlu0 %3107 }
 0x65e   :  { %16278 = vst [vmem:[#allocation136_spill] sm:$0xff] %v12332_v32 }
 0x65f   :  { %v3142_v45 = vpop.permute.xlu1 %3141 }
 0x661   :  { %v3135_v15 = vpop.permute.xlu0 %3134 }
 0x663   :  { %v3153_v11 = vpop.permute.xlu1 %3152 }
 0x665   :  { %v3146_v12 = vpop.permute.xlu0 %3145 }
 0x667   :  { %v3164_v57 = vpop.permute.xlu1 %3163 }
 0x669   :  { %v3157_v24 = vpop.permute.xlu0 %3156 }
 0x66b   :  { %v3175_v25 = vpop.permute.xlu1 %3174 }
 0x66c   :  { %v3213_v56 = vsel %vm178_vm0, %v3131_v13, %v3175_v25 }
 0x66d   :  { %v3168_v8 = vpop.permute.xlu0 %3167 }
 0x66f   :  { %v3186_v22 = vpop.permute.xlu1 %3185 }
 0x670   :  { %v3215_v10 = vsel %vm178_vm0, %v3142_v45, %v3186_v22 }
 0x671   :  { %v3179_v1 = vpop.permute.xlu0 %3178 }
 0x673   :  { %v3197_v26 = vpop.permute.xlu1 %3196 }
 0x674   :  { %v3217_v61 = vsel %vm178_vm0, %v3153_v11, %v3197_v26 }
 0x675   :  { %v3190_v47 = vpop.permute.xlu0 %3189  ;;  %v3221_v58 = vcombine.low %v3213_v56, %v3217_v61  ;;  %v3222_v40 = vcombine.high %v3213_v56, %v3217_v61 }
 0x676   :  { %v3216_v26 = vsel %vm178_vm0, %v3146_v12, %v3190_v47 }
 0x677   :  { %v3208_v51 = vpop.permute.xlu1 %3207  ;;  %v3229_v27 = vrot.slane %v3221_v58, %v11278_v28  ;;  %v3236_v21 = vrot.slane %v3222_v40, %v11278_v28 }
 0x678   :  { %v3219_v42 = vsel %vm178_vm0, %v3164_v57, %v3208_v51  ;;  %v3214_v51 = vsel %vm178_vm0, %v3135_v15, %v3179_v1 }
 0x679   :  { %v3237_v7 = vcombine.low %v3215_v10, %v3219_v42  ;;  %v3238_v39 = vcombine.high %v3215_v10, %v3219_v42  ;;  %v3201_v31 = vpop.permute.xlu0 %3200 }
 0x67a   :  { %v3218_v45 = vsel %vm178_vm0, %v3157_v24, %v3201_v31 }
 0x67b   :  { %v3245_v33 = vrot.slane %v3237_v7, %v11278_v28  ;;  %v3252_v43 = vrot.slane %v3238_v39, %v11278_v28  ;;  %v3289_v10 = vcombine.low %v3214_v51, %v3218_v45  ;;  %v12361_v39 = vld [vmem:[#allocation2 + $0x5] sm:$0x1]  ;;  %v3290_v31 = vcombine.high %v3214_v51, %v3218_v45 }
 0x67c   :  { %v12385_v51 = vld [vmem:[#allocation2 + $0x65] sm:$0x1] }
 0x67d   :  { %v3253_v11 = vcombine.low %v3229_v27, %v3245_v33  ;;  %v3254_v13 = vcombine.high %v3229_v27, %v3245_v33  ;;  %v3212_v25 = vpop.permute.xlu0 %3211  ;;  %v3269_v58 = vcombine.low %v3236_v21, %v3252_v43  ;;  %v3270_v12 = vcombine.high %v3236_v21, %v3252_v43  ;;  %v12365_v33 = vld [vmem:[#allocation2 + $0x15] sm:$0x1]  ;;  %v12367_v43 = vld [vmem:[#allocation2 + $0x25] sm:$0x1] }
 0x67e   :  { %v3220_v57 = vsel %vm178_vm0, %v3168_v8, %v3212_v25  ;;  %v3297_v47 = vrot.slane %v3289_v10, %v11278_v28  ;;  %v12369_v21 = vld [vmem:[#allocation2 + $0x35] sm:$0x1] }
 0x67f   :  { %v12346_v22 = vrot.slane %v3253_v11, %v11292_v52  ;;  %v3305_v61 = vcombine.low %v3216_v26, %v3220_v57  ;;  %v3268_v56 = vrot.slane %v3254_v13, %v11292_v52  ;;  %v3277_v8 = vrot.slane %v3269_v58, %v11292_v52  ;;  %v12383_v58 = vld [vmem:[#allocation2 + $0x55] sm:$0x1] }
 0x680   :  { %v3306_v15 = vcombine.high %v3216_v26, %v3220_v57  ;;  %v3284_v7 = vrot.slane %v3270_v12, %v11292_v52  ;;  %v3448_v26 = vadd.f32 %v12365_v33, %v12361_v39  ;;  %v3456_v45 = vadd.f32 %v12369_v21, %v12367_v43  ;;  %v12378_v57 = vld [vmem:[#allocation2 + $0x45] sm:$0x1]  ;;  %v12387_v10 = vld [vmem:[#allocation2 + $0x75] sm:$0x1] }
 0x681   :  { %16279 = vst [vmem:[#allocation137_spill] sm:$0xff] %v12346_v22  ;;  %3362 = vrot.lane.b32.xlu0 %v3268_v56, %s11125_s0  ;;  %v3285_v42 = vcombine.high %v12346_v22, %v16171_v63  ;;  %v3313_v24 = vrot.slane %v3305_v61, %v11278_v28  ;;  %v3286_v40 = vcombine.high %v3268_v56, %v16171_v63 }
 0x682   :  { %v3287_v27 = vcombine.high %v3277_v8, %v16171_v63  ;;  %v3320_v11 = vrot.slane %v3306_v15, %v11278_v28  ;;  %v3304_v61 = vrot.slane %v3290_v31, %v11278_v28  ;;  %v3288_v56 = vcombine.high %v3284_v7, %v16171_v63  ;;  %v12397_v15 = vld [vmem:[#allocation2 + $0x85] sm:$0x1]  ;;  %v12403_v31 = vld [vmem:[#allocation2 + $0xb5] sm:$0x1] }
 0x683   :  { %3358 = vrot.lane.b32.xlu1 %v3285_v42, %s11132_s25  ;;  %v3321_v1 = vcombine.low %v3297_v47, %v3313_v24  ;;  %v3322_v13 = vcombine.high %v3297_v47, %v3313_v24  ;;  %v3464_v24 = vadd.f32 %v3456_v45, %v3448_v26  ;;  %v3457_v47 = vadd.f32 %v12387_v10, %v12385_v51 }
 0x684   :  { %v3337_v42 = vcombine.low %v3304_v61, %v3320_v11  ;;  %v3472_v48 = vsub.f32 %v3448_v26, %v3456_v45 }
 0x685   :  { %3370 = vrot.lane.b32.xlu0 %v3277_v8, %s11122_s17  ;;  %v3329_v25 = vrot.slane %v3321_v1, %v11292_v52  ;;  %v3336_v12 = vrot.slane %v3322_v13, %v11292_v52  ;;  %v3449_v8 = vadd.f32 %v12383_v58, %v12378_v57  ;;  %v12399_v1 = vld [vmem:[#allocation2 + $0x95] sm:$0x1] }
 0x686   :  { %v3345_v13 = vrot.slane %v3337_v42, %v11292_v52  ;;  %v3476_v46 = vmul.f32 0.5, %v3472_v48 }
 0x687   :  { %3366 = vrot.lane.b32.xlu1 %v3286_v40, %s11133_s26  ;;  %v3353_v40 = vcombine.high %v3329_v25, %v16171_v63  ;;  %v3465_v32 = vadd.f32 %v3457_v47, %v3449_v8  ;;  %v3354_v30 = vcombine.high %v3336_v12, %v16171_v63 }
 0x689   :  { %3378 = vrot.lane.b32.xlu0 %v3284_v7, %s11126_s20  ;;  %v12401_v7 = vld [vmem:[#allocation2 + $0xa5] sm:$0x1] }
 0x68a   :  { %v3458_v34 = vadd.f32 %v12403_v31, %v12401_v7 }
 0x68b   :  { %3374 = vrot.lane.b32.xlu1 %v3287_v27, %s11134_s27  ;;  %v3338_v27 = vcombine.high %v3304_v61, %v3320_v11  ;;  %v12417_v11 = vld [vmem:[#allocation2 + $0xe5] sm:$0x1]  ;;  %v12419_v61 = vld [vmem:[#allocation2 + $0xf5] sm:$0x1] }
 0x68c   :  { %v3459_v41 = vadd.f32 %v12419_v61, %v12417_v11 }
 0x68d   :  { %3386 = vrot.lane.b32.xlu0 %v3329_v25, %s11127_s21  ;;  %v3450_v25 = vadd.f32 %v12399_v1, %v12397_v15  ;;  %v3352_v42 = vrot.slane %v3338_v27, %v11292_v52 }
 0x68f   :  { %3382 = vrot.lane.b32.xlu1 %v3288_v56, %s11135_s28  ;;  %v3468_v56 = vmul.f32 0.5, %v3464_v24  ;;  %v3469_v24 = vmul.f32 0.5, %v3465_v32  ;;  %v3466_v0 = vadd.f32 %v3458_v34, %v3450_v25  ;;  %v3467_v32 = vadd.f32 %v3459_v41, %v3451_v9 }
 0x691   :  { %3394 = vrot.lane.b32.xlu0 %v3336_v12, %s11128_s22  ;;  %v3499_v12 = vrot.slane %v3468_v56, %v11170_v2  ;;  %v3510_v27 = vrot.slane %v3469_v24, %v11170_v2  ;;  %v3470_v56 = vmul.f32 0.5, %v3466_v0  ;;  %v3471_v49 = vmul.f32 0.5, %v3467_v32 }
 0x692   :  { %v3474_v0 = vsub.f32 %v3450_v25, %v3458_v34 }
 0x693   :  { %3390 = vrot.lane.b32.xlu1 %v3353_v40, %s11136_s29  ;;  %v3355_v40 = vcombine.high %v3345_v13, %v16171_v63  ;;  %v3532_v59 = vrot.slane %v3471_v49, %v11170_v2 }
 0x694   :  { %v3478_v36 = vmul.f32 0.5, %v3474_v0 }
 0x695   :  { %3402 = vrot.lane.b32.xlu0 %v3345_v13, %s11129_s23  ;;  %v3521_v13 = vrot.slane %v3470_v56, %v11170_v2  ;;  %v3475_v56 = vsub.f32 %v3451_v9, %v3459_v41 }
 0x696   :  { %v3565_v26 = vrot.slane %v3478_v36, %v11170_v2 }
 0x697   :  { %3398 = vrot.lane.b32.xlu1 %v3354_v30, %s11137_s30  ;;  %v3356_v30 = vcombine.high %v3352_v42, %v16171_v63  ;;  %v3479_v45 = vmul.f32 0.5, %v3475_v56 }
 0x699   :  { %3410 = vrot.lane.b32.xlu0 %v3352_v42, %s11130_s24  ;;  %v3543_v42 = vrot.slane %v3476_v46, %v11170_v2  ;;  %v3576_v48 = vrot.slane %v3479_v45, %v11170_v2 }
 0x69b   :  { %3406 = vrot.lane.b32.xlu1 %v3355_v40, %s11138_s2  ;;  %v3473_v40 = vsub.f32 %v3449_v8, %v3457_v47 }
 0x69d   :  { %3501 = vbcast.lane.b32.xlu0 %v3499_v12, 256  ;;  %v3477_v24 = vmul.f32 0.5, %v3473_v40 }
 0x69f   :  { %3414 = vrot.lane.b32.xlu1 %v3356_v30, %s11139_s3  ;;  %v3554_v30 = vrot.slane %v3477_v24, %v11170_v2 }
 0x6a1   :  { %3512 = vbcast.lane.b32.xlu0 %v3510_v27, 256 }
 0x6a3   :  { %3505 = vbcast.lane.b32.xlu1 %v3499_v12, 264 }
 0x6a5   :  { %3523 = vbcast.lane.b32.xlu0 %v3521_v13, 256 }
 0x6a7   :  { %3516 = vbcast.lane.b32.xlu1 %v3510_v27, 264 }
 0x6a9   :  { %3534 = vbcast.lane.b32.xlu0 %v3532_v59, 256 }
 0x6ab   :  { %3527 = vbcast.lane.b32.xlu1 %v3521_v13, 264 }
 0x6ad   :  { %3545 = vbcast.lane.b32.xlu0 %v3543_v42, 256 }
 0x6af   :  { %3538 = vbcast.lane.b32.xlu1 %v3532_v59, 264 }
 0x6b1   :  { %3556 = vbcast.lane.b32.xlu0 %v3554_v30, 256 }
 0x6b3   :  { %3549 = vbcast.lane.b32.xlu1 %v3543_v42, 264 }
 0x6b5   :  { %3567 = vbcast.lane.b32.xlu0 %v3565_v26, 256 }
 0x6b7   :  { %3560 = vbcast.lane.b32.xlu1 %v3554_v30, 264 }
 0x6b9   :  { %3578 = vbcast.lane.b32.xlu0 %v3576_v48, 256 }
 0x6bb   :  { %3571 = vbcast.lane.b32.xlu1 %v3565_v26, 264 }
 0x6bf   :  { %3582 = vbcast.lane.b32.xlu1 %v3576_v48, 264 }
 0x6f3   :  { %v12440_v46 = vpop.permute.xlu0 %3362 }
 0x6f4   :  { %16280 = vst [vmem:[#allocation138_spill] sm:$0xff] %v12440_v46 }
 0x6f5   :  { %v12442_v49 = vpop.permute.xlu1 %3358 }
 0x6f6   :  { %16281 = vst [vmem:[#allocation139_spill] sm:$0xff] %v12442_v49 }
 0x6f7   :  { %v12444_v34 = vpop.permute.xlu0 %3370 }
 0x6f8   :  { %16282 = vst [vmem:[#allocation140_spill] sm:$0xff] %v12444_v34 }
 0x6f9   :  { %v12446_v41 = vpop.permute.xlu1 %3366 }
 0x6fa   :  { %16283 = vst [vmem:[#allocation141_spill] sm:$0xff] %v12446_v41 }
 0x6fb   :  { %v12448_v59 = vpop.permute.xlu0 %3378 }
 0x6fc   :  { %16284 = vst [vmem:[#allocation142_spill] sm:$0xff] %v12448_v59 }
 0x6fd   :  { %v12450_v36 = vpop.permute.xlu1 %3374 }
 0x6fe   :  { %16285 = vst [vmem:[#allocation143_spill] sm:$0xff] %v12450_v36 }
 0x6ff   :  { %v12452_v9 = vpop.permute.xlu0 %3386 }
 0x700   :  { %16286 = vst [vmem:[#allocation144_spill] sm:$0xff] %v12452_v9 }
 0x701   :  { %v12454_v8 = vpop.permute.xlu1 %3382 }
 0x702   :  { %16287 = vst [vmem:[#allocation145_spill] sm:$0xff] %v12454_v8 }
 0x703   :  { %v12456_v47 = vpop.permute.xlu0 %3394 }
 0x704   :  { %16288 = vst [vmem:[#allocation146_spill] sm:$0xff] %v12456_v47 }
 0x705   :  { %v12458_v25 = vpop.permute.xlu1 %3390 }
 0x706   :  { %16289 = vst [vmem:[#allocation147_spill] sm:$0xff] %v12458_v25 }
 0x707   :  { %v12460_v12 = vpop.permute.xlu0 %3402 }
 0x708   :  { %16290 = vst [vmem:[#allocation148_spill] sm:$0xff] %v12460_v12 }
 0x709   :  { %v12462_v27 = vpop.permute.xlu1 %3398 }
 0x70a   :  { %16291 = vst [vmem:[#allocation149_spill] sm:$0xff] %v12462_v27 }
 0x70b   :  { %v12464_v32 = vpop.permute.xlu0 %3410 }
 0x70c   :  { %16292 = vst [vmem:[#allocation150_spill] sm:$0xff] %v12464_v32 }
 0x70d   :  { %v12466_v13 = vpop.permute.xlu1 %3406 }
 0x70e   :  { %16293 = vst [vmem:[#allocation151_spill] sm:$0xff] %v12466_v13 }
 0x70f   :  { %v3502_v40 = vpop.permute.xlu0 %3501 }
 0x711   :  { %v12468_v42 = vpop.permute.xlu1 %3414 }
 0x712   :  { %16294 = vst [vmem:[#allocation152_spill] sm:$0xff] %v12468_v42 }
 0x713   :  { %v3513_v24 = vpop.permute.xlu0 %3512 }
 0x715   :  { %v3506_v0 = vpop.permute.xlu1 %3505 }
 0x717   :  { %v3524_v30 = vpop.permute.xlu0 %3523 }
 0x719   :  { %v3517_v56 = vpop.permute.xlu1 %3516 }
 0x71b   :  { %v3535_v26 = vpop.permute.xlu0 %3534 }
 0x71d   :  { %v3528_v45 = vpop.permute.xlu1 %3527 }
 0x71f   :  { %v3546_v48 = vpop.permute.xlu0 %3545 }
 0x720   :  { %v3584_v32 = vsel %vm178_vm0, %v3502_v40, %v3546_v48 }
 0x721   :  { %v3539_v55 = vpop.permute.xlu1 %3538 }
 0x723   :  { %v3557_v54 = vpop.permute.xlu0 %3556 }
 0x724   :  { %v3586_v42 = vsel %vm178_vm0, %v3513_v24, %v3557_v54 }
 0x725   :  { %v3550_v4 = vpop.permute.xlu1 %3549 }
 0x727   :  { %v3568_v12 = vpop.permute.xlu0 %3567 }
 0x728   :  { %v3588_v27 = vsel %vm178_vm0, %v3524_v30, %v3568_v12 }
 0x729   :  { %v3561_v47 = vpop.permute.xlu1 %3560  ;;  %v3592_v13 = vcombine.low %v3584_v32, %v3588_v27  ;;  %v3593_v8 = vcombine.high %v3584_v32, %v3588_v27 }
 0x72a   :  { %v3587_v22 = vsel %vm178_vm0, %v3517_v56, %v3561_v47 }
 0x72b   :  { %v3579_v25 = vpop.permute.xlu0 %3578  ;;  %v3600_v41 = vrot.slane %v3592_v13, %v11278_v28  ;;  %v3607_v12 = vrot.slane %v3593_v8, %v11278_v28 }
 0x72c   :  { %v3590_v9 = vsel %vm178_vm0, %v3535_v26, %v3579_v25 }
 0x72d   :  { %v3608_v59 = vcombine.low %v3586_v42, %v3590_v9  ;;  %v3609_v36 = vcombine.high %v3586_v42, %v3590_v9  ;;  %v3572_v34 = vpop.permute.xlu1 %3571 }
 0x72e   :  { %v3589_v54 = vsel %vm178_vm0, %v3528_v45, %v3572_v34 }
 0x72f   :  { %v3616_v46 = vrot.slane %v3608_v59, %v11278_v28  ;;  %v3623_v53 = vrot.slane %v3609_v36, %v11278_v28  ;;  %v3585_v36 = vsel %vm178_vm0, %v3506_v0, %v3550_v4 }
 0x730   :  { %v3660_v13 = vcombine.low %v3585_v36, %v3589_v54  ;;  %v3661_v0 = vcombine.high %v3585_v36, %v3589_v54 }
 0x731   :  { %v3624_v30 = vcombine.low %v3600_v41, %v3616_v46  ;;  %v3625_v40 = vcombine.high %v3600_v41, %v3616_v46  ;;  %v3583_v48 = vpop.permute.xlu1 %3582  ;;  %v3640_v59 = vcombine.low %v3607_v12, %v3623_v53  ;;  %v3641_v41 = vcombine.high %v3607_v12, %v3623_v53 }
 0x732   :  { %v3591_v25 = vsel %vm178_vm0, %v3539_v55, %v3583_v48  ;;  %v3668_v8 = vrot.slane %v3660_v13, %v11278_v28  ;;  %v3460_v12 = vsub.f32 %v12367_v43, %v12369_v21 }
 0x733   :  { %v12482_v9 = vrot.slane %v3624_v30, %v11292_v52  ;;  %v3676_v27 = vcombine.low %v3587_v22, %v3591_v25  ;;  %v3639_v32 = vrot.slane %v3625_v40, %v11292_v52  ;;  %v3648_v55 = vrot.slane %v3640_v59, %v11292_v52 }
 0x734   :  { %v3677_v4 = vcombine.high %v3587_v22, %v3591_v25  ;;  %v3655_v24 = vrot.slane %v3641_v41, %v11292_v52  ;;  %v3452_v22 = vsub.f32 %v12361_v39, %v12365_v33  ;;  %v3675_v30 = vrot.slane %v3661_v0, %v11278_v28 }
 0x735   :  { %16295 = vst [vmem:[#allocation153_spill] sm:$0xff] %v12482_v9  ;;  %3733 = vrot.lane.b32.xlu1 %v3639_v32, %s11125_s0  ;;  %v3656_v46 = vcombine.high %v12482_v9, %v16171_v63  ;;  %v3684_v34 = vrot.slane %v3676_v27, %v11278_v28  ;;  %v3657_v47 = vcombine.high %v3639_v32, %v16171_v63 }
 0x736   :  { %v3658_v53 = vcombine.high %v3648_v55, %v16171_v63  ;;  %v3691_v56 = vrot.slane %v3677_v4, %v11278_v28  ;;  %v3659_v40 = vcombine.high %v3655_v24, %v16171_v63  ;;  %v3480_v25 = vadd.f32 %v3460_v12, %v3452_v22 }
 0x737   :  { %3729 = vrot.lane.b32.xlu0 %v3656_v46, %s11132_s25  ;;  %v3692_v42 = vcombine.low %v3668_v8, %v3684_v34  ;;  %v3693_v26 = vcombine.high %v3668_v8, %v3684_v34  ;;  %v3453_v27 = vsub.f32 %v12378_v57, %v12383_v58  ;;  %v3461_v39 = vsub.f32 %v12385_v51, %v12387_v10 }
 0x738   :  { %v3708_v48 = vcombine.low %v3675_v30, %v3691_v56  ;;  %v3709_v43 = vcombine.high %v3675_v30, %v3691_v56  ;;  %v3484_v32 = vmul.f32 0.5, %v3480_v25  ;;  %v3454_v57 = vsub.f32 %v12397_v15, %v12399_v1 }
 0x739   :  { %3741 = vrot.lane.b32.xlu1 %v3648_v55, %s11122_s17  ;;  %v3700_v45 = vrot.slane %v3692_v42, %v11292_v52  ;;  %v3707_v54 = vrot.slane %v3693_v26, %v11292_v52  ;;  %v3481_v59 = vadd.f32 %v3461_v39, %v3453_v27  ;;  %v3462_v58 = vsub.f32 %v12401_v7, %v12403_v31 }
 0x73a   :  { %v3716_v21 = vrot.slane %v3708_v48, %v11292_v52  ;;  %v3723_v51 = vrot.slane %v3709_v43, %v11292_v52  ;;  %v3806_v10 = vrot.slane %v3484_v32, %v11170_v2  ;;  %v3455_v34 = vsub.f32 %v12413_v62, %v12415_v23 }
 0x73b   :  { %3737 = vrot.lane.b32.xlu0 %v3657_v47, %s11133_s26  ;;  %v3724_v33 = vcombine.high %v3700_v45, %v16171_v63  ;;  %v3725_v36 = vcombine.high %v3707_v54, %v16171_v63  ;;  %v3485_v13 = vmul.f32 0.5, %v3481_v59  ;;  %v3482_v41 = vadd.f32 %v3462_v58, %v3454_v57 }
 0x73c   :  { %v3726_v46 = vcombine.high %v3716_v21, %v16171_v63  ;;  %v3463_v15 = vsub.f32 %v12417_v11, %v12419_v61  ;;  %v3727_v1 = vcombine.high %v3723_v51, %v16171_v63  ;;  %v3488_v4 = vsub.f32 %v3452_v22, %v3460_v12 }
 0x73d   :  { %3749 = vrot.lane.b32.xlu1 %v3655_v24, %s11126_s20  ;;  %v3817_v7 = vrot.slane %v3485_v13, %v11170_v2  ;;  %v3486_v31 = vmul.f32 0.5, %v3482_v41  ;;  %v3489_v11 = vsub.f32 %v3453_v27, %v3461_v39  ;;  %v3490_v24 = vsub.f32 %v3454_v57, %v3462_v58 }
 0x73e   :  { %v3483_v55 = vadd.f32 %v3463_v15, %v3455_v34  ;;  %v3492_v23 = vmul.f32 0.5, %v3488_v4  ;;  %v3491_v56 = vsub.f32 %v3455_v34, %v3463_v15 }
 0x73f   :  { %3745 = vrot.lane.b32.xlu0 %v3658_v53, %s11134_s27  ;;  %v3828_v8 = vrot.slane %v3486_v31, %v11170_v2  ;;  %v3493_v42 = vmul.f32 0.5, %v3489_v11  ;;  %v3494_v53 = vmul.f32 0.5, %v3490_v24 }
 0x740   :  { %v3487_v47 = vmul.f32 0.5, %v3483_v55  ;;  %v3850_v61 = vrot.slane %v3492_v23, %v11170_v2 }
 0x741   :  { %3757 = vrot.lane.b32.xlu1 %v3700_v45, %s11127_s21  ;;  %v3861_v0 = vrot.slane %v3493_v42, %v11170_v2  ;;  %v3872_v26 = vrot.slane %v3494_v53, %v11170_v2  ;;  %v3495_v45 = vmul.f32 0.5, %v3491_v56 }
 0x742   :  { %v3839_v62 = vrot.slane %v3487_v47, %v11170_v2 }
 0x743   :  { %3753 = vrot.lane.b32.xlu0 %v3659_v40, %s11135_s28  ;;  %v3883_v22 = vrot.slane %v3495_v45, %v11170_v2 }
 0x745   :  { %3765 = vrot.lane.b32.xlu1 %v3707_v54, %s11128_s22 }
 0x747   :  { %3761 = vrot.lane.b32.xlu0 %v3724_v33, %s11136_s29 }
 0x749   :  { %3773 = vrot.lane.b32.xlu1 %v3716_v21, %s11129_s23 }
 0x74b   :  { %3769 = vrot.lane.b32.xlu0 %v3725_v36, %s11137_s30 }
 0x74d   :  { %3781 = vrot.lane.b32.xlu1 %v3723_v51, %s11130_s24 }
 0x74f   :  { %3777 = vrot.lane.b32.xlu0 %v3726_v46, %s11138_s2 }
 0x751   :  { %3808 = vbcast.lane.b32.xlu1 %v3806_v10, 256 }
 0x753   :  { %3785 = vrot.lane.b32.xlu0 %v3727_v1, %s11139_s3 }
 0x755   :  { %3819 = vbcast.lane.b32.xlu1 %v3817_v7, 256 }
 0x757   :  { %3812 = vbcast.lane.b32.xlu0 %v3806_v10, 264 }
 0x759   :  { %3830 = vbcast.lane.b32.xlu1 %v3828_v8, 256 }
 0x75b   :  { %3823 = vbcast.lane.b32.xlu0 %v3817_v7, 264 }
 0x75d   :  { %3841 = vbcast.lane.b32.xlu1 %v3839_v62, 256 }
 0x75f   :  { %3834 = vbcast.lane.b32.xlu0 %v3828_v8, 264 }
 0x761   :  { %3852 = vbcast.lane.b32.xlu1 %v3850_v61, 256 }
 0x763   :  { %3845 = vbcast.lane.b32.xlu0 %v3839_v62, 264 }
 0x765   :  { %3863 = vbcast.lane.b32.xlu1 %v3861_v0, 256 }
 0x767   :  { %3856 = vbcast.lane.b32.xlu0 %v3850_v61, 264 }
 0x769   :  { %3874 = vbcast.lane.b32.xlu1 %v3872_v26, 256 }
 0x76b   :  { %3867 = vbcast.lane.b32.xlu0 %v3861_v0, 264 }
 0x76d   :  { %3885 = vbcast.lane.b32.xlu1 %v3883_v22, 256 }
 0x76f   :  { %3878 = vbcast.lane.b32.xlu0 %v3872_v26, 264 }
 0x773   :  { %3889 = vbcast.lane.b32.xlu0 %v3883_v22, 264 }
 0x7a7   :  { %v12544_v12 = vpop.permute.xlu1 %3733 }
 0x7a8   :  { %16296 = vst [vmem:[#allocation154_spill] sm:$0xff] %v12544_v12 }
 0x7a9   :  { %v12546_v30 = vpop.permute.xlu0 %3729 }
 0x7aa   :  { %16297 = vst [vmem:[#allocation155_spill] sm:$0xff] %v12546_v30 }
 0x7ab   :  { %v12548_v40 = vpop.permute.xlu1 %3741 }
 0x7ac   :  { %16298 = vst [vmem:[#allocation156_spill] sm:$0xff] %v12548_v40 }
 0x7ad   :  { %v12550_v48 = vpop.permute.xlu0 %3737 }
 0x7ae   :  { %16299 = vst [vmem:[#allocation157_spill] sm:$0xff] %v12550_v48 }
 0x7af   :  { %v12552_v54 = vpop.permute.xlu1 %3749 }
 0x7b0   :  { %16300 = vst [vmem:[#allocation158_spill] sm:$0xff] %v12552_v54 }
 0x7b1   :  { %v12554_v25 = vpop.permute.xlu0 %3745 }
 0x7b2   :  { %16301 = vst [vmem:[#allocation159_spill] sm:$0xff] %v12554_v25 }
 0x7b3   :  { %v12556_v27 = vpop.permute.xlu1 %3757 }
 0x7b4   :  { %16302 = vst [vmem:[#allocation160_spill] sm:$0xff] %v12556_v27 }
 0x7b5   :  { %v12558_v39 = vpop.permute.xlu0 %3753 }
 0x7b6   :  { %16303 = vst [vmem:[#allocation161_spill] sm:$0xff] %v12558_v39 }
 0x7b7   :  { %v12560_v33 = vpop.permute.xlu1 %3765 }
 0x7b8   :  { %16304 = vst [vmem:[#allocation162_spill] sm:$0xff] %v12560_v33 }
 0x7b9   :  { %v12562_v43 = vpop.permute.xlu0 %3761 }
 0x7ba   :  { %16305 = vst [vmem:[#allocation163_spill] sm:$0xff] %v12562_v43 }
 0x7bb   :  { %v12564_v21 = vpop.permute.xlu1 %3773 }
 0x7bc   :  { %16306 = vst [vmem:[#allocation164_spill] sm:$0xff] %v12564_v21  ;;  %v12653_v21 = vld [vmem:[#allocation2 + $0xc6] sm:$0x1] }
 0x7bd   :  { %v12566_v32 = vpop.permute.xlu0 %3769 }
 0x7be   :  { %16307 = vst [vmem:[#allocation165_spill] sm:$0xff] %v12566_v32  ;;  %v12655_v32 = vld [vmem:[#allocation2 + $0xd6] sm:$0x1] }
 0x7bf   :  { %v12568_v59 = vpop.permute.xlu1 %3781  ;;  %v4129_v43 = vadd.f32 %v12655_v32, %v12653_v21 }
 0x7c0   :  { %16308 = vst [vmem:[#allocation166_spill] sm:$0xff] %v12568_v59 }
 0x7c1   :  { %v12570_v36 = vpop.permute.xlu0 %3777 }
 0x7c2   :  { %16309 = vst [vmem:[#allocation167_spill] sm:$0xff] %v12570_v36 }
 0x7c3   :  { %v3809_v57 = vpop.permute.xlu1 %3808 }
 0x7c5   :  { %v12572_v58 = vpop.permute.xlu0 %3785 }
 0x7c6   :  { %16310 = vst [vmem:[#allocation168_spill] sm:$0xff] %v12572_v58 }
 0x7c7   :  { %v3820_v51 = vpop.permute.xlu1 %3819 }
 0x7c9   :  { %v3813_v10 = vpop.permute.xlu0 %3812 }
 0x7cb   :  { %v3831_v13 = vpop.permute.xlu1 %3830 }
 0x7cd   :  { %v3824_v46 = vpop.permute.xlu0 %3823 }
 0x7cf   :  { %v3842_v41 = vpop.permute.xlu1 %3841 }
 0x7d1   :  { %v3835_v34 = vpop.permute.xlu0 %3834 }
 0x7d3   :  { %v3853_v15 = vpop.permute.xlu1 %3852 }
 0x7d4   :  { %v3891_v4 = vsel %vm178_vm0, %v3809_v57, %v3853_v15 }
 0x7d5   :  { %v3846_v1 = vpop.permute.xlu0 %3845 }
 0x7d7   :  { %v3864_v7 = vpop.permute.xlu1 %3863 }
 0x7d8   :  { %v3893_v11 = vsel %vm178_vm0, %v3820_v51, %v3864_v7 }
 0x7d9   :  { %v3857_v31 = vpop.permute.xlu0 %3856 }
 0x7db   :  { %v3875_v55 = vpop.permute.xlu1 %3874 }
 0x7dc   :  { %v3895_v8 = vsel %vm178_vm0, %v3831_v13, %v3875_v55 }
 0x7dd   :  { %v3868_v47 = vpop.permute.xlu0 %3867  ;;  %v3899_v62 = vcombine.low %v3891_v4, %v3895_v8  ;;  %v3900_v42 = vcombine.high %v3891_v4, %v3895_v8 }
 0x7de   :  { %v3894_v55 = vsel %vm178_vm0, %v3824_v46, %v3868_v47 }
 0x7df   :  { %v3886_v23 = vpop.permute.xlu1 %3885  ;;  %v3907_v56 = vrot.slane %v3899_v62, %v11278_v28  ;;  %v3914_v22 = vrot.slane %v3900_v42, %v11278_v28 }
 0x7e0   :  { %v3897_v61 = vsel %vm178_vm0, %v3842_v41, %v3886_v23  ;;  %v3892_v23 = vsel %vm178_vm0, %v3813_v10, %v3857_v31 }
 0x7e1   :  { %v3915_v24 = vcombine.low %v3893_v11, %v3897_v61  ;;  %v3916_v0 = vcombine.high %v3893_v11, %v3897_v61  ;;  %v3879_v53 = vpop.permute.xlu0 %3878 }
 0x7e2   :  { %v3896_v51 = vsel %vm178_vm0, %v3835_v34, %v3879_v53 }
 0x7e3   :  { %v3923_v26 = vrot.slane %v3915_v24, %v11278_v28  ;;  %v3930_v45 = vrot.slane %v3916_v0, %v11278_v28  ;;  %v3967_v11 = vcombine.low %v3892_v23, %v3896_v51  ;;  %v12601_v0 = vld [vmem:[#allocation2 + $0x6] sm:$0x1]  ;;  %v3968_v53 = vcombine.high %v3892_v23, %v3896_v51 }
 0x7e4   :  { %v12625_v23 = vld [vmem:[#allocation2 + $0x66] sm:$0x1] }
 0x7e5   :  { %v3931_v13 = vcombine.low %v3907_v56, %v3923_v26  ;;  %v3932_v57 = vcombine.high %v3907_v56, %v3923_v26  ;;  %v3890_v15 = vpop.permute.xlu0 %3889  ;;  %v3947_v62 = vcombine.low %v3914_v22, %v3930_v45  ;;  %v3948_v46 = vcombine.high %v3914_v22, %v3930_v45  ;;  %v12605_v26 = vld [vmem:[#allocation2 + $0x16] sm:$0x1]  ;;  %v12607_v45 = vld [vmem:[#allocation2 + $0x26] sm:$0x1] }
 0x7e6   :  { %v3898_v41 = vsel %vm178_vm0, %v3846_v1, %v3890_v15  ;;  %v3975_v47 = vrot.slane %v3967_v11, %v11278_v28  ;;  %v12609_v22 = vld [vmem:[#allocation2 + $0x36] sm:$0x1] }
 0x7e7   :  { %v12586_v7 = vrot.slane %v3931_v13, %v11292_v52  ;;  %v3983_v8 = vcombine.low %v3894_v55, %v3898_v41  ;;  %v3946_v4 = vrot.slane %v3932_v57, %v11292_v52  ;;  %v3955_v1 = vrot.slane %v3947_v62, %v11292_v52  ;;  %v12623_v62 = vld [vmem:[#allocation2 + $0x56] sm:$0x1] }
 0x7e8   :  { %v3984_v10 = vcombine.high %v3894_v55, %v3898_v41  ;;  %v3962_v24 = vrot.slane %v3948_v46, %v11292_v52  ;;  %v4126_v55 = vadd.f32 %v12605_v26, %v12601_v0  ;;  %v4134_v51 = vadd.f32 %v12609_v22, %v12607_v45  ;;  %v12618_v41 = vld [vmem:[#allocation2 + $0x46] sm:$0x1]  ;;  %v12627_v11 = vld [vmem:[#allocation2 + $0x76] sm:$0x1] }
 0x7e9   :  { %16311 = vst [vmem:[#allocation169_spill] sm:$0xff] %v12586_v7  ;;  %4040 = vrot.lane.b32.xlu0 %v3946_v4, %s11125_s0  ;;  %v3963_v61 = vcombine.high %v12586_v7, %v16171_v63  ;;  %v3991_v34 = vrot.slane %v3983_v8, %v11278_v28  ;;  %v3964_v42 = vcombine.high %v3946_v4, %v16171_v63 }
 0x7ea   :  { %v3965_v56 = vcombine.high %v3955_v1, %v16171_v63  ;;  %v3998_v13 = vrot.slane %v3984_v10, %v11278_v28  ;;  %v3982_v8 = vrot.slane %v3968_v53, %v11278_v28  ;;  %v3966_v4 = vcombine.high %v3962_v24, %v16171_v63  ;;  %v12637_v10 = vld [vmem:[#allocation2 + $0x86] sm:$0x1]  ;;  %v12643_v53 = vld [vmem:[#allocation2 + $0xb6] sm:$0x1] }
 0x7eb   :  { %4036 = vrot.lane.b32.xlu1 %v3963_v61, %s11132_s25  ;;  %v3999_v31 = vcombine.low %v3975_v47, %v3991_v34  ;;  %v4000_v57 = vcombine.high %v3975_v47, %v3991_v34  ;;  %v4142_v34 = vadd.f32 %v4134_v51, %v4126_v55  ;;  %v4135_v47 = vadd.f32 %v12627_v11, %v12625_v23 }
 0x7ec   :  { %v4015_v61 = vcombine.low %v3982_v8, %v3998_v13  ;;  %v4150_v39 = vsub.f32 %v4126_v55, %v4134_v51 }
 0x7ed   :  { %4048 = vrot.lane.b32.xlu0 %v3955_v1, %s11122_s17  ;;  %v4007_v15 = vrot.slane %v3999_v31, %v11292_v52  ;;  %v4014_v46 = vrot.slane %v4000_v57, %v11292_v52  ;;  %v4127_v1 = vadd.f32 %v12623_v62, %v12618_v41  ;;  %v12639_v31 = vld [vmem:[#allocation2 + $0x96] sm:$0x1] }
 0x7ee   :  { %v4023_v57 = vrot.slane %v4015_v61, %v11292_v52  ;;  %v4154_v25 = vmul.f32 0.5, %v4150_v39 }
 0x7ef   :  { %4044 = vrot.lane.b32.xlu1 %v3964_v42, %s11133_s26  ;;  %v4031_v42 = vcombine.high %v4007_v15, %v16171_v63  ;;  %v4143_v58 = vadd.f32 %v4135_v47, %v4127_v1  ;;  %v4032_v59 = vcombine.high %v4014_v46, %v16171_v63 }
 0x7f1   :  { %4056 = vrot.lane.b32.xlu0 %v3962_v24, %s11126_s20  ;;  %v12641_v24 = vld [vmem:[#allocation2 + $0xa6] sm:$0x1] }
 0x7f2   :  { %v4136_v36 = vadd.f32 %v12643_v53, %v12641_v24 }
 0x7f3   :  { %4052 = vrot.lane.b32.xlu1 %v3965_v56, %s11134_s27  ;;  %v4016_v56 = vcombine.high %v3982_v8, %v3998_v13  ;;  %v12657_v13 = vld [vmem:[#allocation2 + $0xe6] sm:$0x1]  ;;  %v12659_v8 = vld [vmem:[#allocation2 + $0xf6] sm:$0x1] }
 0x7f4   :  { %v4137_v27 = vadd.f32 %v12659_v8, %v12657_v13 }
 0x7f5   :  { %4064 = vrot.lane.b32.xlu0 %v4007_v15, %s11127_s21  ;;  %v4128_v15 = vadd.f32 %v12639_v31, %v12637_v10  ;;  %v4030_v61 = vrot.slane %v4016_v56, %v11292_v52 }
 0x7f7   :  { %4060 = vrot.lane.b32.xlu1 %v3966_v4, %s11135_s28  ;;  %v4146_v4 = vmul.f32 0.5, %v4142_v34  ;;  %v4147_v34 = vmul.f32 0.5, %v4143_v58  ;;  %v4144_v33 = vadd.f32 %v4136_v36, %v4128_v15  ;;  %v4145_v58 = vadd.f32 %v4137_v27, %v4129_v43 }
 0x7f9   :  { %4072 = vrot.lane.b32.xlu0 %v4014_v46, %s11128_s22  ;;  %v4177_v46 = vrot.slane %v4146_v4, %v11170_v2  ;;  %v4188_v56 = vrot.slane %v4147_v34, %v11170_v2  ;;  %v4148_v4 = vmul.f32 0.5, %v4144_v33  ;;  %v4149_v7 = vmul.f32 0.5, %v4145_v58 }
 0x7fa   :  { %v4152_v33 = vsub.f32 %v4128_v15, %v4136_v36 }
 0x7fb   :  { %4068 = vrot.lane.b32.xlu1 %v4031_v42, %s11136_s29  ;;  %v4033_v42 = vcombine.high %v4023_v57, %v16171_v63  ;;  %v4210_v54 = vrot.slane %v4149_v7, %v11170_v2 }
 0x7fc   :  { %v4156_v40 = vmul.f32 0.5, %v4152_v33 }
 0x7fd   :  { %4080 = vrot.lane.b32.xlu0 %v4023_v57, %s11129_s23  ;;  %v4199_v57 = vrot.slane %v4148_v4, %v11170_v2  ;;  %v4153_v4 = vsub.f32 %v4129_v43, %v4137_v27 }
 0x7fe   :  { %v4243_v55 = vrot.slane %v4156_v40, %v11170_v2 }
 0x7ff   :  { %4076 = vrot.lane.b32.xlu1 %v4032_v59, %s11137_s30  ;;  %v4034_v59 = vcombine.high %v4030_v61, %v16171_v63  ;;  %v4157_v51 = vmul.f32 0.5, %v4153_v4 }
 0x801   :  { %4088 = vrot.lane.b32.xlu0 %v4030_v61, %s11130_s24  ;;  %v4221_v61 = vrot.slane %v4154_v25, %v11170_v2  ;;  %v4254_v39 = vrot.slane %v4157_v51, %v11170_v2 }
 0x803   :  { %4084 = vrot.lane.b32.xlu1 %v4033_v42, %s11138_s2  ;;  %v4151_v42 = vsub.f32 %v4127_v1, %v4135_v47 }
 0x805   :  { %4179 = vbcast.lane.b32.xlu0 %v4177_v46, 256  ;;  %v4155_v34 = vmul.f32 0.5, %v4151_v42 }
 0x807   :  { %4092 = vrot.lane.b32.xlu1 %v4034_v59, %s11139_s3  ;;  %v4232_v59 = vrot.slane %v4155_v34, %v11170_v2 }
 0x809   :  { %4190 = vbcast.lane.b32.xlu0 %v4188_v56, 256 }
 0x80b   :  { %4183 = vbcast.lane.b32.xlu1 %v4177_v46, 264 }
 0x80d   :  { %4201 = vbcast.lane.b32.xlu0 %v4199_v57, 256 }
 0x80f   :  { %4194 = vbcast.lane.b32.xlu1 %v4188_v56, 264 }
 0x811   :  { %4212 = vbcast.lane.b32.xlu0 %v4210_v54, 256 }
 0x813   :  { %4205 = vbcast.lane.b32.xlu1 %v4199_v57, 264 }
 0x815   :  { %4223 = vbcast.lane.b32.xlu0 %v4221_v61, 256 }
 0x817   :  { %4216 = vbcast.lane.b32.xlu1 %v4210_v54, 264 }
 0x819   :  { %4234 = vbcast.lane.b32.xlu0 %v4232_v59, 256 }
 0x81b   :  { %4227 = vbcast.lane.b32.xlu1 %v4221_v61, 264 }
 0x81d   :  { %4245 = vbcast.lane.b32.xlu0 %v4243_v55, 256 }
 0x81f   :  { %4238 = vbcast.lane.b32.xlu1 %v4232_v59, 264 }
 0x821   :  { %4256 = vbcast.lane.b32.xlu0 %v4254_v39, 256 }
 0x823   :  { %4249 = vbcast.lane.b32.xlu1 %v4243_v55, 264 }
 0x827   :  { %4260 = vbcast.lane.b32.xlu1 %v4254_v39, 264 }
 0x85b   :  { %v12680_v25 = vpop.permute.xlu0 %4040 }
 0x85c   :  { %16312 = vst [vmem:[#allocation170_spill] sm:$0xff] %v12680_v25 }
 0x85d   :  { %v12682_v36 = vpop.permute.xlu1 %4036 }
 0x85e   :  { %16313 = vst [vmem:[#allocation171_spill] sm:$0xff] %v12682_v36 }
 0x85f   :  { %v12684_v7 = vpop.permute.xlu0 %4048 }
 0x860   :  { %16314 = vst [vmem:[#allocation172_spill] sm:$0xff] %v12684_v7 }
 0x861   :  { %v12686_v27 = vpop.permute.xlu1 %4044 }
 0x862   :  { %16315 = vst [vmem:[#allocation173_spill] sm:$0xff] %v12686_v27 }
 0x863   :  { %v12688_v54 = vpop.permute.xlu0 %4056 }
 0x864   :  { %16316 = vst [vmem:[#allocation174_spill] sm:$0xff] %v12688_v54 }
 0x865   :  { %v12690_v40 = vpop.permute.xlu1 %4052 }
 0x866   :  { %16317 = vst [vmem:[#allocation175_spill] sm:$0xff] %v12690_v40 }
 0x867   :  { %v12692_v43 = vpop.permute.xlu0 %4064 }
 0x868   :  { %16318 = vst [vmem:[#allocation176_spill] sm:$0xff] %v12692_v43 }
 0x869   :  { %v12694_v1 = vpop.permute.xlu1 %4060 }
 0x86a   :  { %16319 = vst [vmem:[#allocation177_spill] sm:$0xff] %v12694_v1 }
 0x86b   :  { %v12696_v47 = vpop.permute.xlu0 %4072 }
 0x86c   :  { %16320 = vst [vmem:[#allocation178_spill] sm:$0xff] %v12696_v47 }
 0x86d   :  { %v12698_v15 = vpop.permute.xlu1 %4068 }
 0x86e   :  { %16321 = vst [vmem:[#allocation179_spill] sm:$0xff] %v12698_v15 }
 0x86f   :  { %v12700_v46 = vpop.permute.xlu0 %4080 }
 0x870   :  { %16322 = vst [vmem:[#allocation180_spill] sm:$0xff] %v12700_v46 }
 0x871   :  { %v12702_v56 = vpop.permute.xlu1 %4076 }
 0x872   :  { %16323 = vst [vmem:[#allocation181_spill] sm:$0xff] %v12702_v56 }
 0x873   :  { %v12704_v58 = vpop.permute.xlu0 %4088 }
 0x874   :  { %16324 = vst [vmem:[#allocation182_spill] sm:$0xff] %v12704_v58 }
 0x875   :  { %v12706_v57 = vpop.permute.xlu1 %4084 }
 0x876   :  { %16325 = vst [vmem:[#allocation183_spill] sm:$0xff] %v12706_v57 }
 0x877   :  { %v4180_v42 = vpop.permute.xlu0 %4179 }
 0x879   :  { %v12708_v61 = vpop.permute.xlu1 %4092 }
 0x87a   :  { %16326 = vst [vmem:[#allocation184_spill] sm:$0xff] %v12708_v61 }
 0x87b   :  { %v4191_v34 = vpop.permute.xlu0 %4190 }
 0x87d   :  { %v4184_v33 = vpop.permute.xlu1 %4183 }
 0x87f   :  { %v4202_v59 = vpop.permute.xlu0 %4201 }
 0x881   :  { %v4195_v4 = vpop.permute.xlu1 %4194 }
 0x883   :  { %v4213_v55 = vpop.permute.xlu0 %4212 }
 0x885   :  { %v4206_v51 = vpop.permute.xlu1 %4205 }
 0x887   :  { %v4224_v39 = vpop.permute.xlu0 %4223 }
 0x888   :  { %v4262_v58 = vsel %vm178_vm0, %v4180_v42, %v4224_v39 }
 0x889   :  { %v4217_v47 = vpop.permute.xlu1 %4216 }
 0x88b   :  { %v4235_v15 = vpop.permute.xlu0 %4234 }
 0x88c   :  { %v4264_v61 = vsel %vm178_vm0, %v4191_v34, %v4235_v15 }
 0x88d   :  { %v4228_v43 = vpop.permute.xlu1 %4227 }
 0x88f   :  { %v4246_v46 = vpop.permute.xlu0 %4245 }
 0x890   :  { %v4266_v56 = vsel %vm178_vm0, %v4202_v59, %v4246_v46 }
 0x891   :  { %v4239_v1 = vpop.permute.xlu1 %4238  ;;  %v4270_v57 = vcombine.low %v4262_v58, %v4266_v56  ;;  %v4271_v7 = vcombine.high %v4262_v58, %v4266_v56 }
 0x892   :  { %v4265_v30 = vsel %vm178_vm0, %v4195_v4, %v4239_v1 }
 0x893   :  { %v4257_v54 = vpop.permute.xlu0 %4256  ;;  %v4278_v48 = vrot.slane %v4270_v57, %v11278_v28  ;;  %v4285_v46 = vrot.slane %v4271_v7, %v11278_v28 }
 0x894   :  { %v4268_v40 = vsel %vm178_vm0, %v4213_v55, %v4257_v54 }
 0x895   :  { %v4286_v27 = vcombine.low %v4264_v61, %v4268_v40  ;;  %v4287_v25 = vcombine.high %v4264_v61, %v4268_v40  ;;  %v4250_v36 = vpop.permute.xlu1 %4249 }
 0x896   :  { %v4267_v15 = vsel %vm178_vm0, %v4206_v51, %v4250_v36 }
 0x897   :  { %v4294_v12 = vrot.slane %v4286_v27, %v11278_v28  ;;  %v4301_v9 = vrot.slane %v4287_v25, %v11278_v28  ;;  %v4263_v25 = vsel %vm178_vm0, %v4184_v33, %v4228_v43 }
 0x898   :  { %v4338_v57 = vcombine.low %v4263_v25, %v4267_v15  ;;  %v4339_v33 = vcombine.high %v4263_v25, %v4267_v15 }
 0x899   :  { %v4302_v59 = vcombine.low %v4278_v48, %v4294_v12  ;;  %v4303_v42 = vcombine.high %v4278_v48, %v4294_v12  ;;  %v4261_v39 = vpop.permute.xlu1 %4260  ;;  %v4318_v27 = vcombine.low %v4285_v46, %v4301_v9  ;;  %v4319_v48 = vcombine.high %v4285_v46, %v4301_v9 }
 0x89a   :  { %v4269_v54 = vsel %vm178_vm0, %v4217_v47, %v4261_v39  ;;  %v4346_v1 = vrot.slane %v4338_v57, %v11278_v28  ;;  %v4138_v46 = vsub.f32 %v12607_v45, %v12609_v22 }
 0x89b   :  { %v12722_v40 = vrot.slane %v4302_v59, %v11292_v52  ;;  %v4354_v56 = vcombine.low %v4265_v30, %v4269_v54  ;;  %v4317_v58 = vrot.slane %v4303_v42, %v11292_v52  ;;  %v4326_v7 = vrot.slane %v4318_v27, %v11292_v52 }
 0x89c   :  { %v4355_v43 = vcombine.high %v4265_v30, %v4269_v54  ;;  %v4333_v34 = vrot.slane %v4319_v48, %v11292_v52  ;;  %v4130_v30 = vsub.f32 %v12601_v0, %v12605_v26  ;;  %v4353_v59 = vrot.slane %v4339_v33, %v11278_v28 }
 0x89d   :  { %16327 = vst [vmem:[#allocation185_spill] sm:$0xff] %v12722_v40  ;;  %4411 = vrot.lane.b32.xlu1 %v4317_v58, %s11125_s0  ;;  %v4334_v12 = vcombine.high %v12722_v40, %v16171_v63  ;;  %v4362_v36 = vrot.slane %v4354_v56, %v11278_v28  ;;  %v4335_v47 = vcombine.high %v4317_v58, %v16171_v63 }
 0x89e   :  { %v4336_v9 = vcombine.high %v4326_v7, %v16171_v63  ;;  %v4369_v4 = vrot.slane %v4355_v43, %v11278_v28  ;;  %v4337_v42 = vcombine.high %v4333_v34, %v16171_v63  ;;  %v4158_v54 = vadd.f32 %v4138_v46, %v4130_v30 }
 0x89f   :  { %4407 = vrot.lane.b32.xlu0 %v4334_v12, %s11132_s25  ;;  %v4370_v61 = vcombine.low %v4346_v1, %v4362_v36  ;;  %v4371_v55 = vcombine.high %v4346_v1, %v4362_v36  ;;  %v4131_v56 = vsub.f32 %v12618_v41, %v12623_v62  ;;  %v4139_v0 = vsub.f32 %v12625_v23, %v12627_v11 }
 0x8a0   :  { %v4386_v39 = vcombine.low %v4353_v59, %v4369_v4  ;;  %v4387_v45 = vcombine.high %v4353_v59, %v4369_v4  ;;  %v4162_v58 = vmul.f32 0.5, %v4158_v54  ;;  %v4132_v41 = vsub.f32 %v12637_v10, %v12639_v31 }
 0x8a1   :  { %4419 = vrot.lane.b32.xlu1 %v4326_v7, %s11122_s17  ;;  %v4378_v51 = vrot.slane %v4370_v61, %v11292_v52  ;;  %v4385_v15 = vrot.slane %v4371_v55, %v11292_v52  ;;  %v4159_v27 = vadd.f32 %v4139_v0, %v4131_v56  ;;  %v4140_v62 = vsub.f32 %v12641_v24, %v12643_v53 }
 0x8a2   :  { %v4394_v22 = vrot.slane %v4386_v39, %v11292_v52  ;;  %v4401_v23 = vrot.slane %v4387_v45, %v11292_v52  ;;  %v4484_v11 = vrot.slane %v4162_v58, %v11170_v2  ;;  %v4133_v36 = vsub.f32 %v12653_v21, %v12655_v32 }
 0x8a3   :  { %4415 = vrot.lane.b32.xlu0 %v4335_v47, %s11133_s26  ;;  %v4402_v26 = vcombine.high %v4378_v51, %v16171_v63  ;;  %v4403_v25 = vcombine.high %v4385_v15, %v16171_v63  ;;  %v4163_v57 = vmul.f32 0.5, %v4159_v27  ;;  %v4160_v48 = vadd.f32 %v4140_v62, %v4132_v41 }
 0x8a4   :  { %v4404_v12 = vcombine.high %v4394_v22, %v16171_v63  ;;  %v4141_v10 = vsub.f32 %v12657_v13, %v12659_v8  ;;  %v4405_v31 = vcombine.high %v4401_v23, %v16171_v63  ;;  %v4166_v43 = vsub.f32 %v4130_v30, %v4138_v46 }
 0x8a5   :  { %4427 = vrot.lane.b32.xlu1 %v4333_v34, %s11126_s20  ;;  %v4495_v24 = vrot.slane %v4163_v57, %v11170_v2  ;;  %v4164_v53 = vmul.f32 0.5, %v4160_v48  ;;  %v4167_v13 = vsub.f32 %v4131_v56, %v4139_v0  ;;  %v4168_v34 = vsub.f32 %v4132_v41, %v4140_v62 }
 0x8a6   :  { %v4161_v7 = vadd.f32 %v4141_v10, %v4133_v36  ;;  %v4170_v32 = vmul.f32 0.5, %v4166_v43  ;;  %v4169_v4 = vsub.f32 %v4133_v36, %v4141_v10 }
 0x8a7   :  { %4423 = vrot.lane.b32.xlu0 %v4336_v9, %s11134_s27  ;;  %v4506_v1 = vrot.slane %v4164_v53, %v11170_v2  ;;  %v4171_v61 = vmul.f32 0.5, %v4167_v13  ;;  %v4172_v9 = vmul.f32 0.5, %v4168_v34 }
 0x8a8   :  { %v4165_v47 = vmul.f32 0.5, %v4161_v7  ;;  %v4528_v8 = vrot.slane %v4170_v32, %v11170_v2 }
 0x8a9   :  { %4435 = vrot.lane.b32.xlu1 %v4378_v51, %s11127_s21  ;;  %v4539_v33 = vrot.slane %v4171_v61, %v11170_v2  ;;  %v4550_v55 = vrot.slane %v4172_v9, %v11170_v2  ;;  %v4173_v51 = vmul.f32 0.5, %v4169_v4 }
 0x8aa   :  { %v4517_v21 = vrot.slane %v4165_v47, %v11170_v2 }
 0x8ab   :  { %4431 = vrot.lane.b32.xlu0 %v4337_v42, %s11135_s28  ;;  %v4561_v30 = vrot.slane %v4173_v51, %v11170_v2 }
 0x8ad   :  { %4443 = vrot.lane.b32.xlu1 %v4385_v15, %s11128_s22 }
 0x8af   :  { %4439 = vrot.lane.b32.xlu0 %v4402_v26, %s11136_s29 }
 0x8b1   :  { %4451 = vrot.lane.b32.xlu1 %v4394_v22, %s11129_s23 }
 0x8b3   :  { %4447 = vrot.lane.b32.xlu0 %v4403_v25, %s11137_s30 }
 0x8b5   :  { %4459 = vrot.lane.b32.xlu1 %v4401_v23, %s11130_s24 }
 0x8b7   :  { %4455 = vrot.lane.b32.xlu0 %v4404_v12, %s11138_s2 }
 0x8b9   :  { %4486 = vbcast.lane.b32.xlu1 %v4484_v11, 256 }
 0x8bb   :  { %4463 = vrot.lane.b32.xlu0 %v4405_v31, %s11139_s3 }
 0x8bd   :  { %4497 = vbcast.lane.b32.xlu1 %v4495_v24, 256 }
 0x8bf   :  { %4490 = vbcast.lane.b32.xlu0 %v4484_v11, 264 }
 0x8c1   :  { %4508 = vbcast.lane.b32.xlu1 %v4506_v1, 256 }
 0x8c3   :  { %4501 = vbcast.lane.b32.xlu0 %v4495_v24, 264 }
 0x8c5   :  { %4519 = vbcast.lane.b32.xlu1 %v4517_v21, 256 }
 0x8c7   :  { %4512 = vbcast.lane.b32.xlu0 %v4506_v1, 264 }
 0x8c9   :  { %4530 = vbcast.lane.b32.xlu1 %v4528_v8, 256 }
 0x8cb   :  { %4523 = vbcast.lane.b32.xlu0 %v4517_v21, 264 }
 0x8cd   :  { %4541 = vbcast.lane.b32.xlu1 %v4539_v33, 256 }
 0x8cf   :  { %4534 = vbcast.lane.b32.xlu0 %v4528_v8, 264 }
 0x8d1   :  { %4552 = vbcast.lane.b32.xlu1 %v4550_v55, 256 }
 0x8d3   :  { %4545 = vbcast.lane.b32.xlu0 %v4539_v33, 264 }
 0x8d5   :  { %4563 = vbcast.lane.b32.xlu1 %v4561_v30, 256 }
 0x8d7   :  { %4556 = vbcast.lane.b32.xlu0 %v4550_v55, 264 }
 0x8db   :  { %4567 = vbcast.lane.b32.xlu0 %v4561_v30, 264 }
 0x90f   :  { %v12784_v46 = vpop.permute.xlu1 %4411 }
 0x910   :  { %16328 = vst [vmem:[#allocation186_spill] sm:$0xff] %v12784_v46 }
 0x911   :  { %v12786_v59 = vpop.permute.xlu0 %4407 }
 0x912   :  { %16329 = vst [vmem:[#allocation187_spill] sm:$0xff] %v12786_v59 }
 0x913   :  { %v12788_v42 = vpop.permute.xlu1 %4419 }
 0x914   :  { %16330 = vst [vmem:[#allocation188_spill] sm:$0xff] %v12788_v42 }
 0x915   :  { %v12790_v39 = vpop.permute.xlu0 %4415 }
 0x916   :  { %16331 = vst [vmem:[#allocation189_spill] sm:$0xff] %v12790_v39 }
 0x917   :  { %v12792_v15 = vpop.permute.xlu1 %4427 }
 0x918   :  { %16332 = vst [vmem:[#allocation190_spill] sm:$0xff] %v12792_v15 }
 0x919   :  { %v12794_v54 = vpop.permute.xlu0 %4423 }
 0x91a   :  { %16333 = vst [vmem:[#allocation191_spill] sm:$0xff] %v12794_v54 }
 0x91b   :  { %v12796_v56 = vpop.permute.xlu1 %4435 }
 0x91c   :  { %16334 = vst [vmem:[#allocation192_spill] sm:$0xff] %v12796_v56 }
 0x91d   :  { %v12798_v0 = vpop.permute.xlu0 %4431 }
 0x91e   :  { %16335 = vst [vmem:[#allocation193_spill] sm:$0xff] %v12798_v0 }
 0x91f   :  { %v12800_v26 = vpop.permute.xlu1 %4443 }
 0x920   :  { %16336 = vst [vmem:[#allocation194_spill] sm:$0xff] %v12800_v26 }
 0x921   :  { %v12802_v45 = vpop.permute.xlu0 %4439 }
 0x922   :  { %16337 = vst [vmem:[#allocation195_spill] sm:$0xff] %v12802_v45 }
 0x923   :  { %v12804_v22 = vpop.permute.xlu1 %4451 }
 0x924   :  { %16338 = vst [vmem:[#allocation196_spill] sm:$0xff] %v12804_v22  ;;  %v12893_v22 = vld [vmem:[#allocation2 + $0xc7] sm:$0x1] }
 0x925   :  { %v12806_v58 = vpop.permute.xlu0 %4447 }
 0x926   :  { %16339 = vst [vmem:[#allocation197_spill] sm:$0xff] %v12806_v58  ;;  %v12895_v58 = vld [vmem:[#allocation2 + $0xd7] sm:$0x1] }
 0x927   :  { %v12808_v27 = vpop.permute.xlu1 %4459  ;;  %v4807_v45 = vadd.f32 %v12895_v58, %v12893_v22 }
 0x928   :  { %16340 = vst [vmem:[#allocation198_spill] sm:$0xff] %v12808_v27 }
 0x929   :  { %v12810_v25 = vpop.permute.xlu0 %4455 }
 0x92a   :  { %16341 = vst [vmem:[#allocation199_spill] sm:$0xff] %v12810_v25 }
 0x92b   :  { %v4487_v41 = vpop.permute.xlu1 %4486 }
 0x92d   :  { %v12812_v62 = vpop.permute.xlu0 %4463 }
 0x92e   :  { %16342 = vst [vmem:[#allocation200_spill] sm:$0xff] %v12812_v62 }
 0x92f   :  { %v4498_v23 = vpop.permute.xlu1 %4497 }
 0x931   :  { %v4491_v11 = vpop.permute.xlu0 %4490 }
 0x933   :  { %v4509_v57 = vpop.permute.xlu1 %4508 }
 0x935   :  { %v4502_v12 = vpop.permute.xlu0 %4501 }
 0x937   :  { %v4520_v48 = vpop.permute.xlu1 %4519 }
 0x939   :  { %v4513_v36 = vpop.permute.xlu0 %4512 }
 0x93b   :  { %v4531_v10 = vpop.permute.xlu1 %4530 }
 0x93c   :  { %v4569_v43 = vsel %vm178_vm0, %v4487_v41, %v4531_v10 }
 0x93d   :  { %v4524_v31 = vpop.permute.xlu0 %4523 }
 0x93f   :  { %v4542_v24 = vpop.permute.xlu1 %4541 }
 0x940   :  { %v4571_v13 = vsel %vm178_vm0, %v4498_v23, %v4542_v24 }
 0x941   :  { %v4535_v53 = vpop.permute.xlu0 %4534 }
 0x943   :  { %v4553_v7 = vpop.permute.xlu1 %4552 }
 0x944   :  { %v4573_v1 = vsel %vm178_vm0, %v4509_v57, %v4553_v7 }
 0x945   :  { %v4546_v47 = vpop.permute.xlu0 %4545  ;;  %v4577_v21 = vcombine.low %v4569_v43, %v4573_v1  ;;  %v4578_v61 = vcombine.high %v4569_v43, %v4573_v1 }
 0x946   :  { %v4572_v7 = vsel %vm178_vm0, %v4502_v12, %v4546_v47 }
 0x947   :  { %v4564_v32 = vpop.permute.xlu1 %4563  ;;  %v4585_v4 = vrot.slane %v4577_v21, %v11278_v28  ;;  %v4592_v30 = vrot.slane %v4578_v61, %v11278_v28 }
 0x948   :  { %v4575_v8 = vsel %vm178_vm0, %v4520_v48, %v4564_v32  ;;  %v4570_v32 = vsel %vm178_vm0, %v4491_v11, %v4535_v53 }
 0x949   :  { %v4593_v34 = vcombine.low %v4571_v13, %v4575_v8  ;;  %v4594_v33 = vcombine.high %v4571_v13, %v4575_v8  ;;  %v4557_v9 = vpop.permute.xlu0 %4556 }
 0x94a   :  { %v4574_v23 = vsel %vm178_vm0, %v4513_v36, %v4557_v9 }
 0x94b   :  { %v4601_v55 = vrot.slane %v4593_v34, %v11278_v28  ;;  %v4608_v51 = vrot.slane %v4594_v33, %v11278_v28  ;;  %v4645_v13 = vcombine.low %v4570_v32, %v4574_v23  ;;  %v12841_v33 = vld [vmem:[#allocation2 + $0x7] sm:$0x1]  ;;  %v4646_v9 = vcombine.high %v4570_v32, %v4574_v23 }
 0x94c   :  { %v12865_v32 = vld [vmem:[#allocation2 + $0x67] sm:$0x1] }
 0x94d   :  { %v4609_v57 = vcombine.low %v4585_v4, %v4601_v55  ;;  %v4610_v41 = vcombine.high %v4585_v4, %v4601_v55  ;;  %v4568_v10 = vpop.permute.xlu0 %4567  ;;  %v4625_v21 = vcombine.low %v4592_v30, %v4608_v51  ;;  %v4626_v12 = vcombine.high %v4592_v30, %v4608_v51  ;;  %v12845_v55 = vld [vmem:[#allocation2 + $0x17] sm:$0x1]  ;;  %v12847_v51 = vld [vmem:[#allocation2 + $0x27] sm:$0x1] }
 0x94e   :  { %v4576_v48 = vsel %vm178_vm0, %v4524_v31, %v4568_v10  ;;  %v4653_v47 = vrot.slane %v4645_v13, %v11278_v28  ;;  %v12849_v30 = vld [vmem:[#allocation2 + $0x37] sm:$0x1] }
 0x94f   :  { %v12826_v24 = vrot.slane %v4609_v57, %v11292_v52  ;;  %v4661_v1 = vcombine.low %v4572_v7, %v4576_v48  ;;  %v4624_v43 = vrot.slane %v4610_v41, %v11292_v52  ;;  %v4633_v31 = vrot.slane %v4625_v21, %v11292_v52  ;;  %v12863_v21 = vld [vmem:[#allocation2 + $0x57] sm:$0x1] }
 0x950   :  { %v4662_v11 = vcombine.high %v4572_v7, %v4576_v48  ;;  %v4640_v34 = vrot.slane %v4626_v12, %v11292_v52  ;;  %v4804_v7 = vadd.f32 %v12845_v55, %v12841_v33  ;;  %v4812_v23 = vadd.f32 %v12849_v30, %v12847_v51  ;;  %v12858_v48 = vld [vmem:[#allocation2 + $0x47] sm:$0x1]  ;;  %v12867_v13 = vld [vmem:[#allocation2 + $0x77] sm:$0x1] }
 0x951   :  { %4718 = vrot.lane.b32.xlu0 %v4624_v43, %s11125_s0  ;;  %v4641_v8 = vcombine.high %v12826_v24, %v16171_v63  ;;  %v4669_v36 = vrot.slane %v4661_v1, %v11278_v28  ;;  %v4642_v61 = vcombine.high %v4624_v43, %v16171_v63  ;;  %v4643_v4 = vcombine.high %v4633_v31, %v16171_v63 }
 0x952   :  { %v4676_v57 = vrot.slane %v4662_v11, %v11278_v28  ;;  %v4660_v1 = vrot.slane %v4646_v9, %v11278_v28  ;;  %v4644_v43 = vcombine.high %v4640_v34, %v16171_v63  ;;  %v12877_v11 = vld [vmem:[#allocation2 + $0x87] sm:$0x1]  ;;  %v12883_v9 = vld [vmem:[#allocation2 + $0xb7] sm:$0x1]  ;;  %v4828_v15 = vsub.f32 %v4804_v7, %v4812_v23 }
 0x953   :  { %4714 = vrot.lane.b32.xlu1 %v4641_v8, %s11132_s25  ;;  %v4677_v53 = vcombine.low %v4653_v47, %v4669_v36  ;;  %v4678_v41 = vcombine.high %v4653_v47, %v4669_v36  ;;  %v4820_v36 = vadd.f32 %v4812_v23, %v4804_v7  ;;  %v4813_v47 = vadd.f32 %v12867_v13, %v12865_v32 }
 0x954   :  { %v4693_v8 = vcombine.low %v4660_v1, %v4676_v57  ;;  %v4832_v42 = vmul.f32 0.5, %v4828_v15 }
 0x955   :  { %4726 = vrot.lane.b32.xlu0 %v4633_v31, %s11122_s17  ;;  %v4685_v10 = vrot.slane %v4677_v53, %v11292_v52  ;;  %v4692_v12 = vrot.slane %v4678_v41, %v11292_v52  ;;  %v4805_v31 = vadd.f32 %v12863_v21, %v12858_v48  ;;  %v12879_v53 = vld [vmem:[#allocation2 + $0x97] sm:$0x1] }
 0x956   :  { %v4701_v41 = vrot.slane %v4693_v8, %v11292_v52 }
 0x957   :  { %4722 = vrot.lane.b32.xlu1 %v4642_v61, %s11133_s26  ;;  %v4709_v61 = vcombine.high %v4685_v10, %v16171_v63  ;;  %v4821_v62 = vadd.f32 %v4813_v47, %v4805_v31  ;;  %v4710_v27 = vcombine.high %v4692_v12, %v16171_v63 }
 0x959   :  { %4734 = vrot.lane.b32.xlu0 %v4640_v34, %s11126_s20  ;;  %v12881_v34 = vld [vmem:[#allocation2 + $0xa7] sm:$0x1] }
 0x95a   :  { %v4814_v25 = vadd.f32 %v12883_v9, %v12881_v34 }
 0x95b   :  { %4730 = vrot.lane.b32.xlu1 %v4643_v4, %s11134_s27  ;;  %v4694_v4 = vcombine.high %v4660_v1, %v4676_v57  ;;  %v12897_v57 = vld [vmem:[#allocation2 + $0xe7] sm:$0x1]  ;;  %v12899_v1 = vld [vmem:[#allocation2 + $0xf7] sm:$0x1] }
 0x95c   :  { %v4815_v56 = vadd.f32 %v12899_v1, %v12897_v57 }
 0x95d   :  { %4742 = vrot.lane.b32.xlu0 %v4685_v10, %s11127_s21  ;;  %v4806_v10 = vadd.f32 %v12879_v53, %v12877_v11  ;;  %v4708_v8 = vrot.slane %v4694_v4, %v11292_v52 }
 0x95f   :  { %4738 = vrot.lane.b32.xlu1 %v4644_v43, %s11135_s28  ;;  %v4824_v43 = vmul.f32 0.5, %v4820_v36  ;;  %v4825_v36 = vmul.f32 0.5, %v4821_v62  ;;  %v4822_v26 = vadd.f32 %v4814_v25, %v4806_v10  ;;  %v4823_v62 = vadd.f32 %v4815_v56, %v4807_v45 }
 0x961   :  { %4750 = vrot.lane.b32.xlu0 %v4692_v12, %s11128_s22  ;;  %v4855_v12 = vrot.slane %v4824_v43, %v11170_v2  ;;  %v4866_v4 = vrot.slane %v4825_v36, %v11170_v2  ;;  %v4826_v43 = vmul.f32 0.5, %v4822_v26  ;;  %v4827_v0 = vmul.f32 0.5, %v4823_v62 }
 0x962   :  { %v4830_v26 = vsub.f32 %v4806_v10, %v4814_v25 }
 0x963   :  { %4746 = vrot.lane.b32.xlu1 %v4709_v61, %s11136_s29  ;;  %v4711_v61 = vcombine.high %v4701_v41, %v16171_v63  ;;  %v4888_v54 = vrot.slane %v4827_v0, %v11170_v2 }
 0x964   :  { %v4834_v39 = vmul.f32 0.5, %v4830_v26 }
 0x965   :  { %4758 = vrot.lane.b32.xlu0 %v4701_v41, %s11129_s23  ;;  %v4877_v41 = vrot.slane %v4826_v43, %v11170_v2  ;;  %v4831_v43 = vsub.f32 %v4807_v45, %v4815_v56 }
 0x966   :  { %v4921_v7 = vrot.slane %v4834_v39, %v11170_v2 }
 0x967   :  { %4754 = vrot.lane.b32.xlu1 %v4710_v27, %s11137_s30  ;;  %v4712_v27 = vcombine.high %v4708_v8, %v16171_v63  ;;  %v4835_v23 = vmul.f32 0.5, %v4831_v43 }
 0x969   :  { %4766 = vrot.lane.b32.xlu0 %v4708_v8, %s11130_s24  ;;  %v4899_v8 = vrot.slane %v4832_v42, %v11170_v2  ;;  %v4932_v15 = vrot.slane %v4835_v23, %v11170_v2 }
 0x96b   :  { %4762 = vrot.lane.b32.xlu1 %v4711_v61, %s11138_s2  ;;  %v4829_v61 = vsub.f32 %v4805_v31, %v4813_v47 }
 0x96d   :  { %4857 = vbcast.lane.b32.xlu0 %v4855_v12, 256  ;;  %v4833_v36 = vmul.f32 0.5, %v4829_v61 }
 0x96f   :  { %4770 = vrot.lane.b32.xlu1 %v4712_v27, %s11139_s3  ;;  %v4910_v27 = vrot.slane %v4833_v36, %v11170_v2 }
 0x971   :  { %4868 = vbcast.lane.b32.xlu0 %v4866_v4, 256 }
 0x973   :  { %4861 = vbcast.lane.b32.xlu1 %v4855_v12, 264 }
 0x975   :  { %4879 = vbcast.lane.b32.xlu0 %v4877_v41, 256 }
 0x977   :  { %4872 = vbcast.lane.b32.xlu1 %v4866_v4, 264 }
 0x979   :  { %4890 = vbcast.lane.b32.xlu0 %v4888_v54, 256 }
 0x97b   :  { %4883 = vbcast.lane.b32.xlu1 %v4877_v41, 264 }
 0x97d   :  { %4901 = vbcast.lane.b32.xlu0 %v4899_v8, 256 }
 0x97f   :  { %4894 = vbcast.lane.b32.xlu1 %v4888_v54, 264 }
 0x981   :  { %4912 = vbcast.lane.b32.xlu0 %v4910_v27, 256 }
 0x983   :  { %4905 = vbcast.lane.b32.xlu1 %v4899_v8, 264 }
 0x985   :  { %4923 = vbcast.lane.b32.xlu0 %v4921_v7, 256 }
 0x987   :  { %4916 = vbcast.lane.b32.xlu1 %v4910_v27, 264 }
 0x989   :  { %4934 = vbcast.lane.b32.xlu0 %v4932_v15, 256 }
 0x98b   :  { %4927 = vbcast.lane.b32.xlu1 %v4921_v7, 264 }
 0x98f   :  { %4938 = vbcast.lane.b32.xlu1 %v4932_v15, 264 }
 0x9c3   :  { %v12920_v42 = vpop.permute.xlu0 %4718 }
 0x9c4   :  { %16343 = vst [vmem:[#allocation201_spill] sm:$0xff] %v12920_v42 }
 0x9c5   :  { %v12922_v0 = vpop.permute.xlu1 %4714 }
 0x9c7   :  { %v12924_v25 = vpop.permute.xlu0 %4726 }
 0x9c8   :  { %16344 = vst [vmem:[#allocation202_spill] sm:$0xff] %v12924_v25 }
 0x9c9   :  { %v12926_v56 = vpop.permute.xlu1 %4722 }
 0x9ca   :  { %16345 = vst [vmem:[#allocation203_spill] sm:$0xff] %v12926_v56 }
 0x9cb   :  { %v12928_v54 = vpop.permute.xlu0 %4734 }
 0x9cc   :  { %16346 = vst [vmem:[#allocation204_spill] sm:$0xff] %v12928_v54 }
 0x9cd   :  { %v12930_v39 = vpop.permute.xlu1 %4730 }
 0x9ce   :  { %16347 = vst [vmem:[#allocation205_spill] sm:$0xff] %v12930_v39 }
 0x9cf   :  { %v12932_v45 = vpop.permute.xlu0 %4742 }
 0x9d0   :  { %16348 = vst [vmem:[#allocation206_spill] sm:$0xff] %v12932_v45 }
 0x9d1   :  { %v12934_v31 = vpop.permute.xlu1 %4738 }
 0x9d2   :  { %16349 = vst [vmem:[#allocation207_spill] sm:$0xff] %v12934_v31 }
 0x9d3   :  { %v12936_v47 = vpop.permute.xlu0 %4750 }
 0x9d4   :  { %16350 = vst [vmem:[#allocation208_spill] sm:$0xff] %v12936_v47 }
 0x9d5   :  { %v12938_v10 = vpop.permute.xlu1 %4746 }
 0x9d6   :  { %16351 = vst [vmem:[#allocation209_spill] sm:$0xff] %v12938_v10 }
 0x9d7   :  { %v12940_v12 = vpop.permute.xlu0 %4758 }
 0x9d8   :  { %16352 = vst [vmem:[#allocation210_spill] sm:$0xff] %v12940_v12 }
 0x9d9   :  { %v12942_v4 = vpop.permute.xlu1 %4754 }
 0x9da   :  { %16353 = vst [vmem:[#allocation211_spill] sm:$0xff] %v12942_v4 }
 0x9db   :  { %v12944_v62 = vpop.permute.xlu0 %4766 }
 0x9dc   :  { %16354 = vst [vmem:[#allocation212_spill] sm:$0xff] %v12944_v62 }
 0x9dd   :  { %v12946_v41 = vpop.permute.xlu1 %4762 }
 0x9de   :  { %16355 = vst [vmem:[#allocation213_spill] sm:$0xff] %v12946_v41 }
 0x9df   :  { %v4858_v61 = vpop.permute.xlu0 %4857 }
 0x9e1   :  { %v12948_v8 = vpop.permute.xlu1 %4770 }
 0x9e2   :  { %16356 = vst [vmem:[#allocation214_spill] sm:$0xff] %v12948_v8 }
 0x9e3   :  { %v4869_v36 = vpop.permute.xlu0 %4868 }
 0x9e5   :  { %v4862_v26 = vpop.permute.xlu1 %4861 }
 0x9e7   :  { %v4880_v27 = vpop.permute.xlu0 %4879 }
 0x9e9   :  { %v4873_v43 = vpop.permute.xlu1 %4872 }
 0x9eb   :  { %v4891_v7 = vpop.permute.xlu0 %4890 }
 0x9ed   :  { %v4884_v23 = vpop.permute.xlu1 %4883 }
 0x9ef   :  { %v4902_v15 = vpop.permute.xlu0 %4901 }
 0x9f0   :  { %v4940_v62 = vsel %vm178_vm0, %v4858_v61, %v4902_v15 }
 0x9f1   :  { %v4895_v46 = vpop.permute.xlu1 %4894 }
 0x9f3   :  { %v4913_v40 = vpop.permute.xlu0 %4912 }
 0x9f4   :  { %v4942_v8 = vsel %vm178_vm0, %v4869_v36, %v4913_v40 }
 0x9f5   :  { %v4906_v59 = vpop.permute.xlu1 %4905 }
 0x9f7   :  { %v4924_v12 = vpop.permute.xlu0 %4923 }
 0x9f8   :  { %v4944_v4 = vsel %vm178_vm0, %v4880_v27, %v4924_v12 }
 0x9f9   :  { %v4917_v47 = vpop.permute.xlu1 %4916  ;;  %v4948_v41 = vcombine.low %v4940_v62, %v4944_v4  ;;  %v4949_v31 = vcombine.high %v4940_v62, %v4944_v4 }
 0x9fa   :  { %v4943_v60 = vsel %vm178_vm0, %v4873_v43, %v4917_v47 }
 0x9fb   :  { %v4935_v10 = vpop.permute.xlu0 %4934  ;;  %v4956_v56 = vrot.slane %v4948_v41, %v11278_v28  ;;  %v4963_v12 = vrot.slane %v4949_v31, %v11278_v28 }
 0x9fc   :  { %v4946_v45 = vsel %vm178_vm0, %v4891_v7, %v4935_v10 }
 0x9fd   :  { %v4964_v54 = vcombine.low %v4942_v8, %v4946_v45  ;;  %v4965_v39 = vcombine.high %v4942_v8, %v4946_v45  ;;  %v4928_v25 = vpop.permute.xlu1 %4927 }
 0x9fe   :  { %v4945_v40 = vsel %vm178_vm0, %v4884_v23, %v4928_v25 }
 0x9ff   :  { %v4972_v42 = vrot.slane %v4964_v54, %v11278_v28  ;;  %v4979_v49 = vrot.slane %v4965_v39, %v11278_v28  ;;  %v4941_v39 = vsel %vm178_vm0, %v4862_v26, %v4906_v59 }
 0xa00   :  { %v5016_v41 = vcombine.low %v4941_v39, %v4945_v40  ;;  %v5017_v26 = vcombine.high %v4941_v39, %v4945_v40 }
 0xa01   :  { %v4980_v27 = vcombine.low %v4956_v56, %v4972_v42  ;;  %v4981_v61 = vcombine.high %v4956_v56, %v4972_v42  ;;  %v4939_v15 = vpop.permute.xlu1 %4938  ;;  %v4996_v54 = vcombine.low %v4963_v12, %v4979_v49  ;;  %v4997_v56 = vcombine.high %v4963_v12, %v4979_v49 }
 0xa02   :  { %v4947_v10 = vsel %vm178_vm0, %v4895_v46, %v4939_v15  ;;  %v5024_v31 = vrot.slane %v5016_v41, %v11278_v28  ;;  %v4816_v12 = vsub.f32 %v12847_v51, %v12849_v30 }
 0xa03   :  { %v12962_v45 = vrot.slane %v4980_v27, %v11292_v52  ;;  %v5032_v4 = vcombine.low %v4943_v60, %v4947_v10  ;;  %v4995_v62 = vrot.slane %v4981_v61, %v11292_v52  ;;  %v5004_v46 = vrot.slane %v4996_v54, %v11292_v52 }
 0xa04   :  { %v5033_v59 = vcombine.high %v4943_v60, %v4947_v10  ;;  %v5011_v36 = vrot.slane %v4997_v56, %v11292_v52  ;;  %v4808_v60 = vsub.f32 %v12841_v33, %v12845_v55  ;;  %v5031_v27 = vrot.slane %v5017_v26, %v11278_v28 }
 0xa05   :  { %16357 = vst [vmem:[#allocation215_spill] sm:$0xff] %v12962_v45  ;;  %5089 = vrot.lane.b32.xlu1 %v4995_v62, %s11125_s0  ;;  %v5012_v42 = vcombine.high %v12962_v45, %v16171_v63  ;;  %v5040_v25 = vrot.slane %v5032_v4, %v11278_v28  ;;  %v5013_v47 = vcombine.high %v4995_v62, %v16171_v63 }
 0xa06   :  { %v5014_v49 = vcombine.high %v5004_v46, %v16171_v63  ;;  %v5047_v43 = vrot.slane %v5033_v59, %v11278_v28  ;;  %v5015_v61 = vcombine.high %v5011_v36, %v16171_v63  ;;  %v4836_v10 = vadd.f32 %v4816_v12, %v4808_v60 }
 0xa07   :  { %5085 = vrot.lane.b32.xlu0 %v5012_v42, %s11132_s25  ;;  %v5048_v8 = vcombine.low %v5024_v31, %v5040_v25  ;;  %v5049_v7 = vcombine.high %v5024_v31, %v5040_v25  ;;  %v4809_v4 = vsub.f32 %v12858_v48, %v12863_v21  ;;  %v4817_v33 = vsub.f32 %v12865_v32, %v12867_v13 }
 0xa08   :  { %v5064_v15 = vcombine.low %v5031_v27, %v5047_v43  ;;  %v5065_v51 = vcombine.high %v5031_v27, %v5047_v43  ;;  %v4840_v62 = vmul.f32 0.5, %v4836_v10  ;;  %v4810_v48 = vsub.f32 %v12877_v11, %v12879_v53 }
 0xa09   :  { %5097 = vrot.lane.b32.xlu1 %v5004_v46, %s11122_s17  ;;  %v5056_v23 = vrot.slane %v5048_v8, %v11292_v52  ;;  %v5063_v40 = vrot.slane %v5049_v7, %v11292_v52  ;;  %v4837_v54 = vadd.f32 %v4817_v33, %v4809_v4  ;;  %v4818_v21 = vsub.f32 %v12881_v34, %v12883_v9 }
 0xa0a   :  { %v5072_v30 = vrot.slane %v5064_v15, %v11292_v52  ;;  %v5079_v32 = vrot.slane %v5065_v51, %v11292_v52  ;;  %v5162_v13 = vrot.slane %v4840_v62, %v11170_v2  ;;  %v4811_v25 = vsub.f32 %v12893_v22, %v12895_v58 }
 0xa0b   :  { %5093 = vrot.lane.b32.xlu0 %v5013_v47, %s11133_s26  ;;  %v5080_v55 = vcombine.high %v5056_v23, %v16171_v63  ;;  %v5081_v39 = vcombine.high %v5063_v40, %v16171_v63  ;;  %v4841_v41 = vmul.f32 0.5, %v4837_v54  ;;  %v4838_v56 = vadd.f32 %v4818_v21, %v4810_v48 }
 0xa0c   :  { %v5082_v42 = vcombine.high %v5072_v30, %v16171_v63  ;;  %v4819_v11 = vsub.f32 %v12897_v57, %v12899_v1  ;;  %v5083_v53 = vcombine.high %v5079_v32, %v16171_v63  ;;  %v4844_v59 = vsub.f32 %v4808_v60, %v4816_v12 }
 0xa0d   :  { %5105 = vrot.lane.b32.xlu1 %v5011_v36, %s11126_s20  ;;  %v5173_v34 = vrot.slane %v4841_v41, %v11170_v2  ;;  %v4842_v9 = vmul.f32 0.5, %v4838_v56  ;;  %v4845_v57 = vsub.f32 %v4809_v4, %v4817_v33  ;;  %v4846_v36 = vsub.f32 %v4810_v48, %v4818_v21 }
 0xa0e   :  { %v4839_v46 = vadd.f32 %v4819_v11, %v4811_v25  ;;  %v4848_v58 = vmul.f32 0.5, %v4844_v59  ;;  %v4847_v43 = vsub.f32 %v4811_v25, %v4819_v11 }
 0xa0f   :  { %5101 = vrot.lane.b32.xlu0 %v5014_v49, %s11134_s27  ;;  %v5184_v31 = vrot.slane %v4842_v9, %v11170_v2  ;;  %v4849_v8 = vmul.f32 0.5, %v4845_v57  ;;  %v4850_v49 = vmul.f32 0.5, %v4846_v36 }
 0xa10   :  { %v4843_v47 = vmul.f32 0.5, %v4839_v46  ;;  %v5206_v1 = vrot.slane %v4848_v58, %v11170_v2 }
 0xa11   :  { %5113 = vrot.lane.b32.xlu1 %v5056_v23, %s11127_s21  ;;  %v5217_v26 = vrot.slane %v4849_v8, %v11170_v2  ;;  %v5228_v7 = vrot.slane %v4850_v49, %v11170_v2  ;;  %v4851_v23 = vmul.f32 0.5, %v4847_v43 }
 0xa12   :  { %v5195_v22 = vrot.slane %v4843_v47, %v11170_v2 }
 0xa13   :  { %5109 = vrot.lane.b32.xlu0 %v5015_v61, %s11135_s28  ;;  %v5239_v60 = vrot.slane %v4851_v23, %v11170_v2 }
 0xa15   :  { %5121 = vrot.lane.b32.xlu1 %v5063_v40, %s11128_s22 }
 0xa17   :  { %5117 = vrot.lane.b32.xlu0 %v5080_v55, %s11136_s29 }
 0xa19   :  { %5129 = vrot.lane.b32.xlu1 %v5072_v30, %s11129_s23 }
 0xa1b   :  { %5125 = vrot.lane.b32.xlu0 %v5081_v39, %s11137_s30 }
 0xa1d   :  { %5137 = vrot.lane.b32.xlu1 %v5079_v32, %s11130_s24 }
 0xa1f   :  { %5133 = vrot.lane.b32.xlu0 %v5082_v42, %s11138_s2 }
 0xa21   :  { %5164 = vbcast.lane.b32.xlu1 %v5162_v13, 256 }
 0xa23   :  { %5141 = vrot.lane.b32.xlu0 %v5083_v53, %s11139_s3 }
 0xa25   :  { %5175 = vbcast.lane.b32.xlu1 %v5173_v34, 256 }
 0xa27   :  { %5168 = vbcast.lane.b32.xlu0 %v5162_v13, 264 }
 0xa29   :  { %5186 = vbcast.lane.b32.xlu1 %v5184_v31, 256 }
 0xa2b   :  { %5179 = vbcast.lane.b32.xlu0 %v5173_v34, 264 }
 0xa2d   :  { %5197 = vbcast.lane.b32.xlu1 %v5195_v22, 256 }
 0xa2f   :  { %5190 = vbcast.lane.b32.xlu0 %v5184_v31, 264 }
 0xa31   :  { %5208 = vbcast.lane.b32.xlu1 %v5206_v1, 256 }
 0xa33   :  { %5201 = vbcast.lane.b32.xlu0 %v5195_v22, 264 }
 0xa35   :  { %5219 = vbcast.lane.b32.xlu1 %v5217_v26, 256 }
 0xa37   :  { %5212 = vbcast.lane.b32.xlu0 %v5206_v1, 264 }
 0xa39   :  { %5230 = vbcast.lane.b32.xlu1 %v5228_v7, 256 }
 0xa3b   :  { %5223 = vbcast.lane.b32.xlu0 %v5217_v26, 264 }
 0xa3d   :  { %5241 = vbcast.lane.b32.xlu1 %v5239_v60, 256 }
 0xa3f   :  { %5234 = vbcast.lane.b32.xlu0 %v5228_v7, 264 }
 0xa43   :  { %5245 = vbcast.lane.b32.xlu0 %v5239_v60, 264 }
 0xa77   :  { %v13024_v12 = vpop.permute.xlu1 %5089 }
 0xa78   :  { %16358 = vst [vmem:[#allocation216_spill] sm:$0xff] %v13024_v12 }
 0xa79   :  { %v13026_v27 = vpop.permute.xlu0 %5085 }
 0xa7a   :  { %16359 = vst [vmem:[#allocation217_spill] sm:$0xff] %v13026_v27 }
 0xa7b   :  { %v13028_v61 = vpop.permute.xlu1 %5097 }
 0xa7c   :  { %16360 = vst [vmem:[#allocation218_spill] sm:$0xff] %v13028_v61 }
 0xa7d   :  { %v13030_v15 = vpop.permute.xlu0 %5093 }
 0xa7e   :  { %16361 = vst [vmem:[#allocation219_spill] sm:$0xff] %v13030_v15 }
 0xa7f   :  { %v13032_v40 = vpop.permute.xlu1 %5105 }
 0xa80   :  { %16362 = vst [vmem:[#allocation220_spill] sm:$0xff] %v13032_v40 }
 0xa81   :  { %v13034_v10 = vpop.permute.xlu0 %5101 }
 0xa82   :  { %16363 = vst [vmem:[#allocation221_spill] sm:$0xff] %v13034_v10 }
 0xa83   :  { %v13036_v4 = vpop.permute.xlu1 %5113 }
 0xa84   :  { %16364 = vst [vmem:[#allocation222_spill] sm:$0xff] %v13036_v4 }
 0xa85   :  { %v13038_v33 = vpop.permute.xlu0 %5109 }
 0xa86   :  { %16365 = vst [vmem:[#allocation223_spill] sm:$0xff] %v13038_v33 }
 0xa87   :  { %v13040_v55 = vpop.permute.xlu1 %5121 }
 0xa88   :  { %16366 = vst [vmem:[#allocation224_spill] sm:$0xff] %v13040_v55 }
 0xa89   :  { %v13042_v51 = vpop.permute.xlu0 %5117 }
 0xa8a   :  { %16367 = vst [vmem:[#allocation225_spill] sm:$0xff] %v13042_v51 }
 0xa8b   :  { %v13044_v30 = vpop.permute.xlu1 %5129 }
 0xa8c   :  { %16368 = vst [vmem:[#allocation226_spill] sm:$0xff] %v13044_v30  ;;  %v13133_v30 = vld [vmem:[#allocation2 + $0xc8] sm:$0x1] }
 0xa8d   :  { %v13046_v62 = vpop.permute.xlu0 %5125 }
 0xa8e   :  { %16369 = vst [vmem:[#allocation227_spill] sm:$0xff] %v13046_v62  ;;  %v13135_v62 = vld [vmem:[#allocation2 + $0xd8] sm:$0x1] }
 0xa8f   :  { %v13048_v54 = vpop.permute.xlu1 %5137 }
 0xa90   :  { %16370 = vst [vmem:[#allocation228_spill] sm:$0xff] %v13048_v54 }
 0xa91   :  { %v13050_v39 = vpop.permute.xlu0 %5133 }
 0xa92   :  { %16371 = vst [vmem:[#allocation229_spill] sm:$0xff] %v13050_v39 }
 0xa93   :  { %v5165_v48 = vpop.permute.xlu1 %5164 }
 0xa95   :  { %v13052_v21 = vpop.permute.xlu0 %5141 }
 0xa96   :  { %16372 = vst [vmem:[#allocation230_spill] sm:$0xff] %v13052_v21 }
 0xa97   :  { %v5176_v32 = vpop.permute.xlu1 %5175 }
 0xa99   :  { %v5169_v13 = vpop.permute.xlu0 %5168 }
 0xa9b   :  { %v5187_v41 = vpop.permute.xlu1 %5186 }
 0xa9d   :  { %v5180_v42 = vpop.permute.xlu0 %5179 }
 0xa9f   :  { %v5198_v56 = vpop.permute.xlu1 %5197 }
 0xaa1   :  { %v5191_v25 = vpop.permute.xlu0 %5190 }
 0xaa3   :  { %v5209_v11 = vpop.permute.xlu1 %5208 }
 0xaa4   :  { %v5247_v59 = vsel %vm178_vm0, %v5165_v48, %v5209_v11 }
 0xaa5   :  { %v5202_v53 = vpop.permute.xlu0 %5201 }
 0xaa7   :  { %v5220_v34 = vpop.permute.xlu1 %5219 }
 0xaa8   :  { %v5249_v57 = vsel %vm178_vm0, %v5176_v32, %v5220_v34 }
 0xaa9   :  { %v5213_v9 = vpop.permute.xlu0 %5212 }
 0xaab   :  { %v5231_v46 = vpop.permute.xlu1 %5230 }
 0xaac   :  { %v5251_v31 = vsel %vm178_vm0, %v5187_v41, %v5231_v46 }
 0xaad   :  { %v5224_v47 = vpop.permute.xlu0 %5223  ;;  %v5255_v22 = vcombine.low %v5247_v59, %v5251_v31  ;;  %v5256_v8 = vcombine.high %v5247_v59, %v5251_v31 }
 0xaae   :  { %v5250_v46 = vsel %vm178_vm0, %v5180_v42, %v5224_v47 }
 0xaaf   :  { %v5242_v58 = vpop.permute.xlu1 %5241  ;;  %v5263_v43 = vrot.slane %v5255_v22, %v11278_v28  ;;  %v5270_v60 = vrot.slane %v5256_v8, %v11278_v28 }
 0xab0   :  { %v5253_v1 = vsel %vm178_vm0, %v5198_v56, %v5242_v58  ;;  %v5248_v58 = vsel %vm178_vm0, %v5169_v13, %v5213_v9 }
 0xab1   :  { %v5271_v36 = vcombine.low %v5249_v57, %v5253_v1  ;;  %v5272_v26 = vcombine.high %v5249_v57, %v5253_v1  ;;  %v5235_v49 = vpop.permute.xlu0 %5234 }
 0xab2   :  { %v5252_v32 = vsel %vm178_vm0, %v5191_v25, %v5235_v49 }
 0xab3   :  { %v5279_v7 = vrot.slane %v5271_v36, %v11278_v28  ;;  %v5286_v23 = vrot.slane %v5272_v26, %v11278_v28  ;;  %v5323_v57 = vcombine.low %v5248_v58, %v5252_v32  ;;  %v13081_v26 = vld [vmem:[#allocation2 + $0x8] sm:$0x1]  ;;  %v5324_v49 = vcombine.high %v5248_v58, %v5252_v32 }
 0xab4   :  { %v13105_v58 = vld [vmem:[#allocation2 + $0x68] sm:$0x1] }
 0xab5   :  { %v5287_v41 = vcombine.low %v5263_v43, %v5279_v7  ;;  %v5288_v48 = vcombine.high %v5263_v43, %v5279_v7  ;;  %v5246_v11 = vpop.permute.xlu0 %5245  ;;  %v5303_v22 = vcombine.low %v5270_v60, %v5286_v23  ;;  %v5304_v42 = vcombine.high %v5270_v60, %v5286_v23  ;;  %v13085_v7 = vld [vmem:[#allocation2 + $0x18] sm:$0x1]  ;;  %v13087_v23 = vld [vmem:[#allocation2 + $0x28] sm:$0x1] }
 0xab6   :  { %v5254_v56 = vsel %vm178_vm0, %v5202_v53, %v5246_v11  ;;  %v5331_v47 = vrot.slane %v5323_v57, %v11278_v28  ;;  %v13089_v60 = vld [vmem:[#allocation2 + $0x38] sm:$0x1] }
 0xab7   :  { %v13066_v34 = vrot.slane %v5287_v41, %v11292_v52  ;;  %v5339_v31 = vcombine.low %v5250_v46, %v5254_v56  ;;  %v5302_v59 = vrot.slane %v5288_v48, %v11292_v52  ;;  %v5311_v53 = vrot.slane %v5303_v22, %v11292_v52  ;;  %v13103_v22 = vld [vmem:[#allocation2 + $0x58] sm:$0x1] }
 0xab8   :  { %v5340_v13 = vcombine.high %v5250_v46, %v5254_v56  ;;  %v5318_v36 = vrot.slane %v5304_v42, %v11292_v52  ;;  %v5482_v46 = vadd.f32 %v13085_v7, %v13081_v26  ;;  %v5490_v32 = vadd.f32 %v13089_v60, %v13087_v23  ;;  %v13098_v56 = vld [vmem:[#allocation2 + $0x48] sm:$0x1]  ;;  %v13107_v57 = vld [vmem:[#allocation2 + $0x78] sm:$0x1] }
 0xab9   :  { %16373 = vst [vmem:[#allocation231_spill] sm:$0xff] %v13066_v34  ;;  %5396 = vrot.lane.b32.xlu0 %v5302_v59, %s11125_s0  ;;  %v5319_v1 = vcombine.high %v13066_v34, %v16171_v63  ;;  %v5347_v25 = vrot.slane %v5339_v31, %v11278_v28  ;;  %v5320_v8 = vcombine.high %v5302_v59, %v16171_v63 }
 0xaba   :  { %v5321_v43 = vcombine.high %v5311_v53, %v16171_v63  ;;  %v5354_v41 = vrot.slane %v5340_v13, %v11278_v28  ;;  %v5338_v31 = vrot.slane %v5324_v49, %v11278_v28  ;;  %v5322_v59 = vcombine.high %v5318_v36, %v16171_v63  ;;  %v13117_v13 = vld [vmem:[#allocation2 + $0x88] sm:$0x1]  ;;  %v13123_v49 = vld [vmem:[#allocation2 + $0xb8] sm:$0x1] }
 0xabb   :  { %5392 = vrot.lane.b32.xlu1 %v5319_v1, %s11132_s25  ;;  %v5355_v9 = vcombine.low %v5331_v47, %v5347_v25  ;;  %v5356_v48 = vcombine.high %v5331_v47, %v5347_v25  ;;  %v5498_v25 = vadd.f32 %v5490_v32, %v5482_v46  ;;  %v5491_v47 = vadd.f32 %v13107_v57, %v13105_v58 }
 0xabc   :  { %v5371_v1 = vcombine.low %v5338_v31, %v5354_v41  ;;  %v5485_v34 = vadd.f32 %v13135_v62, %v13133_v30  ;;  %v5506_v33 = vsub.f32 %v5482_v46, %v5490_v32 }
 0xabd   :  { %5404 = vrot.lane.b32.xlu0 %v5311_v53, %s11122_s17  ;;  %v5363_v11 = vrot.slane %v5355_v9, %v11292_v52  ;;  %v5370_v42 = vrot.slane %v5356_v48, %v11292_v52  ;;  %v5483_v53 = vadd.f32 %v13103_v22, %v13098_v56  ;;  %v13119_v9 = vld [vmem:[#allocation2 + $0x98] sm:$0x1] }
 0xabe   :  { %v5379_v48 = vrot.slane %v5371_v1, %v11292_v52  ;;  %v5510_v10 = vmul.f32 0.5, %v5506_v33 }
 0xabf   :  { %5400 = vrot.lane.b32.xlu1 %v5320_v8, %s11133_s26  ;;  %v5387_v8 = vcombine.high %v5363_v11, %v16171_v63  ;;  %v5499_v21 = vadd.f32 %v5491_v47, %v5483_v53  ;;  %v5388_v54 = vcombine.high %v5370_v42, %v16171_v63 }
 0xac1   :  { %5412 = vrot.lane.b32.xlu0 %v5318_v36, %s11126_s20  ;;  %v13121_v36 = vld [vmem:[#allocation2 + $0xa8] sm:$0x1] }
 0xac2   :  { %v5492_v39 = vadd.f32 %v13123_v49, %v13121_v36 }
 0xac3   :  { %5408 = vrot.lane.b32.xlu1 %v5321_v43, %s11134_s27  ;;  %v5372_v43 = vcombine.high %v5338_v31, %v5354_v41  ;;  %v13137_v41 = vld [vmem:[#allocation2 + $0xe8] sm:$0x1]  ;;  %v13139_v31 = vld [vmem:[#allocation2 + $0xf8] sm:$0x1] }
 0xac4   :  { %v5493_v51 = vadd.f32 %v13139_v31, %v13137_v41 }
 0xac5   :  { %5420 = vrot.lane.b32.xlu0 %v5363_v11, %s11127_s21  ;;  %v5484_v11 = vadd.f32 %v13119_v9, %v13117_v13  ;;  %v5386_v1 = vrot.slane %v5372_v43, %v11292_v52 }
 0xac7   :  { %5416 = vrot.lane.b32.xlu1 %v5322_v59, %s11135_s28  ;;  %v5502_v59 = vmul.f32 0.5, %v5498_v25  ;;  %v5503_v25 = vmul.f32 0.5, %v5499_v21  ;;  %v5500_v55 = vadd.f32 %v5492_v39, %v5484_v11  ;;  %v5501_v21 = vadd.f32 %v5493_v51, %v5485_v34 }
 0xac9   :  { %5428 = vrot.lane.b32.xlu0 %v5370_v42, %s11128_s22  ;;  %v5533_v42 = vrot.slane %v5502_v59, %v11170_v2  ;;  %v5544_v43 = vrot.slane %v5503_v25, %v11170_v2  ;;  %v5504_v59 = vmul.f32 0.5, %v5500_v55  ;;  %v5505_v4 = vmul.f32 0.5, %v5501_v21 }
 0xaca   :  { %v5508_v55 = vsub.f32 %v5484_v11, %v5492_v39 }
 0xacb   :  { %5424 = vrot.lane.b32.xlu1 %v5387_v8, %s11136_s29  ;;  %v5389_v8 = vcombine.high %v5379_v48, %v16171_v63  ;;  %v5566_v40 = vrot.slane %v5505_v4, %v11170_v2 }
 0xacc   :  { %v5512_v61 = vmul.f32 0.5, %v5508_v55 }
 0xacd   :  { %5436 = vrot.lane.b32.xlu0 %v5379_v48, %s11129_s23  ;;  %v5555_v48 = vrot.slane %v5504_v59, %v11170_v2  ;;  %v5509_v59 = vsub.f32 %v5485_v34, %v5493_v51 }
 0xace   :  { %v5599_v46 = vrot.slane %v5512_v61, %v11170_v2 }
 0xacf   :  { %5432 = vrot.lane.b32.xlu1 %v5388_v54, %s11137_s30  ;;  %v5390_v54 = vcombine.high %v5386_v1, %v16171_v63  ;;  %v5513_v32 = vmul.f32 0.5, %v5509_v59 }
 0xad1   :  { %5444 = vrot.lane.b32.xlu0 %v5386_v1, %s11130_s24  ;;  %v5577_v1 = vrot.slane %v5510_v10, %v11170_v2  ;;  %v5610_v4 = vrot.slane %v5513_v32, %v11170_v2 }
 0xad3   :  { %5440 = vrot.lane.b32.xlu1 %v5389_v8, %s11138_s2  ;;  %v5507_v8 = vsub.f32 %v5483_v53, %v5491_v47 }
 0xad5   :  { %5535 = vbcast.lane.b32.xlu0 %v5533_v42, 256  ;;  %v5511_v25 = vmul.f32 0.5, %v5507_v8 }
 0xad7   :  { %5448 = vrot.lane.b32.xlu1 %v5390_v54, %s11139_s3  ;;  %v5588_v54 = vrot.slane %v5511_v25, %v11170_v2 }
 0xad9   :  { %5546 = vbcast.lane.b32.xlu0 %v5544_v43, 256 }
 0xadb   :  { %5539 = vbcast.lane.b32.xlu1 %v5533_v42, 264 }
 0xadd   :  { %5557 = vbcast.lane.b32.xlu0 %v5555_v48, 256 }
 0xadf   :  { %5550 = vbcast.lane.b32.xlu1 %v5544_v43, 264 }
 0xae1   :  { %5568 = vbcast.lane.b32.xlu0 %v5566_v40, 256 }
 0xae3   :  { %5561 = vbcast.lane.b32.xlu1 %v5555_v48, 264 }
 0xae5   :  { %5579 = vbcast.lane.b32.xlu0 %v5577_v1, 256 }
 0xae7   :  { %5572 = vbcast.lane.b32.xlu1 %v5566_v40, 264 }
 0xae9   :  { %5590 = vbcast.lane.b32.xlu0 %v5588_v54, 256 }
 0xaeb   :  { %5583 = vbcast.lane.b32.xlu1 %v5577_v1, 264 }
 0xaed   :  { %5601 = vbcast.lane.b32.xlu0 %v5599_v46, 256 }
 0xaef   :  { %5594 = vbcast.lane.b32.xlu1 %v5588_v54, 264 }
 0xaf1   :  { %5612 = vbcast.lane.b32.xlu0 %v5610_v4, 256 }
 0xaf3   :  { %5605 = vbcast.lane.b32.xlu1 %v5599_v46, 264 }
 0xaf7   :  { %5616 = vbcast.lane.b32.xlu1 %v5610_v4, 264 }
 0xb2b   :  { %v13160_v10 = vpop.permute.xlu0 %5396 }
 0xb2c   :  { %16374 = vst [vmem:[#allocation232_spill] sm:$0xff] %v13160_v10 }
 0xb2d   :  { %v13162_v33 = vpop.permute.xlu1 %5392 }
 0xb2e   :  { %16375 = vst [vmem:[#allocation233_spill] sm:$0xff] %v13162_v33 }
 0xb2f   :  { %v13164_v39 = vpop.permute.xlu0 %5404 }
 0xb30   :  { %16376 = vst [vmem:[#allocation234_spill] sm:$0xff] %v13164_v39 }
 0xb31   :  { %v13166_v51 = vpop.permute.xlu1 %5400 }
 0xb32   :  { %16377 = vst [vmem:[#allocation235_spill] sm:$0xff] %v13166_v51 }
 0xb33   :  { %v13168_v40 = vpop.permute.xlu0 %5412 }
 0xb34   :  { %16378 = vst [vmem:[#allocation236_spill] sm:$0xff] %v13168_v40 }
 0xb35   :  { %v13170_v61 = vpop.permute.xlu1 %5408 }
 0xb36   :  { %16379 = vst [vmem:[#allocation237_spill] sm:$0xff] %v13170_v61 }
 0xb37   :  { %v13172_v34 = vpop.permute.xlu0 %5420 }
 0xb38   :  { %16380 = vst [vmem:[#allocation238_spill] sm:$0xff] %v13172_v34 }
 0xb39   :  { %v13174_v53 = vpop.permute.xlu1 %5416 }
 0xb3a   :  { %16381 = vst [vmem:[#allocation239_spill] sm:$0xff] %v13174_v53 }
 0xb3b   :  { %v13176_v47 = vpop.permute.xlu0 %5428 }
 0xb3c   :  { %16382 = vst [vmem:[#allocation240_spill] sm:$0xff] %v13176_v47 }
 0xb3d   :  { %v13178_v11 = vpop.permute.xlu1 %5424 }
 0xb3e   :  { %16383 = vst [vmem:[#allocation241_spill] sm:$0xff] %v13178_v11 }
 0xb3f   :  { %v13180_v42 = vpop.permute.xlu0 %5436 }
 0xb40   :  { %16384 = vst [vmem:[#allocation242_spill] sm:$0xff] %v13180_v42 }
 0xb41   :  { %v13182_v43 = vpop.permute.xlu1 %5432 }
 0xb42   :  { %16385 = vst [vmem:[#allocation243_spill] sm:$0xff] %v13182_v43 }
 0xb43   :  { %v13184_v21 = vpop.permute.xlu0 %5444 }
 0xb44   :  { %16386 = vst [vmem:[#allocation244_spill] sm:$0xff] %v13184_v21 }
 0xb45   :  { %v13186_v48 = vpop.permute.xlu1 %5440 }
 0xb46   :  { %16387 = vst [vmem:[#allocation245_spill] sm:$0xff] %v13186_v48 }
 0xb47   :  { %v5536_v8 = vpop.permute.xlu0 %5535 }
 0xb49   :  { %v13188_v1 = vpop.permute.xlu1 %5448 }
 0xb4a   :  { %16388 = vst [vmem:[#allocation246_spill] sm:$0xff] %v13188_v1 }
 0xb4b   :  { %v5547_v25 = vpop.permute.xlu0 %5546 }
 0xb4d   :  { %v5540_v55 = vpop.permute.xlu1 %5539 }
 0xb4f   :  { %v5558_v54 = vpop.permute.xlu0 %5557 }
 0xb51   :  { %v5551_v59 = vpop.permute.xlu1 %5550 }
 0xb53   :  { %v5569_v46 = vpop.permute.xlu0 %5568 }
 0xb55   :  { %v5562_v32 = vpop.permute.xlu1 %5561 }
 0xb57   :  { %v5580_v4 = vpop.permute.xlu0 %5579 }
 0xb58   :  { %v5618_v21 = vsel %vm178_vm0, %v5536_v8, %v5580_v4 }
 0xb59   :  { %v5573_v47 = vpop.permute.xlu1 %5572 }
 0xb5b   :  { %v5591_v11 = vpop.permute.xlu0 %5590 }
 0xb5c   :  { %v5620_v1 = vsel %vm178_vm0, %v5547_v25, %v5591_v11 }
 0xb5d   :  { %v5584_v34 = vpop.permute.xlu1 %5583 }
 0xb5f   :  { %v5602_v42 = vpop.permute.xlu0 %5601 }
 0xb60   :  { %v5622_v43 = vsel %vm178_vm0, %v5558_v54, %v5602_v42 }
 0xb61   :  { %v5595_v53 = vpop.permute.xlu1 %5594  ;;  %v5626_v48 = vcombine.low %v5618_v21, %v5622_v43  ;;  %v5627_v39 = vcombine.high %v5618_v21, %v5622_v43 }
 0xb62   :  { %v5621_v27 = vsel %vm178_vm0, %v5551_v59, %v5595_v53 }
 0xb63   :  { %v5613_v40 = vpop.permute.xlu0 %5612  ;;  %v5634_v15 = vrot.slane %v5626_v48, %v11278_v28  ;;  %v5641_v42 = vrot.slane %v5627_v39, %v11278_v28 }
 0xb64   :  { %v5624_v61 = vsel %vm178_vm0, %v5569_v46, %v5613_v40 }
 0xb65   :  { %v5642_v51 = vcombine.low %v5620_v1, %v5624_v61  ;;  %v5643_v10 = vcombine.high %v5620_v1, %v5624_v61  ;;  %v5606_v33 = vpop.permute.xlu1 %5605 }
 0xb66   :  { %v5623_v11 = vsel %vm178_vm0, %v5562_v32, %v5606_v33 }
 0xb67   :  { %v5650_v12 = vrot.slane %v5642_v51, %v11278_v28  ;;  %v5657_v45 = vrot.slane %v5643_v10, %v11278_v28  ;;  %v5619_v10 = vsel %vm178_vm0, %v5540_v55, %v5584_v34 }
 0xb68   :  { %v5694_v48 = vcombine.low %v5619_v10, %v5623_v11  ;;  %v5695_v55 = vcombine.high %v5619_v10, %v5623_v11 }
 0xb69   :  { %v5658_v54 = vcombine.low %v5634_v15, %v5650_v12  ;;  %v5659_v8 = vcombine.high %v5634_v15, %v5650_v12  ;;  %v5617_v4 = vpop.permute.xlu1 %5616  ;;  %v5674_v51 = vcombine.low %v5641_v42, %v5657_v45  ;;  %v5675_v15 = vcombine.high %v5641_v42, %v5657_v45 }
 0xb6a   :  { %v5625_v40 = vsel %vm178_vm0, %v5573_v47, %v5617_v4  ;;  %v5702_v53 = vrot.slane %v5694_v48, %v11278_v28  ;;  %v5494_v42 = vsub.f32 %v13087_v23, %v13089_v60 }
 0xb6b   :  { %v13202_v61 = vrot.slane %v5658_v54, %v11292_v52  ;;  %v5710_v43 = vcombine.low %v5621_v27, %v5625_v40  ;;  %v5673_v21 = vrot.slane %v5659_v8, %v11292_v52  ;;  %v5682_v39 = vrot.slane %v5674_v51, %v11292_v52 }
 0xb6c   :  { %v5711_v34 = vcombine.high %v5621_v27, %v5625_v40  ;;  %v5689_v25 = vrot.slane %v5675_v15, %v11292_v52  ;;  %v5486_v27 = vsub.f32 %v13081_v26, %v13085_v7  ;;  %v5709_v54 = vrot.slane %v5695_v55, %v11278_v28 }
 0xb6d   :  { %16389 = vst [vmem:[#allocation247_spill] sm:$0xff] %v13202_v61  ;;  %5767 = vrot.lane.b32.xlu1 %v5673_v21, %s11125_s0  ;;  %v5690_v12 = vcombine.high %v13202_v61, %v16171_v63  ;;  %v5718_v33 = vrot.slane %v5710_v43, %v11278_v28  ;;  %v5691_v47 = vcombine.high %v5673_v21, %v16171_v63 }
 0xb6e   :  { %v5692_v45 = vcombine.high %v5682_v39, %v16171_v63  ;;  %v5725_v59 = vrot.slane %v5711_v34, %v11278_v28  ;;  %v5693_v8 = vcombine.high %v5689_v25, %v16171_v63  ;;  %v5514_v40 = vadd.f32 %v5494_v42, %v5486_v27 }
 0xb6f   :  { %5763 = vrot.lane.b32.xlu0 %v5690_v12, %s11132_s25  ;;  %v5726_v1 = vcombine.low %v5702_v53, %v5718_v33  ;;  %v5727_v46 = vcombine.high %v5702_v53, %v5718_v33  ;;  %v5487_v43 = vsub.f32 %v13098_v56, %v13103_v22  ;;  %v5495_v26 = vsub.f32 %v13105_v58, %v13107_v57 }
 0xb70   :  { %v5742_v4 = vcombine.low %v5709_v54, %v5725_v59  ;;  %v5743_v23 = vcombine.high %v5709_v54, %v5725_v59  ;;  %v5518_v21 = vmul.f32 0.5, %v5514_v40  ;;  %v5488_v56 = vsub.f32 %v13117_v13, %v13119_v9 }
 0xb71   :  { %5775 = vrot.lane.b32.xlu1 %v5682_v39, %s11122_s17  ;;  %v5734_v32 = vrot.slane %v5726_v1, %v11292_v52  ;;  %v5741_v11 = vrot.slane %v5727_v46, %v11292_v52  ;;  %v5515_v51 = vadd.f32 %v5495_v26, %v5487_v43  ;;  %v5496_v22 = vsub.f32 %v13121_v36, %v13123_v49 }
 0xb72   :  { %v5750_v60 = vrot.slane %v5742_v4, %v11292_v52  ;;  %v5757_v58 = vrot.slane %v5743_v23, %v11292_v52  ;;  %v5840_v57 = vrot.slane %v5518_v21, %v11170_v2  ;;  %v5489_v33 = vsub.f32 %v13133_v30, %v13135_v62 }
 0xb73   :  { %5771 = vrot.lane.b32.xlu0 %v5691_v47, %s11133_s26  ;;  %v5758_v7 = vcombine.high %v5734_v32, %v16171_v63  ;;  %v5759_v10 = vcombine.high %v5741_v11, %v16171_v63  ;;  %v5519_v48 = vmul.f32 0.5, %v5515_v51  ;;  %v5516_v15 = vadd.f32 %v5496_v22, %v5488_v56 }
 0xb74   :  { %v5760_v12 = vcombine.high %v5750_v60, %v16171_v63  ;;  %v5497_v13 = vsub.f32 %v13137_v41, %v13139_v31  ;;  %v5761_v9 = vcombine.high %v5757_v58, %v16171_v63  ;;  %v5522_v34 = vsub.f32 %v5486_v27, %v5494_v42 }
 0xb75   :  { %5783 = vrot.lane.b32.xlu1 %v5689_v25, %s11126_s20  ;;  %v5851_v36 = vrot.slane %v5519_v48, %v11170_v2  ;;  %v5520_v49 = vmul.f32 0.5, %v5516_v15  ;;  %v5523_v41 = vsub.f32 %v5487_v43, %v5495_v26  ;;  %v5524_v25 = vsub.f32 %v5488_v56, %v5496_v22 }
 0xb76   :  { %v5517_v39 = vadd.f32 %v5497_v13, %v5489_v33  ;;  %v5526_v62 = vmul.f32 0.5, %v5522_v34  ;;  %v5525_v59 = vsub.f32 %v5489_v33, %v5497_v13 }
 0xb77   :  { %5779 = vrot.lane.b32.xlu0 %v5692_v45, %s11134_s27  ;;  %v5862_v53 = vrot.slane %v5520_v49, %v11170_v2  ;;  %v5527_v1 = vmul.f32 0.5, %v5523_v41  ;;  %v5528_v45 = vmul.f32 0.5, %v5524_v25 }
 0xb78   :  { %v5521_v47 = vmul.f32 0.5, %v5517_v39  ;;  %v5884_v31 = vrot.slane %v5526_v62, %v11170_v2 }
 0xb79   :  { %5791 = vrot.lane.b32.xlu1 %v5734_v32, %s11127_s21  ;;  %v5895_v55 = vrot.slane %v5527_v1, %v11170_v2  ;;  %v5906_v46 = vrot.slane %v5528_v45, %v11170_v2  ;;  %v5529_v32 = vmul.f32 0.5, %v5525_v59 }
 0xb7a   :  { %v5873_v30 = vrot.slane %v5521_v47, %v11170_v2 }
 0xb7b   :  { %5787 = vrot.lane.b32.xlu0 %v5693_v8, %s11135_s28  ;;  %v5917_v27 = vrot.slane %v5529_v32, %v11170_v2 }
 0xb7d   :  { %5799 = vrot.lane.b32.xlu1 %v5741_v11, %s11128_s22 }
 0xb7f   :  { %5795 = vrot.lane.b32.xlu0 %v5758_v7, %s11136_s29 }
 0xb81   :  { %5807 = vrot.lane.b32.xlu1 %v5750_v60, %s11129_s23 }
 0xb83   :  { %5803 = vrot.lane.b32.xlu0 %v5759_v10, %s11137_s30 }
 0xb85   :  { %5815 = vrot.lane.b32.xlu1 %v5757_v58, %s11130_s24 }
 0xb87   :  { %5811 = vrot.lane.b32.xlu0 %v5760_v12, %s11138_s2 }
 0xb89   :  { %5842 = vbcast.lane.b32.xlu1 %v5840_v57, 256 }
 0xb8b   :  { %5819 = vrot.lane.b32.xlu0 %v5761_v9, %s11139_s3 }
 0xb8d   :  { %5853 = vbcast.lane.b32.xlu1 %v5851_v36, 256 }
 0xb8f   :  { %5846 = vbcast.lane.b32.xlu0 %v5840_v57, 264 }
 0xb91   :  { %5864 = vbcast.lane.b32.xlu1 %v5862_v53, 256 }
 0xb93   :  { %5857 = vbcast.lane.b32.xlu0 %v5851_v36, 264 }
 0xb95   :  { %5875 = vbcast.lane.b32.xlu1 %v5873_v30, 256 }
 0xb97   :  { %5868 = vbcast.lane.b32.xlu0 %v5862_v53, 264 }
 0xb99   :  { %5886 = vbcast.lane.b32.xlu1 %v5884_v31, 256 }
 0xb9b   :  { %5879 = vbcast.lane.b32.xlu0 %v5873_v30, 264 }
 0xb9d   :  { %5897 = vbcast.lane.b32.xlu1 %v5895_v55, 256 }
 0xb9f   :  { %5890 = vbcast.lane.b32.xlu0 %v5884_v31, 264 }
 0xba1   :  { %5908 = vbcast.lane.b32.xlu1 %v5906_v46, 256 }
 0xba3   :  { %5901 = vbcast.lane.b32.xlu0 %v5895_v55, 264 }
 0xba5   :  { %5919 = vbcast.lane.b32.xlu1 %v5917_v27, 256 }
 0xba7   :  { %5912 = vbcast.lane.b32.xlu0 %v5906_v46, 264 }
 0xbab   :  { %5923 = vbcast.lane.b32.xlu0 %v5917_v27, 264 }
 0xbdf   :  { %v13264_v42 = vpop.permute.xlu1 %5767 }
 0xbe0   :  { %16390 = vst [vmem:[#allocation248_spill] sm:$0xff] %v13264_v42 }
 0xbe1   :  { %v13266_v54 = vpop.permute.xlu0 %5763 }
 0xbe2   :  { %16391 = vst [vmem:[#allocation249_spill] sm:$0xff] %v13266_v54 }
 0xbe3   :  { %v13268_v8 = vpop.permute.xlu1 %5775 }
 0xbe4   :  { %16392 = vst [vmem:[#allocation250_spill] sm:$0xff] %v13268_v8 }
 0xbe5   :  { %v13270_v4 = vpop.permute.xlu0 %5771 }
 0xbe6   :  { %16393 = vst [vmem:[#allocation251_spill] sm:$0xff] %v13270_v4 }
 0xbe7   :  { %v13272_v11 = vpop.permute.xlu1 %5783 }
 0xbe8   :  { %16394 = vst [vmem:[#allocation252_spill] sm:$0xff] %v13272_v11 }
 0xbe9   :  { %v13274_v40 = vpop.permute.xlu0 %5779 }
 0xbea   :  { %16395 = vst [vmem:[#allocation253_spill] sm:$0xff] %v13274_v40 }
 0xbeb   :  { %v13276_v43 = vpop.permute.xlu1 %5791 }
 0xbec   :  { %16396 = vst [vmem:[#allocation254_spill] sm:$0xff] %v13276_v43 }
 0xbed   :  { %v13278_v26 = vpop.permute.xlu0 %5787 }
 0xbee   :  { %16397 = vst [vmem:[#allocation255_spill] sm:$0xff] %v13278_v26 }
 0xbef   :  { %v13280_v7 = vpop.permute.xlu1 %5799 }
 0xbf0   :  { %16398 = vst [vmem:[#allocation256_spill] sm:$0xff] %v13280_v7 }
 0xbf1   :  { %v13282_v23 = vpop.permute.xlu0 %5795 }
 0xbf2   :  { %16399 = vst [vmem:[#allocation257_spill] sm:$0xff] %v13282_v23 }
 0xbf3   :  { %v13284_v60 = vpop.permute.xlu1 %5807 }
 0xbf4   :  { %16400 = vst [vmem:[#allocation258_spill] sm:$0xff] %v13284_v60  ;;  %v13373_v60 = vld [vmem:[#allocation2 + $0xc9] sm:$0x1] }
 0xbf5   :  { %v13286_v21 = vpop.permute.xlu0 %5803 }
 0xbf6   :  { %16401 = vst [vmem:[#allocation259_spill] sm:$0xff] %v13286_v21  ;;  %v13375_v21 = vld [vmem:[#allocation2 + $0xd9] sm:$0x1] }
 0xbf7   :  { %v13288_v51 = vpop.permute.xlu1 %5815  ;;  %v6163_v23 = vadd.f32 %v13375_v21, %v13373_v60 }
 0xbf8   :  { %16402 = vst [vmem:[#allocation260_spill] sm:$0xff] %v13288_v51 }
 0xbf9   :  { %v13290_v10 = vpop.permute.xlu0 %5811 }
 0xbfa   :  { %16403 = vst [vmem:[#allocation261_spill] sm:$0xff] %v13290_v10 }
 0xbfb   :  { %v5843_v56 = vpop.permute.xlu1 %5842 }
 0xbfd   :  { %v13292_v22 = vpop.permute.xlu0 %5819 }
 0xbfe   :  { %16404 = vst [vmem:[#allocation262_spill] sm:$0xff] %v13292_v22 }
 0xbff   :  { %v5854_v58 = vpop.permute.xlu1 %5853 }
 0xc01   :  { %v5847_v57 = vpop.permute.xlu0 %5846 }
 0xc03   :  { %v5865_v48 = vpop.permute.xlu1 %5864 }
 0xc05   :  { %v5858_v12 = vpop.permute.xlu0 %5857 }
 0xc07   :  { %v5876_v15 = vpop.permute.xlu1 %5875 }
 0xc09   :  { %v5869_v33 = vpop.permute.xlu0 %5868 }
 0xc0b   :  { %v5887_v13 = vpop.permute.xlu1 %5886 }
 0xc0c   :  { %v5925_v34 = vsel %vm178_vm0, %v5843_v56, %v5887_v13 }
 0xc0d   :  { %v5880_v9 = vpop.permute.xlu0 %5879 }
 0xc0f   :  { %v5898_v36 = vpop.permute.xlu1 %5897 }
 0xc10   :  { %v5927_v41 = vsel %vm178_vm0, %v5854_v58, %v5898_v36 }
 0xc11   :  { %v5891_v49 = vpop.permute.xlu0 %5890 }
 0xc13   :  { %v5909_v39 = vpop.permute.xlu1 %5908 }
 0xc14   :  { %v5929_v53 = vsel %vm178_vm0, %v5865_v48, %v5909_v39 }
 0xc15   :  { %v5902_v47 = vpop.permute.xlu0 %5901  ;;  %v5933_v30 = vcombine.low %v5925_v34, %v5929_v53  ;;  %v5934_v1 = vcombine.high %v5925_v34, %v5929_v53 }
 0xc16   :  { %v5928_v39 = vsel %vm178_vm0, %v5858_v12, %v5902_v47 }
 0xc17   :  { %v5920_v62 = vpop.permute.xlu1 %5919  ;;  %v5941_v59 = vrot.slane %v5933_v30, %v11278_v28  ;;  %v5948_v27 = vrot.slane %v5934_v1, %v11278_v28 }
 0xc18   :  { %v5931_v31 = vsel %vm178_vm0, %v5876_v15, %v5920_v62  ;;  %v5926_v62 = vsel %vm178_vm0, %v5847_v57, %v5891_v49 }
 0xc19   :  { %v5949_v25 = vcombine.low %v5927_v41, %v5931_v31  ;;  %v5950_v55 = vcombine.high %v5927_v41, %v5931_v31  ;;  %v5913_v45 = vpop.permute.xlu0 %5912 }
 0xc1a   :  { %v5930_v58 = vsel %vm178_vm0, %v5869_v33, %v5913_v45 }
 0xc1b   :  { %v5957_v46 = vrot.slane %v5949_v25, %v11278_v28  ;;  %v5964_v32 = vrot.slane %v5950_v55, %v11278_v28  ;;  %v6001_v41 = vcombine.low %v5926_v62, %v5930_v58  ;;  %v13321_v55 = vld [vmem:[#allocation2 + $0x9] sm:$0x1]  ;;  %v6002_v45 = vcombine.high %v5926_v62, %v5930_v58 }
 0xc1c   :  { %v13345_v62 = vld [vmem:[#allocation2 + $0x69] sm:$0x1] }
 0xc1d   :  { %v5965_v48 = vcombine.low %v5941_v59, %v5957_v46  ;;  %v5966_v56 = vcombine.high %v5941_v59, %v5957_v46  ;;  %v5924_v13 = vpop.permute.xlu0 %5923  ;;  %v5981_v30 = vcombine.low %v5948_v27, %v5964_v32  ;;  %v5982_v12 = vcombine.high %v5948_v27, %v5964_v32  ;;  %v13325_v46 = vld [vmem:[#allocation2 + $0x19] sm:$0x1]  ;;  %v13327_v32 = vld [vmem:[#allocation2 + $0x29] sm:$0x1] }
 0xc1e   :  { %v5932_v15 = vsel %vm178_vm0, %v5880_v9, %v5924_v13  ;;  %v6009_v47 = vrot.slane %v6001_v41, %v11278_v28  ;;  %v13329_v27 = vld [vmem:[#allocation2 + $0x39] sm:$0x1] }
 0xc1f   :  { %v13306_v36 = vrot.slane %v5965_v48, %v11292_v52  ;;  %v6017_v53 = vcombine.low %v5928_v39, %v5932_v15  ;;  %v5980_v34 = vrot.slane %v5966_v56, %v11292_v52  ;;  %v5989_v9 = vrot.slane %v5981_v30, %v11292_v52  ;;  %v13343_v30 = vld [vmem:[#allocation2 + $0x59] sm:$0x1] }
 0xc20   :  { %v6018_v57 = vcombine.high %v5928_v39, %v5932_v15  ;;  %v5996_v25 = vrot.slane %v5982_v12, %v11292_v52  ;;  %v6160_v39 = vadd.f32 %v13325_v46, %v13321_v55  ;;  %v6168_v58 = vadd.f32 %v13329_v27, %v13327_v32  ;;  %v13338_v15 = vld [vmem:[#allocation2 + $0x49] sm:$0x1]  ;;  %v13347_v41 = vld [vmem:[#allocation2 + $0x79] sm:$0x1] }
 0xc21   :  { %16405 = vst [vmem:[#allocation263_spill] sm:$0xff] %v13306_v36  ;;  %6074 = vrot.lane.b32.xlu0 %v5980_v34, %s11125_s0  ;;  %v5997_v31 = vcombine.high %v13306_v36, %v16171_v63  ;;  %v6025_v33 = vrot.slane %v6017_v53, %v11278_v28  ;;  %v5998_v1 = vcombine.high %v5980_v34, %v16171_v63 }
 0xc22   :  { %v5999_v59 = vcombine.high %v5989_v9, %v16171_v63  ;;  %v6032_v48 = vrot.slane %v6018_v57, %v11278_v28  ;;  %v6016_v53 = vrot.slane %v6002_v45, %v11278_v28  ;;  %v6000_v34 = vcombine.high %v5996_v25, %v16171_v63  ;;  %v13357_v57 = vld [vmem:[#allocation2 + $0x89] sm:$0x1]  ;;  %v13363_v45 = vld [vmem:[#allocation2 + $0xb9] sm:$0x1] }
 0xc23   :  { %6070 = vrot.lane.b32.xlu1 %v5997_v31, %s11132_s25  ;;  %v6033_v49 = vcombine.low %v6009_v47, %v6025_v33  ;;  %v6034_v56 = vcombine.high %v6009_v47, %v6025_v33  ;;  %v6176_v33 = vadd.f32 %v6168_v58, %v6160_v39  ;;  %v6169_v47 = vadd.f32 %v13347_v41, %v13345_v62 }
 0xc24   :  { %v6049_v31 = vcombine.low %v6016_v53, %v6032_v48  ;;  %v6184_v11 = vsub.f32 %v6160_v39, %v6168_v58 }
 0xc25   :  { %6082 = vrot.lane.b32.xlu0 %v5989_v9, %s11122_s17  ;;  %v6041_v13 = vrot.slane %v6033_v49, %v11292_v52  ;;  %v6048_v12 = vrot.slane %v6034_v56, %v11292_v52  ;;  %v6161_v9 = vadd.f32 %v13343_v30, %v13338_v15  ;;  %v13359_v49 = vld [vmem:[#allocation2 + $0x99] sm:$0x1] }
 0xc26   :  { %v6057_v56 = vrot.slane %v6049_v31, %v11292_v52  ;;  %v6188_v8 = vmul.f32 0.5, %v6184_v11 }
 0xc27   :  { %6078 = vrot.lane.b32.xlu1 %v5998_v1, %s11133_s26  ;;  %v6065_v1 = vcombine.high %v6041_v13, %v16171_v63  ;;  %v6177_v22 = vadd.f32 %v6169_v47, %v6161_v9  ;;  %v6066_v51 = vcombine.high %v6048_v12, %v16171_v63 }
 0xc29   :  { %6090 = vrot.lane.b32.xlu0 %v5996_v25, %s11126_s20  ;;  %v13361_v25 = vld [vmem:[#allocation2 + $0xa9] sm:$0x1] }
 0xc2a   :  { %v6170_v10 = vadd.f32 %v13363_v45, %v13361_v25 }
 0xc2b   :  { %6086 = vrot.lane.b32.xlu1 %v5999_v59, %s11134_s27  ;;  %v6050_v59 = vcombine.high %v6016_v53, %v6032_v48  ;;  %v13377_v48 = vld [vmem:[#allocation2 + $0xe9] sm:$0x1]  ;;  %v13379_v53 = vld [vmem:[#allocation2 + $0xf9] sm:$0x1] }
 0xc2c   :  { %v6171_v43 = vadd.f32 %v13379_v53, %v13377_v48 }
 0xc2d   :  { %6098 = vrot.lane.b32.xlu0 %v6041_v13, %s11127_s21  ;;  %v6162_v13 = vadd.f32 %v13359_v49, %v13357_v57  ;;  %v6064_v31 = vrot.slane %v6050_v59, %v11292_v52 }
 0xc2f   :  { %6094 = vrot.lane.b32.xlu1 %v6000_v34, %s11135_s28  ;;  %v6180_v34 = vmul.f32 0.5, %v6176_v33  ;;  %v6181_v33 = vmul.f32 0.5, %v6177_v22  ;;  %v6178_v7 = vadd.f32 %v6170_v10, %v6162_v13  ;;  %v6179_v22 = vadd.f32 %v6171_v43, %v6163_v23 }
 0xc31   :  { %6106 = vrot.lane.b32.xlu0 %v6048_v12, %s11128_s22  ;;  %v6211_v12 = vrot.slane %v6180_v34, %v11170_v2  ;;  %v6222_v59 = vrot.slane %v6181_v33, %v11170_v2  ;;  %v6182_v34 = vmul.f32 0.5, %v6178_v7  ;;  %v6183_v26 = vmul.f32 0.5, %v6179_v22 }
 0xc32   :  { %v6186_v7 = vsub.f32 %v6162_v13, %v6170_v10 }
 0xc33   :  { %6102 = vrot.lane.b32.xlu1 %v6065_v1, %s11136_s29  ;;  %v6067_v1 = vcombine.high %v6057_v56, %v16171_v63  ;;  %v6244_v40 = vrot.slane %v6183_v26, %v11170_v2 }
 0xc34   :  { %v6190_v4 = vmul.f32 0.5, %v6186_v7 }
 0xc35   :  { %6114 = vrot.lane.b32.xlu0 %v6057_v56, %s11129_s23  ;;  %v6233_v56 = vrot.slane %v6182_v34, %v11170_v2  ;;  %v6187_v34 = vsub.f32 %v6163_v23, %v6171_v43 }
 0xc36   :  { %v6277_v39 = vrot.slane %v6190_v4, %v11170_v2 }
 0xc37   :  { %6110 = vrot.lane.b32.xlu1 %v6066_v51, %s11137_s30  ;;  %v6068_v51 = vcombine.high %v6064_v31, %v16171_v63  ;;  %v6191_v58 = vmul.f32 0.5, %v6187_v34 }
 0xc39   :  { %6122 = vrot.lane.b32.xlu0 %v6064_v31, %s11130_s24  ;;  %v6255_v31 = vrot.slane %v6188_v8, %v11170_v2  ;;  %v6288_v11 = vrot.slane %v6191_v58, %v11170_v2 }
 0xc3b   :  { %6118 = vrot.lane.b32.xlu1 %v6067_v1, %s11138_s2  ;;  %v6185_v1 = vsub.f32 %v6161_v9, %v6169_v47 }
 0xc3d   :  { %6213 = vbcast.lane.b32.xlu0 %v6211_v12, 256  ;;  %v6189_v33 = vmul.f32 0.5, %v6185_v1 }
 0xc3f   :  { %6126 = vrot.lane.b32.xlu1 %v6068_v51, %s11139_s3  ;;  %v6266_v51 = vrot.slane %v6189_v33, %v11170_v2 }
 0xc41   :  { %6224 = vbcast.lane.b32.xlu0 %v6222_v59, 256 }
 0xc43   :  { %6217 = vbcast.lane.b32.xlu1 %v6211_v12, 264 }
 0xc45   :  { %6235 = vbcast.lane.b32.xlu0 %v6233_v56, 256 }
 0xc47   :  { %6228 = vbcast.lane.b32.xlu1 %v6222_v59, 264 }
 0xc49   :  { %6246 = vbcast.lane.b32.xlu0 %v6244_v40, 256 }
 0xc4b   :  { %6239 = vbcast.lane.b32.xlu1 %v6233_v56, 264 }
 0xc4d   :  { %6257 = vbcast.lane.b32.xlu0 %v6255_v31, 256 }
 0xc4f   :  { %6250 = vbcast.lane.b32.xlu1 %v6244_v40, 264 }
 0xc51   :  { %6268 = vbcast.lane.b32.xlu0 %v6266_v51, 256 }
 0xc53   :  { %6261 = vbcast.lane.b32.xlu1 %v6255_v31, 264 }
 0xc55   :  { %6279 = vbcast.lane.b32.xlu0 %v6277_v39, 256 }
 0xc57   :  { %6272 = vbcast.lane.b32.xlu1 %v6266_v51, 264 }
 0xc59   :  { %6290 = vbcast.lane.b32.xlu0 %v6288_v11, 256 }
 0xc5b   :  { %6283 = vbcast.lane.b32.xlu1 %v6277_v39, 264 }
 0xc5f   :  { %6294 = vbcast.lane.b32.xlu1 %v6288_v11, 264 }
 0xc93   :  { %v13400_v8 = vpop.permute.xlu0 %6074 }
 0xc94   :  { %16406 = vst [vmem:[#allocation264_spill] sm:$0xff] %v13400_v8 }
 0xc95   :  { %v13402_v26 = vpop.permute.xlu1 %6070 }
 0xc96   :  { %16407 = vst [vmem:[#allocation265_spill] sm:$0xff] %v13402_v26 }
 0xc97   :  { %v13404_v10 = vpop.permute.xlu0 %6082 }
 0xc98   :  { %16408 = vst [vmem:[#allocation266_spill] sm:$0xff] %v13404_v10 }
 0xc99   :  { %v13406_v43 = vpop.permute.xlu1 %6078 }
 0xc9a   :  { %16409 = vst [vmem:[#allocation267_spill] sm:$0xff] %v13406_v43 }
 0xc9b   :  { %v13408_v40 = vpop.permute.xlu0 %6090 }
 0xc9c   :  { %16410 = vst [vmem:[#allocation268_spill] sm:$0xff] %v13408_v40 }
 0xc9d   :  { %v13410_v4 = vpop.permute.xlu1 %6086 }
 0xc9e   :  { %16411 = vst [vmem:[#allocation269_spill] sm:$0xff] %v13410_v4 }
 0xc9f   :  { %v13412_v23 = vpop.permute.xlu0 %6098 }
 0xca0   :  { %16412 = vst [vmem:[#allocation270_spill] sm:$0xff] %v13412_v23 }
 0xca1   :  { %v13414_v9 = vpop.permute.xlu1 %6094 }
 0xca2   :  { %16413 = vst [vmem:[#allocation271_spill] sm:$0xff] %v13414_v9 }
 0xca3   :  { %v13416_v47 = vpop.permute.xlu0 %6106 }
 0xca4   :  { %16414 = vst [vmem:[#allocation272_spill] sm:$0xff] %v13416_v47 }
 0xca5   :  { %v13418_v13 = vpop.permute.xlu1 %6102 }
 0xca6   :  { %16415 = vst [vmem:[#allocation273_spill] sm:$0xff] %v13418_v13 }
 0xca7   :  { %v13420_v12 = vpop.permute.xlu0 %6114 }
 0xca8   :  { %16416 = vst [vmem:[#allocation274_spill] sm:$0xff] %v13420_v12 }
 0xca9   :  { %v13422_v59 = vpop.permute.xlu1 %6110 }
 0xcaa   :  { %16417 = vst [vmem:[#allocation275_spill] sm:$0xff] %v13422_v59 }
 0xcab   :  { %v13424_v22 = vpop.permute.xlu0 %6122 }
 0xcac   :  { %16418 = vst [vmem:[#allocation276_spill] sm:$0xff] %v13424_v22 }
 0xcad   :  { %v13426_v56 = vpop.permute.xlu1 %6118 }
 0xcae   :  { %16419 = vst [vmem:[#allocation277_spill] sm:$0xff] %v13426_v56 }
 0xcaf   :  { %v6214_v1 = vpop.permute.xlu0 %6213 }
 0xcb1   :  { %v13428_v31 = vpop.permute.xlu1 %6126 }
 0xcb2   :  { %16420 = vst [vmem:[#allocation278_spill] sm:$0xff] %v13428_v31 }
 0xcb3   :  { %v6225_v33 = vpop.permute.xlu0 %6224 }
 0xcb5   :  { %v6218_v7 = vpop.permute.xlu1 %6217 }
 0xcb7   :  { %v6236_v51 = vpop.permute.xlu0 %6235 }
 0xcb9   :  { %v6229_v34 = vpop.permute.xlu1 %6228 }
 0xcbb   :  { %v6247_v39 = vpop.permute.xlu0 %6246 }
 0xcbd   :  { %v6240_v58 = vpop.permute.xlu1 %6239 }
 0xcbf   :  { %v6258_v11 = vpop.permute.xlu0 %6257 }
 0xcc0   :  { %v6296_v22 = vsel %vm178_vm0, %v6214_v1, %v6258_v11 }
 0xcc1   :  { %v6251_v42 = vpop.permute.xlu1 %6250 }
 0xcc3   :  { %v6269_v61 = vpop.permute.xlu0 %6268 }
 0xcc4   :  { %v6298_v31 = vsel %vm178_vm0, %v6225_v33, %v6269_v61 }
 0xcc5   :  { %v6262_v54 = vpop.permute.xlu1 %6261 }
 0xcc7   :  { %v6280_v12 = vpop.permute.xlu0 %6279 }
 0xcc8   :  { %v6300_v59 = vsel %vm178_vm0, %v6236_v51, %v6280_v12 }
 0xcc9   :  { %v6273_v47 = vpop.permute.xlu1 %6272  ;;  %v6304_v56 = vcombine.low %v6296_v22, %v6300_v59  ;;  %v6305_v9 = vcombine.high %v6296_v22, %v6300_v59 }
 0xcca   :  { %v6299_v26 = vsel %vm178_vm0, %v6229_v34, %v6273_v47 }
 0xccb   :  { %v6291_v13 = vpop.permute.xlu0 %6290  ;;  %v6312_v43 = vrot.slane %v6304_v56, %v11278_v28  ;;  %v6319_v12 = vrot.slane %v6305_v9, %v11278_v28 }
 0xccc   :  { %v6302_v23 = vsel %vm178_vm0, %v6247_v39, %v6291_v13 }
 0xccd   :  { %v6320_v40 = vcombine.low %v6298_v31, %v6302_v23  ;;  %v6321_v4 = vcombine.high %v6298_v31, %v6302_v23  ;;  %v6284_v10 = vpop.permute.xlu1 %6283 }
 0xcce   :  { %v6301_v61 = vsel %vm178_vm0, %v6240_v58, %v6284_v10 }
 0xccf   :  { %v6328_v8 = vrot.slane %v6320_v40, %v11278_v28  ;;  %v6335_v36 = vrot.slane %v6321_v4, %v11278_v28  ;;  %v6297_v4 = vsel %vm178_vm0, %v6218_v7, %v6262_v54 }
 0xcd0   :  { %v6372_v56 = vcombine.low %v6297_v4, %v6301_v61  ;;  %v6373_v7 = vcombine.high %v6297_v4, %v6301_v61 }
 0xcd1   :  { %v6336_v51 = vcombine.low %v6312_v43, %v6328_v8  ;;  %v6337_v1 = vcombine.high %v6312_v43, %v6328_v8  ;;  %v6295_v11 = vpop.permute.xlu1 %6294  ;;  %v6352_v40 = vcombine.low %v6319_v12, %v6335_v36  ;;  %v6353_v43 = vcombine.high %v6319_v12, %v6335_v36 }
 0xcd2   :  { %v6303_v13 = vsel %vm178_vm0, %v6251_v42, %v6295_v11  ;;  %v6380_v9 = vrot.slane %v6372_v56, %v11278_v28  ;;  %v6172_v12 = vsub.f32 %v13327_v32, %v13329_v27 }
 0xcd3   :  { %v13442_v23 = vrot.slane %v6336_v51, %v11292_v52  ;;  %v6388_v59 = vcombine.low %v6299_v26, %v6303_v13  ;;  %v6351_v22 = vrot.slane %v6337_v1, %v11292_v52  ;;  %v6360_v42 = vrot.slane %v6352_v40, %v11292_v52 }
 0xcd4   :  { %v6389_v54 = vcombine.high %v6299_v26, %v6303_v13  ;;  %v6367_v33 = vrot.slane %v6353_v43, %v11292_v52  ;;  %v6164_v26 = vsub.f32 %v13321_v55, %v13325_v46  ;;  %v6387_v51 = vrot.slane %v6373_v7, %v11278_v28 }
 0xcd5   :  { %16421 = vst [vmem:[#allocation279_spill] sm:$0xff] %v13442_v23  ;;  %6445 = vrot.lane.b32.xlu1 %v6351_v22, %s11125_s0  ;;  %v6368_v8 = vcombine.high %v13442_v23, %v16171_v63  ;;  %v6396_v10 = vrot.slane %v6388_v59, %v11278_v28  ;;  %v6369_v47 = vcombine.high %v6351_v22, %v16171_v63 }
 0xcd6   :  { %v6370_v36 = vcombine.high %v6360_v42, %v16171_v63  ;;  %v6403_v34 = vrot.slane %v6389_v54, %v11278_v28  ;;  %v6371_v1 = vcombine.high %v6367_v33, %v16171_v63  ;;  %v6192_v13 = vadd.f32 %v6172_v12, %v6164_v26 }
 0xcd7   :  { %6441 = vrot.lane.b32.xlu0 %v6368_v8, %s11132_s25  ;;  %v6404_v31 = vcombine.low %v6380_v9, %v6396_v10  ;;  %v6405_v39 = vcombine.high %v6380_v9, %v6396_v10  ;;  %v6165_v59 = vsub.f32 %v13338_v15, %v13343_v30  ;;  %v6173_v55 = vsub.f32 %v13345_v62, %v13347_v41 }
 0xcd8   :  { %v6420_v11 = vcombine.low %v6387_v51, %v6403_v34  ;;  %v6421_v32 = vcombine.high %v6387_v51, %v6403_v34  ;;  %v6196_v22 = vmul.f32 0.5, %v6192_v13  ;;  %v6166_v15 = vsub.f32 %v13357_v57, %v13359_v49 }
 0xcd9   :  { %6453 = vrot.lane.b32.xlu1 %v6360_v42, %s11122_s17  ;;  %v6412_v58 = vrot.slane %v6404_v31, %v11292_v52  ;;  %v6419_v61 = vrot.slane %v6405_v39, %v11292_v52  ;;  %v6193_v40 = vadd.f32 %v6173_v55, %v6165_v59  ;;  %v6174_v30 = vsub.f32 %v13361_v25, %v13363_v45 }
 0xcda   :  { %v6428_v27 = vrot.slane %v6420_v11, %v11292_v52  ;;  %v6435_v62 = vrot.slane %v6421_v32, %v11292_v52  ;;  %v6518_v41 = vrot.slane %v6196_v22, %v11170_v2  ;;  %v6167_v10 = vsub.f32 %v13373_v60, %v13375_v21 }
 0xcdb   :  { %6449 = vrot.lane.b32.xlu0 %v6369_v47, %s11133_s26  ;;  %v6436_v46 = vcombine.high %v6412_v58, %v16171_v63  ;;  %v6437_v4 = vcombine.high %v6419_v61, %v16171_v63  ;;  %v6197_v56 = vmul.f32 0.5, %v6193_v40  ;;  %v6194_v43 = vadd.f32 %v6174_v30, %v6166_v15 }
 0xcdc   :  { %v6438_v8 = vcombine.high %v6428_v27, %v16171_v63  ;;  %v6175_v57 = vsub.f32 %v13377_v48, %v13379_v53  ;;  %v6439_v49 = vcombine.high %v6435_v62, %v16171_v63  ;;  %v6200_v54 = vsub.f32 %v6164_v26, %v6172_v12 }
 0xcdd   :  { %6461 = vrot.lane.b32.xlu1 %v6367_v33, %s11126_s20  ;;  %v6529_v25 = vrot.slane %v6197_v56, %v11170_v2  ;;  %v6198_v45 = vmul.f32 0.5, %v6194_v43  ;;  %v6201_v48 = vsub.f32 %v6165_v59, %v6173_v55  ;;  %v6202_v33 = vsub.f32 %v6166_v15, %v6174_v30 }
 0xcde   :  { %v6195_v42 = vadd.f32 %v6175_v57, %v6167_v10  ;;  %v6204_v21 = vmul.f32 0.5, %v6200_v54  ;;  %v6203_v34 = vsub.f32 %v6167_v10, %v6175_v57 }
 0xcdf   :  { %6457 = vrot.lane.b32.xlu0 %v6370_v36, %s11134_s27  ;;  %v6540_v9 = vrot.slane %v6198_v45, %v11170_v2  ;;  %v6205_v31 = vmul.f32 0.5, %v6201_v48  ;;  %v6206_v36 = vmul.f32 0.5, %v6202_v33 }
 0xce0   :  { %v6199_v47 = vmul.f32 0.5, %v6195_v42  ;;  %v6562_v53 = vrot.slane %v6204_v21, %v11170_v2 }
 0xce1   :  { %6469 = vrot.lane.b32.xlu1 %v6412_v58, %s11127_s21  ;;  %v6573_v7 = vrot.slane %v6205_v31, %v11170_v2  ;;  %v6584_v39 = vrot.slane %v6206_v36, %v11170_v2  ;;  %v6207_v58 = vmul.f32 0.5, %v6203_v34 }
 0xce2   :  { %v6551_v60 = vrot.slane %v6199_v47, %v11170_v2 }
 0xce3   :  { %6465 = vrot.lane.b32.xlu0 %v6371_v1, %s11135_s28  ;;  %v6595_v26 = vrot.slane %v6207_v58, %v11170_v2 }
 0xce5   :  { %6477 = vrot.lane.b32.xlu1 %v6419_v61, %s11128_s22 }
 0xce7   :  { %6473 = vrot.lane.b32.xlu0 %v6436_v46, %s11136_s29 }
 0xce9   :  { %6485 = vrot.lane.b32.xlu1 %v6428_v27, %s11129_s23 }
 0xceb   :  { %6481 = vrot.lane.b32.xlu0 %v6437_v4, %s11137_s30 }
 0xced   :  { %6493 = vrot.lane.b32.xlu1 %v6435_v62, %s11130_s24 }
 0xcef   :  { %6489 = vrot.lane.b32.xlu0 %v6438_v8, %s11138_s2 }
 0xcf1   :  { %6520 = vbcast.lane.b32.xlu1 %v6518_v41, 256 }
 0xcf3   :  { %6497 = vrot.lane.b32.xlu0 %v6439_v49, %s11139_s3 }
 0xcf5   :  { %6531 = vbcast.lane.b32.xlu1 %v6529_v25, 256 }
 0xcf7   :  { %6524 = vbcast.lane.b32.xlu0 %v6518_v41, 264 }
 0xcf9   :  { %6542 = vbcast.lane.b32.xlu1 %v6540_v9, 256 }
 0xcfb   :  { %6535 = vbcast.lane.b32.xlu0 %v6529_v25, 264 }
 0xcfd   :  { %6553 = vbcast.lane.b32.xlu1 %v6551_v60, 256 }
 0xcff   :  { %6546 = vbcast.lane.b32.xlu0 %v6540_v9, 264 }
 0xd01   :  { %6564 = vbcast.lane.b32.xlu1 %v6562_v53, 256 }
 0xd03   :  { %6557 = vbcast.lane.b32.xlu0 %v6551_v60, 264 }
 0xd05   :  { %6575 = vbcast.lane.b32.xlu1 %v6573_v7, 256 }
 0xd07   :  { %6568 = vbcast.lane.b32.xlu0 %v6562_v53, 264 }
 0xd09   :  { %6586 = vbcast.lane.b32.xlu1 %v6584_v39, 256 }
 0xd0b   :  { %6579 = vbcast.lane.b32.xlu0 %v6573_v7, 264 }
 0xd0d   :  { %6597 = vbcast.lane.b32.xlu1 %v6595_v26, 256 }
 0xd0f   :  { %6590 = vbcast.lane.b32.xlu0 %v6584_v39, 264 }
 0xd13   :  { %6601 = vbcast.lane.b32.xlu0 %v6595_v26, 264 }
 0xd47   :  { %v13504_v12 = vpop.permute.xlu1 %6445 }
 0xd48   :  { %16422 = vst [vmem:[#allocation280_spill] sm:$0xff] %v13504_v12 }
 0xd49   :  { %v13506_v51 = vpop.permute.xlu0 %6441 }
 0xd4a   :  { %16423 = vst [vmem:[#allocation281_spill] sm:$0xff] %v13506_v51 }
 0xd4b   :  { %v13508_v1 = vpop.permute.xlu1 %6453 }
 0xd4c   :  { %16424 = vst [vmem:[#allocation282_spill] sm:$0xff] %v13508_v1 }
 0xd4d   :  { %v13510_v11 = vpop.permute.xlu0 %6449 }
 0xd4e   :  { %16425 = vst [vmem:[#allocation283_spill] sm:$0xff] %v13510_v11 }
 0xd4f   :  { %v13512_v61 = vpop.permute.xlu1 %6461 }
 0xd50   :  { %16426 = vst [vmem:[#allocation284_spill] sm:$0xff] %v13512_v61 }
 0xd51   :  { %v13514_v13 = vpop.permute.xlu0 %6457 }
 0xd52   :  { %16427 = vst [vmem:[#allocation285_spill] sm:$0xff] %v13514_v13 }
 0xd53   :  { %v13516_v59 = vpop.permute.xlu1 %6469 }
 0xd54   :  { %16428 = vst [vmem:[#allocation286_spill] sm:$0xff] %v13516_v59 }
 0xd55   :  { %v13518_v55 = vpop.permute.xlu0 %6465 }
 0xd56   :  { %16429 = vst [vmem:[#allocation287_spill] sm:$0xff] %v13518_v55 }
 0xd57   :  { %v13520_v46 = vpop.permute.xlu1 %6477 }
 0xd58   :  { %16430 = vst [vmem:[#allocation288_spill] sm:$0xff] %v13520_v46 }
 0xd59   :  { %v13522_v32 = vpop.permute.xlu0 %6473 }
 0xd5a   :  { %16431 = vst [vmem:[#allocation289_spill] sm:$0xff] %v13522_v32 }
 0xd5b   :  { %v13524_v27 = vpop.permute.xlu1 %6485 }
 0xd5c   :  { %16432 = vst [vmem:[#allocation290_spill] sm:$0xff] %v13524_v27  ;;  %v13613_v27 = vld [vmem:[#allocation2 + $0xca] sm:$0x1] }
 0xd5d   :  { %v13526_v22 = vpop.permute.xlu0 %6481 }
 0xd5e   :  { %16433 = vst [vmem:[#allocation291_spill] sm:$0xff] %v13526_v22  ;;  %v13615_v22 = vld [vmem:[#allocation2 + $0xda] sm:$0x1] }
 0xd5f   :  { %v13528_v40 = vpop.permute.xlu1 %6493 }
 0xd60   :  { %16434 = vst [vmem:[#allocation292_spill] sm:$0xff] %v13528_v40 }
 0xd61   :  { %v13530_v4 = vpop.permute.xlu0 %6489 }
 0xd62   :  { %16435 = vst [vmem:[#allocation293_spill] sm:$0xff] %v13530_v4 }
 0xd63   :  { %v6521_v15 = vpop.permute.xlu1 %6520 }
 0xd65   :  { %v13532_v30 = vpop.permute.xlu0 %6497 }
 0xd66   :  { %16436 = vst [vmem:[#allocation294_spill] sm:$0xff] %v13532_v30 }
 0xd67   :  { %v6532_v62 = vpop.permute.xlu1 %6531 }
 0xd69   :  { %v6525_v41 = vpop.permute.xlu0 %6524 }
 0xd6b   :  { %v6543_v56 = vpop.permute.xlu1 %6542 }
 0xd6d   :  { %v6536_v8 = vpop.permute.xlu0 %6535 }
 0xd6f   :  { %v6554_v43 = vpop.permute.xlu1 %6553 }
 0xd71   :  { %v6547_v10 = vpop.permute.xlu0 %6546 }
 0xd73   :  { %v6565_v57 = vpop.permute.xlu1 %6564 }
 0xd74   :  { %v6603_v54 = vsel %vm178_vm0, %v6521_v15, %v6565_v57 }
 0xd75   :  { %v6558_v49 = vpop.permute.xlu0 %6557 }
 0xd77   :  { %v6576_v25 = vpop.permute.xlu1 %6575 }
 0xd78   :  { %v6605_v48 = vsel %vm178_vm0, %v6532_v62, %v6576_v25 }
 0xd79   :  { %v6569_v45 = vpop.permute.xlu0 %6568 }
 0xd7b   :  { %v6587_v42 = vpop.permute.xlu1 %6586 }
 0xd7c   :  { %v6607_v9 = vsel %vm178_vm0, %v6543_v56, %v6587_v42 }
 0xd7d   :  { %v6580_v47 = vpop.permute.xlu0 %6579  ;;  %v6611_v60 = vcombine.low %v6603_v54, %v6607_v9  ;;  %v6612_v31 = vcombine.high %v6603_v54, %v6607_v9 }
 0xd7e   :  { %v6606_v42 = vsel %vm178_vm0, %v6536_v8, %v6580_v47 }
 0xd7f   :  { %v6598_v21 = vpop.permute.xlu1 %6597  ;;  %v6619_v34 = vrot.slane %v6611_v60, %v11278_v28  ;;  %v6626_v26 = vrot.slane %v6612_v31, %v11278_v28 }
 0xd80   :  { %v6609_v53 = vsel %vm178_vm0, %v6554_v43, %v6598_v21  ;;  %v6604_v21 = vsel %vm178_vm0, %v6525_v41, %v6569_v45 }
 0xd81   :  { %v6627_v33 = vcombine.low %v6605_v48, %v6609_v53  ;;  %v6628_v7 = vcombine.high %v6605_v48, %v6609_v53  ;;  %v6591_v36 = vpop.permute.xlu0 %6590 }
 0xd82   :  { %v6608_v62 = vsel %vm178_vm0, %v6547_v10, %v6591_v36 }
 0xd83   :  { %v6635_v39 = vrot.slane %v6627_v33, %v11278_v28  ;;  %v6642_v58 = vrot.slane %v6628_v7, %v11278_v28  ;;  %v6679_v48 = vcombine.low %v6604_v21, %v6608_v62  ;;  %v13561_v7 = vld [vmem:[#allocation2 + $0xa] sm:$0x1]  ;;  %v6680_v36 = vcombine.high %v6604_v21, %v6608_v62 }
 0xd84   :  { %v13585_v21 = vld [vmem:[#allocation2 + $0x6a] sm:$0x1] }
 0xd85   :  { %v6643_v56 = vcombine.low %v6619_v34, %v6635_v39  ;;  %v6644_v15 = vcombine.high %v6619_v34, %v6635_v39  ;;  %v6602_v57 = vpop.permute.xlu0 %6601  ;;  %v6659_v60 = vcombine.low %v6626_v26, %v6642_v58  ;;  %v6660_v8 = vcombine.high %v6626_v26, %v6642_v58  ;;  %v13565_v39 = vld [vmem:[#allocation2 + $0x1a] sm:$0x1]  ;;  %v13567_v58 = vld [vmem:[#allocation2 + $0x2a] sm:$0x1] }
 0xd86   :  { %v6610_v43 = vsel %vm178_vm0, %v6558_v49, %v6602_v57  ;;  %v6687_v47 = vrot.slane %v6679_v48, %v11278_v28  ;;  %v13569_v26 = vld [vmem:[#allocation2 + $0x3a] sm:$0x1] }
 0xd87   :  { %v13546_v25 = vrot.slane %v6643_v56, %v11292_v52  ;;  %v6695_v9 = vcombine.low %v6606_v42, %v6610_v43  ;;  %v6658_v54 = vrot.slane %v6644_v15, %v11292_v52  ;;  %v6667_v49 = vrot.slane %v6659_v60, %v11292_v52  ;;  %v13583_v60 = vld [vmem:[#allocation2 + $0x5a] sm:$0x1] }
 0xd88   :  { %v6696_v41 = vcombine.high %v6606_v42, %v6610_v43  ;;  %v6674_v33 = vrot.slane %v6660_v8, %v11292_v52  ;;  %v6838_v42 = vadd.f32 %v13565_v39, %v13561_v7  ;;  %v6846_v62 = vadd.f32 %v13569_v26, %v13567_v58  ;;  %v13578_v43 = vld [vmem:[#allocation2 + $0x4a] sm:$0x1]  ;;  %v13587_v48 = vld [vmem:[#allocation2 + $0x7a] sm:$0x1] }
 0xd89   :  { %16437 = vst [vmem:[#allocation295_spill] sm:$0xff] %v13546_v25  ;;  %6752 = vrot.lane.b32.xlu0 %v6658_v54, %s11125_s0  ;;  %v6675_v53 = vcombine.high %v13546_v25, %v16171_v63  ;;  %v6703_v10 = vrot.slane %v6695_v9, %v11278_v28  ;;  %v6676_v31 = vcombine.high %v6658_v54, %v16171_v63 }
 0xd8a   :  { %v6677_v34 = vcombine.high %v6667_v49, %v16171_v63  ;;  %v6710_v56 = vrot.slane %v6696_v41, %v11278_v28  ;;  %v6694_v9 = vrot.slane %v6680_v36, %v11278_v28  ;;  %v6678_v54 = vcombine.high %v6674_v33, %v16171_v63  ;;  %v13597_v41 = vld [vmem:[#allocation2 + $0x8a] sm:$0x1]  ;;  %v13603_v36 = vld [vmem:[#allocation2 + $0xba] sm:$0x1] }
 0xd8b   :  { %6748 = vrot.lane.b32.xlu1 %v6675_v53, %s11132_s25  ;;  %v6711_v45 = vcombine.low %v6687_v47, %v6703_v10  ;;  %v6712_v15 = vcombine.high %v6687_v47, %v6703_v10  ;;  %v6854_v10 = vadd.f32 %v6846_v62, %v6838_v42  ;;  %v6847_v47 = vadd.f32 %v13587_v48, %v13585_v21 }
 0xd8c   :  { %v6727_v53 = vcombine.low %v6694_v9, %v6710_v56  ;;  %v6841_v25 = vadd.f32 %v13615_v22, %v13613_v27  ;;  %v6862_v55 = vsub.f32 %v6838_v42, %v6846_v62 }
 0xd8d   :  { %6760 = vrot.lane.b32.xlu0 %v6667_v49, %s11122_s17  ;;  %v6719_v57 = vrot.slane %v6711_v45, %v11292_v52  ;;  %v6726_v8 = vrot.slane %v6712_v15, %v11292_v52  ;;  %v6839_v49 = vadd.f32 %v13583_v60, %v13578_v43  ;;  %v13599_v45 = vld [vmem:[#allocation2 + $0x9a] sm:$0x1] }
 0xd8e   :  { %v6735_v15 = vrot.slane %v6727_v53, %v11292_v52  ;;  %v6866_v13 = vmul.f32 0.5, %v6862_v55 }
 0xd8f   :  { %6756 = vrot.lane.b32.xlu1 %v6676_v31, %s11133_s26  ;;  %v6743_v31 = vcombine.high %v6719_v57, %v16171_v63  ;;  %v6855_v30 = vadd.f32 %v6847_v47, %v6839_v49  ;;  %v6744_v40 = vcombine.high %v6726_v8, %v16171_v63 }
 0xd91   :  { %6768 = vrot.lane.b32.xlu0 %v6674_v33, %s11126_s20  ;;  %v13601_v33 = vld [vmem:[#allocation2 + $0xaa] sm:$0x1] }
 0xd92   :  { %v6848_v4 = vadd.f32 %v13603_v36, %v13601_v33 }
 0xd93   :  { %6764 = vrot.lane.b32.xlu1 %v6677_v34, %s11134_s27  ;;  %v6728_v34 = vcombine.high %v6694_v9, %v6710_v56  ;;  %v13617_v56 = vld [vmem:[#allocation2 + $0xea] sm:$0x1]  ;;  %v13619_v9 = vld [vmem:[#allocation2 + $0xfa] sm:$0x1] }
 0xd94   :  { %v6849_v32 = vadd.f32 %v13619_v9, %v13617_v56 }
 0xd95   :  { %6776 = vrot.lane.b32.xlu0 %v6719_v57, %s11127_s21  ;;  %v6840_v57 = vadd.f32 %v13599_v45, %v13597_v41  ;;  %v6742_v53 = vrot.slane %v6728_v34, %v11292_v52 }
 0xd97   :  { %6772 = vrot.lane.b32.xlu1 %v6678_v54, %s11135_s28  ;;  %v6858_v54 = vmul.f32 0.5, %v6854_v10  ;;  %v6859_v10 = vmul.f32 0.5, %v6855_v30  ;;  %v6856_v46 = vadd.f32 %v6848_v4, %v6840_v57  ;;  %v6857_v30 = vadd.f32 %v6849_v32, %v6841_v25 }
 0xd99   :  { %6784 = vrot.lane.b32.xlu0 %v6726_v8, %s11128_s22  ;;  %v6889_v8 = vrot.slane %v6858_v54, %v11170_v2  ;;  %v6900_v34 = vrot.slane %v6859_v10, %v11170_v2  ;;  %v6860_v54 = vmul.f32 0.5, %v6856_v46  ;;  %v6861_v59 = vmul.f32 0.5, %v6857_v30 }
 0xd9a   :  { %v6864_v46 = vsub.f32 %v6840_v57, %v6848_v4 }
 0xd9b   :  { %6780 = vrot.lane.b32.xlu1 %v6743_v31, %s11136_s29  ;;  %v6745_v31 = vcombine.high %v6735_v15, %v16171_v63  ;;  %v6922_v61 = vrot.slane %v6861_v59, %v11170_v2 }
 0xd9c   :  { %v6868_v1 = vmul.f32 0.5, %v6864_v46 }
 0xd9d   :  { %6792 = vrot.lane.b32.xlu0 %v6735_v15, %s11129_s23  ;;  %v6911_v15 = vrot.slane %v6860_v54, %v11170_v2  ;;  %v6865_v54 = vsub.f32 %v6841_v25, %v6849_v32 }
 0xd9e   :  { %v6955_v42 = vrot.slane %v6868_v1, %v11170_v2 }
 0xd9f   :  { %6788 = vrot.lane.b32.xlu1 %v6744_v40, %s11137_s30  ;;  %v6746_v40 = vcombine.high %v6742_v53, %v16171_v63  ;;  %v6869_v62 = vmul.f32 0.5, %v6865_v54 }
 0xda1   :  { %6800 = vrot.lane.b32.xlu0 %v6742_v53, %s11130_s24  ;;  %v6933_v53 = vrot.slane %v6866_v13, %v11170_v2  ;;  %v6966_v59 = vrot.slane %v6869_v62, %v11170_v2 }
 0xda3   :  { %6796 = vrot.lane.b32.xlu1 %v6745_v31, %s11138_s2  ;;  %v6863_v31 = vsub.f32 %v6839_v49, %v6847_v47 }
 0xda5   :  { %6891 = vbcast.lane.b32.xlu0 %v6889_v8, 256  ;;  %v6867_v10 = vmul.f32 0.5, %v6863_v31 }
 0xda7   :  { %6804 = vrot.lane.b32.xlu1 %v6746_v40, %s11139_s3  ;;  %v6944_v40 = vrot.slane %v6867_v10, %v11170_v2 }
 0xda9   :  { %6902 = vbcast.lane.b32.xlu0 %v6900_v34, 256 }
 0xdab   :  { %6895 = vbcast.lane.b32.xlu1 %v6889_v8, 264 }
 0xdad   :  { %6913 = vbcast.lane.b32.xlu0 %v6911_v15, 256 }
 0xdaf   :  { %6906 = vbcast.lane.b32.xlu1 %v6900_v34, 264 }
 0xdb1   :  { %6924 = vbcast.lane.b32.xlu0 %v6922_v61, 256 }
 0xdb3   :  { %6917 = vbcast.lane.b32.xlu1 %v6911_v15, 264 }
 0xdb5   :  { %6935 = vbcast.lane.b32.xlu0 %v6933_v53, 256 }
 0xdb7   :  { %6928 = vbcast.lane.b32.xlu1 %v6922_v61, 264 }
 0xdb9   :  { %6946 = vbcast.lane.b32.xlu0 %v6944_v40, 256 }
 0xdbb   :  { %6939 = vbcast.lane.b32.xlu1 %v6933_v53, 264 }
 0xdbd   :  { %6957 = vbcast.lane.b32.xlu0 %v6955_v42, 256 }
 0xdbf   :  { %6950 = vbcast.lane.b32.xlu1 %v6944_v40, 264 }
 0xdc1   :  { %6968 = vbcast.lane.b32.xlu0 %v6966_v59, 256 }
 0xdc3   :  { %6961 = vbcast.lane.b32.xlu1 %v6955_v42, 264 }
 0xdc7   :  { %6972 = vbcast.lane.b32.xlu1 %v6966_v59, 264 }
 0xdfb   :  { %v13640_v13 = vpop.permute.xlu0 %6752 }
 0xdfc   :  { %16438 = vst [vmem:[#allocation296_spill] sm:$0xff] %v13640_v13 }
 0xdfd   :  { %v13642_v55 = vpop.permute.xlu1 %6748 }
 0xdfe   :  { %16439 = vst [vmem:[#allocation297_spill] sm:$0xff] %v13642_v55 }
 0xdff   :  { %v13644_v4 = vpop.permute.xlu0 %6760 }
 0xe00   :  { %16440 = vst [vmem:[#allocation298_spill] sm:$0xff] %v13644_v4 }
 0xe01   :  { %v13646_v32 = vpop.permute.xlu1 %6756 }
 0xe02   :  { %16441 = vst [vmem:[#allocation299_spill] sm:$0xff] %v13646_v32 }
 0xe03   :  { %v13648_v61 = vpop.permute.xlu0 %6768 }
 0xe04   :  { %16442 = vst [vmem:[#allocation300_spill] sm:$0xff] %v13648_v61 }
 0xe05   :  { %v13650_v1 = vpop.permute.xlu1 %6764 }
 0xe06   :  { %16443 = vst [vmem:[#allocation301_spill] sm:$0xff] %v13650_v1 }
 0xe07   :  { %v13652_v25 = vpop.permute.xlu0 %6776 }
 0xe08   :  { %16444 = vst [vmem:[#allocation302_spill] sm:$0xff] %v13652_v25 }
 0xe09   :  { %v13654_v49 = vpop.permute.xlu1 %6772 }
 0xe0a   :  { %16445 = vst [vmem:[#allocation303_spill] sm:$0xff] %v13654_v49 }
 0xe0b   :  { %v13656_v47 = vpop.permute.xlu0 %6784 }
 0xe0c   :  { %16446 = vst [vmem:[#allocation304_spill] sm:$0xff] %v13656_v47 }
 0xe0d   :  { %v13658_v57 = vpop.permute.xlu1 %6780 }
 0xe0e   :  { %16447 = vst [vmem:[#allocation305_spill] sm:$0xff] %v13658_v57 }
 0xe0f   :  { %v13660_v8 = vpop.permute.xlu0 %6792 }
 0xe10   :  { %16448 = vst [vmem:[#allocation306_spill] sm:$0xff] %v13660_v8 }
 0xe11   :  { %v13662_v34 = vpop.permute.xlu1 %6788 }
 0xe12   :  { %16449 = vst [vmem:[#allocation307_spill] sm:$0xff] %v13662_v34 }
 0xe13   :  { %v13664_v30 = vpop.permute.xlu0 %6800 }
 0xe14   :  { %16450 = vst [vmem:[#allocation308_spill] sm:$0xff] %v13664_v30 }
 0xe15   :  { %v13666_v15 = vpop.permute.xlu1 %6796 }
 0xe16   :  { %16451 = vst [vmem:[#allocation309_spill] sm:$0xff] %v13666_v15 }
 0xe17   :  { %v6892_v31 = vpop.permute.xlu0 %6891 }
 0xe19   :  { %v13668_v53 = vpop.permute.xlu1 %6804 }
 0xe1a   :  { %16452 = vst [vmem:[#allocation310_spill] sm:$0xff] %v13668_v53 }
 0xe1b   :  { %v6903_v10 = vpop.permute.xlu0 %6902 }
 0xe1d   :  { %v6896_v46 = vpop.permute.xlu1 %6895 }
 0xe1f   :  { %v6914_v40 = vpop.permute.xlu0 %6913 }
 0xe21   :  { %v6907_v54 = vpop.permute.xlu1 %6906 }
 0xe23   :  { %v6925_v42 = vpop.permute.xlu0 %6924 }
 0xe25   :  { %v6918_v62 = vpop.permute.xlu1 %6917 }
 0xe27   :  { %v6936_v59 = vpop.permute.xlu0 %6935 }
 0xe28   :  { %v6974_v30 = vsel %vm178_vm0, %v6892_v31, %v6936_v59 }
 0xe29   :  { %v6929_v47 = vpop.permute.xlu1 %6928 }
 0xe2b   :  { %v6947_v57 = vpop.permute.xlu0 %6946 }
 0xe2c   :  { %v6976_v53 = vsel %vm178_vm0, %v6903_v10, %v6947_v57 }
 0xe2d   :  { %v6940_v25 = vpop.permute.xlu1 %6939 }
 0xe2f   :  { %v6958_v8 = vpop.permute.xlu0 %6957 }
 0xe30   :  { %v6978_v34 = vsel %vm178_vm0, %v6914_v40, %v6958_v8 }
 0xe31   :  { %v6951_v49 = vpop.permute.xlu1 %6950  ;;  %v6982_v15 = vcombine.low %v6974_v30, %v6978_v34  ;;  %v6983_v4 = vcombine.high %v6974_v30, %v6978_v34 }
 0xe32   :  { %v6977_v51 = vsel %vm178_vm0, %v6907_v54, %v6951_v49 }
 0xe33   :  { %v6969_v61 = vpop.permute.xlu0 %6968  ;;  %v6990_v11 = vrot.slane %v6982_v15, %v11278_v28  ;;  %v6997_v8 = vrot.slane %v6983_v4, %v11278_v28 }
 0xe34   :  { %v6980_v1 = vsel %vm178_vm0, %v6925_v42, %v6969_v61 }
 0xe35   :  { %v6998_v32 = vcombine.low %v6976_v53, %v6980_v1  ;;  %v6999_v13 = vcombine.high %v6976_v53, %v6980_v1  ;;  %v6962_v55 = vpop.permute.xlu1 %6961 }
 0xe36   :  { %v6979_v57 = vsel %vm178_vm0, %v6918_v62, %v6962_v55 }
 0xe37   :  { %v7006_v12 = vrot.slane %v6998_v32, %v11278_v28  ;;  %v7013_v23 = vrot.slane %v6999_v13, %v11278_v28  ;;  %v6975_v13 = vsel %vm178_vm0, %v6896_v46, %v6940_v25 }
 0xe38   :  { %v7050_v15 = vcombine.low %v6975_v13, %v6979_v57  ;;  %v7051_v46 = vcombine.high %v6975_v13, %v6979_v57 }
 0xe39   :  { %v7014_v40 = vcombine.low %v6990_v11, %v7006_v12  ;;  %v7015_v31 = vcombine.high %v6990_v11, %v7006_v12  ;;  %v6973_v59 = vpop.permute.xlu1 %6972  ;;  %v7030_v32 = vcombine.low %v6997_v8, %v7013_v23  ;;  %v7031_v11 = vcombine.high %v6997_v8, %v7013_v23 }
 0xe3a   :  { %v6981_v61 = vsel %vm178_vm0, %v6929_v47, %v6973_v59  ;;  %v7058_v49 = vrot.slane %v7050_v15, %v11278_v28  ;;  %v6850_v8 = vsub.f32 %v13567_v58, %v13569_v26 }
 0xe3b   :  { %v13682_v1 = vrot.slane %v7014_v40, %v11292_v52  ;;  %v7066_v34 = vcombine.low %v6977_v51, %v6981_v61  ;;  %v7029_v30 = vrot.slane %v7015_v31, %v11292_v52  ;;  %v7038_v4 = vrot.slane %v7030_v32, %v11292_v52 }
 0xe3c   :  { %v7067_v25 = vcombine.high %v6977_v51, %v6981_v61  ;;  %v7045_v10 = vrot.slane %v7031_v11, %v11292_v52  ;;  %v6842_v51 = vsub.f32 %v13561_v7, %v13565_v39  ;;  %v7065_v40 = vrot.slane %v7051_v46, %v11278_v28 }
 0xe3d   :  { %16453 = vst [vmem:[#allocation311_spill] sm:$0xff] %v13682_v1  ;;  %7123 = vrot.lane.b32.xlu1 %v7029_v30, %s11125_s0  ;;  %v7046_v12 = vcombine.high %v13682_v1, %v16171_v63  ;;  %v7074_v55 = vrot.slane %v7066_v34, %v11278_v28  ;;  %v7047_v47 = vcombine.high %v7029_v30, %v16171_v63 }
 0xe3e   :  { %v7048_v23 = vcombine.high %v7038_v4, %v16171_v63  ;;  %v7081_v54 = vrot.slane %v7067_v25, %v11278_v28  ;;  %v7049_v31 = vcombine.high %v7045_v10, %v16171_v63  ;;  %v6870_v61 = vadd.f32 %v6850_v8, %v6842_v51 }
 0xe3f   :  { %7119 = vrot.lane.b32.xlu0 %v7046_v12, %s11132_s25  ;;  %v7082_v53 = vcombine.low %v7058_v49, %v7074_v55  ;;  %v7083_v42 = vcombine.high %v7058_v49, %v7074_v55  ;;  %v6843_v34 = vsub.f32 %v13578_v43, %v13583_v60  ;;  %v6851_v7 = vsub.f32 %v13585_v21, %v13587_v48 }
 0xe40   :  { %v7098_v59 = vcombine.low %v7065_v40, %v7081_v54  ;;  %v7099_v58 = vcombine.high %v7065_v40, %v7081_v54  ;;  %v6874_v30 = vmul.f32 0.5, %v6870_v61  ;;  %v6844_v43 = vsub.f32 %v13597_v41, %v13599_v45 }
 0xe41   :  { %7131 = vrot.lane.b32.xlu1 %v7038_v4, %s11122_s17  ;;  %v7090_v62 = vrot.slane %v7082_v53, %v11292_v52  ;;  %v7097_v57 = vrot.slane %v7083_v42, %v11292_v52  ;;  %v6871_v32 = vadd.f32 %v6851_v7, %v6843_v34  ;;  %v6852_v60 = vsub.f32 %v13601_v33, %v13603_v36 }
 0xe42   :  { %v7106_v26 = vrot.slane %v7098_v59, %v11292_v52  ;;  %v7113_v21 = vrot.slane %v7099_v58, %v11292_v52  ;;  %v7196_v48 = vrot.slane %v6874_v30, %v11170_v2  ;;  %v6845_v55 = vsub.f32 %v13613_v27, %v13615_v22 }
 0xe43   :  { %7127 = vrot.lane.b32.xlu0 %v7047_v47, %s11133_s26  ;;  %v7114_v39 = vcombine.high %v7090_v62, %v16171_v63  ;;  %v7115_v13 = vcombine.high %v7097_v57, %v16171_v63  ;;  %v6875_v15 = vmul.f32 0.5, %v6871_v32  ;;  %v6872_v11 = vadd.f32 %v6852_v60, %v6844_v43 }
 0xe44   :  { %v7116_v12 = vcombine.high %v7106_v26, %v16171_v63  ;;  %v6853_v41 = vsub.f32 %v13617_v56, %v13619_v9  ;;  %v7117_v45 = vcombine.high %v7113_v21, %v16171_v63  ;;  %v6878_v25 = vsub.f32 %v6842_v51, %v6850_v8 }
 0xe45   :  { %7139 = vrot.lane.b32.xlu1 %v7045_v10, %s11126_s20  ;;  %v7207_v33 = vrot.slane %v6875_v15, %v11170_v2  ;;  %v6876_v36 = vmul.f32 0.5, %v6872_v11  ;;  %v6879_v56 = vsub.f32 %v6843_v34, %v6851_v7  ;;  %v6880_v10 = vsub.f32 %v6844_v43, %v6852_v60 }
 0xe46   :  { %v6873_v4 = vadd.f32 %v6853_v41, %v6845_v55  ;;  %v6882_v22 = vmul.f32 0.5, %v6878_v25  ;;  %v6881_v54 = vsub.f32 %v6845_v55, %v6853_v41 }
 0xe47   :  { %7135 = vrot.lane.b32.xlu0 %v7048_v23, %s11134_s27  ;;  %v7218_v49 = vrot.slane %v6876_v36, %v11170_v2  ;;  %v6883_v53 = vmul.f32 0.5, %v6879_v56  ;;  %v6884_v23 = vmul.f32 0.5, %v6880_v10 }
 0xe48   :  { %v6877_v47 = vmul.f32 0.5, %v6873_v4  ;;  %v7240_v9 = vrot.slane %v6882_v22, %v11170_v2 }
 0xe49   :  { %7147 = vrot.lane.b32.xlu1 %v7090_v62, %s11127_s21  ;;  %v7251_v46 = vrot.slane %v6883_v53, %v11170_v2  ;;  %v7262_v42 = vrot.slane %v6884_v23, %v11170_v2  ;;  %v6885_v62 = vmul.f32 0.5, %v6881_v54 }
 0xe4a   :  { %v7229_v27 = vrot.slane %v6877_v47, %v11170_v2 }
 0xe4b   :  { %7143 = vrot.lane.b32.xlu0 %v7049_v31, %s11135_s28  ;;  %v7273_v51 = vrot.slane %v6885_v62, %v11170_v2 }
 0xe4d   :  { %7155 = vrot.lane.b32.xlu1 %v7097_v57, %s11128_s22 }
 0xe4f   :  { %7151 = vrot.lane.b32.xlu0 %v7114_v39, %s11136_s29 }
 0xe51   :  { %7163 = vrot.lane.b32.xlu1 %v7106_v26, %s11129_s23 }
 0xe53   :  { %7159 = vrot.lane.b32.xlu0 %v7115_v13, %s11137_s30 }
 0xe55   :  { %7171 = vrot.lane.b32.xlu1 %v7113_v21, %s11130_s24 }
 0xe57   :  { %7167 = vrot.lane.b32.xlu0 %v7116_v12, %s11138_s2 }
 0xe59   :  { %7198 = vbcast.lane.b32.xlu1 %v7196_v48, 256 }
 0xe5b   :  { %7175 = vrot.lane.b32.xlu0 %v7117_v45, %s11139_s3 }
 0xe5d   :  { %7209 = vbcast.lane.b32.xlu1 %v7207_v33, 256 }
 0xe5f   :  { %7202 = vbcast.lane.b32.xlu0 %v7196_v48, 264 }
 0xe61   :  { %7220 = vbcast.lane.b32.xlu1 %v7218_v49, 256 }
 0xe63   :  { %7213 = vbcast.lane.b32.xlu0 %v7207_v33, 264 }
 0xe65   :  { %7231 = vbcast.lane.b32.xlu1 %v7229_v27, 256 }
 0xe67   :  { %7224 = vbcast.lane.b32.xlu0 %v7218_v49, 264 }
 0xe69   :  { %7242 = vbcast.lane.b32.xlu1 %v7240_v9, 256 }
 0xe6b   :  { %7235 = vbcast.lane.b32.xlu0 %v7229_v27, 264 }
 0xe6d   :  { %7253 = vbcast.lane.b32.xlu1 %v7251_v46, 256 }
 0xe6f   :  { %7246 = vbcast.lane.b32.xlu0 %v7240_v9, 264 }
 0xe71   :  { %7264 = vbcast.lane.b32.xlu1 %v7262_v42, 256 }
 0xe73   :  { %7257 = vbcast.lane.b32.xlu0 %v7251_v46, 264 }
 0xe75   :  { %7275 = vbcast.lane.b32.xlu1 %v7273_v51, 256 }
 0xe77   :  { %7268 = vbcast.lane.b32.xlu0 %v7262_v42, 264 }
 0xe7b   :  { %7279 = vbcast.lane.b32.xlu0 %v7273_v51, 264 }
 0xeaf   :  { %v13744_v8 = vpop.permute.xlu1 %7123 }
 0xeb0   :  { %16454 = vst [vmem:[#allocation312_spill] sm:$0xff] %v13744_v8 }
 0xeb1   :  { %v13746_v40 = vpop.permute.xlu0 %7119 }
 0xeb2   :  { %16455 = vst [vmem:[#allocation313_spill] sm:$0xff] %v13746_v40 }
 0xeb3   :  { %v13748_v31 = vpop.permute.xlu1 %7131 }
 0xeb4   :  { %16456 = vst [vmem:[#allocation314_spill] sm:$0xff] %v13748_v31 }
 0xeb5   :  { %v13750_v59 = vpop.permute.xlu0 %7127 }
 0xeb6   :  { %16457 = vst [vmem:[#allocation315_spill] sm:$0xff] %v13750_v59 }
 0xeb7   :  { %v13752_v57 = vpop.permute.xlu1 %7139 }
 0xeb8   :  { %16458 = vst [vmem:[#allocation316_spill] sm:$0xff] %v13752_v57 }
 0xeb9   :  { %v13754_v61 = vpop.permute.xlu0 %7135 }
 0xeba   :  { %16459 = vst [vmem:[#allocation317_spill] sm:$0xff] %v13754_v61 }
 0xebb   :  { %v13756_v34 = vpop.permute.xlu1 %7147 }
 0xebc   :  { %16460 = vst [vmem:[#allocation318_spill] sm:$0xff] %v13756_v34 }
 0xebd   :  { %v13758_v7 = vpop.permute.xlu0 %7143 }
 0xebe   :  { %16461 = vst [vmem:[#allocation319_spill] sm:$0xff] %v13758_v7 }
 0xebf   :  { %v13760_v39 = vpop.permute.xlu1 %7155 }
 0xec0   :  { %16462 = vst [vmem:[#allocation320_spill] sm:$0xff] %v13760_v39 }
 0xec1   :  { %v13762_v58 = vpop.permute.xlu0 %7151 }
 0xec2   :  { %16463 = vst [vmem:[#allocation321_spill] sm:$0xff] %v13762_v58 }
 0xec3   :  { %v13764_v26 = vpop.permute.xlu1 %7163 }
 0xec4   :  { %16464 = vst [vmem:[#allocation322_spill] sm:$0xff] %v13764_v26  ;;  %v13853_v26 = vld [vmem:[#allocation2 + $0xcb] sm:$0x1] }
 0xec5   :  { %v13766_v30 = vpop.permute.xlu0 %7159 }
 0xec6   :  { %16465 = vst [vmem:[#allocation323_spill] sm:$0xff] %v13766_v30  ;;  %v13855_v30 = vld [vmem:[#allocation2 + $0xdb] sm:$0x1] }
 0xec7   :  { %v13768_v32 = vpop.permute.xlu1 %7171  ;;  %v7519_v58 = vadd.f32 %v13855_v30, %v13853_v26 }
 0xec8   :  { %16466 = vst [vmem:[#allocation324_spill] sm:$0xff] %v13768_v32 }
 0xec9   :  { %v13770_v13 = vpop.permute.xlu0 %7167 }
 0xeca   :  { %16467 = vst [vmem:[#allocation325_spill] sm:$0xff] %v13770_v13 }
 0xecb   :  { %v7199_v43 = vpop.permute.xlu1 %7198 }
 0xecd   :  { %v13772_v60 = vpop.permute.xlu0 %7175 }
 0xece   :  { %16468 = vst [vmem:[#allocation326_spill] sm:$0xff] %v13772_v60 }
 0xecf   :  { %v7210_v21 = vpop.permute.xlu1 %7209 }
 0xed1   :  { %v7203_v48 = vpop.permute.xlu0 %7202 }
 0xed3   :  { %v7221_v15 = vpop.permute.xlu1 %7220 }
 0xed5   :  { %v7214_v12 = vpop.permute.xlu0 %7213 }
 0xed7   :  { %v7232_v11 = vpop.permute.xlu1 %7231 }
 0xed9   :  { %v7225_v55 = vpop.permute.xlu0 %7224 }
 0xedb   :  { %v7243_v41 = vpop.permute.xlu1 %7242 }
 0xedc   :  { %v7281_v25 = vsel %vm178_vm0, %v7199_v43, %v7243_v41 }
 0xedd   :  { %v7236_v45 = vpop.permute.xlu0 %7235 }
 0xedf   :  { %v7254_v33 = vpop.permute.xlu1 %7253 }
 0xee0   :  { %v7283_v56 = vsel %vm178_vm0, %v7210_v21, %v7254_v33 }
 0xee1   :  { %v7247_v36 = vpop.permute.xlu0 %7246 }
 0xee3   :  { %v7265_v4 = vpop.permute.xlu1 %7264 }
 0xee4   :  { %v7285_v49 = vsel %vm178_vm0, %v7221_v15, %v7265_v4 }
 0xee5   :  { %v7258_v47 = vpop.permute.xlu0 %7257  ;;  %v7289_v27 = vcombine.low %v7281_v25, %v7285_v49  ;;  %v7290_v53 = vcombine.high %v7281_v25, %v7285_v49 }
 0xee6   :  { %v7284_v4 = vsel %vm178_vm0, %v7214_v12, %v7258_v47 }
 0xee7   :  { %v7276_v22 = vpop.permute.xlu1 %7275  ;;  %v7297_v54 = vrot.slane %v7289_v27, %v11278_v28  ;;  %v7304_v51 = vrot.slane %v7290_v53, %v11278_v28 }
 0xee8   :  { %v7287_v9 = vsel %vm178_vm0, %v7232_v11, %v7276_v22  ;;  %v7282_v22 = vsel %vm178_vm0, %v7203_v48, %v7247_v36 }
 0xee9   :  { %v7305_v10 = vcombine.low %v7283_v56, %v7287_v9  ;;  %v7306_v46 = vcombine.high %v7283_v56, %v7287_v9  ;;  %v7269_v23 = vpop.permute.xlu0 %7268 }
 0xeea   :  { %v7286_v21 = vsel %vm178_vm0, %v7225_v55, %v7269_v23 }
 0xeeb   :  { %v7313_v42 = vrot.slane %v7305_v10, %v11278_v28  ;;  %v7320_v62 = vrot.slane %v7306_v46, %v11278_v28  ;;  %v7357_v56 = vcombine.low %v7282_v22, %v7286_v21  ;;  %v13801_v46 = vld [vmem:[#allocation2 + $0xb] sm:$0x1]  ;;  %v7358_v23 = vcombine.high %v7282_v22, %v7286_v21 }
 0xeec   :  { %v13825_v22 = vld [vmem:[#allocation2 + $0x6b] sm:$0x1] }
 0xeed   :  { %v7321_v15 = vcombine.low %v7297_v54, %v7313_v42  ;;  %v7322_v43 = vcombine.high %v7297_v54, %v7313_v42  ;;  %v7280_v41 = vpop.permute.xlu0 %7279  ;;  %v7337_v27 = vcombine.low %v7304_v51, %v7320_v62  ;;  %v7338_v12 = vcombine.high %v7304_v51, %v7320_v62  ;;  %v13805_v42 = vld [vmem:[#allocation2 + $0x1b] sm:$0x1]  ;;  %v13807_v62 = vld [vmem:[#allocation2 + $0x2b] sm:$0x1] }
 0xeee   :  { %v7288_v11 = vsel %vm178_vm0, %v7236_v45, %v7280_v41  ;;  %v7365_v47 = vrot.slane %v7357_v56, %v11278_v28  ;;  %v13809_v51 = vld [vmem:[#allocation2 + $0x3b] sm:$0x1] }
 0xeef   :  { %v13786_v33 = vrot.slane %v7321_v15, %v11292_v52  ;;  %v7373_v49 = vcombine.low %v7284_v4, %v7288_v11  ;;  %v7336_v25 = vrot.slane %v7322_v43, %v11292_v52  ;;  %v7345_v45 = vrot.slane %v7337_v27, %v11292_v52  ;;  %v13823_v27 = vld [vmem:[#allocation2 + $0x5b] sm:$0x1] }
 0xef0   :  { %v7374_v48 = vcombine.high %v7284_v4, %v7288_v11  ;;  %v7352_v10 = vrot.slane %v7338_v12, %v11292_v52  ;;  %v7516_v4 = vadd.f32 %v13805_v42, %v13801_v46  ;;  %v7524_v21 = vadd.f32 %v13809_v51, %v13807_v62  ;;  %v13818_v11 = vld [vmem:[#allocation2 + $0x4b] sm:$0x1]  ;;  %v13827_v56 = vld [vmem:[#allocation2 + $0x7b] sm:$0x1] }
 0xef1   :  { %16469 = vst [vmem:[#allocation327_spill] sm:$0xff] %v13786_v33  ;;  %7430 = vrot.lane.b32.xlu0 %v7336_v25, %s11125_s0  ;;  %v7353_v9 = vcombine.high %v13786_v33, %v16171_v63  ;;  %v7381_v55 = vrot.slane %v7373_v49, %v11278_v28  ;;  %v7354_v53 = vcombine.high %v7336_v25, %v16171_v63 }
 0xef2   :  { %v7355_v54 = vcombine.high %v7345_v45, %v16171_v63  ;;  %v7388_v15 = vrot.slane %v7374_v48, %v11278_v28  ;;  %v7372_v49 = vrot.slane %v7358_v23, %v11278_v28  ;;  %v7356_v25 = vcombine.high %v7352_v10, %v16171_v63  ;;  %v13837_v48 = vld [vmem:[#allocation2 + $0x8b] sm:$0x1]  ;;  %v13843_v23 = vld [vmem:[#allocation2 + $0xbb] sm:$0x1] }
 0xef3   :  { %7426 = vrot.lane.b32.xlu1 %v7353_v9, %s11132_s25  ;;  %v7389_v36 = vcombine.low %v7365_v47, %v7381_v55  ;;  %v7390_v43 = vcombine.high %v7365_v47, %v7381_v55  ;;  %v7532_v55 = vadd.f32 %v7524_v21, %v7516_v4  ;;  %v7525_v47 = vadd.f32 %v13827_v56, %v13825_v22 }
 0xef4   :  { %v7405_v9 = vcombine.low %v7372_v49, %v7388_v15  ;;  %v7540_v57 = vsub.f32 %v7516_v4, %v7524_v21 }
 0xef5   :  { %7438 = vrot.lane.b32.xlu0 %v7345_v45, %s11122_s17  ;;  %v7397_v41 = vrot.slane %v7389_v36, %v11292_v52  ;;  %v7404_v12 = vrot.slane %v7390_v43, %v11292_v52  ;;  %v7517_v45 = vadd.f32 %v13823_v27, %v13818_v11  ;;  %v13839_v36 = vld [vmem:[#allocation2 + $0x9b] sm:$0x1] }
 0xef6   :  { %v7413_v43 = vrot.slane %v7405_v9, %v11292_v52  ;;  %v7544_v31 = vmul.f32 0.5, %v7540_v57 }
 0xef7   :  { %7434 = vrot.lane.b32.xlu1 %v7354_v53, %s11133_s26  ;;  %v7421_v53 = vcombine.high %v7397_v41, %v16171_v63  ;;  %v7533_v60 = vadd.f32 %v7525_v47, %v7517_v45  ;;  %v7422_v32 = vcombine.high %v7404_v12, %v16171_v63 }
 0xef9   :  { %7446 = vrot.lane.b32.xlu0 %v7352_v10, %s11126_s20  ;;  %v13841_v10 = vld [vmem:[#allocation2 + $0xab] sm:$0x1] }
 0xefa   :  { %v7526_v13 = vadd.f32 %v13843_v23, %v13841_v10 }
 0xefb   :  { %7442 = vrot.lane.b32.xlu1 %v7355_v54, %s11134_s27  ;;  %v7406_v54 = vcombine.high %v7372_v49, %v7388_v15  ;;  %v13857_v15 = vld [vmem:[#allocation2 + $0xeb] sm:$0x1]  ;;  %v13859_v49 = vld [vmem:[#allocation2 + $0xfb] sm:$0x1] }
 0xefc   :  { %v7527_v34 = vadd.f32 %v13859_v49, %v13857_v15 }
 0xefd   :  { %7454 = vrot.lane.b32.xlu0 %v7397_v41, %s11127_s21  ;;  %v7518_v41 = vadd.f32 %v13839_v36, %v13837_v48  ;;  %v7420_v9 = vrot.slane %v7406_v54, %v11292_v52 }
 0xeff   :  { %7450 = vrot.lane.b32.xlu1 %v7356_v25, %s11135_s28  ;;  %v7536_v25 = vmul.f32 0.5, %v7532_v55  ;;  %v7537_v55 = vmul.f32 0.5, %v7533_v60  ;;  %v7534_v39 = vadd.f32 %v7526_v13, %v7518_v41  ;;  %v7535_v60 = vadd.f32 %v7527_v34, %v7519_v58 }
 0xf01   :  { %7462 = vrot.lane.b32.xlu0 %v7404_v12, %s11128_s22  ;;  %v7567_v12 = vrot.slane %v7536_v25, %v11170_v2  ;;  %v7578_v54 = vrot.slane %v7537_v55, %v11170_v2  ;;  %v7538_v25 = vmul.f32 0.5, %v7534_v39  ;;  %v7539_v7 = vmul.f32 0.5, %v7535_v60 }
 0xf02   :  { %v7542_v39 = vsub.f32 %v7518_v41, %v7526_v13 }
 0xf03   :  { %7458 = vrot.lane.b32.xlu1 %v7421_v53, %s11136_s29  ;;  %v7423_v53 = vcombine.high %v7413_v43, %v16171_v63  ;;  %v7600_v61 = vrot.slane %v7539_v7, %v11170_v2 }
 0xf04   :  { %v7546_v59 = vmul.f32 0.5, %v7542_v39 }
 0xf05   :  { %7470 = vrot.lane.b32.xlu0 %v7413_v43, %s11129_s23  ;;  %v7589_v43 = vrot.slane %v7538_v25, %v11170_v2  ;;  %v7543_v25 = vsub.f32 %v7519_v58, %v7527_v34 }
 0xf06   :  { %v7633_v4 = vrot.slane %v7546_v59, %v11170_v2 }
 0xf07   :  { %7466 = vrot.lane.b32.xlu1 %v7422_v32, %s11137_s30  ;;  %v7424_v32 = vcombine.high %v7420_v9, %v16171_v63  ;;  %v7547_v21 = vmul.f32 0.5, %v7543_v25 }
 0xf09   :  { %7478 = vrot.lane.b32.xlu0 %v7420_v9, %s11130_s24  ;;  %v7611_v9 = vrot.slane %v7544_v31, %v11170_v2  ;;  %v7644_v57 = vrot.slane %v7547_v21, %v11170_v2 }
 0xf0b   :  { %7474 = vrot.lane.b32.xlu1 %v7423_v53, %s11138_s2  ;;  %v7541_v53 = vsub.f32 %v7517_v45, %v7525_v47 }
 0xf0d   :  { %7569 = vbcast.lane.b32.xlu0 %v7567_v12, 256  ;;  %v7545_v55 = vmul.f32 0.5, %v7541_v53 }
 0xf0f   :  { %7482 = vrot.lane.b32.xlu1 %v7424_v32, %s11139_s3  ;;  %v7622_v32 = vrot.slane %v7545_v55, %v11170_v2 }
 0xf11   :  { %7580 = vbcast.lane.b32.xlu0 %v7578_v54, 256 }
 0xf13   :  { %7573 = vbcast.lane.b32.xlu1 %v7567_v12, 264 }
 0xf15   :  { %7591 = vbcast.lane.b32.xlu0 %v7589_v43, 256 }
 0xf17   :  { %7584 = vbcast.lane.b32.xlu1 %v7578_v54, 264 }
 0xf19   :  { %7602 = vbcast.lane.b32.xlu0 %v7600_v61, 256 }
 0xf1b   :  { %7595 = vbcast.lane.b32.xlu1 %v7589_v43, 264 }
 0xf1d   :  { %7613 = vbcast.lane.b32.xlu0 %v7611_v9, 256 }
 0xf1f   :  { %7606 = vbcast.lane.b32.xlu1 %v7600_v61, 264 }
 0xf21   :  { %7624 = vbcast.lane.b32.xlu0 %v7622_v32, 256 }
 0xf23   :  { %7617 = vbcast.lane.b32.xlu1 %v7611_v9, 264 }
 0xf25   :  { %7635 = vbcast.lane.b32.xlu0 %v7633_v4, 256 }
 0xf27   :  { %7628 = vbcast.lane.b32.xlu1 %v7622_v32, 264 }
 0xf29   :  { %7646 = vbcast.lane.b32.xlu0 %v7644_v57, 256 }
 0xf2b   :  { %7639 = vbcast.lane.b32.xlu1 %v7633_v4, 264 }
 0xf2f   :  { %7650 = vbcast.lane.b32.xlu1 %v7644_v57, 264 }
 0xf63   :  { %v13880_v31 = vpop.permute.xlu0 %7430 }
 0xf64   :  { %16470 = vst [vmem:[#allocation328_spill] sm:$0xff] %v13880_v31 }
 0xf65   :  { %v13882_v7 = vpop.permute.xlu1 %7426 }
 0xf66   :  { %16471 = vst [vmem:[#allocation329_spill] sm:$0xff] %v13882_v7 }
 0xf67   :  { %v13884_v13 = vpop.permute.xlu0 %7438 }
 0xf68   :  { %16472 = vst [vmem:[#allocation330_spill] sm:$0xff] %v13884_v13 }
 0xf69   :  { %v13886_v34 = vpop.permute.xlu1 %7434 }
 0xf6a   :  { %16473 = vst [vmem:[#allocation331_spill] sm:$0xff] %v13886_v34 }
 0xf6b   :  { %v13888_v61 = vpop.permute.xlu0 %7446 }
 0xf6c   :  { %16474 = vst [vmem:[#allocation332_spill] sm:$0xff] %v13888_v61 }
 0xf6d   :  { %v13890_v59 = vpop.permute.xlu1 %7442 }
 0xf6e   :  { %16475 = vst [vmem:[#allocation333_spill] sm:$0xff] %v13890_v59 }
 0xf6f   :  { %v13892_v58 = vpop.permute.xlu0 %7454 }
 0xf70   :  { %16476 = vst [vmem:[#allocation334_spill] sm:$0xff] %v13892_v58 }
 0xf71   :  { %v13894_v45 = vpop.permute.xlu1 %7450 }
 0xf72   :  { %16477 = vst [vmem:[#allocation335_spill] sm:$0xff] %v13894_v45 }
 0xf73   :  { %v13896_v47 = vpop.permute.xlu0 %7462 }
 0xf74   :  { %16478 = vst [vmem:[#allocation336_spill] sm:$0xff] %v13896_v47 }
 0xf75   :  { %v13898_v41 = vpop.permute.xlu1 %7458 }
 0xf76   :  { %16479 = vst [vmem:[#allocation337_spill] sm:$0xff] %v13898_v41 }
 0xf77   :  { %v13900_v12 = vpop.permute.xlu0 %7470 }
 0xf78   :  { %16480 = vst [vmem:[#allocation338_spill] sm:$0xff] %v13900_v12 }
 0xf79   :  { %v13902_v54 = vpop.permute.xlu1 %7466 }
 0xf7a   :  { %16481 = vst [vmem:[#allocation339_spill] sm:$0xff] %v13902_v54 }
 0xf7b   :  { %v13904_v60 = vpop.permute.xlu0 %7478 }
 0xf7c   :  { %16482 = vst [vmem:[#allocation340_spill] sm:$0xff] %v13904_v60 }
 0xf7d   :  { %v13906_v43 = vpop.permute.xlu1 %7474 }
 0xf7e   :  { %16483 = vst [vmem:[#allocation341_spill] sm:$0xff] %v13906_v43 }
 0xf7f   :  { %v7570_v53 = vpop.permute.xlu0 %7569 }
 0xf81   :  { %v13908_v9 = vpop.permute.xlu1 %7482 }
 0xf82   :  { %16484 = vst [vmem:[#allocation342_spill] sm:$0xff] %v13908_v9 }
 0xf83   :  { %v7581_v55 = vpop.permute.xlu0 %7580 }
 0xf85   :  { %v7574_v39 = vpop.permute.xlu1 %7573 }
 0xf87   :  { %v7592_v32 = vpop.permute.xlu0 %7591 }
 0xf89   :  { %v7585_v25 = vpop.permute.xlu1 %7584 }
 0xf8b   :  { %v7603_v4 = vpop.permute.xlu0 %7602 }
 0xf8d   :  { %v7596_v21 = vpop.permute.xlu1 %7595 }
 0xf8f   :  { %v7614_v57 = vpop.permute.xlu0 %7613 }
 0xf90   :  { %v7652_v60 = vsel %vm178_vm0, %v7570_v53, %v7614_v57 }
 0xf91   :  { %v7607_v8 = vpop.permute.xlu1 %7606 }
 0xf93   :  { %v7625_v1 = vpop.permute.xlu0 %7624 }
 0xf94   :  { %v7654_v9 = vsel %vm178_vm0, %v7581_v55, %v7625_v1 }
 0xf95   :  { %v7618_v40 = vpop.permute.xlu1 %7617 }
 0xf97   :  { %v7636_v12 = vpop.permute.xlu0 %7635 }
 0xf98   :  { %v7656_v54 = vsel %vm178_vm0, %v7592_v32, %v7636_v12 }
 0xf99   :  { %v7629_v47 = vpop.permute.xlu1 %7628  ;;  %v7660_v43 = vcombine.low %v7652_v60, %v7656_v54  ;;  %v7661_v45 = vcombine.high %v7652_v60, %v7656_v54 }
 0xf9a   :  { %v7655_v7 = vsel %vm178_vm0, %v7585_v25, %v7629_v47 }
 0xf9b   :  { %v7647_v41 = vpop.permute.xlu0 %7646  ;;  %v7668_v34 = vrot.slane %v7660_v43, %v11278_v28  ;;  %v7675_v12 = vrot.slane %v7661_v45, %v11278_v28 }
 0xf9c   :  { %v7658_v58 = vsel %vm178_vm0, %v7603_v4, %v7647_v41 }
 0xf9d   :  { %v7676_v61 = vcombine.low %v7654_v9, %v7658_v58  ;;  %v7677_v59 = vcombine.high %v7654_v9, %v7658_v58  ;;  %v7640_v13 = vpop.permute.xlu1 %7639 }
 0xf9e   :  { %v7657_v1 = vsel %vm178_vm0, %v7596_v21, %v7640_v13 }
 0xf9f   :  { %v7684_v31 = vrot.slane %v7676_v61, %v11278_v28  ;;  %v7691_v33 = vrot.slane %v7677_v59, %v11278_v28  ;;  %v7653_v59 = vsel %vm178_vm0, %v7574_v39, %v7618_v40 }
 0xfa0   :  { %v7728_v43 = vcombine.low %v7653_v59, %v7657_v1  ;;  %v7729_v39 = vcombine.high %v7653_v59, %v7657_v1 }
 0xfa1   :  { %v7692_v32 = vcombine.low %v7668_v34, %v7684_v31  ;;  %v7693_v53 = vcombine.high %v7668_v34, %v7684_v31  ;;  %v7651_v57 = vpop.permute.xlu1 %7650  ;;  %v7708_v61 = vcombine.low %v7675_v12, %v7691_v33  ;;  %v7709_v34 = vcombine.high %v7675_v12, %v7691_v33 }
 0xfa2   :  { %v7659_v41 = vsel %vm178_vm0, %v7607_v8, %v7651_v57  ;;  %v7736_v45 = vrot.slane %v7728_v43, %v11278_v28  ;;  %v7528_v12 = vsub.f32 %v13807_v62, %v13809_v51 }
 0xfa3   :  { %v13922_v58 = vrot.slane %v7692_v32, %v11292_v52  ;;  %v7744_v54 = vcombine.low %v7655_v7, %v7659_v41  ;;  %v7707_v60 = vrot.slane %v7693_v53, %v11292_v52  ;;  %v7716_v8 = vrot.slane %v7708_v61, %v11292_v52 }
 0xfa4   :  { %v7745_v40 = vcombine.high %v7655_v7, %v7659_v41  ;;  %v7723_v55 = vrot.slane %v7709_v34, %v11292_v52  ;;  %v7520_v7 = vsub.f32 %v13801_v46, %v13805_v42  ;;  %v7743_v32 = vrot.slane %v7729_v39, %v11278_v28 }
 0xfa5   :  { %16485 = vst [vmem:[#allocation343_spill] sm:$0xff] %v13922_v58  ;;  %7801 = vrot.lane.b32.xlu1 %v7707_v60, %s11125_s0  ;;  %v7724_v31 = vcombine.high %v13922_v58, %v16171_v63  ;;  %v7752_v13 = vrot.slane %v7744_v54, %v11278_v28  ;;  %v7725_v47 = vcombine.high %v7707_v60, %v16171_v63 }
 0xfa6   :  { %v7726_v33 = vcombine.high %v7716_v8, %v16171_v63  ;;  %v7759_v25 = vrot.slane %v7745_v40, %v11278_v28  ;;  %v7727_v53 = vcombine.high %v7723_v55, %v16171_v63  ;;  %v7548_v41 = vadd.f32 %v7528_v12, %v7520_v7 }
 0xfa7   :  { %7797 = vrot.lane.b32.xlu0 %v7724_v31, %s11132_s25  ;;  %v7760_v9 = vcombine.low %v7736_v45, %v7752_v13  ;;  %v7761_v4 = vcombine.high %v7736_v45, %v7752_v13  ;;  %v7521_v54 = vsub.f32 %v13818_v11, %v13823_v27  ;;  %v7529_v46 = vsub.f32 %v13825_v22, %v13827_v56 }
 0xfa8   :  { %v7776_v57 = vcombine.low %v7743_v32, %v7759_v25  ;;  %v7777_v62 = vcombine.high %v7743_v32, %v7759_v25  ;;  %v7552_v60 = vmul.f32 0.5, %v7548_v41  ;;  %v7522_v11 = vsub.f32 %v13837_v48, %v13839_v36 }
 0xfa9   :  { %7809 = vrot.lane.b32.xlu1 %v7716_v8, %s11122_s17  ;;  %v7768_v21 = vrot.slane %v7760_v9, %v11292_v52  ;;  %v7775_v1 = vrot.slane %v7761_v4, %v11292_v52  ;;  %v7549_v61 = vadd.f32 %v7529_v46, %v7521_v54  ;;  %v7530_v27 = vsub.f32 %v13841_v10, %v13843_v23 }
 0xfaa   :  { %v7784_v51 = vrot.slane %v7776_v57, %v11292_v52  ;;  %v7791_v22 = vrot.slane %v7777_v62, %v11292_v52  ;;  %v7874_v56 = vrot.slane %v7552_v60, %v11170_v2  ;;  %v7523_v13 = vsub.f32 %v13853_v26, %v13855_v30 }
 0xfab   :  { %7805 = vrot.lane.b32.xlu0 %v7725_v47, %s11133_s26  ;;  %v7792_v42 = vcombine.high %v7768_v21, %v16171_v63  ;;  %v7793_v59 = vcombine.high %v7775_v1, %v16171_v63  ;;  %v7553_v43 = vmul.f32 0.5, %v7549_v61  ;;  %v7550_v34 = vadd.f32 %v7530_v27, %v7522_v11 }
 0xfac   :  { %v7794_v31 = vcombine.high %v7784_v51, %v16171_v63  ;;  %v7531_v48 = vsub.f32 %v13857_v15, %v13859_v49  ;;  %v7795_v36 = vcombine.high %v7791_v22, %v16171_v63  ;;  %v7556_v40 = vsub.f32 %v7520_v7, %v7528_v12 }
 0xfad   :  { %7817 = vrot.lane.b32.xlu1 %v7723_v55, %s11126_s20  ;;  %v7885_v10 = vrot.slane %v7553_v43, %v11170_v2  ;;  %v7554_v23 = vmul.f32 0.5, %v7550_v34  ;;  %v7557_v15 = vsub.f32 %v7521_v54, %v7529_v46  ;;  %v7558_v55 = vsub.f32 %v7522_v11, %v7530_v27 }
 0xfae   :  { %v7551_v8 = vadd.f32 %v7531_v48, %v7523_v13  ;;  %v7560_v30 = vmul.f32 0.5, %v7556_v40  ;;  %v7559_v25 = vsub.f32 %v7523_v13, %v7531_v48 }
 0xfaf   :  { %7813 = vrot.lane.b32.xlu0 %v7726_v33, %s11134_s27  ;;  %v7896_v45 = vrot.slane %v7554_v23, %v11170_v2  ;;  %v7561_v9 = vmul.f32 0.5, %v7557_v15  ;;  %v7562_v33 = vmul.f32 0.5, %v7558_v55 }
 0xfb0   :  { %v7555_v47 = vmul.f32 0.5, %v7551_v8  ;;  %v7918_v49 = vrot.slane %v7560_v30, %v11170_v2 }
 0xfb1   :  { %7825 = vrot.lane.b32.xlu1 %v7768_v21, %s11127_s21  ;;  %v7929_v39 = vrot.slane %v7561_v9, %v11170_v2  ;;  %v7940_v4 = vrot.slane %v7562_v33, %v11170_v2  ;;  %v7563_v21 = vmul.f32 0.5, %v7559_v25 }
 0xfb2   :  { %v7907_v26 = vrot.slane %v7555_v47, %v11170_v2 }
 0xfb3   :  { %7821 = vrot.lane.b32.xlu0 %v7727_v53, %s11135_s28  ;;  %v7951_v7 = vrot.slane %v7563_v21, %v11170_v2 }
 0xfb5   :  { %7833 = vrot.lane.b32.xlu1 %v7775_v1, %s11128_s22 }
 0xfb7   :  { %7829 = vrot.lane.b32.xlu0 %v7792_v42, %s11136_s29 }
 0xfb9   :  { %7841 = vrot.lane.b32.xlu1 %v7784_v51, %s11129_s23 }
 0xfbb   :  { %7837 = vrot.lane.b32.xlu0 %v7793_v59, %s11137_s30 }
 0xfbd   :  { %7849 = vrot.lane.b32.xlu1 %v7791_v22, %s11130_s24 }
 0xfbf   :  { %7845 = vrot.lane.b32.xlu0 %v7794_v31, %s11138_s2 }
 0xfc1   :  { %7876 = vbcast.lane.b32.xlu1 %v7874_v56, 256 }
 0xfc3   :  { %7853 = vrot.lane.b32.xlu0 %v7795_v36, %s11139_s3 }
 0xfc5   :  { %7887 = vbcast.lane.b32.xlu1 %v7885_v10, 256 }
 0xfc7   :  { %7880 = vbcast.lane.b32.xlu0 %v7874_v56, 264 }
 0xfc9   :  { %7898 = vbcast.lane.b32.xlu1 %v7896_v45, 256 }
 0xfcb   :  { %7891 = vbcast.lane.b32.xlu0 %v7885_v10, 264 }
 0xfcd   :  { %7909 = vbcast.lane.b32.xlu1 %v7907_v26, 256 }
 0xfcf   :  { %7902 = vbcast.lane.b32.xlu0 %v7896_v45, 264 }
 0xfd1   :  { %7920 = vbcast.lane.b32.xlu1 %v7918_v49, 256 }
 0xfd3   :  { %7913 = vbcast.lane.b32.xlu0 %v7907_v26, 264 }
 0xfd5   :  { %7931 = vbcast.lane.b32.xlu1 %v7929_v39, 256 }
 0xfd7   :  { %7924 = vbcast.lane.b32.xlu0 %v7918_v49, 264 }
 0xfd9   :  { %7942 = vbcast.lane.b32.xlu1 %v7940_v4, 256 }
 0xfdb   :  { %7935 = vbcast.lane.b32.xlu0 %v7929_v39, 264 }
 0xfdd   :  { %7953 = vbcast.lane.b32.xlu1 %v7951_v7, 256 }
 0xfdf   :  { %7946 = vbcast.lane.b32.xlu0 %v7940_v4, 264 }
 0xfe3   :  { %7957 = vbcast.lane.b32.xlu0 %v7951_v7, 264 }
0x1017   :  { %v13984_v12 = vpop.permute.xlu1 %7801 }
0x1018   :  { %16486 = vst [vmem:[#allocation344_spill] sm:$0xff] %v13984_v12 }
0x1019   :  { %v13986_v32 = vpop.permute.xlu0 %7797 }
0x101a   :  { %16487 = vst [vmem:[#allocation345_spill] sm:$0xff] %v13986_v32 }
0x101b   :  { %v13988_v53 = vpop.permute.xlu1 %7809 }
0x101c   :  { %16488 = vst [vmem:[#allocation346_spill] sm:$0xff] %v13988_v53 }
0x101d   :  { %v13990_v57 = vpop.permute.xlu0 %7805 }
0x101e   :  { %16489 = vst [vmem:[#allocation347_spill] sm:$0xff] %v13990_v57 }
0x101f   :  { %v13992_v1 = vpop.permute.xlu1 %7817 }
0x1020   :  { %16490 = vst [vmem:[#allocation348_spill] sm:$0xff] %v13992_v1 }
0x1021   :  { %v13994_v41 = vpop.permute.xlu0 %7813 }
0x1022   :  { %16491 = vst [vmem:[#allocation349_spill] sm:$0xff] %v13994_v41 }
0x1023   :  { %v13996_v54 = vpop.permute.xlu1 %7825 }
0x1024   :  { %16492 = vst [vmem:[#allocation350_spill] sm:$0xff] %v13996_v54 }
0x1025   :  { %v13998_v46 = vpop.permute.xlu0 %7821 }
0x1026   :  { %16493 = vst [vmem:[#allocation351_spill] sm:$0xff] %v13998_v46 }
0x1027   :  { %v14000_v42 = vpop.permute.xlu1 %7833 }
0x1028   :  { %16494 = vst [vmem:[#allocation352_spill] sm:$0xff] %v14000_v42 }
0x1029   :  { %v14002_v62 = vpop.permute.xlu0 %7829 }
0x102a   :  { %16495 = vst [vmem:[#allocation353_spill] sm:$0xff] %v14002_v62 }
0x102b   :  { %v14004_v51 = vpop.permute.xlu1 %7841 }
0x102c   :  { %16496 = vst [vmem:[#allocation354_spill] sm:$0xff] %v14004_v51  ;;  %v14093_v51 = vld [vmem:[#allocation2 + $0xcc] sm:$0x1] }
0x102d   :  { %v14006_v60 = vpop.permute.xlu0 %7837 }
0x102e   :  { %16497 = vst [vmem:[#allocation355_spill] sm:$0xff] %v14006_v60  ;;  %v14095_v60 = vld [vmem:[#allocation2 + $0xdc] sm:$0x1] }
0x102f   :  { %v14008_v61 = vpop.permute.xlu1 %7849 }
0x1030   :  { %16498 = vst [vmem:[#allocation356_spill] sm:$0xff] %v14008_v61 }
0x1031   :  { %v14010_v59 = vpop.permute.xlu0 %7845 }
0x1032   :  { %16499 = vst [vmem:[#allocation357_spill] sm:$0xff] %v14010_v59 }
0x1033   :  { %v7877_v11 = vpop.permute.xlu1 %7876 }
0x1035   :  { %v14012_v27 = vpop.permute.xlu0 %7853 }
0x1036   :  { %16500 = vst [vmem:[#allocation358_spill] sm:$0xff] %v14012_v27 }
0x1037   :  { %v7888_v22 = vpop.permute.xlu1 %7887 }
0x1039   :  { %v7881_v56 = vpop.permute.xlu0 %7880 }
0x103b   :  { %v7899_v43 = vpop.permute.xlu1 %7898 }
0x103d   :  { %v7892_v31 = vpop.permute.xlu0 %7891 }
0x103f   :  { %v7910_v34 = vpop.permute.xlu1 %7909 }
0x1041   :  { %v7903_v13 = vpop.permute.xlu0 %7902 }
0x1043   :  { %v7921_v48 = vpop.permute.xlu1 %7920 }
0x1044   :  { %v7959_v40 = vsel %vm178_vm0, %v7877_v11, %v7921_v48 }
0x1045   :  { %v7914_v36 = vpop.permute.xlu0 %7913 }
0x1047   :  { %v7932_v10 = vpop.permute.xlu1 %7931 }
0x1048   :  { %v7961_v15 = vsel %vm178_vm0, %v7888_v22, %v7932_v10 }
0x1049   :  { %v7925_v23 = vpop.permute.xlu0 %7924 }
0x104b   :  { %v7943_v8 = vpop.permute.xlu1 %7942 }
0x104c   :  { %v7963_v45 = vsel %vm178_vm0, %v7899_v43, %v7943_v8 }
0x104d   :  { %v7936_v47 = vpop.permute.xlu0 %7935  ;;  %v7967_v26 = vcombine.low %v7959_v40, %v7963_v45  ;;  %v7968_v9 = vcombine.high %v7959_v40, %v7963_v45 }
0x104e   :  { %v7962_v8 = vsel %vm178_vm0, %v7892_v31, %v7936_v47 }
0x104f   :  { %v7954_v30 = vpop.permute.xlu1 %7953  ;;  %v7975_v25 = vrot.slane %v7967_v26, %v11278_v28  ;;  %v7982_v7 = vrot.slane %v7968_v9, %v11278_v28 }
0x1050   :  { %v7965_v49 = vsel %vm178_vm0, %v7910_v34, %v7954_v30  ;;  %v7960_v30 = vsel %vm178_vm0, %v7881_v56, %v7925_v23 }
0x1051   :  { %v7983_v55 = vcombine.low %v7961_v15, %v7965_v49  ;;  %v7984_v39 = vcombine.high %v7961_v15, %v7965_v49  ;;  %v7947_v33 = vpop.permute.xlu0 %7946 }
0x1052   :  { %v7964_v22 = vsel %vm178_vm0, %v7903_v13, %v7947_v33 }
0x1053   :  { %v7991_v4 = vrot.slane %v7983_v55, %v11278_v28  ;;  %v7998_v21 = vrot.slane %v7984_v39, %v11278_v28  ;;  %v8035_v15 = vcombine.low %v7960_v30, %v7964_v22  ;;  %v14041_v39 = vld [vmem:[#allocation2 + $0xc] sm:$0x1]  ;;  %v8036_v33 = vcombine.high %v7960_v30, %v7964_v22 }
0x1054   :  { %v14065_v30 = vld [vmem:[#allocation2 + $0x6c] sm:$0x1] }
0x1055   :  { %v7999_v43 = vcombine.low %v7975_v25, %v7991_v4  ;;  %v8000_v11 = vcombine.high %v7975_v25, %v7991_v4  ;;  %v7958_v48 = vpop.permute.xlu0 %7957  ;;  %v8015_v26 = vcombine.low %v7982_v7, %v7998_v21  ;;  %v8016_v31 = vcombine.high %v7982_v7, %v7998_v21  ;;  %v14045_v4 = vld [vmem:[#allocation2 + $0x1c] sm:$0x1]  ;;  %v14047_v21 = vld [vmem:[#allocation2 + $0x2c] sm:$0x1] }
0x1056   :  { %v7966_v34 = vsel %vm178_vm0, %v7914_v36, %v7958_v48  ;;  %v8043_v47 = vrot.slane %v8035_v15, %v11278_v28  ;;  %v14049_v7 = vld [vmem:[#allocation2 + $0x3c] sm:$0x1] }
0x1057   :  { %v14026_v10 = vrot.slane %v7999_v43, %v11292_v52  ;;  %v8051_v45 = vcombine.low %v7962_v8, %v7966_v34  ;;  %v8014_v40 = vrot.slane %v8000_v11, %v11292_v52  ;;  %v8023_v36 = vrot.slane %v8015_v26, %v11292_v52  ;;  %v14063_v26 = vld [vmem:[#allocation2 + $0x5c] sm:$0x1] }
0x1058   :  { %v8052_v56 = vcombine.high %v7962_v8, %v7966_v34  ;;  %v8030_v55 = vrot.slane %v8016_v31, %v11292_v52  ;;  %v8194_v8 = vadd.f32 %v14045_v4, %v14041_v39  ;;  %v8202_v22 = vadd.f32 %v14049_v7, %v14047_v21  ;;  %v14058_v34 = vld [vmem:[#allocation2 + $0x4c] sm:$0x1]  ;;  %v14067_v15 = vld [vmem:[#allocation2 + $0x7c] sm:$0x1] }
0x1059   :  { %16501 = vst [vmem:[#allocation359_spill] sm:$0xff] %v14026_v10  ;;  %8108 = vrot.lane.b32.xlu0 %v8014_v40, %s11125_s0  ;;  %v8031_v49 = vcombine.high %v14026_v10, %v16171_v63  ;;  %v8059_v13 = vrot.slane %v8051_v45, %v11278_v28  ;;  %v8032_v9 = vcombine.high %v8014_v40, %v16171_v63 }
0x105a   :  { %v8033_v25 = vcombine.high %v8023_v36, %v16171_v63  ;;  %v8066_v43 = vrot.slane %v8052_v56, %v11278_v28  ;;  %v8050_v45 = vrot.slane %v8036_v33, %v11278_v28  ;;  %v8034_v40 = vcombine.high %v8030_v55, %v16171_v63  ;;  %v14077_v56 = vld [vmem:[#allocation2 + $0x8c] sm:$0x1]  ;;  %v14083_v33 = vld [vmem:[#allocation2 + $0xbc] sm:$0x1] }
0x105b   :  { %8104 = vrot.lane.b32.xlu1 %v8031_v49, %s11132_s25  ;;  %v8067_v23 = vcombine.low %v8043_v47, %v8059_v13  ;;  %v8068_v11 = vcombine.high %v8043_v47, %v8059_v13  ;;  %v8210_v13 = vadd.f32 %v8202_v22, %v8194_v8  ;;  %v8203_v47 = vadd.f32 %v14067_v15, %v14065_v30 }
0x105c   :  { %v8083_v49 = vcombine.low %v8050_v45, %v8066_v43  ;;  %v8197_v10 = vadd.f32 %v14095_v60, %v14093_v51  ;;  %v8218_v46 = vsub.f32 %v8194_v8, %v8202_v22 }
0x105d   :  { %8116 = vrot.lane.b32.xlu0 %v8023_v36, %s11122_s17  ;;  %v8075_v48 = vrot.slane %v8067_v23, %v11292_v52  ;;  %v8082_v31 = vrot.slane %v8068_v11, %v11292_v52  ;;  %v8195_v36 = vadd.f32 %v14063_v26, %v14058_v34  ;;  %v14079_v23 = vld [vmem:[#allocation2 + $0x9c] sm:$0x1] }
0x105e   :  { %v8091_v11 = vrot.slane %v8083_v49, %v11292_v52  ;;  %v8222_v41 = vmul.f32 0.5, %v8218_v46 }
0x105f   :  { %8112 = vrot.lane.b32.xlu1 %v8032_v9, %s11133_s26  ;;  %v8099_v9 = vcombine.high %v8075_v48, %v16171_v63  ;;  %v8211_v27 = vadd.f32 %v8203_v47, %v8195_v36  ;;  %v8100_v61 = vcombine.high %v8082_v31, %v16171_v63 }
0x1061   :  { %8124 = vrot.lane.b32.xlu0 %v8030_v55, %s11126_s20  ;;  %v14081_v55 = vld [vmem:[#allocation2 + $0xac] sm:$0x1] }
0x1062   :  { %v8204_v59 = vadd.f32 %v14083_v33, %v14081_v55 }
0x1063   :  { %8120 = vrot.lane.b32.xlu1 %v8033_v25, %s11134_s27  ;;  %v8084_v25 = vcombine.high %v8050_v45, %v8066_v43  ;;  %v14097_v43 = vld [vmem:[#allocation2 + $0xec] sm:$0x1]  ;;  %v14099_v45 = vld [vmem:[#allocation2 + $0xfc] sm:$0x1] }
0x1064   :  { %v8205_v62 = vadd.f32 %v14099_v45, %v14097_v43 }
0x1065   :  { %8132 = vrot.lane.b32.xlu0 %v8075_v48, %s11127_s21  ;;  %v8196_v48 = vadd.f32 %v14079_v23, %v14077_v56  ;;  %v8098_v49 = vrot.slane %v8084_v25, %v11292_v52 }
0x1067   :  { %8128 = vrot.lane.b32.xlu1 %v8034_v40, %s11135_s28  ;;  %v8214_v40 = vmul.f32 0.5, %v8210_v13  ;;  %v8215_v13 = vmul.f32 0.5, %v8211_v27  ;;  %v8212_v42 = vadd.f32 %v8204_v59, %v8196_v48  ;;  %v8213_v27 = vadd.f32 %v8205_v62, %v8197_v10 }
0x1069   :  { %8140 = vrot.lane.b32.xlu0 %v8082_v31, %s11128_s22  ;;  %v8245_v31 = vrot.slane %v8214_v40, %v11170_v2  ;;  %v8256_v25 = vrot.slane %v8215_v13, %v11170_v2  ;;  %v8216_v40 = vmul.f32 0.5, %v8212_v42  ;;  %v8217_v54 = vmul.f32 0.5, %v8213_v27 }
0x106a   :  { %v8220_v42 = vsub.f32 %v8196_v48, %v8204_v59 }
0x106b   :  { %8136 = vrot.lane.b32.xlu1 %v8099_v9, %s11136_s29  ;;  %v8101_v9 = vcombine.high %v8091_v11, %v16171_v63  ;;  %v8278_v1 = vrot.slane %v8217_v54, %v11170_v2 }
0x106c   :  { %v8224_v53 = vmul.f32 0.5, %v8220_v42 }
0x106d   :  { %8148 = vrot.lane.b32.xlu0 %v8091_v11, %s11129_s23  ;;  %v8267_v11 = vrot.slane %v8216_v40, %v11170_v2  ;;  %v8221_v40 = vsub.f32 %v8197_v10, %v8205_v62 }
0x106e   :  { %v8311_v8 = vrot.slane %v8224_v53, %v11170_v2 }
0x106f   :  { %8144 = vrot.lane.b32.xlu1 %v8100_v61, %s11137_s30  ;;  %v8102_v61 = vcombine.high %v8098_v49, %v16171_v63  ;;  %v8225_v22 = vmul.f32 0.5, %v8221_v40 }
0x1071   :  { %8156 = vrot.lane.b32.xlu0 %v8098_v49, %s11130_s24  ;;  %v8289_v49 = vrot.slane %v8222_v41, %v11170_v2  ;;  %v8322_v54 = vrot.slane %v8225_v22, %v11170_v2 }
0x1073   :  { %8152 = vrot.lane.b32.xlu1 %v8101_v9, %s11138_s2  ;;  %v8219_v9 = vsub.f32 %v8195_v36, %v8203_v47 }
0x1075   :  { %8247 = vbcast.lane.b32.xlu0 %v8245_v31, 256  ;;  %v8223_v13 = vmul.f32 0.5, %v8219_v9 }
0x1077   :  { %8160 = vrot.lane.b32.xlu1 %v8102_v61, %s11139_s3  ;;  %v8300_v61 = vrot.slane %v8223_v13, %v11170_v2 }
0x1079   :  { %8258 = vbcast.lane.b32.xlu0 %v8256_v25, 256 }
0x107b   :  { %8251 = vbcast.lane.b32.xlu1 %v8245_v31, 264 }
0x107d   :  { %8269 = vbcast.lane.b32.xlu0 %v8267_v11, 256 }
0x107f   :  { %8262 = vbcast.lane.b32.xlu1 %v8256_v25, 264 }
0x1081   :  { %8280 = vbcast.lane.b32.xlu0 %v8278_v1, 256 }
0x1083   :  { %8273 = vbcast.lane.b32.xlu1 %v8267_v11, 264 }
0x1085   :  { %8291 = vbcast.lane.b32.xlu0 %v8289_v49, 256 }
0x1087   :  { %8284 = vbcast.lane.b32.xlu1 %v8278_v1, 264 }
0x1089   :  { %8302 = vbcast.lane.b32.xlu0 %v8300_v61, 256 }
0x108b   :  { %8295 = vbcast.lane.b32.xlu1 %v8289_v49, 264 }
0x108d   :  { %8313 = vbcast.lane.b32.xlu0 %v8311_v8, 256 }
0x108f   :  { %8306 = vbcast.lane.b32.xlu1 %v8300_v61, 264 }
0x1091   :  { %8324 = vbcast.lane.b32.xlu0 %v8322_v54, 256 }
0x1093   :  { %8317 = vbcast.lane.b32.xlu1 %v8311_v8, 264 }
0x1097   :  { %8328 = vbcast.lane.b32.xlu1 %v8322_v54, 264 }
0x10cb   :  { %v14120_v41 = vpop.permute.xlu0 %8108 }
0x10cc   :  { %16502 = vst [vmem:[#allocation360_spill] sm:$0xff] %v14120_v41 }
0x10cd   :  { %v14122_v46 = vpop.permute.xlu1 %8104 }
0x10ce   :  { %16503 = vst [vmem:[#allocation361_spill] sm:$0xff] %v14122_v46 }
0x10cf   :  { %v14124_v59 = vpop.permute.xlu0 %8116 }
0x10d0   :  { %16504 = vst [vmem:[#allocation362_spill] sm:$0xff] %v14124_v59 }
0x10d1   :  { %v14126_v62 = vpop.permute.xlu1 %8112 }
0x10d2   :  { %16505 = vst [vmem:[#allocation363_spill] sm:$0xff] %v14126_v62 }
0x10d3   :  { %v14128_v1 = vpop.permute.xlu0 %8124 }
0x10d4   :  { %16506 = vst [vmem:[#allocation364_spill] sm:$0xff] %v14128_v1 }
0x10d5   :  { %v14130_v53 = vpop.permute.xlu1 %8120 }
0x10d6   :  { %16507 = vst [vmem:[#allocation365_spill] sm:$0xff] %v14130_v53 }
0x10d7   :  { %v14132_v10 = vpop.permute.xlu0 %8132 }
0x10d8   :  { %16508 = vst [vmem:[#allocation366_spill] sm:$0xff] %v14132_v10 }
0x10d9   :  { %v14134_v36 = vpop.permute.xlu1 %8128 }
0x10da   :  { %16509 = vst [vmem:[#allocation367_spill] sm:$0xff] %v14134_v36 }
0x10db   :  { %v14136_v47 = vpop.permute.xlu0 %8140 }
0x10dc   :  { %16510 = vst [vmem:[#allocation368_spill] sm:$0xff] %v14136_v47 }
0x10dd   :  { %v14138_v48 = vpop.permute.xlu1 %8136 }
0x10de   :  { %16511 = vst [vmem:[#allocation369_spill] sm:$0xff] %v14138_v48 }
0x10df   :  { %v14140_v31 = vpop.permute.xlu0 %8148 }
0x10e0   :  { %16512 = vst [vmem:[#allocation370_spill] sm:$0xff] %v14140_v31 }
0x10e1   :  { %v14142_v25 = vpop.permute.xlu1 %8144 }
0x10e2   :  { %16513 = vst [vmem:[#allocation371_spill] sm:$0xff] %v14142_v25 }
0x10e3   :  { %v14144_v27 = vpop.permute.xlu0 %8156 }
0x10e4   :  { %16514 = vst [vmem:[#allocation372_spill] sm:$0xff] %v14144_v27 }
0x10e5   :  { %v14146_v11 = vpop.permute.xlu1 %8152 }
0x10e6   :  { %16515 = vst [vmem:[#allocation373_spill] sm:$0xff] %v14146_v11 }
0x10e7   :  { %v8248_v9 = vpop.permute.xlu0 %8247 }
0x10e9   :  { %v14148_v49 = vpop.permute.xlu1 %8160 }
0x10ea   :  { %16516 = vst [vmem:[#allocation374_spill] sm:$0xff] %v14148_v49 }
0x10eb   :  { %v8259_v13 = vpop.permute.xlu0 %8258 }
0x10ed   :  { %v8252_v42 = vpop.permute.xlu1 %8251 }
0x10ef   :  { %v8270_v61 = vpop.permute.xlu0 %8269 }
0x10f1   :  { %v8263_v40 = vpop.permute.xlu1 %8262 }
0x10f3   :  { %v8281_v8 = vpop.permute.xlu0 %8280 }
0x10f5   :  { %v8274_v22 = vpop.permute.xlu1 %8273 }
0x10f7   :  { %v8292_v54 = vpop.permute.xlu0 %8291 }
0x10f8   :  { %v8330_v27 = vsel %vm178_vm0, %v8248_v9, %v8292_v54 }
0x10f9   :  { %v8285_v47 = vpop.permute.xlu1 %8284 }
0x10fb   :  { %v8303_v48 = vpop.permute.xlu0 %8302 }
0x10fc   :  { %v8332_v49 = vsel %vm178_vm0, %v8259_v13, %v8303_v48 }
0x10fd   :  { %v8296_v10 = vpop.permute.xlu1 %8295 }
0x10ff   :  { %v8314_v31 = vpop.permute.xlu0 %8313 }
0x1100   :  { %v8334_v25 = vsel %vm178_vm0, %v8270_v61, %v8314_v31 }
0x1101   :  { %v8307_v36 = vpop.permute.xlu1 %8306  ;;  %v8338_v11 = vcombine.low %v8330_v27, %v8334_v25  ;;  %v8339_v59 = vcombine.high %v8330_v27, %v8334_v25 }
0x1102   :  { %v8333_v32 = vsel %vm178_vm0, %v8263_v40, %v8307_v36 }
0x1103   :  { %v8325_v1 = vpop.permute.xlu0 %8324  ;;  %v8346_v57 = vrot.slane %v8338_v11, %v11278_v28  ;;  %v8353_v31 = vrot.slane %v8339_v59, %v11278_v28 }
0x1104   :  { %v8336_v53 = vsel %vm178_vm0, %v8281_v8, %v8325_v1 }
0x1105   :  { %v8354_v62 = vcombine.low %v8332_v49, %v8336_v53  ;;  %v8355_v41 = vcombine.high %v8332_v49, %v8336_v53  ;;  %v8318_v46 = vpop.permute.xlu1 %8317 }
0x1106   :  { %v8335_v48 = vsel %vm178_vm0, %v8274_v22, %v8318_v46 }
0x1107   :  { %v8362_v12 = vrot.slane %v8354_v62, %v11278_v28  ;;  %v8369_v58 = vrot.slane %v8355_v41, %v11278_v28  ;;  %v8331_v41 = vsel %vm178_vm0, %v8252_v42, %v8296_v10 }
0x1108   :  { %v8406_v11 = vcombine.low %v8331_v41, %v8335_v48  ;;  %v8407_v42 = vcombine.high %v8331_v41, %v8335_v48 }
0x1109   :  { %v8370_v61 = vcombine.low %v8346_v57, %v8362_v12  ;;  %v8371_v9 = vcombine.high %v8346_v57, %v8362_v12  ;;  %v8329_v54 = vpop.permute.xlu1 %8328  ;;  %v8386_v62 = vcombine.low %v8353_v31, %v8369_v58  ;;  %v8387_v57 = vcombine.high %v8353_v31, %v8369_v58 }
0x110a   :  { %v8337_v1 = vsel %vm178_vm0, %v8285_v47, %v8329_v54  ;;  %v8414_v36 = vrot.slane %v8406_v11, %v11278_v28  ;;  %v8206_v31 = vsub.f32 %v14047_v21, %v14049_v7 }
0x110b   :  { %v14162_v53 = vrot.slane %v8370_v61, %v11292_v52  ;;  %v8422_v25 = vcombine.low %v8333_v32, %v8337_v1  ;;  %v8385_v27 = vrot.slane %v8371_v9, %v11292_v52  ;;  %v8394_v59 = vrot.slane %v8386_v62, %v11292_v52 }
0x110c   :  { %v8423_v10 = vcombine.high %v8333_v32, %v8337_v1  ;;  %v8401_v13 = vrot.slane %v8387_v57, %v11292_v52  ;;  %v8198_v32 = vsub.f32 %v14041_v39, %v14045_v4  ;;  %v8421_v61 = vrot.slane %v8407_v42, %v11278_v28 }
0x110d   :  { %16517 = vst [vmem:[#allocation375_spill] sm:$0xff] %v14162_v53  ;;  %8479 = vrot.lane.b32.xlu1 %v8385_v27, %s11125_s0  ;;  %v8402_v12 = vcombine.high %v14162_v53, %v16171_v63  ;;  %v8430_v46 = vrot.slane %v8422_v25, %v11278_v28  ;;  %v8403_v47 = vcombine.high %v8385_v27, %v16171_v63 }
0x110e   :  { %v8404_v58 = vcombine.high %v8394_v59, %v16171_v63  ;;  %v8437_v40 = vrot.slane %v8423_v10, %v11278_v28  ;;  %v8405_v9 = vcombine.high %v8401_v13, %v16171_v63  ;;  %v8226_v1 = vadd.f32 %v8206_v31, %v8198_v32 }
0x110f   :  { %8475 = vrot.lane.b32.xlu0 %v8402_v12, %s11132_s25  ;;  %v8438_v49 = vcombine.low %v8414_v36, %v8430_v46  ;;  %v8439_v8 = vcombine.high %v8414_v36, %v8430_v46  ;;  %v8199_v25 = vsub.f32 %v14058_v34, %v14063_v26  ;;  %v8207_v39 = vsub.f32 %v14065_v30, %v14067_v15 }
0x1110   :  { %v8454_v54 = vcombine.low %v8421_v61, %v8437_v40  ;;  %v8455_v21 = vcombine.high %v8421_v61, %v8437_v40  ;;  %v8230_v27 = vmul.f32 0.5, %v8226_v1  ;;  %v8200_v34 = vsub.f32 %v14077_v56, %v14079_v23 }
0x1111   :  { %8487 = vrot.lane.b32.xlu1 %v8394_v59, %s11122_s17  ;;  %v8446_v22 = vrot.slane %v8438_v49, %v11292_v52  ;;  %v8453_v48 = vrot.slane %v8439_v8, %v11292_v52  ;;  %v8227_v62 = vadd.f32 %v8207_v39, %v8199_v25  ;;  %v8208_v26 = vsub.f32 %v14081_v55, %v14083_v33 }
0x1112   :  { %v8462_v7 = vrot.slane %v8454_v54, %v11292_v52  ;;  %v8469_v30 = vrot.slane %v8455_v21, %v11292_v52  ;;  %v8552_v15 = vrot.slane %v8230_v27, %v11170_v2  ;;  %v8201_v46 = vsub.f32 %v14093_v51, %v14095_v60 }
0x1113   :  { %8483 = vrot.lane.b32.xlu0 %v8403_v47, %s11133_s26  ;;  %v8470_v4 = vcombine.high %v8446_v22, %v16171_v63  ;;  %v8471_v41 = vcombine.high %v8453_v48, %v16171_v63  ;;  %v8231_v11 = vmul.f32 0.5, %v8227_v62  ;;  %v8228_v57 = vadd.f32 %v8208_v26, %v8200_v34 }
0x1114   :  { %v8472_v12 = vcombine.high %v8462_v7, %v16171_v63  ;;  %v8209_v56 = vsub.f32 %v14097_v43, %v14099_v45  ;;  %v8473_v23 = vcombine.high %v8469_v30, %v16171_v63  ;;  %v8234_v10 = vsub.f32 %v8198_v32, %v8206_v31 }
0x1115   :  { %8495 = vrot.lane.b32.xlu1 %v8401_v13, %s11126_s20  ;;  %v8563_v55 = vrot.slane %v8231_v11, %v11170_v2  ;;  %v8232_v33 = vmul.f32 0.5, %v8228_v57  ;;  %v8235_v43 = vsub.f32 %v8199_v25, %v8207_v39  ;;  %v8236_v13 = vsub.f32 %v8200_v34, %v8208_v26 }
0x1116   :  { %v8229_v59 = vadd.f32 %v8209_v56, %v8201_v46  ;;  %v8238_v60 = vmul.f32 0.5, %v8234_v10  ;;  %v8237_v40 = vsub.f32 %v8201_v46, %v8209_v56 }
0x1117   :  { %8491 = vrot.lane.b32.xlu0 %v8404_v58, %s11134_s27  ;;  %v8574_v36 = vrot.slane %v8232_v33, %v11170_v2  ;;  %v8239_v49 = vmul.f32 0.5, %v8235_v43  ;;  %v8240_v58 = vmul.f32 0.5, %v8236_v13 }
0x1118   :  { %v8233_v47 = vmul.f32 0.5, %v8229_v59  ;;  %v8596_v45 = vrot.slane %v8238_v60, %v11170_v2 }
0x1119   :  { %8503 = vrot.lane.b32.xlu1 %v8446_v22, %s11127_s21  ;;  %v8607_v42 = vrot.slane %v8239_v49, %v11170_v2  ;;  %v8618_v8 = vrot.slane %v8240_v58, %v11170_v2  ;;  %v8241_v22 = vmul.f32 0.5, %v8237_v40 }
0x111a   :  { %v8585_v51 = vrot.slane %v8233_v47, %v11170_v2 }
0x111b   :  { %8499 = vrot.lane.b32.xlu0 %v8405_v9, %s11135_s28  ;;  %v8629_v32 = vrot.slane %v8241_v22, %v11170_v2 }
0x111d   :  { %8511 = vrot.lane.b32.xlu1 %v8453_v48, %s11128_s22 }
0x111f   :  { %8507 = vrot.lane.b32.xlu0 %v8470_v4, %s11136_s29 }
0x1121   :  { %8519 = vrot.lane.b32.xlu1 %v8462_v7, %s11129_s23 }
0x1123   :  { %8515 = vrot.lane.b32.xlu0 %v8471_v41, %s11137_s30 }
0x1125   :  { %8527 = vrot.lane.b32.xlu1 %v8469_v30, %s11130_s24 }
0x1127   :  { %8523 = vrot.lane.b32.xlu0 %v8472_v12, %s11138_s2 }
0x1129   :  { %8554 = vbcast.lane.b32.xlu1 %v8552_v15, 256 }
0x112b   :  { %8531 = vrot.lane.b32.xlu0 %v8473_v23, %s11139_s3 }
0x112d   :  { %8565 = vbcast.lane.b32.xlu1 %v8563_v55, 256 }
0x112f   :  { %8558 = vbcast.lane.b32.xlu0 %v8552_v15, 264 }
0x1131   :  { %8576 = vbcast.lane.b32.xlu1 %v8574_v36, 256 }
0x1133   :  { %8569 = vbcast.lane.b32.xlu0 %v8563_v55, 264 }
0x1135   :  { %8587 = vbcast.lane.b32.xlu1 %v8585_v51, 256 }
0x1137   :  { %8580 = vbcast.lane.b32.xlu0 %v8574_v36, 264 }
0x1139   :  { %8598 = vbcast.lane.b32.xlu1 %v8596_v45, 256 }
0x113b   :  { %8591 = vbcast.lane.b32.xlu0 %v8585_v51, 264 }
0x113d   :  { %8609 = vbcast.lane.b32.xlu1 %v8607_v42, 256 }
0x113f   :  { %8602 = vbcast.lane.b32.xlu0 %v8596_v45, 264 }
0x1141   :  { %8620 = vbcast.lane.b32.xlu1 %v8618_v8, 256 }
0x1143   :  { %8613 = vbcast.lane.b32.xlu0 %v8607_v42, 264 }
0x1145   :  { %8631 = vbcast.lane.b32.xlu1 %v8629_v32, 256 }
0x1147   :  { %8624 = vbcast.lane.b32.xlu0 %v8618_v8, 264 }
0x114b   :  { %8635 = vbcast.lane.b32.xlu0 %v8629_v32, 264 }
0x117f   :  { %v14224_v31 = vpop.permute.xlu1 %8479 }
0x1180   :  { %16518 = vst [vmem:[#allocation376_spill] sm:$0xff] %v14224_v31 }
0x1181   :  { %v14226_v61 = vpop.permute.xlu0 %8475 }
0x1182   :  { %16519 = vst [vmem:[#allocation377_spill] sm:$0xff] %v14226_v61 }
0x1183   :  { %v14228_v9 = vpop.permute.xlu1 %8487 }
0x1184   :  { %16520 = vst [vmem:[#allocation378_spill] sm:$0xff] %v14228_v9 }
0x1185   :  { %v14230_v54 = vpop.permute.xlu0 %8483 }
0x1186   :  { %16521 = vst [vmem:[#allocation379_spill] sm:$0xff] %v14230_v54 }
0x1187   :  { %v14232_v48 = vpop.permute.xlu1 %8495 }
0x1188   :  { %16522 = vst [vmem:[#allocation380_spill] sm:$0xff] %v14232_v48 }
0x1189   :  { %v14234_v1 = vpop.permute.xlu0 %8491 }
0x118a   :  { %16523 = vst [vmem:[#allocation381_spill] sm:$0xff] %v14234_v1 }
0x118b   :  { %v14236_v25 = vpop.permute.xlu1 %8503 }
0x118c   :  { %16524 = vst [vmem:[#allocation382_spill] sm:$0xff] %v14236_v25 }
0x118d   :  { %v14238_v39 = vpop.permute.xlu0 %8499 }
0x118e   :  { %16525 = vst [vmem:[#allocation383_spill] sm:$0xff] %v14238_v39 }
0x118f   :  { %v14240_v4 = vpop.permute.xlu1 %8511 }
0x1190   :  { %16526 = vst [vmem:[#allocation384_spill] sm:$0xff] %v14240_v4 }
0x1191   :  { %v14242_v21 = vpop.permute.xlu0 %8507 }
0x1192   :  { %16527 = vst [vmem:[#allocation385_spill] sm:$0xff] %v14242_v21 }
0x1193   :  { %v14244_v7 = vpop.permute.xlu1 %8519 }
0x1194   :  { %16528 = vst [vmem:[#allocation386_spill] sm:$0xff] %v14244_v7  ;;  %v14333_v7 = vld [vmem:[#allocation2 + $0xcd] sm:$0x1] }
0x1195   :  { %v14246_v27 = vpop.permute.xlu0 %8515 }
0x1196   :  { %16529 = vst [vmem:[#allocation387_spill] sm:$0xff] %v14246_v27  ;;  %v14335_v27 = vld [vmem:[#allocation2 + $0xdd] sm:$0x1] }
0x1197   :  { %v14248_v62 = vpop.permute.xlu1 %8527  ;;  %v8875_v21 = vadd.f32 %v14335_v27, %v14333_v7 }
0x1198   :  { %16530 = vst [vmem:[#allocation388_spill] sm:$0xff] %v14248_v62 }
0x1199   :  { %v14250_v41 = vpop.permute.xlu0 %8523 }
0x119a   :  { %16531 = vst [vmem:[#allocation389_spill] sm:$0xff] %v14250_v41 }
0x119b   :  { %v8555_v34 = vpop.permute.xlu1 %8554 }
0x119d   :  { %v14252_v26 = vpop.permute.xlu0 %8531 }
0x119e   :  { %16532 = vst [vmem:[#allocation390_spill] sm:$0xff] %v14252_v26 }
0x119f   :  { %v8566_v30 = vpop.permute.xlu1 %8565 }
0x11a1   :  { %v8559_v15 = vpop.permute.xlu0 %8558 }
0x11a3   :  { %v8577_v11 = vpop.permute.xlu1 %8576 }
0x11a5   :  { %v8570_v12 = vpop.permute.xlu0 %8569 }
0x11a7   :  { %v8588_v57 = vpop.permute.xlu1 %8587 }
0x11a9   :  { %v8581_v46 = vpop.permute.xlu0 %8580 }
0x11ab   :  { %v8599_v56 = vpop.permute.xlu1 %8598 }
0x11ac   :  { %v8637_v10 = vsel %vm178_vm0, %v8555_v34, %v8599_v56 }
0x11ad   :  { %v8592_v23 = vpop.permute.xlu0 %8591 }
0x11af   :  { %v8610_v55 = vpop.permute.xlu1 %8609 }
0x11b0   :  { %v8639_v43 = vsel %vm178_vm0, %v8566_v30, %v8610_v55 }
0x11b1   :  { %v8603_v33 = vpop.permute.xlu0 %8602 }
0x11b3   :  { %v8621_v59 = vpop.permute.xlu1 %8620 }
0x11b4   :  { %v8641_v36 = vsel %vm178_vm0, %v8577_v11, %v8621_v59 }
0x11b5   :  { %v8614_v47 = vpop.permute.xlu0 %8613  ;;  %v8645_v51 = vcombine.low %v8637_v10, %v8641_v36  ;;  %v8646_v49 = vcombine.high %v8637_v10, %v8641_v36 }
0x11b6   :  { %v8640_v59 = vsel %vm178_vm0, %v8570_v12, %v8614_v47 }
0x11b7   :  { %v8632_v60 = vpop.permute.xlu1 %8631  ;;  %v8653_v40 = vrot.slane %v8645_v51, %v11278_v28  ;;  %v8660_v32 = vrot.slane %v8646_v49, %v11278_v28 }
0x11b8   :  { %v8643_v45 = vsel %vm178_vm0, %v8588_v57, %v8632_v60  ;;  %v8638_v60 = vsel %vm178_vm0, %v8559_v15, %v8603_v33 }
0x11b9   :  { %v8661_v13 = vcombine.low %v8639_v43, %v8643_v45  ;;  %v8662_v42 = vcombine.high %v8639_v43, %v8643_v45  ;;  %v8625_v58 = vpop.permute.xlu0 %8624 }
0x11ba   :  { %v8642_v30 = vsel %vm178_vm0, %v8581_v46, %v8625_v58 }
0x11bb   :  { %v8669_v8 = vrot.slane %v8661_v13, %v11278_v28  ;;  %v8676_v22 = vrot.slane %v8662_v42, %v11278_v28  ;;  %v8713_v43 = vcombine.low %v8638_v60, %v8642_v30  ;;  %v14281_v42 = vld [vmem:[#allocation2 + $0xd] sm:$0x1]  ;;  %v8714_v58 = vcombine.high %v8638_v60, %v8642_v30 }
0x11bc   :  { %v14305_v60 = vld [vmem:[#allocation2 + $0x6d] sm:$0x1] }
0x11bd   :  { %v8677_v11 = vcombine.low %v8653_v40, %v8669_v8  ;;  %v8678_v34 = vcombine.high %v8653_v40, %v8669_v8  ;;  %v8636_v56 = vpop.permute.xlu0 %8635  ;;  %v8693_v51 = vcombine.low %v8660_v32, %v8676_v22  ;;  %v8694_v12 = vcombine.high %v8660_v32, %v8676_v22  ;;  %v14285_v8 = vld [vmem:[#allocation2 + $0x1d] sm:$0x1]  ;;  %v14287_v22 = vld [vmem:[#allocation2 + $0x2d] sm:$0x1] }
0x11be   :  { %v8644_v57 = vsel %vm178_vm0, %v8592_v23, %v8636_v56  ;;  %v8721_v47 = vrot.slane %v8713_v43, %v11278_v28  ;;  %v14289_v32 = vld [vmem:[#allocation2 + $0x3d] sm:$0x1] }
0x11bf   :  { %v14266_v55 = vrot.slane %v8677_v11, %v11292_v52  ;;  %v8729_v36 = vcombine.low %v8640_v59, %v8644_v57  ;;  %v8692_v10 = vrot.slane %v8678_v34, %v11292_v52  ;;  %v8701_v23 = vrot.slane %v8693_v51, %v11292_v52  ;;  %v14303_v51 = vld [vmem:[#allocation2 + $0x5d] sm:$0x1] }
0x11c0   :  { %v8730_v15 = vcombine.high %v8640_v59, %v8644_v57  ;;  %v8708_v13 = vrot.slane %v8694_v12, %v11292_v52  ;;  %v8872_v59 = vadd.f32 %v14285_v8, %v14281_v42  ;;  %v8880_v30 = vadd.f32 %v14289_v32, %v14287_v22  ;;  %v14298_v57 = vld [vmem:[#allocation2 + $0x4d] sm:$0x1]  ;;  %v14307_v43 = vld [vmem:[#allocation2 + $0x7d] sm:$0x1] }
0x11c1   :  { %16533 = vst [vmem:[#allocation391_spill] sm:$0xff] %v14266_v55  ;;  %8786 = vrot.lane.b32.xlu0 %v8692_v10, %s11125_s0  ;;  %v8709_v45 = vcombine.high %v14266_v55, %v16171_v63  ;;  %v8737_v46 = vrot.slane %v8729_v36, %v11278_v28  ;;  %v8710_v49 = vcombine.high %v8692_v10, %v16171_v63 }
0x11c2   :  { %v8711_v40 = vcombine.high %v8701_v23, %v16171_v63  ;;  %v8744_v11 = vrot.slane %v8730_v15, %v11278_v28  ;;  %v8728_v36 = vrot.slane %v8714_v58, %v11278_v28  ;;  %v8712_v10 = vcombine.high %v8708_v13, %v16171_v63  ;;  %v14317_v15 = vld [vmem:[#allocation2 + $0x8d] sm:$0x1]  ;;  %v14323_v58 = vld [vmem:[#allocation2 + $0xbd] sm:$0x1] }
0x11c3   :  { %8782 = vrot.lane.b32.xlu1 %v8709_v45, %s11132_s25  ;;  %v8745_v33 = vcombine.low %v8721_v47, %v8737_v46  ;;  %v8746_v34 = vcombine.high %v8721_v47, %v8737_v46  ;;  %v8888_v46 = vadd.f32 %v8880_v30, %v8872_v59  ;;  %v8881_v47 = vadd.f32 %v14307_v43, %v14305_v60 }
0x11c4   :  { %v8761_v45 = vcombine.low %v8728_v36, %v8744_v11  ;;  %v8896_v48 = vsub.f32 %v8872_v59, %v8880_v30 }
0x11c5   :  { %8794 = vrot.lane.b32.xlu0 %v8701_v23, %s11122_s17  ;;  %v8753_v56 = vrot.slane %v8745_v33, %v11292_v52  ;;  %v8760_v12 = vrot.slane %v8746_v34, %v11292_v52  ;;  %v8873_v23 = vadd.f32 %v14303_v51, %v14298_v57  ;;  %v14319_v33 = vld [vmem:[#allocation2 + $0x9d] sm:$0x1] }
0x11c6   :  { %v8769_v34 = vrot.slane %v8761_v45, %v11292_v52  ;;  %v8900_v9 = vmul.f32 0.5, %v8896_v48 }
0x11c7   :  { %8790 = vrot.lane.b32.xlu1 %v8710_v49, %s11133_s26  ;;  %v8777_v49 = vcombine.high %v8753_v56, %v16171_v63  ;;  %v8889_v26 = vadd.f32 %v8881_v47, %v8873_v23  ;;  %v8778_v62 = vcombine.high %v8760_v12, %v16171_v63 }
0x11c9   :  { %8802 = vrot.lane.b32.xlu0 %v8708_v13, %s11126_s20  ;;  %v14321_v13 = vld [vmem:[#allocation2 + $0xad] sm:$0x1] }
0x11ca   :  { %v8882_v41 = vadd.f32 %v14323_v58, %v14321_v13 }
0x11cb   :  { %8798 = vrot.lane.b32.xlu1 %v8711_v40, %s11134_s27  ;;  %v8762_v40 = vcombine.high %v8728_v36, %v8744_v11  ;;  %v14337_v11 = vld [vmem:[#allocation2 + $0xed] sm:$0x1]  ;;  %v14339_v36 = vld [vmem:[#allocation2 + $0xfd] sm:$0x1] }
0x11cc   :  { %v8883_v25 = vadd.f32 %v14339_v36, %v14337_v11 }
0x11cd   :  { %8810 = vrot.lane.b32.xlu0 %v8753_v56, %s11127_s21  ;;  %v8874_v56 = vadd.f32 %v14319_v33, %v14317_v15  ;;  %v8776_v45 = vrot.slane %v8762_v40, %v11292_v52 }
0x11cf   :  { %8806 = vrot.lane.b32.xlu1 %v8712_v10, %s11135_s28  ;;  %v8892_v10 = vmul.f32 0.5, %v8888_v46  ;;  %v8893_v46 = vmul.f32 0.5, %v8889_v26  ;;  %v8890_v4 = vadd.f32 %v8882_v41, %v8874_v56  ;;  %v8891_v26 = vadd.f32 %v8883_v25, %v8875_v21 }
0x11d1   :  { %8818 = vrot.lane.b32.xlu0 %v8760_v12, %s11128_s22  ;;  %v8923_v12 = vrot.slane %v8892_v10, %v11170_v2  ;;  %v8934_v40 = vrot.slane %v8893_v46, %v11170_v2  ;;  %v8894_v10 = vmul.f32 0.5, %v8890_v4  ;;  %v8895_v39 = vmul.f32 0.5, %v8891_v26 }
0x11d2   :  { %v8898_v4 = vsub.f32 %v8874_v56, %v8882_v41 }
0x11d3   :  { %8814 = vrot.lane.b32.xlu1 %v8777_v49, %s11136_s29  ;;  %v8779_v49 = vcombine.high %v8769_v34, %v16171_v63  ;;  %v8956_v1 = vrot.slane %v8895_v39, %v11170_v2 }
0x11d4   :  { %v8902_v54 = vmul.f32 0.5, %v8898_v4 }
0x11d5   :  { %8826 = vrot.lane.b32.xlu0 %v8769_v34, %s11129_s23  ;;  %v8945_v34 = vrot.slane %v8894_v10, %v11170_v2  ;;  %v8899_v10 = vsub.f32 %v8875_v21, %v8883_v25 }
0x11d6   :  { %v8989_v59 = vrot.slane %v8902_v54, %v11170_v2 }
0x11d7   :  { %8822 = vrot.lane.b32.xlu1 %v8778_v62, %s11137_s30  ;;  %v8780_v62 = vcombine.high %v8776_v45, %v16171_v63  ;;  %v8903_v30 = vmul.f32 0.5, %v8899_v10 }
0x11d9   :  { %8834 = vrot.lane.b32.xlu0 %v8776_v45, %s11130_s24  ;;  %v8967_v45 = vrot.slane %v8900_v9, %v11170_v2  ;;  %v9000_v48 = vrot.slane %v8903_v30, %v11170_v2 }
0x11db   :  { %8830 = vrot.lane.b32.xlu1 %v8779_v49, %s11138_s2  ;;  %v8897_v49 = vsub.f32 %v8873_v23, %v8881_v47 }
0x11dd   :  { %8925 = vbcast.lane.b32.xlu0 %v8923_v12, 256  ;;  %v8901_v46 = vmul.f32 0.5, %v8897_v49 }
0x11df   :  { %8838 = vrot.lane.b32.xlu1 %v8780_v62, %s11139_s3  ;;  %v8978_v62 = vrot.slane %v8901_v46, %v11170_v2 }
0x11e1   :  { %8936 = vbcast.lane.b32.xlu0 %v8934_v40, 256 }
0x11e3   :  { %8929 = vbcast.lane.b32.xlu1 %v8923_v12, 264 }
0x11e5   :  { %8947 = vbcast.lane.b32.xlu0 %v8945_v34, 256 }
0x11e7   :  { %8940 = vbcast.lane.b32.xlu1 %v8934_v40, 264 }
0x11e9   :  { %8958 = vbcast.lane.b32.xlu0 %v8956_v1, 256 }
0x11eb   :  { %8951 = vbcast.lane.b32.xlu1 %v8945_v34, 264 }
0x11ed   :  { %8969 = vbcast.lane.b32.xlu0 %v8967_v45, 256 }
0x11ef   :  { %8962 = vbcast.lane.b32.xlu1 %v8956_v1, 264 }
0x11f1   :  { %8980 = vbcast.lane.b32.xlu0 %v8978_v62, 256 }
0x11f3   :  { %8973 = vbcast.lane.b32.xlu1 %v8967_v45, 264 }
0x11f5   :  { %8991 = vbcast.lane.b32.xlu0 %v8989_v59, 256 }
0x11f7   :  { %8984 = vbcast.lane.b32.xlu1 %v8978_v62, 264 }
0x11f9   :  { %9002 = vbcast.lane.b32.xlu0 %v9000_v48, 256 }
0x11fb   :  { %8995 = vbcast.lane.b32.xlu1 %v8989_v59, 264 }
0x11ff   :  { %9006 = vbcast.lane.b32.xlu1 %v9000_v48, 264 }
0x1233   :  { %v14360_v9 = vpop.permute.xlu0 %8786 }
0x1234   :  { %16534 = vst [vmem:[#allocation392_spill] sm:$0xff] %v14360_v9 }
0x1235   :  { %v14362_v39 = vpop.permute.xlu1 %8782 }
0x1236   :  { %16535 = vst [vmem:[#allocation393_spill] sm:$0xff] %v14362_v39 }
0x1237   :  { %v14364_v41 = vpop.permute.xlu0 %8794 }
0x1238   :  { %16536 = vst [vmem:[#allocation394_spill] sm:$0xff] %v14364_v41 }
0x1239   :  { %v14366_v25 = vpop.permute.xlu1 %8790 }
0x123a   :  { %16537 = vst [vmem:[#allocation395_spill] sm:$0xff] %v14366_v25 }
0x123b   :  { %v14368_v1 = vpop.permute.xlu0 %8802 }
0x123c   :  { %16538 = vst [vmem:[#allocation396_spill] sm:$0xff] %v14368_v1 }
0x123d   :  { %v14370_v54 = vpop.permute.xlu1 %8798 }
0x123e   :  { %16539 = vst [vmem:[#allocation397_spill] sm:$0xff] %v14370_v54 }
0x123f   :  { %v14372_v21 = vpop.permute.xlu0 %8810 }
0x1240   :  { %16540 = vst [vmem:[#allocation398_spill] sm:$0xff] %v14372_v21 }
0x1241   :  { %v14374_v23 = vpop.permute.xlu1 %8806 }
0x1242   :  { %16541 = vst [vmem:[#allocation399_spill] sm:$0xff] %v14374_v23 }
0x1243   :  { %v14376_v47 = vpop.permute.xlu0 %8818 }
0x1244   :  { %16542 = vst [vmem:[#allocation400_spill] sm:$0xff] %v14376_v47 }
0x1245   :  { %v14378_v56 = vpop.permute.xlu1 %8814 }
0x1246   :  { %16543 = vst [vmem:[#allocation401_spill] sm:$0xff] %v14378_v56 }
0x1247   :  { %v14380_v12 = vpop.permute.xlu0 %8826 }
0x1248   :  { %16544 = vst [vmem:[#allocation402_spill] sm:$0xff] %v14380_v12 }
0x1249   :  { %v14382_v40 = vpop.permute.xlu1 %8822 }
0x124a   :  { %16545 = vst [vmem:[#allocation403_spill] sm:$0xff] %v14382_v40 }
0x124b   :  { %v14384_v26 = vpop.permute.xlu0 %8834 }
0x124c   :  { %16546 = vst [vmem:[#allocation404_spill] sm:$0xff] %v14384_v26 }
0x124d   :  { %v14386_v34 = vpop.permute.xlu1 %8830 }
0x124e   :  { %16547 = vst [vmem:[#allocation405_spill] sm:$0xff] %v14386_v34 }
0x124f   :  { %v8926_v49 = vpop.permute.xlu0 %8925 }
0x1251   :  { %v14388_v45 = vpop.permute.xlu1 %8838 }
0x1252   :  { %16548 = vst [vmem:[#allocation406_spill] sm:$0xff] %v14388_v45 }
0x1253   :  { %v8937_v46 = vpop.permute.xlu0 %8936 }
0x1255   :  { %v8930_v4 = vpop.permute.xlu1 %8929 }
0x1257   :  { %v8948_v62 = vpop.permute.xlu0 %8947 }
0x1259   :  { %v8941_v10 = vpop.permute.xlu1 %8940 }
0x125b   :  { %v8959_v59 = vpop.permute.xlu0 %8958 }
0x125d   :  { %v8952_v30 = vpop.permute.xlu1 %8951 }
0x125f   :  { %v8970_v48 = vpop.permute.xlu0 %8969 }
0x1260   :  { %v9008_v26 = vsel %vm178_vm0, %v8926_v49, %v8970_v48 }
0x1261   :  { %v8963_v31 = vpop.permute.xlu1 %8962 }
0x1263   :  { %v8981_v53 = vpop.permute.xlu0 %8980 }
0x1264   :  { %v9010_v45 = vsel %vm178_vm0, %v8937_v46, %v8981_v53 }
0x1265   :  { %v8974_v61 = vpop.permute.xlu1 %8973 }
0x1267   :  { %v8992_v12 = vpop.permute.xlu0 %8991 }
0x1268   :  { %v9012_v40 = vsel %vm178_vm0, %v8948_v62, %v8992_v12 }
0x1269   :  { %v8985_v47 = vpop.permute.xlu1 %8984  ;;  %v9016_v34 = vcombine.low %v9008_v26, %v9012_v40  ;;  %v9017_v23 = vcombine.high %v9008_v26, %v9012_v40 }
0x126a   :  { %v9011_v39 = vsel %vm178_vm0, %v8941_v10, %v8985_v47 }
0x126b   :  { %v9003_v56 = vpop.permute.xlu0 %9002  ;;  %v9024_v25 = vrot.slane %v9016_v34, %v11278_v28  ;;  %v9031_v12 = vrot.slane %v9017_v23, %v11278_v28 }
0x126c   :  { %v9014_v21 = vsel %vm178_vm0, %v8959_v59, %v9003_v56 }
0x126d   :  { %v9032_v1 = vcombine.low %v9010_v45, %v9014_v21  ;;  %v9033_v54 = vcombine.high %v9010_v45, %v9014_v21  ;;  %v8996_v41 = vpop.permute.xlu1 %8995 }
0x126e   :  { %v9013_v53 = vsel %vm178_vm0, %v8952_v30, %v8996_v41 }
0x126f   :  { %v9040_v9 = vrot.slane %v9032_v1, %v11278_v28  ;;  %v9047_v55 = vrot.slane %v9033_v54, %v11278_v28  ;;  %v9009_v54 = vsel %vm178_vm0, %v8930_v4, %v8974_v61 }
0x1270   :  { %v9084_v34 = vcombine.low %v9009_v54, %v9013_v53  ;;  %v9085_v4 = vcombine.high %v9009_v54, %v9013_v53 }
0x1271   :  { %v9048_v62 = vcombine.low %v9024_v25, %v9040_v9  ;;  %v9049_v49 = vcombine.high %v9024_v25, %v9040_v9  ;;  %v9007_v48 = vpop.permute.xlu1 %9006  ;;  %v9064_v1 = vcombine.low %v9031_v12, %v9047_v55  ;;  %v9065_v25 = vcombine.high %v9031_v12, %v9047_v55 }
0x1272   :  { %v9015_v56 = vsel %vm178_vm0, %v8963_v31, %v9007_v48  ;;  %v9092_v23 = vrot.slane %v9084_v34, %v11278_v28  ;;  %v8884_v12 = vsub.f32 %v14287_v22, %v14289_v32 }
0x1273   :  { %v14402_v21 = vrot.slane %v9048_v62, %v11292_v52  ;;  %v9100_v40 = vcombine.low %v9011_v39, %v9015_v56  ;;  %v9063_v26 = vrot.slane %v9049_v49, %v11292_v52  ;;  %v9072_v31 = vrot.slane %v9064_v1, %v11292_v52 }
0x1274   :  { %v9101_v61 = vcombine.high %v9011_v39, %v9015_v56  ;;  %v9079_v46 = vrot.slane %v9065_v25, %v11292_v52  ;;  %v8876_v39 = vsub.f32 %v14281_v42, %v14285_v8  ;;  %v9099_v62 = vrot.slane %v9085_v4, %v11278_v28 }
0x1275   :  { %16549 = vst [vmem:[#allocation407_spill] sm:$0xff] %v14402_v21  ;;  %9157 = vrot.lane.b32.xlu1 %v9063_v26, %s11125_s0  ;;  %v9080_v9 = vcombine.high %v14402_v21, %v16171_v63  ;;  %v9108_v41 = vrot.slane %v9100_v40, %v11278_v28  ;;  %v9081_v47 = vcombine.high %v9063_v26, %v16171_v63 }
0x1276   :  { %v9082_v55 = vcombine.high %v9072_v31, %v16171_v63  ;;  %v9115_v10 = vrot.slane %v9101_v61, %v11278_v28  ;;  %v9083_v49 = vcombine.high %v9079_v46, %v16171_v63  ;;  %v8904_v56 = vadd.f32 %v8884_v12, %v8876_v39 }
0x1277   :  { %9153 = vrot.lane.b32.xlu0 %v9080_v9, %s11132_s25  ;;  %v9116_v45 = vcombine.low %v9092_v23, %v9108_v41  ;;  %v9117_v59 = vcombine.high %v9092_v23, %v9108_v41  ;;  %v8877_v40 = vsub.f32 %v14298_v57, %v14303_v51  ;;  %v8885_v42 = vsub.f32 %v14305_v60, %v14307_v43 }
0x1278   :  { %v9132_v48 = vcombine.low %v9099_v62, %v9115_v10  ;;  %v9133_v22 = vcombine.high %v9099_v62, %v9115_v10  ;;  %v8908_v26 = vmul.f32 0.5, %v8904_v56  ;;  %v8878_v57 = vsub.f32 %v14317_v15, %v14319_v33 }
0x1279   :  { %9165 = vrot.lane.b32.xlu1 %v9072_v31, %s11122_s17  ;;  %v9124_v30 = vrot.slane %v9116_v45, %v11292_v52  ;;  %v9131_v53 = vrot.slane %v9117_v59, %v11292_v52  ;;  %v8905_v1 = vadd.f32 %v8885_v42, %v8877_v40  ;;  %v8886_v51 = vsub.f32 %v14321_v13, %v14323_v58 }
0x127a   :  { %v9140_v32 = vrot.slane %v9132_v48, %v11292_v52  ;;  %v9147_v60 = vrot.slane %v9133_v22, %v11292_v52  ;;  %v9230_v43 = vrot.slane %v8908_v26, %v11170_v2  ;;  %v8879_v41 = vsub.f32 %v14333_v7, %v14335_v27 }
0x127b   :  { %9161 = vrot.lane.b32.xlu0 %v9081_v47, %s11133_s26  ;;  %v9148_v8 = vcombine.high %v9124_v30, %v16171_v63  ;;  %v9149_v54 = vcombine.high %v9131_v53, %v16171_v63  ;;  %v8909_v34 = vmul.f32 0.5, %v8905_v1  ;;  %v8906_v25 = vadd.f32 %v8886_v51, %v8878_v57 }
0x127c   :  { %v9150_v9 = vcombine.high %v9140_v32, %v16171_v63  ;;  %v8887_v15 = vsub.f32 %v14337_v11, %v14339_v36  ;;  %v9151_v33 = vcombine.high %v9147_v60, %v16171_v63  ;;  %v8912_v61 = vsub.f32 %v8876_v39, %v8884_v12 }
0x127d   :  { %9173 = vrot.lane.b32.xlu1 %v9079_v46, %s11126_s20  ;;  %v9241_v13 = vrot.slane %v8909_v34, %v11170_v2  ;;  %v8910_v58 = vmul.f32 0.5, %v8906_v25  ;;  %v8913_v11 = vsub.f32 %v8877_v40, %v8885_v42  ;;  %v8914_v46 = vsub.f32 %v8878_v57, %v8886_v51 }
0x127e   :  { %v8907_v31 = vadd.f32 %v8887_v15, %v8879_v41  ;;  %v8916_v27 = vmul.f32 0.5, %v8912_v61  ;;  %v8915_v10 = vsub.f32 %v8879_v41, %v8887_v15 }
0x127f   :  { %9169 = vrot.lane.b32.xlu0 %v9082_v55, %s11134_s27  ;;  %v9252_v23 = vrot.slane %v8910_v58, %v11170_v2  ;;  %v8917_v45 = vmul.f32 0.5, %v8913_v11  ;;  %v8918_v55 = vmul.f32 0.5, %v8914_v46 }
0x1280   :  { %v8911_v47 = vmul.f32 0.5, %v8907_v31  ;;  %v9274_v36 = vrot.slane %v8916_v27, %v11170_v2 }
0x1281   :  { %9181 = vrot.lane.b32.xlu1 %v9124_v30, %s11127_s21  ;;  %v9285_v4 = vrot.slane %v8917_v45, %v11170_v2  ;;  %v9296_v59 = vrot.slane %v8918_v55, %v11170_v2  ;;  %v8919_v30 = vmul.f32 0.5, %v8915_v10 }
0x1282   :  { %v9263_v7 = vrot.slane %v8911_v47, %v11170_v2 }
0x1283   :  { %9177 = vrot.lane.b32.xlu0 %v9083_v49, %s11135_s28  ;;  %v9307_v39 = vrot.slane %v8919_v30, %v11170_v2 }
0x1285   :  { %9189 = vrot.lane.b32.xlu1 %v9131_v53, %s11128_s22 }
0x1287   :  { %9185 = vrot.lane.b32.xlu0 %v9148_v8, %s11136_s29 }
0x1289   :  { %9197 = vrot.lane.b32.xlu1 %v9140_v32, %s11129_s23 }
0x128b   :  { %9193 = vrot.lane.b32.xlu0 %v9149_v54, %s11137_s30 }
0x128d   :  { %9205 = vrot.lane.b32.xlu1 %v9147_v60, %s11130_s24 }
0x128f   :  { %9201 = vrot.lane.b32.xlu0 %v9150_v9, %s11138_s2 }
0x1291   :  { %9232 = vbcast.lane.b32.xlu1 %v9230_v43, 256 }
0x1293   :  { %9209 = vrot.lane.b32.xlu0 %v9151_v33, %s11139_s3 }
0x1295   :  { %9243 = vbcast.lane.b32.xlu1 %v9241_v13, 256 }
0x1297   :  { %9236 = vbcast.lane.b32.xlu0 %v9230_v43, 264 }
0x1299   :  { %9254 = vbcast.lane.b32.xlu1 %v9252_v23, 256 }
0x129b   :  { %9247 = vbcast.lane.b32.xlu0 %v9241_v13, 264 }
0x129d   :  { %9265 = vbcast.lane.b32.xlu1 %v9263_v7, 256 }
0x129f   :  { %9258 = vbcast.lane.b32.xlu0 %v9252_v23, 264 }
0x12a1   :  { %9276 = vbcast.lane.b32.xlu1 %v9274_v36, 256 }
0x12a3   :  { %9269 = vbcast.lane.b32.xlu0 %v9263_v7, 264 }
0x12a5   :  { %9287 = vbcast.lane.b32.xlu1 %v9285_v4, 256 }
0x12a7   :  { %9280 = vbcast.lane.b32.xlu0 %v9274_v36, 264 }
0x12a9   :  { %9298 = vbcast.lane.b32.xlu1 %v9296_v59, 256 }
0x12ab   :  { %9291 = vbcast.lane.b32.xlu0 %v9285_v4, 264 }
0x12ad   :  { %9309 = vbcast.lane.b32.xlu1 %v9307_v39, 256 }
0x12af   :  { %9302 = vbcast.lane.b32.xlu0 %v9296_v59, 264 }
0x12b3   :  { %9313 = vbcast.lane.b32.xlu0 %v9307_v39, 264 }
0x12e7   :  { %v14464_v12 = vpop.permute.xlu1 %9157 }
0x12e8   :  { %16550 = vst [vmem:[#allocation408_spill] sm:$0xff] %v14464_v12 }
0x12e9   :  { %v14466_v62 = vpop.permute.xlu0 %9153 }
0x12ea   :  { %16551 = vst [vmem:[#allocation409_spill] sm:$0xff] %v14466_v62 }
0x12eb   :  { %v14468_v49 = vpop.permute.xlu1 %9165 }
0x12ec   :  { %16552 = vst [vmem:[#allocation410_spill] sm:$0xff] %v14468_v49 }
0x12ed   :  { %v14470_v48 = vpop.permute.xlu0 %9161 }
0x12ee   :  { %16553 = vst [vmem:[#allocation411_spill] sm:$0xff] %v14470_v48 }
0x12ef   :  { %v14472_v53 = vpop.permute.xlu1 %9173 }
0x12f0   :  { %16554 = vst [vmem:[#allocation412_spill] sm:$0xff] %v14472_v53 }
0x12f1   :  { %v14474_v56 = vpop.permute.xlu0 %9169 }
0x12f2   :  { %16555 = vst [vmem:[#allocation413_spill] sm:$0xff] %v14474_v56 }
0x12f3   :  { %v14476_v40 = vpop.permute.xlu1 %9181 }
0x12f4   :  { %16556 = vst [vmem:[#allocation414_spill] sm:$0xff] %v14476_v40 }
0x12f5   :  { %v14478_v42 = vpop.permute.xlu0 %9177 }
0x12f6   :  { %16557 = vst [vmem:[#allocation415_spill] sm:$0xff] %v14478_v42 }
0x12f7   :  { %v14480_v8 = vpop.permute.xlu1 %9189 }
0x12f8   :  { %16558 = vst [vmem:[#allocation416_spill] sm:$0xff] %v14480_v8 }
0x12f9   :  { %v14482_v22 = vpop.permute.xlu0 %9185 }
0x12fa   :  { %16559 = vst [vmem:[#allocation417_spill] sm:$0xff] %v14482_v22 }
0x12fb   :  { %v14484_v32 = vpop.permute.xlu1 %9197 }
0x12fc   :  { %16560 = vst [vmem:[#allocation418_spill] sm:$0xff] %v14484_v32  ;;  %v14573_v32 = vld [vmem:[#allocation2 + $0xce] sm:$0x1] }
0x12fd   :  { %v14486_v26 = vpop.permute.xlu0 %9193 }
0x12fe   :  { %16561 = vst [vmem:[#allocation419_spill] sm:$0xff] %v14486_v26  ;;  %v14575_v26 = vld [vmem:[#allocation2 + $0xde] sm:$0x1] }
0x12ff   :  { %v14488_v1 = vpop.permute.xlu1 %9205 }
0x1300   :  { %16562 = vst [vmem:[#allocation420_spill] sm:$0xff] %v14488_v1 }
0x1301   :  { %v14490_v54 = vpop.permute.xlu0 %9201 }
0x1302   :  { %16563 = vst [vmem:[#allocation421_spill] sm:$0xff] %v14490_v54 }
0x1303   :  { %v9233_v57 = vpop.permute.xlu1 %9232 }
0x1305   :  { %v14492_v51 = vpop.permute.xlu0 %9209 }
0x1306   :  { %16564 = vst [vmem:[#allocation422_spill] sm:$0xff] %v14492_v51 }
0x1307   :  { %v9244_v60 = vpop.permute.xlu1 %9243 }
0x1309   :  { %v9237_v43 = vpop.permute.xlu0 %9236 }
0x130b   :  { %v9255_v34 = vpop.permute.xlu1 %9254 }
0x130d   :  { %v9248_v9 = vpop.permute.xlu0 %9247 }
0x130f   :  { %v9266_v25 = vpop.permute.xlu1 %9265 }
0x1311   :  { %v9259_v41 = vpop.permute.xlu0 %9258 }
0x1313   :  { %v9277_v15 = vpop.permute.xlu1 %9276 }
0x1314   :  { %v9315_v61 = vsel %vm178_vm0, %v9233_v57, %v9277_v15 }
0x1315   :  { %v9270_v33 = vpop.permute.xlu0 %9269 }
0x1317   :  { %v9288_v13 = vpop.permute.xlu1 %9287 }
0x1318   :  { %v9317_v11 = vsel %vm178_vm0, %v9244_v60, %v9288_v13 }
0x1319   :  { %v9281_v58 = vpop.permute.xlu0 %9280 }
0x131b   :  { %v9299_v31 = vpop.permute.xlu1 %9298 }
0x131c   :  { %v9319_v23 = vsel %vm178_vm0, %v9255_v34, %v9299_v31 }
0x131d   :  { %v9292_v47 = vpop.permute.xlu0 %9291  ;;  %v9323_v7 = vcombine.low %v9315_v61, %v9319_v23  ;;  %v9324_v45 = vcombine.high %v9315_v61, %v9319_v23 }
0x131e   :  { %v9318_v31 = vsel %vm178_vm0, %v9248_v9, %v9292_v47 }
0x131f   :  { %v9310_v27 = vpop.permute.xlu1 %9309  ;;  %v9331_v10 = vrot.slane %v9323_v7, %v11278_v28  ;;  %v9338_v39 = vrot.slane %v9324_v45, %v11278_v28 }
0x1320   :  { %v9321_v36 = vsel %vm178_vm0, %v9266_v25, %v9310_v27  ;;  %v9316_v27 = vsel %vm178_vm0, %v9237_v43, %v9281_v58 }
0x1321   :  { %v9339_v46 = vcombine.low %v9317_v11, %v9321_v36  ;;  %v9340_v4 = vcombine.high %v9317_v11, %v9321_v36  ;;  %v9303_v55 = vpop.permute.xlu0 %9302 }
0x1322   :  { %v9320_v60 = vsel %vm178_vm0, %v9259_v41, %v9303_v55 }
0x1323   :  { %v9347_v59 = vrot.slane %v9339_v46, %v11278_v28  ;;  %v9354_v30 = vrot.slane %v9340_v4, %v11278_v28  ;;  %v9391_v11 = vcombine.low %v9316_v27, %v9320_v60  ;;  %v14521_v4 = vld [vmem:[#allocation2 + $0xe] sm:$0x1]  ;;  %v9392_v55 = vcombine.high %v9316_v27, %v9320_v60 }
0x1324   :  { %v14545_v27 = vld [vmem:[#allocation2 + $0x6e] sm:$0x1] }
0x1325   :  { %v9355_v34 = vcombine.low %v9331_v10, %v9347_v59  ;;  %v9356_v57 = vcombine.high %v9331_v10, %v9347_v59  ;;  %v9314_v15 = vpop.permute.xlu0 %9313  ;;  %v9371_v7 = vcombine.low %v9338_v39, %v9354_v30  ;;  %v9372_v9 = vcombine.high %v9338_v39, %v9354_v30  ;;  %v14525_v59 = vld [vmem:[#allocation2 + $0x1e] sm:$0x1]  ;;  %v14527_v30 = vld [vmem:[#allocation2 + $0x2e] sm:$0x1] }
0x1326   :  { %v9322_v25 = vsel %vm178_vm0, %v9270_v33, %v9314_v15  ;;  %v9399_v47 = vrot.slane %v9391_v11, %v11278_v28  ;;  %v14529_v39 = vld [vmem:[#allocation2 + $0x3e] sm:$0x1] }
0x1327   :  { %v14506_v13 = vrot.slane %v9355_v34, %v11292_v52  ;;  %v9407_v23 = vcombine.low %v9318_v31, %v9322_v25  ;;  %v9370_v61 = vrot.slane %v9356_v57, %v11292_v52  ;;  %v9379_v33 = vrot.slane %v9371_v7, %v11292_v52  ;;  %v14543_v7 = vld [vmem:[#allocation2 + $0x5e] sm:$0x1] }
0x1328   :  { %v9408_v43 = vcombine.high %v9318_v31, %v9322_v25  ;;  %v9386_v46 = vrot.slane %v9372_v9, %v11292_v52  ;;  %v9550_v31 = vadd.f32 %v14525_v59, %v14521_v4  ;;  %v9558_v60 = vadd.f32 %v14529_v39, %v14527_v30  ;;  %v14538_v25 = vld [vmem:[#allocation2 + $0x4e] sm:$0x1]  ;;  %v14547_v11 = vld [vmem:[#allocation2 + $0x7e] sm:$0x1] }
0x1329   :  { %16565 = vst [vmem:[#allocation423_spill] sm:$0xff] %v14506_v13  ;;  %9464 = vrot.lane.b32.xlu0 %v9370_v61, %s11125_s0  ;;  %v9387_v36 = vcombine.high %v14506_v13, %v16171_v63  ;;  %v9415_v41 = vrot.slane %v9407_v23, %v11278_v28  ;;  %v9388_v45 = vcombine.high %v9370_v61, %v16171_v63 }
0x132a   :  { %v9389_v10 = vcombine.high %v9379_v33, %v16171_v63  ;;  %v9422_v34 = vrot.slane %v9408_v43, %v11278_v28  ;;  %v9406_v23 = vrot.slane %v9392_v55, %v11278_v28  ;;  %v9390_v61 = vcombine.high %v9386_v46, %v16171_v63  ;;  %v14557_v43 = vld [vmem:[#allocation2 + $0x8e] sm:$0x1]  ;;  %v14563_v55 = vld [vmem:[#allocation2 + $0xbe] sm:$0x1] }
0x132b   :  { %9460 = vrot.lane.b32.xlu1 %v9387_v36, %s11132_s25  ;;  %v9423_v58 = vcombine.low %v9399_v47, %v9415_v41  ;;  %v9424_v57 = vcombine.high %v9399_v47, %v9415_v41  ;;  %v9566_v41 = vadd.f32 %v9558_v60, %v9550_v31  ;;  %v9559_v47 = vadd.f32 %v14547_v11, %v14545_v27 }
0x132c   :  { %v9439_v36 = vcombine.low %v9406_v23, %v9422_v34  ;;  %v9553_v13 = vadd.f32 %v14575_v26, %v14573_v32  ;;  %v9574_v42 = vsub.f32 %v9550_v31, %v9558_v60 }
0x132d   :  { %9472 = vrot.lane.b32.xlu0 %v9379_v33, %s11122_s17  ;;  %v9431_v15 = vrot.slane %v9423_v58, %v11292_v52  ;;  %v9438_v9 = vrot.slane %v9424_v57, %v11292_v52  ;;  %v9551_v33 = vadd.f32 %v14543_v7, %v14538_v25  ;;  %v14559_v58 = vld [vmem:[#allocation2 + $0x9e] sm:$0x1] }
0x132e   :  { %v9447_v57 = vrot.slane %v9439_v36, %v11292_v52  ;;  %v9578_v56 = vmul.f32 0.5, %v9574_v42 }
0x132f   :  { %9468 = vrot.lane.b32.xlu1 %v9388_v45, %s11133_s26  ;;  %v9455_v45 = vcombine.high %v9431_v15, %v16171_v63  ;;  %v9567_v51 = vadd.f32 %v9559_v47, %v9551_v33  ;;  %v9456_v1 = vcombine.high %v9438_v9, %v16171_v63 }
0x1331   :  { %9480 = vrot.lane.b32.xlu0 %v9386_v46, %s11126_s20  ;;  %v14561_v46 = vld [vmem:[#allocation2 + $0xae] sm:$0x1] }
0x1332   :  { %v9560_v54 = vadd.f32 %v14563_v55, %v14561_v46 }
0x1333   :  { %9476 = vrot.lane.b32.xlu1 %v9389_v10, %s11134_s27  ;;  %v9440_v10 = vcombine.high %v9406_v23, %v9422_v34  ;;  %v14577_v34 = vld [vmem:[#allocation2 + $0xee] sm:$0x1]  ;;  %v14579_v23 = vld [vmem:[#allocation2 + $0xfe] sm:$0x1] }
0x1334   :  { %v9561_v22 = vadd.f32 %v14579_v23, %v14577_v34 }
0x1335   :  { %9488 = vrot.lane.b32.xlu0 %v9431_v15, %s11127_s21  ;;  %v9552_v15 = vadd.f32 %v14559_v58, %v14557_v43  ;;  %v9454_v36 = vrot.slane %v9440_v10, %v11292_v52 }
0x1337   :  { %9484 = vrot.lane.b32.xlu1 %v9390_v61, %s11135_s28  ;;  %v9570_v61 = vmul.f32 0.5, %v9566_v41  ;;  %v9571_v41 = vmul.f32 0.5, %v9567_v51  ;;  %v9568_v8 = vadd.f32 %v9560_v54, %v9552_v15  ;;  %v9569_v51 = vadd.f32 %v9561_v22, %v9553_v13 }
0x1339   :  { %9496 = vrot.lane.b32.xlu0 %v9438_v9, %s11128_s22  ;;  %v9601_v9 = vrot.slane %v9570_v61, %v11170_v2  ;;  %v9612_v10 = vrot.slane %v9571_v41, %v11170_v2  ;;  %v9572_v61 = vmul.f32 0.5, %v9568_v8  ;;  %v9573_v40 = vmul.f32 0.5, %v9569_v51 }
0x133a   :  { %v9576_v8 = vsub.f32 %v9552_v15, %v9560_v54 }
0x133b   :  { %9492 = vrot.lane.b32.xlu1 %v9455_v45, %s11136_s29  ;;  %v9457_v45 = vcombine.high %v9447_v57, %v16171_v63  ;;  %v9634_v53 = vrot.slane %v9573_v40, %v11170_v2 }
0x133c   :  { %v9580_v49 = vmul.f32 0.5, %v9576_v8 }
0x133d   :  { %9504 = vrot.lane.b32.xlu0 %v9447_v57, %s11129_s23  ;;  %v9623_v57 = vrot.slane %v9572_v61, %v11170_v2  ;;  %v9577_v61 = vsub.f32 %v9553_v13, %v9561_v22 }
0x133e   :  { %v9667_v31 = vrot.slane %v9580_v49, %v11170_v2 }
0x133f   :  { %9500 = vrot.lane.b32.xlu1 %v9456_v1, %s11137_s30  ;;  %v9458_v1 = vcombine.high %v9454_v36, %v16171_v63  ;;  %v9581_v60 = vmul.f32 0.5, %v9577_v61 }
0x1341   :  { %9512 = vrot.lane.b32.xlu0 %v9454_v36, %s11130_s24  ;;  %v9645_v36 = vrot.slane %v9578_v56, %v11170_v2  ;;  %v9678_v40 = vrot.slane %v9581_v60, %v11170_v2 }
0x1343   :  { %9508 = vrot.lane.b32.xlu1 %v9457_v45, %s11138_s2  ;;  %v9575_v45 = vsub.f32 %v9551_v33, %v9559_v47 }
0x1345   :  { %9603 = vbcast.lane.b32.xlu0 %v9601_v9, 256  ;;  %v9579_v41 = vmul.f32 0.5, %v9575_v45 }
0x1347   :  { %9516 = vrot.lane.b32.xlu1 %v9458_v1, %s11139_s3  ;;  %v9656_v1 = vrot.slane %v9579_v41, %v11170_v2 }
0x1349   :  { %9614 = vbcast.lane.b32.xlu0 %v9612_v10, 256 }
0x134b   :  { %9607 = vbcast.lane.b32.xlu1 %v9601_v9, 264 }
0x134d   :  { %9625 = vbcast.lane.b32.xlu0 %v9623_v57, 256 }
0x134f   :  { %9618 = vbcast.lane.b32.xlu1 %v9612_v10, 264 }
0x1351   :  { %9636 = vbcast.lane.b32.xlu0 %v9634_v53, 256 }
0x1353   :  { %9629 = vbcast.lane.b32.xlu1 %v9623_v57, 264 }
0x1355   :  { %9647 = vbcast.lane.b32.xlu0 %v9645_v36, 256 }
0x1357   :  { %9640 = vbcast.lane.b32.xlu1 %v9634_v53, 264 }
0x1359   :  { %9658 = vbcast.lane.b32.xlu0 %v9656_v1, 256 }
0x135b   :  { %9651 = vbcast.lane.b32.xlu1 %v9645_v36, 264 }
0x135d   :  { %9669 = vbcast.lane.b32.xlu0 %v9667_v31, 256 }
0x135f   :  { %9662 = vbcast.lane.b32.xlu1 %v9656_v1, 264 }
0x1361   :  { %9680 = vbcast.lane.b32.xlu0 %v9678_v40, 256 }
0x1363   :  { %9673 = vbcast.lane.b32.xlu1 %v9667_v31, 264 }
0x1367   :  { %9684 = vbcast.lane.b32.xlu1 %v9678_v40, 264 }
0x139b   :  { %v14600_v56 = vpop.permute.xlu0 %9464 }
0x139c   :  { %16566 = vst [vmem:[#allocation424_spill] sm:$0xff] %v14600_v56 }
0x139d   :  { %v14602_v42 = vpop.permute.xlu1 %9460 }
0x139e   :  { %16567 = vst [vmem:[#allocation425_spill] sm:$0xff] %v14602_v42 }
0x139f   :  { %v14604_v54 = vpop.permute.xlu0 %9472 }
0x13a0   :  { %16568 = vst [vmem:[#allocation426_spill] sm:$0xff] %v14604_v54 }
0x13a1   :  { %v14606_v22 = vpop.permute.xlu1 %9468 }
0x13a2   :  { %16569 = vst [vmem:[#allocation427_spill] sm:$0xff] %v14606_v22 }
0x13a3   :  { %v14608_v53 = vpop.permute.xlu0 %9480 }
0x13a4   :  { %16570 = vst [vmem:[#allocation428_spill] sm:$0xff] %v14608_v53 }
0x13a5   :  { %v14610_v49 = vpop.permute.xlu1 %9476 }
0x13a6   :  { %16571 = vst [vmem:[#allocation429_spill] sm:$0xff] %v14610_v49 }
0x13a7   :  { %v14612_v13 = vpop.permute.xlu0 %9488 }
0x13a8   :  { %16572 = vst [vmem:[#allocation430_spill] sm:$0xff] %v14612_v13 }
0x13a9   :  { %v14614_v33 = vpop.permute.xlu1 %9484 }
0x13aa   :  { %16573 = vst [vmem:[#allocation431_spill] sm:$0xff] %v14614_v33 }
0x13ab   :  { %v14616_v47 = vpop.permute.xlu0 %9496 }
0x13ac   :  { %16574 = vst [vmem:[#allocation432_spill] sm:$0xff] %v14616_v47 }
0x13ad   :  { %v14618_v15 = vpop.permute.xlu1 %9492 }
0x13ae   :  { %16575 = vst [vmem:[#allocation433_spill] sm:$0xff] %v14618_v15 }
0x13af   :  { %v14620_v9 = vpop.permute.xlu0 %9504 }
0x13b0   :  { %16576 = vst [vmem:[#allocation434_spill] sm:$0xff] %v14620_v9 }
0x13b1   :  { %v14622_v10 = vpop.permute.xlu1 %9500 }
0x13b2   :  { %16577 = vst [vmem:[#allocation435_spill] sm:$0xff] %v14622_v10 }
0x13b3   :  { %v14624_v51 = vpop.permute.xlu0 %9512 }
0x13b4   :  { %16578 = vst [vmem:[#allocation436_spill] sm:$0xff] %v14624_v51 }
0x13b5   :  { %v14626_v57 = vpop.permute.xlu1 %9508 }
0x13b6   :  { %16579 = vst [vmem:[#allocation437_spill] sm:$0xff] %v14626_v57 }
0x13b7   :  { %v9604_v45 = vpop.permute.xlu0 %9603 }
0x13b9   :  { %v14628_v36 = vpop.permute.xlu1 %9516 }
0x13ba   :  { %16580 = vst [vmem:[#allocation438_spill] sm:$0xff] %v14628_v36 }
0x13bb   :  { %v9615_v41 = vpop.permute.xlu0 %9614 }
0x13bd   :  { %v9608_v8 = vpop.permute.xlu1 %9607 }
0x13bf   :  { %v9626_v1 = vpop.permute.xlu0 %9625 }
0x13c1   :  { %v9619_v61 = vpop.permute.xlu1 %9618 }
0x13c3   :  { %v9637_v31 = vpop.permute.xlu0 %9636 }
0x13c5   :  { %v9630_v60 = vpop.permute.xlu1 %9629 }
0x13c7   :  { %v9648_v40 = vpop.permute.xlu0 %9647 }
0x13c8   :  { %v9686_v51 = vsel %vm178_vm0, %v9604_v45, %v9648_v40 }
0x13c9   :  { %v9641_v47 = vpop.permute.xlu1 %9640 }
0x13cb   :  { %v9659_v15 = vpop.permute.xlu0 %9658 }
0x13cc   :  { %v9688_v36 = vsel %vm178_vm0, %v9615_v41, %v9659_v15 }
0x13cd   :  { %v9652_v13 = vpop.permute.xlu1 %9651 }
0x13cf   :  { %v9670_v9 = vpop.permute.xlu0 %9669 }
0x13d0   :  { %v9690_v10 = vsel %vm178_vm0, %v9626_v1, %v9670_v9 }
0x13d1   :  { %v9663_v33 = vpop.permute.xlu1 %9662  ;;  %v9694_v57 = vcombine.low %v9686_v51, %v9690_v10  ;;  %v9695_v54 = vcombine.high %v9686_v51, %v9690_v10 }
0x13d2   :  { %v9689_v62 = vsel %vm178_vm0, %v9619_v61, %v9663_v33 }
0x13d3   :  { %v9681_v53 = vpop.permute.xlu0 %9680  ;;  %v9702_v48 = vrot.slane %v9694_v57, %v11278_v28  ;;  %v9709_v9 = vrot.slane %v9695_v54, %v11278_v28 }
0x13d4   :  { %v9692_v49 = vsel %vm178_vm0, %v9637_v31, %v9681_v53 }
0x13d5   :  { %v9710_v22 = vcombine.low %v9688_v36, %v9692_v49  ;;  %v9711_v56 = vcombine.high %v9688_v36, %v9692_v49  ;;  %v9674_v42 = vpop.permute.xlu1 %9673 }
0x13d6   :  { %v9691_v15 = vsel %vm178_vm0, %v9630_v60, %v9674_v42 }
0x13d7   :  { %v9718_v12 = vrot.slane %v9710_v22, %v11278_v28  ;;  %v9725_v21 = vrot.slane %v9711_v56, %v11278_v28  ;;  %v9687_v56 = vsel %vm178_vm0, %v9608_v8, %v9652_v13 }
0x13d8   :  { %v9762_v57 = vcombine.low %v9687_v56, %v9691_v15  ;;  %v9763_v8 = vcombine.high %v9687_v56, %v9691_v15 }
0x13d9   :  { %v9726_v1 = vcombine.low %v9702_v48, %v9718_v12  ;;  %v9727_v45 = vcombine.high %v9702_v48, %v9718_v12  ;;  %v9685_v40 = vpop.permute.xlu1 %9684  ;;  %v9742_v22 = vcombine.low %v9709_v9, %v9725_v21  ;;  %v9743_v48 = vcombine.high %v9709_v9, %v9725_v21 }
0x13da   :  { %v9693_v53 = vsel %vm178_vm0, %v9641_v47, %v9685_v40  ;;  %v9770_v33 = vrot.slane %v9762_v57, %v11278_v28  ;;  %v9562_v9 = vsub.f32 %v14527_v30, %v14529_v39 }
0x13db   :  { %v14642_v49 = vrot.slane %v9726_v1, %v11292_v52  ;;  %v9778_v10 = vcombine.low %v9689_v62, %v9693_v53  ;;  %v9741_v51 = vrot.slane %v9727_v45, %v11292_v52  ;;  %v9750_v54 = vrot.slane %v9742_v22, %v11292_v52 }
0x13dc   :  { %v9779_v13 = vcombine.high %v9689_v62, %v9693_v53  ;;  %v9757_v41 = vrot.slane %v9743_v48, %v11292_v52  ;;  %v9554_v62 = vsub.f32 %v14521_v4, %v14525_v59  ;;  %v9777_v1 = vrot.slane %v9763_v8, %v11278_v28  ;;  %v10213_v8 = vld [vmem:[#allocation2 + $0x4f] sm:$0x1] }
0x13dd   :  { %9835 = vrot.lane.b32.xlu1 %v9741_v51, %s11125_s0  ;;  %v9758_v12 = vcombine.high %v14642_v49, %v16171_v63  ;;  %v9786_v42 = vrot.slane %v9778_v10, %v11278_v28  ;;  %v9759_v47 = vcombine.high %v9741_v51, %v16171_v63  ;;  %v9760_v21 = vcombine.high %v9750_v54, %v16171_v63 }
0x13de   :  { %v9793_v61 = vrot.slane %v9779_v13, %v11278_v28  ;;  %v9761_v45 = vcombine.high %v9757_v41, %v16171_v63  ;;  %v9582_v53 = vadd.f32 %v9562_v9, %v9554_v62  ;;  %v9555_v10 = vsub.f32 %v14538_v25, %v14543_v7 }
0x13df   :  { %9831 = vrot.lane.b32.xlu0 %v9758_v12, %s11132_s25  ;;  %v9794_v36 = vcombine.low %v9770_v33, %v9786_v42  ;;  %v9795_v31 = vcombine.high %v9770_v33, %v9786_v42  ;;  %v9563_v4 = vsub.f32 %v14545_v27, %v14547_v11  ;;  %v9556_v25 = vsub.f32 %v14557_v43, %v14559_v58 }
0x13e0   :  { %v9810_v40 = vcombine.low %v9777_v1, %v9793_v61  ;;  %v9811_v30 = vcombine.high %v9777_v1, %v9793_v61  ;;  %v9586_v51 = vmul.f32 0.5, %v9582_v53  ;;  %v9564_v7 = vsub.f32 %v14561_v46, %v14563_v55  ;;  %v10221_v61 = vld [vmem:[#allocation2 + $0x6f] sm:$0x1] }
0x13e1   :  { %9843 = vrot.lane.b32.xlu1 %v9750_v54, %s11122_s17  ;;  %v9802_v60 = vrot.slane %v9794_v36, %v11292_v52  ;;  %v9809_v15 = vrot.slane %v9795_v31, %v11292_v52  ;;  %v9583_v22 = vadd.f32 %v9563_v4, %v9555_v10  ;;  %v9557_v42 = vsub.f32 %v14573_v32, %v14575_v26  ;;  %v10225_v31 = vld [vmem:[#allocation2 + $0x7f] sm:$0x1]  ;;  %v10212_v1 = vld [vmem:[#allocation2 + $0xf] sm:$0x1] }
0x13e2   :  { %v9818_v39 = vrot.slane %v9810_v40, %v11292_v52  ;;  %v9825_v27 = vrot.slane %v9811_v30, %v11292_v52  ;;  %v9908_v11 = vrot.slane %v9586_v51, %v11170_v2  ;;  %v9584_v48 = vadd.f32 %v9564_v7, %v9556_v25  ;;  %v10223_v30 = vld [vmem:[#allocation2 + $0xef] sm:$0x1] }
0x13e3   :  { %9839 = vrot.lane.b32.xlu0 %v9759_v47, %s11133_s26  ;;  %v9826_v59 = vcombine.high %v9802_v60, %v16171_v63  ;;  %v9827_v56 = vcombine.high %v9809_v15, %v16171_v63  ;;  %v9587_v57 = vmul.f32 0.5, %v9583_v22  ;;  %v9565_v43 = vsub.f32 %v14577_v34, %v14579_v23 }
0x13e4   :  { %v9828_v12 = vcombine.high %v9818_v39, %v16171_v63  ;;  %v9829_v58 = vcombine.high %v9825_v27, %v16171_v63  ;;  %v9588_v55 = vmul.f32 0.5, %v9584_v48  ;;  %v9590_v13 = vsub.f32 %v9554_v62, %v9562_v9  ;;  %v10216_v62 = vld [vmem:[#allocation2 + $0x1f] sm:$0x1]  ;;  %v10220_v9 = vld [vmem:[#allocation2 + $0x2f] sm:$0x1] }
0x13e5   :  { %9851 = vrot.lane.b32.xlu1 %v9757_v41, %s11126_s20  ;;  %v9919_v46 = vrot.slane %v9587_v57, %v11170_v2  ;;  %v9585_v54 = vadd.f32 %v9565_v43, %v9557_v42  ;;  %v9591_v34 = vsub.f32 %v9555_v10, %v9563_v4  ;;  %v9592_v23 = vsub.f32 %v9556_v25, %v9564_v7  ;;  %v10215_v4 = vld [vmem:[#allocation2 + $0xcf] sm:$0x1]  ;;  %v10218_v7 = vld [vmem:[#allocation2 + $0x9f] sm:$0x1] }
0x13e6   :  { %v9930_v33 = vrot.slane %v9588_v55, %v11170_v2  ;;  %v9594_v26 = vmul.f32 0.5, %v9590_v13  ;;  %v10237_v10 = vadd.f32 %v10225_v31, %v10221_v61  ;;  %v10228_v51 = vadd.f32 %v10216_v62, %v10212_v1 }
0x13e7   :  { %9847 = vrot.lane.b32.xlu0 %v9760_v21, %s11134_s27  ;;  %v9589_v47 = vmul.f32 0.5, %v9585_v54  ;;  %v9595_v41 = vmul.f32 0.5, %v9591_v34  ;;  %v10217_v21 = vld [vmem:[#allocation2 + $0x5f] sm:$0x1] }
0x13e8   :  { %v9952_v36 = vrot.slane %v9594_v26, %v11170_v2  ;;  %v10229_v53 = vadd.f32 %v10217_v21, %v10213_v8 }
0x13e9   :  { %9859 = vrot.lane.b32.xlu1 %v9802_v60, %s11127_s21  ;;  %v9941_v32 = vrot.slane %v9589_v47, %v11170_v2  ;;  %v9596_v60 = vmul.f32 0.5, %v9592_v23  ;;  %v9963_v40 = vrot.slane %v9595_v41, %v11170_v2 }
0x13eb   :  { %9855 = vrot.lane.b32.xlu0 %v9761_v45, %s11135_s28  ;;  %v10224_v45 = vld [vmem:[#allocation2 + $0x3f] sm:$0x1]  ;;  %v9974_v25 = vrot.slane %v9596_v60, %v11170_v2 }
0x13ec   :  { %v10236_v22 = vadd.f32 %v10224_v45, %v10220_v9 }
0x13ed   :  { %9867 = vrot.lane.b32.xlu1 %v9809_v15, %s11128_s22  ;;  %v9593_v15 = vsub.f32 %v9557_v42, %v9565_v43 }
0x13ee   :  { %v10244_v43 = vadd.f32 %v10236_v22, %v10228_v51  ;;  %v10252_v23 = vsub.f32 %v10228_v51, %v10236_v22 }
0x13ef   :  { %9863 = vrot.lane.b32.xlu0 %v9826_v59, %s11136_s29  ;;  %v10219_v59 = vld [vmem:[#allocation2 + $0xdf] sm:$0x1]  ;;  %v9597_v57 = vmul.f32 0.5, %v9593_v15 }
0x13f0   :  { %v10231_v48 = vadd.f32 %v10219_v59, %v10215_v4  ;;  %v10248_v47 = vmul.f32 0.5, %v10244_v43 }
0x13f1   :  { %9875 = vrot.lane.b32.xlu1 %v9818_v39, %s11129_s23  ;;  %v10227_v39 = vld [vmem:[#allocation2 + $0xff] sm:$0x1]  ;;  %v14704_v55 = vrot.slane %v9597_v57, %v11170_v2  ;;  %v10233_v57 = vsub.f32 %v10213_v8, %v10217_v21 }
0x13f2   :  { %v10239_v42 = vadd.f32 %v10227_v39, %v10223_v30 }
0x13f3   :  { %9871 = vrot.lane.b32.xlu0 %v9827_v56, %s11137_s30  ;;  %v10214_v56 = vld [vmem:[#allocation2 + $0x8f] sm:$0x1] }
0x13f4   :  { %v10234_v21 = vsub.f32 %v10214_v56, %v10218_v7 }
0x13f5   :  { %9883 = vrot.lane.b32.xlu1 %v9825_v27, %s11130_s24  ;;  %v10222_v27 = vld [vmem:[#allocation2 + $0xaf] sm:$0x1] }
0x13f7   :  { %9879 = vrot.lane.b32.xlu0 %v9828_v12, %s11138_s2  ;;  %v10245_v12 = vadd.f32 %v10237_v10, %v10229_v53 }
0x13f9   :  { %9910 = vbcast.lane.b32.xlu1 %v9908_v11, 256  ;;  %v10249_v54 = vmul.f32 0.5, %v10245_v12  ;;  %v10241_v12 = vsub.f32 %v10221_v61, %v10225_v31 }
0x13fb   :  { %9887 = vrot.lane.b32.xlu0 %v9829_v58, %s11139_s3  ;;  %v10230_v58 = vadd.f32 %v10218_v7, %v10214_v56  ;;  %v14708_v26 = vrot.slane %v10249_v54, %v11170_v2  ;;  %v10232_v54 = vsub.f32 %v10212_v1, %v10216_v62 }
0x13fd   :  { %9921 = vbcast.lane.b32.xlu1 %v9919_v46, 256 }
0x13ff   :  { %9914 = vbcast.lane.b32.xlu0 %v9908_v11, 264  ;;  %v10226_v11 = vld [vmem:[#allocation2 + $0xbf] sm:$0x1] }
0x1400   :  { %v10242_v61 = vsub.f32 %v10222_v27, %v10226_v11 }
0x1401   :  { %9932 = vbcast.lane.b32.xlu1 %v9930_v33, 256 }
0x1403   :  { %9925 = vbcast.lane.b32.xlu0 %v9919_v46, 264  ;;  %v10238_v46 = vadd.f32 %v10226_v11, %v10222_v27 }
0x1405   :  { %9943 = vbcast.lane.b32.xlu1 %v9941_v32, 256  ;;  %v10246_v13 = vadd.f32 %v10238_v46, %v10230_v58  ;;  %v10254_v43 = vsub.f32 %v10230_v58, %v10238_v46 }
0x1407   :  { %9936 = vbcast.lane.b32.xlu0 %v9930_v33, 264  ;;  %v10247_v33 = vadd.f32 %v10239_v42, %v10231_v48  ;;  %v10250_v41 = vmul.f32 0.5, %v10246_v13  ;;  %v10243_v13 = vsub.f32 %v10223_v30, %v10227_v39  ;;  %v10269_v30 = vsub.f32 %v10233_v57, %v10241_v12 }
0x1409   :  { %9954 = vbcast.lane.b32.xlu1 %v9952_v36, 256  ;;  %v10251_v34 = vmul.f32 0.5, %v10247_v33  ;;  %v10240_v33 = vsub.f32 %v10220_v9, %v10224_v45  ;;  %v10262_v45 = vadd.f32 %v10242_v61, %v10234_v21  ;;  %v10273_v11 = vmul.f32 0.5, %v10269_v30 }
0x140b   :  { %9947 = vbcast.lane.b32.xlu0 %v9941_v32, 264  ;;  %v10253_v32 = vsub.f32 %v10229_v53, %v10237_v10  ;;  %v10312_v15 = vrot.slane %v10251_v34, %v11170_v2  ;;  %v10256_v53 = vmul.f32 0.5, %v10252_v23  ;;  %v10301_v10 = vrot.slane %v10250_v41, %v11170_v2 }
0x140c   :  { %v10260_v8 = vadd.f32 %v10240_v33, %v10232_v54  ;;  %v10266_v56 = vmul.f32 0.5, %v10262_v45  ;;  %v10268_v7 = vsub.f32 %v10232_v54, %v10240_v33  ;;  %v10270_v23 = vsub.f32 %v10234_v21, %v10242_v61 }
0x140d   :  { %9965 = vbcast.lane.b32.xlu1 %v9963_v40, 256  ;;  %v10257_v60 = vmul.f32 0.5, %v10253_v32  ;;  %v10323_v32 = vrot.slane %v10256_v53, %v11170_v2  ;;  %v10641_v41 = vrot.slane %v10273_v11, %v11170_v2 }
0x140e   :  { %v10264_v9 = vmul.f32 0.5, %v10260_v8  ;;  %v10608_v46 = vrot.slane %v10266_v56, %v11170_v2  ;;  %v10272_v34 = vmul.f32 0.5, %v10268_v7 }
0x140f   :  { %9958 = vbcast.lane.b32.xlu0 %v9952_v36, 264  ;;  %v10279_v36 = vrot.slane %v10248_v47, %v11170_v2  ;;  %v10334_v51 = vrot.slane %v10257_v60, %v11170_v2  ;;  %v10235_v47 = vsub.f32 %v10215_v4, %v10219_v59 }
0x1410   :  { %v10586_v39 = vrot.slane %v10264_v9, %v11170_v2 }
0x1411   :  { %9976 = vbcast.lane.b32.xlu1 %v9974_v25, 256  ;;  %v10263_v1 = vadd.f32 %v10243_v13, %v10235_v47  ;;  %v10271_v58 = vsub.f32 %v10235_v47, %v10243_v13 }
0x1413   :  { %9969 = vbcast.lane.b32.xlu0 %v9963_v40, 264  ;;  %v10255_v40 = vsub.f32 %v10231_v48, %v10239_v42  ;;  %v10258_v48 = vmul.f32 0.5, %v10254_v43  ;;  %v10267_v59 = vmul.f32 0.5, %v10263_v1  ;;  %v10275_v60 = vmul.f32 0.5, %v10271_v58 }
0x1415   :  { %9987 = vbcast.lane.b32.xlu1 %v14704_v55, 256  ;;  %v10259_v22 = vmul.f32 0.5, %v10255_v40  ;;  %v10345_v62 = vrot.slane %v10258_v48, %v11170_v2  ;;  %v10619_v27 = vrot.slane %v10267_v59, %v11170_v2  ;;  %v10630_v40 = vrot.slane %v10272_v34, %v11170_v2 }
0x1417   :  { %9980 = vbcast.lane.b32.xlu0 %v9974_v25, 264  ;;  %v10261_v25 = vadd.f32 %v10241_v12, %v10233_v57  ;;  %v10356_v31 = vrot.slane %v10259_v22, %v11170_v2  ;;  %v10274_v57 = vmul.f32 0.5, %v10270_v23  ;;  %v10663_v12 = vrot.slane %v10275_v60, %v11170_v2 }
0x1419   :  { %10292 = vbcast.lane.b32.xlu1 %v14708_v26, 256  ;;  %v10265_v42 = vmul.f32 0.5, %v10261_v25  ;;  %v10652_v53 = vrot.slane %v10274_v57, %v11170_v2 }
0x141b   :  { %10281 = vbcast.lane.b32.xlu0 %v10279_v36, 256  ;;  %v10597_v4 = vrot.slane %v10265_v42, %v11170_v2 }
0x141d   :  { %10314 = vbcast.lane.b32.xlu1 %v10312_v15, 256 }
0x141f   :  { %10303 = vbcast.lane.b32.xlu0 %v10301_v10, 256 }
0x1421   :  { %10336 = vbcast.lane.b32.xlu1 %v10334_v51, 256 }
0x1423   :  { %10325 = vbcast.lane.b32.xlu0 %v10323_v32, 256 }
0x1425   :  { %10358 = vbcast.lane.b32.xlu1 %v10356_v31, 256 }
0x1427   :  { %10347 = vbcast.lane.b32.xlu0 %v10345_v62, 256 }
0x1429   :  { %10599 = vbcast.lane.b32.xlu1 %v10597_v4, 256 }
0x142b   :  { %10588 = vbcast.lane.b32.xlu0 %v10586_v39, 256 }
0x142d   :  { %10621 = vbcast.lane.b32.xlu1 %v10619_v27, 256 }
0x142f   :  { %10610 = vbcast.lane.b32.xlu0 %v10608_v46, 256 }
0x1431   :  { %10643 = vbcast.lane.b32.xlu1 %v10641_v41, 256 }
0x1433   :  { %10632 = vbcast.lane.b32.xlu0 %v10630_v40, 256 }
0x1435   :  { %10665 = vbcast.lane.b32.xlu1 %v10663_v12, 256 }
0x1437   :  { %10654 = vbcast.lane.b32.xlu0 %v10652_v53, 256 }
0x1439   :  { %10285 = vbcast.lane.b32.xlu1 %v10279_v36, 264 }
0x143b   :  { %9991 = vbcast.lane.b32.xlu0 %v14704_v55, 264 }
0x143d   :  { %10307 = vbcast.lane.b32.xlu1 %v10301_v10, 264 }
0x143f   :  { %10296 = vbcast.lane.b32.xlu0 %v14708_v26, 264 }
0x1441   :  { %10329 = vbcast.lane.b32.xlu1 %v10323_v32, 264 }
0x1443   :  { %10318 = vbcast.lane.b32.xlu0 %v10312_v15, 264 }
0x1445   :  { %10351 = vbcast.lane.b32.xlu1 %v10345_v62, 264 }
0x1447   :  { %10340 = vbcast.lane.b32.xlu0 %v10334_v51, 264 }
0x1449   :  { %10592 = vbcast.lane.b32.xlu1 %v10586_v39, 264 }
0x144b   :  { %10362 = vbcast.lane.b32.xlu0 %v10356_v31, 264 }
0x144d   :  { %10614 = vbcast.lane.b32.xlu1 %v10608_v46, 264 }
0x144f   :  { %v14728_v43 = vpop.permute.xlu1 %9835  ;;  %10603 = vbcast.lane.b32.xlu0 %v10597_v4, 264 }
0x1451   :  { %v14730_v54 = vpop.permute.xlu0 %9831  ;;  %10636 = vbcast.lane.b32.xlu1 %v10630_v40, 264 }
0x1453   :  { %v14732_v2 = vpop.permute.xlu1 %9843  ;;  %10625 = vbcast.lane.b32.xlu0 %v10619_v27, 264 }
0x1455   :  { %v14734_v55 = vpop.permute.xlu0 %9839  ;;  %10658 = vbcast.lane.b32.xlu1 %v10652_v53, 264 }
0x1457   :  { %v14736_v26 = vpop.permute.xlu1 %9851  ;;  %10647 = vbcast.lane.b32.xlu0 %v10641_v41, 264 }
0x1459   :  { %v14738_v36 = vpop.permute.xlu0 %9847 }
0x145b   :  { %v14740_v15 = vpop.permute.xlu1 %9859  ;;  %10669 = vbcast.lane.b32.xlu0 %v10663_v12, 264 }
0x145c   :  { %16581 = vst [vmem:[#allocation439_spill] sm:$0xff] %v14740_v15 }
0x145d   :  { %v14742_v10 = vpop.permute.xlu0 %9855 }
0x145f   :  { %v14744_v33 = vpop.permute.xlu1 %9867 }
0x1460   :  { %16582 = vst [vmem:[#allocation440_spill] sm:$0xff] %v14744_v33 }
0x1461   :  { %v14746_v51 = vpop.permute.xlu0 %9863 }
0x1462   :  { %16583 = vst [vmem:[#allocation441_spill] sm:$0xff] %v14746_v51 }
0x1463   :  { %v14748_v22 = vpop.permute.xlu1 %9875 }
0x1464   :  { %16584 = vst [vmem:[#allocation442_spill] sm:$0xff] %v14748_v22 }
0x1465   :  { %v14750_v25 = vpop.permute.xlu0 %9871 }
0x1466   :  { %16585 = vst [vmem:[#allocation443_spill] sm:$0xff] %v14750_v25 }
0x1467   :  { %v14752_v47 = vpop.permute.xlu1 %9883 }
0x1468   :  { %16586 = vst [vmem:[#allocation444_spill] sm:$0xff] %v14752_v47 }
0x1469   :  { %v14754_v13 = vpop.permute.xlu0 %9879 }
0x146a   :  { %16587 = vst [vmem:[#allocation445_spill] sm:$0xff] %v14754_v13 }
0x146b   :  { %v9911_v32 = vpop.permute.xlu1 %9910 }
0x146d   :  { %v14756_v48 = vpop.permute.xlu0 %9887 }
0x146e   :  { %16588 = vst [vmem:[#allocation446_spill] sm:$0xff] %v14756_v48 }
0x146f   :  { %v9922_v8 = vpop.permute.xlu1 %9921 }
0x1471   :  { %v14758_v21 = vpop.permute.xlu0 %9914 }
0x1473   :  { %v9933_v61 = vpop.permute.xlu1 %9932 }
0x1475   :  { %v14760_v31 = vpop.permute.xlu0 %9925 }
0x1477   :  { %v9944_v42 = vpop.permute.xlu1 %9943 }
0x1479   :  { %v14762_v1 = vpop.permute.xlu0 %9936 }
0x147b   :  { %v9955_v62 = vpop.permute.xlu1 %9954 }
0x147c   :  { %v9993_v56 = vsel %vm178_vm0, %v9911_v32, %v9955_v62 }
0x147d   :  { %v14764_v9 = vpop.permute.xlu0 %9947 }
0x147f   :  { %v9966_v45 = vpop.permute.xlu1 %9965 }
0x1480   :  { %v9995_v11 = vsel %vm178_vm0, %v9922_v8, %v9966_v45 }
0x1481   :  { %v14766_v4 = vpop.permute.xlu0 %9958 }
0x1483   :  { %v9977_v59 = vpop.permute.xlu1 %9976 }
0x1484   :  { %v9997_v30 = vsel %vm178_vm0, %v9933_v61, %v9977_v59 }
0x1485   :  { %v14769_v39 = vpop.permute.xlu0 %9969  ;;  %v10001_v7 = vcombine.low %v9993_v56, %v9997_v30  ;;  %v10002_v33 = vcombine.high %v9993_v56, %v9997_v30 }
0x1487   :  { %v9988_v27 = vpop.permute.xlu1 %9987  ;;  %v10009_v23 = vrot.slane %v10001_v7, %v11278_v28 }
0x1488   :  { %v9999_v58 = vsel %vm178_vm0, %v9944_v42, %v9988_v27 }
0x1489   :  { %v10017_v46 = vcombine.low %v9995_v11, %v9999_v58  ;;  %v14774_v34 = vpop.permute.xlu0 %9980 }
0x148b   :  { %v10025_v41 = vrot.slane %v10017_v46, %v11278_v28  ;;  %v10293_v60 = vpop.permute.xlu1 %10292 }
0x148d   :  { %v10033_v40 = vcombine.low %v10009_v23, %v10025_v41  ;;  %v10034_v57 = vcombine.high %v10009_v23, %v10025_v41  ;;  %v10282_v12 = vpop.permute.xlu0 %10281 }
0x148f   :  { %v14779_v53 = vrot.slane %v10033_v40, %v11292_v52  ;;  %v10315_v32 = vpop.permute.xlu1 %10314  ;;  %v10048_v61 = vrot.slane %v10034_v57, %v11292_v52 }
0x1491   :  { %10142 = vrot.lane.b32.xlu0 %v10048_v61, %s11125_s0  ;;  %v10304_v8 = vpop.permute.xlu0 %10303  ;;  %v10065_v42 = vcombine.high %v14779_v53, %v16171_v63  ;;  %v10066_v45 = vcombine.high %v10048_v61, %v16171_v63 }
0x1493   :  { %10138 = vrot.lane.b32.xlu1 %v10065_v42, %s11132_s25  ;;  %v10337_v62 = vpop.permute.xlu1 %10336 }
0x1494   :  { %v10366_v27 = vsel %vm178_vm0, %v10293_v60, %v10337_v62 }
0x1495   :  { %10146 = vrot.lane.b32.xlu0 %v10066_v45, %s11133_s26  ;;  %v10326_v59 = vpop.permute.xlu0 %10325  ;;  %v10018_v45 = vcombine.high %v9995_v11, %v9999_v58 }
0x1496   :  { %v10364_v40 = vsel %vm178_vm0, %v10282_v12, %v10326_v59 }
0x1497   :  { %v10359_v7 = vpop.permute.xlu1 %10358  ;;  %v10032_v62 = vrot.slane %v10018_v45, %v11278_v28 }
0x1498   :  { %v10370_v46 = vsel %vm178_vm0, %v10315_v32, %v10359_v7  ;;  %v10016_v7 = vrot.slane %v10002_v33, %v11278_v28 }
0x1499   :  { %v10388_v23 = vcombine.low %v10366_v27, %v10370_v46  ;;  %v10348_v41 = vpop.permute.xlu0 %10347  ;;  %v10389_v45 = vcombine.high %v10366_v27, %v10370_v46 }
0x149a   :  { %v10368_v57 = vsel %vm178_vm0, %v10304_v8, %v10348_v41  ;;  %v10049_v30 = vcombine.low %v10016_v7, %v10032_v62 }
0x149b   :  { %v10372_v48 = vcombine.low %v10364_v40, %v10368_v57  ;;  %v10600_v47 = vpop.permute.xlu1 %10599  ;;  %v10396_v42 = vrot.slane %v10388_v23, %v11278_v28  ;;  %v10373_v23 = vcombine.high %v10364_v40, %v10368_v57  ;;  %v10403_v57 = vrot.slane %v10389_v45, %v11278_v28 }
0x149c   :  { %v10057_v51 = vrot.slane %v10049_v30, %v11292_v52 }
0x149d   :  { %v10380_v61 = vrot.slane %v10372_v48, %v11278_v28  ;;  %v10589_v13 = vpop.permute.xlu0 %10588 }
0x149f   :  { %v10404_v22 = vcombine.low %v10380_v61, %v10396_v42  ;;  %v10622_v25 = vpop.permute.xlu1 %10621  ;;  %v10405_v12 = vcombine.high %v10380_v61, %v10396_v42 }
0x14a1   :  { %v14795_v60 = vrot.slane %v10404_v22, %v11292_v52  ;;  %v10611_v32 = vpop.permute.xlu0 %10610  ;;  %v10419_v58 = vrot.slane %v10405_v12, %v11292_v52  ;;  %v10387_v12 = vrot.slane %v10373_v23, %v11278_v28 }
0x14a3   :  { %v10644_v59 = vpop.permute.xlu1 %10643  ;;  %v10436_v8 = vcombine.high %v14795_v60, %v16171_v63  ;;  %v10420_v30 = vcombine.low %v10387_v12, %v10403_v57 }
0x14a4   :  { %v10673_v22 = vsel %vm178_vm0, %v10600_v47, %v10644_v59 }
0x14a5   :  { %10509 = vrot.lane.b32.xlu1 %v10436_v8, %s11132_s25  ;;  %v10633_v48 = vpop.permute.xlu0 %10632 }
0x14a6   :  { %v10671_v61 = vsel %vm178_vm0, %v10589_v13, %v10633_v48 }
0x14a7   :  { %v10666_v11 = vpop.permute.xlu1 %10665 }
0x14a8   :  { %v10677_v56 = vsel %vm178_vm0, %v10622_v25, %v10666_v11 }
0x14a9   :  { %v10695_v41 = vcombine.low %v10673_v22, %v10677_v56  ;;  %10513 = vrot.lane.b32.xlu1 %v10419_v58, %s11125_s0  ;;  %v10655_v42 = vpop.permute.xlu0 %10654  ;;  %v10696_v23 = vcombine.high %v10673_v22, %v10677_v56  ;;  %v10437_v56 = vcombine.high %v10419_v58, %v16171_v63 }
0x14aa   :  { %v10675_v33 = vsel %vm178_vm0, %v10611_v32, %v10655_v42 }
0x14ab   :  { %v10679_v8 = vcombine.low %v10671_v61, %v10675_v33  ;;  %v10286_v15 = vpop.permute.xlu1 %10285  ;;  %v10703_v47 = vrot.slane %v10695_v41, %v11278_v28  ;;  %v10680_v32 = vcombine.high %v10671_v61, %v10675_v33  ;;  %v10428_v33 = vrot.slane %v10420_v30, %v11292_v52 }
0x14ac   :  { %v10710_v22 = vrot.slane %v10696_v23, %v11278_v28 }
0x14ad   :  { %v10687_v25 = vrot.slane %v10679_v8, %v11278_v28  ;;  %10150 = vrot.lane.b32.xlu1 %v10057_v51, %s11122_s17  ;;  %v9992_v40 = vpop.permute.xlu0 %9991  ;;  %v10050_v8 = vcombine.high %v10016_v7, %v10032_v62  ;;  %v10694_v45 = vrot.slane %v10680_v32, %v11278_v28  ;;  %v14834_v62 = vsel %vm178_vm0, %v14760_v31, %v14769_v39 }
0x14ae   :  { %v14839_v7 = vsel %vm178_vm0, %v14762_v1, %v14774_v34  ;;  %v10067_v1 = vcombine.high %v10057_v51, %v16171_v63  ;;  %v10421_v34 = vcombine.high %v10387_v12, %v10403_v57 }
0x14af   :  { %v10711_v59 = vcombine.low %v10687_v25, %v10703_v47  ;;  %v10712_v13 = vcombine.high %v10687_v25, %v10703_v47  ;;  %v10308_v48 = vpop.permute.xlu1 %10307  ;;  %v14826_v47 = vsel %vm178_vm0, %v14764_v9, %v9992_v40  ;;  %v10727_v58 = vcombine.low %v10694_v45, %v10710_v22 }
0x14b0   :  { %v10085_v9 = vcombine.low %v14834_v62, %v14826_v47 }
0x14b1   :  { %v14815_v27 = vrot.slane %v10711_v59, %v11292_v52  ;;  %v10297_v46 = vpop.permute.xlu0 %10296  ;;  %v10726_v11 = vrot.slane %v10712_v13, %v11292_v52  ;;  %v10064_v59 = vrot.slane %v10050_v8, %v11292_v52  ;;  %v14848_v13 = vsel %vm178_vm0, %v14758_v21, %v14766_v4 }
0x14b2   :  { %v10069_v31 = vcombine.low %v14848_v13, %v14839_v7  ;;  %v10093_v32 = vrot.slane %v10085_v9, %v11278_v28  ;;  %v10735_v23 = vrot.slane %v10727_v58, %v11292_v52  ;;  %v10728_v9 = vcombine.high %v10694_v45, %v10710_v22 }
0x14b3   :  { %10820 = vrot.lane.b32.xlu1 %v10726_v11, %s11125_s0  ;;  %v10743_v41 = vcombine.high %v14815_v27, %v16171_v63  ;;  %v10330_v42 = vpop.permute.xlu1 %10329  ;;  %v10744_v57 = vcombine.high %v10726_v11, %v16171_v63 }
0x14b4   :  { %v10077_v12 = vrot.slane %v10069_v31, %v11278_v28 }
0x14b5   :  { %10816 = vrot.lane.b32.xlu0 %v10743_v41, %s11132_s25  ;;  %v10319_v61 = vpop.permute.xlu0 %10318  ;;  %v14858_v41 = vsel %vm178_vm0, %v10286_v15, %v10330_v42  ;;  %v10435_v42 = vrot.slane %v10421_v34, %v11292_v52 }
0x14b7   :  { %10521 = vrot.lane.b32.xlu1 %v10428_v33, %s11122_s17  ;;  %v10352_v25 = vpop.permute.xlu1 %10351 }
0x14b8   :  { %v14864_v4 = vsel %vm178_vm0, %v10308_v48, %v10352_v25 }
0x14b9   :  { %10517 = vrot.lane.b32.xlu0 %v10437_v56, %s11133_s26  ;;  %v10341_v40 = vpop.permute.xlu0 %10340  ;;  %v10101_v56 = vcombine.low %v10077_v12, %v10093_v32  ;;  %v10440_v15 = vcombine.low %v14858_v41, %v14864_v4 }
0x14ba   :  { %v14861_v21 = vsel %vm178_vm0, %v10297_v46, %v10341_v40 }
0x14bb   :  { %10158 = vrot.lane.b32.xlu1 %v10064_v59, %s11126_s20  ;;  %v10593_v39 = vpop.permute.xlu1 %10592  ;;  %v10448_v11 = vrot.slane %v10440_v15, %v11278_v28  ;;  %v10109_v31 = vrot.slane %v10101_v56, %v11292_v52  ;;  %v10745_v15 = vcombine.high %v10735_v23, %v16171_v63 }
0x14bd   :  { %10154 = vrot.lane.b32.xlu0 %v10067_v1, %s11134_s27  ;;  %v10363_v30 = vpop.permute.xlu0 %10362  ;;  %v10068_v1 = vcombine.high %v10064_v59, %v16171_v63 }
0x14be   :  { %v14867_v51 = vsel %vm178_vm0, %v10319_v61, %v10363_v30  ;;  %v10438_v61 = vcombine.high %v10428_v33, %v16171_v63 }
0x14bf   :  { %10828 = vrot.lane.b32.xlu1 %v10735_v23, %s11122_s17  ;;  %v10615_v8 = vpop.permute.xlu1 %10614  ;;  %v10456_v46 = vcombine.low %v14861_v21, %v14867_v51 }
0x14c1   :  { %10824 = vrot.lane.b32.xlu0 %v10744_v57, %s11133_s26  ;;  %v10604_v48 = vpop.permute.xlu0 %10603  ;;  %v10464_v40 = vrot.slane %v10456_v46, %v11278_v28  ;;  %v10742_v57 = vrot.slane %v10728_v9, %v11292_v52  ;;  %v10439_v9 = vcombine.high %v10435_v42, %v16171_v63 }
0x14c3   :  { %10529 = vrot.lane.b32.xlu1 %v10435_v42, %s11126_s20  ;;  %v10637_v25 = vpop.permute.xlu1 %10636  ;;  %v10472_v45 = vcombine.low %v10448_v11, %v10464_v40 }
0x14c4   :  { %v14887_v33 = vsel %vm178_vm0, %v10593_v39, %v10637_v25  ;;  %v10102_v39 = vcombine.high %v10077_v12, %v10093_v32  ;;  %v10086_v32 = vcombine.high %v14834_v62, %v14826_v47  ;;  %v705_v62 = vsel %vm383_vm1, %v11356_v35, %v11466_v18 }
0x14c5   :  { %10525 = vrot.lane.b32.xlu0 %v10438_v61, %s11134_s27  ;;  %v10626_v58 = vpop.permute.xlu0 %10625  ;;  %v10480_v46 = vrot.slane %v10472_v45, %v11292_v52  ;;  %v10473_v45 = vcombine.high %v10448_v11, %v10464_v40  ;;  %v10441_v11 = vcombine.high %v14858_v41, %v14864_v4  ;;  %v10457_v40 = vcombine.high %v14861_v21, %v14867_v51 }
0x14c6   :  { %v14921_v42 = vrot.slane %v10086_v32, %v11278_v28  ;;  %v706_v18 = vsel %vm385_vm2, %v705_v62, %v11456_v50 }
0x14c7   :  { %10166 = vrot.lane.b32.xlu1 %v10109_v31, %s11127_s21  ;;  %v10659_v34 = vpop.permute.xlu1 %10658  ;;  %v10487_v35 = vrot.slane %v10473_v45, %v11292_v52  ;;  %v14945_v41 = vrot.slane %v10441_v11, %v11278_v28  ;;  %v14948_v21 = vrot.slane %v10457_v40, %v11278_v28  ;;  %v16595_v45 = vld [vmem:[#allocation329_spill] sm:$0xff]  ;;  %v16599_v40 = vld [vmem:[#allocation138_spill] sm:$0xff] }
0x14c8   :  { %v14890_v30 = vsel %vm178_vm0, %v10615_v8, %v10659_v34  ;;  %v10133_v34 = vcombine.high %v10109_v31, %v16171_v63 }
0x14c9   :  { %10162 = vrot.lane.b32.xlu0 %v10068_v1, %s11135_s28  ;;  %v10648_v22 = vpop.permute.xlu0 %10647  ;;  %v10747_v59 = vcombine.low %v14887_v33, %v14890_v30 }
0x14ca   :  { %v14899_v56 = vsel %vm178_vm0, %v10604_v48, %v10648_v22  ;;  %v10116_v48 = vrot.slane %v10102_v39, %v11292_v52  ;;  %v707_v22 = vsel %vm387_vm3, %v706_v18, %v11470_v20  ;;  %v10488_v39 = vcombine.low %v14945_v41, %v14948_v21 }
0x14cb   :  { %10836 = vrot.lane.b32.xlu1 %v10742_v57, %s11126_s20  ;;  %v10755_v25 = vrot.slane %v10747_v59, %v11278_v28  ;;  %v708_v20 = vsel %vm389_vm4, %v707_v22, %v11460_v5  ;;  %v2061_v59 = vsel %vm383_vm1, %v11866_v37, %v11962_v3  ;;  %v16600_v22 = vld [vmem:[#allocation81_spill] sm:$0xff] }
0x14cc   :  { %v709_v51 = vsel %vm391_vm5, %v708_v20, %v11476_v29  ;;  %v2062_v37 = vsel %vm385_vm2, %v2061_v59, %v11960_v6  ;;  %v16603_v59 = vld [vmem:[#allocation328_spill] sm:$0xff] }
0x14cd   :  { %10832 = vrot.lane.b32.xlu0 %v10745_v15, %s11134_s27  ;;  %v10670_v8 = vpop.permute.xlu0 %10669  ;;  %v10134_v15 = vcombine.high %v10116_v48, %v16171_v63 }
0x14ce   :  { %v14904_v61 = vsel %vm178_vm0, %v10626_v58, %v10670_v8  ;;  %v10070_v58 = vcombine.high %v14848_v13, %v14839_v7  ;;  %v10746_v13 = vcombine.high %v10742_v57, %v16171_v63  ;;  %v10504_v57 = vcombine.high %v10480_v46, %v16171_v63 }
0x14cf   :  { %v10763_v23 = vcombine.low %v14899_v56, %v14904_v61  ;;  %10537 = vrot.lane.b32.xlu1 %v10480_v46, %s11127_s21  ;;  %v10748_v8 = vcombine.high %v14887_v33, %v14890_v30  ;;  %v10764_v5 = vcombine.high %v14899_v56, %v14904_v61  ;;  %v710_v46 = vsel %vm393_vm6, %v709_v51, %v11464_v16  ;;  %v16602_v51 = vld [vmem:[#allocation202_spill] sm:$0xff] }
0x14d0   :  { %v10084_v7 = vrot.slane %v10070_v58, %v11278_v28  ;;  %v2063_v33 = vsel %vm387_vm3, %v2062_v37, %v11966_v17  ;;  %v4773_v61 = vsel %vm383_vm1, %v12826_v24, %v12922_v0  ;;  %v16592_v24 = vld [vmem:[#allocation201_spill] sm:$0xff]  ;;  %v16593_v58 = vld [vmem:[#allocation16_spill] sm:$0xff]  ;;  %vm10938_vm0 = vcmask 261120  }
0x14d1   :  { %v10771_v12 = vrot.slane %v10763_v23, %v11278_v28  ;;  %10533 = vrot.lane.b32.xlu0 %v10439_v9, %s11135_s28  ;;  %v14981_v56 = vrot.slane %v10748_v8, %v11278_v28  ;;  %v14984_v16 = vrot.slane %v10764_v5, %v11278_v28  ;;  %v2064_v23 = vsel %vm389_vm4, %v2063_v33, %v11964_v14  ;;  %v16589_v9 = vld [vmem:[#allocation79_spill] sm:$0xff]  ;;  %v16604_v5 = vld [vmem:[#allocation17_spill] sm:$0xff] }
0x14d2   :  { %v10117_v31 = vcombine.low %v10084_v7, %v14921_v42  ;;  %v10118_v30 = vcombine.high %v10084_v7, %v14921_v42  ;;  %v10505_v28 = vcombine.high %v10487_v35, %v16171_v63  ;;  %v2065_v32 = vsel %vm391_vm5, %v2064_v23, %v16589_v9  ;;  %v16597_v7 = vld [vmem:[#allocation22_spill] sm:$0xff] }
0x14d3   :  { %v10779_v1 = vcombine.low %v10755_v25, %v10771_v12  ;;  %10174 = vrot.lane.b32.xlu1 %v10116_v48, %s11128_s22  ;;  %v10780_v4 = vcombine.high %v10755_v25, %v10771_v12  ;;  %v711_v25 = vsel %vm395_vm7, %v710_v46, %v11480_v44  ;;  %v10496_v44 = vrot.slane %v10488_v39, %v11292_v52  ;;  %v16591_v12 = vld [vmem:[#allocation137_spill] sm:$0xff]  ;;  %v16611_v9 = vld [vmem:[#allocation30_spill] sm:$0xff] }
0x14d4   :  { %v10125_v50 = vrot.slane %v10117_v31, %v11292_v52  ;;  %v712_v6 = vsel %vm397_vm8, %v711_v25, %v11468_v19  ;;  %v16590_v19 = vld [vmem:[#allocation139_spill] sm:$0xff]  ;;  %v4774_v0 = vsel %vm385_vm2, %v4773_v61, %v16592_v24  ;;  %v10132_v14 = vrot.slane %v10118_v30, %v11292_v52  ;;  %v16598_v31 = vld [vmem:[#allocation78_spill] sm:$0xff]  ;;  %v16605_v25 = vld [vmem:[#allocation205_spill] sm:$0xff] }
0x14d5   :  { %10170 = vrot.lane.b32.xlu0 %v10133_v34, %s11136_s29  ;;  %v10787_v47 = vrot.slane %v10779_v1, %v11292_v52  ;;  %v10794_v29 = vrot.slane %v10780_v4, %v11292_v52  ;;  %v713_v17 = vsel %vm399_vm9, %v712_v6, %v11486_v38  ;;  %v3417_v48 = vsel %vm383_vm1, %v16591_v12, %v16590_v19  ;;  %v16594_v34 = vld [vmem:[#allocation203_spill] sm:$0xff]  ;;  %v16601_v4 = vld [vmem:[#allocation141_spill] sm:$0xff]  ;;  %v16608_v61 = vld [vmem:[#allocation80_spill] sm:$0xff] }
0x14d6   :  { %v10795_v38 = vcombine.low %v14981_v56, %v14984_v16  ;;  %v714_v1 = vsel %vm401_vm10, %v713_v17, %v16593_v58  ;;  %v4775_v42 = vsel %vm387_vm3, %v4774_v0, %v16594_v34  ;;  %v2066_v11 = vsel %vm393_vm6, %v2065_v32, %v16598_v31  ;;  %v16607_v30 = vld [vmem:[#allocation25_spill] sm:$0xff]  ;;  %v16612_v19 = vld [vmem:[#allocation83_spill] sm:$0xff] }
0x14d7   :  { %10844 = vrot.lane.b32.xlu1 %v10787_v47, %s11127_s21  ;;  %v10811_v3 = vcombine.high %v10787_v47, %v16171_v63  ;;  %v16596_v47 = vld [vmem:[#allocation327_spill] sm:$0xff]  ;;  %v10135_v18 = vcombine.high %v10125_v50, %v16171_v63  ;;  %v10489_v8 = vcombine.high %v14945_v41, %v14948_v21  ;;  %v16609_v21 = vld [vmem:[#allocation140_spill] sm:$0xff]  ;;  %v10812_v23 = vcombine.high %v10794_v29, %v16171_v63  ;;  %v16614_v0 = vld [vmem:[#allocation265_spill] sm:$0xff] }
0x14d8   :  { %v7485_v62 = vsel %vm383_vm1, %v16596_v47, %v16595_v45  ;;  %v10796_v45 = vcombine.high %v14981_v56, %v14984_v16  ;;  %v16623_v16 = vld [vmem:[#allocation264_spill] sm:$0xff] }
0x14d9   :  { %10840 = vrot.lane.b32.xlu0 %v10746_v13, %s11135_s28  ;;  %v715_v13 = vsel %vm403_vm11, %v714_v1, %v16597_v7  ;;  %v7486_v39 = vsel %vm385_vm2, %v7485_v62, %v16603_v59  ;;  %v16616_v1 = vld [vmem:[#allocation204_spill] sm:$0xff]  ;;  %v10503_v47 = vrot.slane %v10489_v8, %v11292_v52  ;;  %v16618_v62 = vld [vmem:[#allocation18_spill] sm:$0xff] }
0x14da   :  { %v716_v46 = vsel %vm405_vm12, %v715_v13, %v16604_v5  ;;  %v16619_v13 = vld [vmem:[#allocation207_spill] sm:$0xff]  ;;  %v16627_v5 = vld [vmem:[#allocation393_spill] sm:$0xff] }
0x14db   :  { %10545 = vrot.lane.b32.xlu1 %v10487_v35, %s11128_s22  ;;  %v3418_v35 = vsel %vm385_vm2, %v3417_v48, %v16599_v40  ;;  %v717_v6 = vsel %vm407_vm13, %v716_v46, %v16607_v30  ;;  %v16613_v48 = vld [vmem:[#allocation143_spill] sm:$0xff] }
0x14dc   :  { %v3419_v20 = vsel %vm387_vm3, %v3418_v35, %v16601_v4  ;;  %v718_v7 = vsel %vm409_vm14, %v717_v6, %v16618_v62  ;;  %v16621_v35 = vld [vmem:[#allocation31_spill] sm:$0xff]  ;;  %v10506_v4 = vcombine.high %v10496_v44, %v16171_v63  ;;  %v10507_v6 = vcombine.high %v10503_v47, %v16171_v63 }
0x14dd   :  { %10541 = vrot.lane.b32.xlu0 %v10504_v57, %s11136_s29  ;;  %v2067_v57 = vsel %vm395_vm7, %v2066_v11, %v16600_v22  ;;  %v3420_v17 = vsel %vm389_vm4, %v3419_v20, %v16609_v21  ;;  %v16620_v11 = vld [vmem:[#allocation333_spill] sm:$0xff]  ;;  %v16622_v22 = vld [vmem:[#allocation82_spill] sm:$0xff]  ;;  %v16628_v46 = vld [vmem:[#allocation391_spill] sm:$0xff] }
0x14de   :  { %v2068_v41 = vsel %vm397_vm8, %v2067_v57, %v16608_v61  ;;  %v3421_v24 = vsel %vm391_vm5, %v3420_v17, %v16613_v48  ;;  %v16624_v20 = vld [vmem:[#allocation85_spill] sm:$0xff]  ;;  %v16631_v61 = vld [vmem:[#allocation34_spill] sm:$0xff] }
0x14df   :  { %10182 = vrot.lane.b32.xlu1 %v10125_v50, %s11129_s23  ;;  %v15037_v50 = vrot.slane %v10795_v38, %v11292_v52  ;;  %v2069_v12 = vsel %vm399_vm9, %v2068_v41, %v16612_v19  ;;  %v16615_v38 = vld [vmem:[#allocation263_spill] sm:$0xff]  ;;  %v16632_v21 = vld [vmem:[#allocation145_spill] sm:$0xff]  ;;  %v16635_v19 = vld [vmem:[#allocation84_spill] sm:$0xff] }
0x14e0   :  { %v6129_v58 = vsel %vm383_vm1, %v16615_v38, %v16614_v0  ;;  %v2070_v56 = vsel %vm401_vm10, %v2069_v12, %v16622_v22  ;;  %v10136_v38 = vcombine.high %v10132_v14, %v16171_v63 }
0x14e1   :  { %10178 = vrot.lane.b32.xlu0 %v10134_v15, %s11137_s30  ;;  %v4776_v15 = vsel %vm389_vm4, %v4775_v42, %v16602_v51  ;;  %v16617_v42 = vld [vmem:[#allocation330_spill] sm:$0xff]  ;;  %v6130_v57 = vsel %vm385_vm2, %v6129_v58, %v16623_v16  ;;  %v2071_v51 = vsel %vm403_vm11, %v2070_v56, %v16624_v20  ;;  %v16638_v58 = vld [vmem:[#allocation27_spill] sm:$0xff]  ;;  %v16648_v20 = vld [vmem:[#allocation337_spill] sm:$0xff] }
0x14e2   :  { %v4777_v37 = vsel %vm391_vm5, %v4776_v15, %v16605_v25  ;;  %v16625_v15 = vld [vmem:[#allocation142_spill] sm:$0xff]  ;;  %v8841_v25 = vsel %vm383_vm1, %v16628_v46, %v16627_v5  ;;  %v2072_v12 = vsel %vm405_vm12, %v2071_v51, %v16635_v19  ;;  %v16646_v56 = vld [vmem:[#allocation147_spill] sm:$0xff]  ;;  %v16660_v19 = vld [vmem:[#allocation336_spill] sm:$0xff] }
0x14e3   :  { %10852 = vrot.lane.b32.xlu1 %v10794_v29, %s11128_s22  ;;  %v4778_v34 = vsel %vm393_vm6, %v4777_v37, %v16616_v1  ;;  %v3422_v59 = vsel %vm393_vm6, %v3421_v24, %v16625_v15  ;;  %v16629_v37 = vld [vmem:[#allocation206_spill] sm:$0xff]  ;;  %v16637_v24 = vld [vmem:[#allocation392_spill] sm:$0xff]  ;;  %v15120_v1 = vsel %vm411_vm15, %v718_v7, %v16638_v58  ;;  %v16664_v58 = vld [vmem:[#allocation279_spill] sm:$0xff] }
0x14e4   :  { %v4779_v31 = vsel %vm395_vm7, %v4778_v34, %v16619_v13  ;;  %v3423_v17 = vsel %vm395_vm7, %v3422_v59, %v16632_v21  ;;  %v8842_v0 = vsel %vm385_vm2, %v8841_v25, %v16637_v24  ;;  %v16639_v34 = vld [vmem:[#allocation87_spill] sm:$0xff]  ;;  %v16642_v13 = vld [vmem:[#allocation144_spill] sm:$0xff]  ;;  %v16651_v5 = vld [vmem:[#allocation394_spill] sm:$0xff]  ;;  %v10813_v25 = vcombine.high %v15037_v50, %v16171_v63 }
0x14e5   :  { %10848 = vrot.lane.b32.xlu0 %v10811_v3, %s11136_s29  ;;  %v16606_v3 = vld [vmem:[#allocation331_spill] sm:$0xff]  ;;  %v16649_v15 = vld [vmem:[#allocation36_spill] sm:$0xff]  ;;  %v16656_v21 = vld [vmem:[#allocation397_spill] sm:$0xff] }
0x14e6   :  { %v7487_v33 = vsel %vm387_vm3, %v7486_v39, %v16606_v3  ;;  %v16626_v39 = vld [vmem:[#allocation267_spill] sm:$0xff]  ;;  %v4780_v3 = vsel %vm397_vm8, %v4779_v31, %v16629_v37  ;;  %v3424_v31 = vsel %vm397_vm8, %v3423_v17, %v16642_v13  ;;  %v16652_v37 = vld [vmem:[#allocation86_spill] sm:$0xff]  ;;  %v16662_v24 = vld [vmem:[#allocation213_spill] sm:$0xff] }
0x14e7   :  { %10553 = vrot.lane.b32.xlu1 %v10496_v44, %s11129_s23  ;;  %v7488_v29 = vsel %vm389_vm4, %v7487_v33, %v16617_v42  ;;  %v6131_v8 = vsel %vm387_vm3, %v6130_v57, %v16626_v39  ;;  %v16630_v33 = vld [vmem:[#allocation332_spill] sm:$0xff]  ;;  %v10810_v44 = vrot.slane %v10796_v45, %v11292_v52  ;;  %v16636_v52 = vld [vmem:[#allocation266_spill] sm:$0xff]  ;;  %v2073_v42 = vsel %vm407_vm13, %v2072_v12, %v16639_v34  ;;  %v16647_v57 = vld [vmem:[#allocation211_spill] sm:$0xff] }
0x14e8   :  { %v7489_v40 = vsel %vm391_vm5, %v7488_v29, %v16620_v11  ;;  %v6132_v48 = vsel %vm389_vm4, %v6131_v8, %v16636_v52  ;;  %v16640_v29 = vld [vmem:[#allocation269_spill] sm:$0xff]  ;;  %v16643_v11 = vld [vmem:[#allocation208_spill] sm:$0xff]  ;;  %v3425_v16 = vsel %vm399_vm9, %v3424_v31, %v16646_v56  ;;  %v16668_v31 = vld [vmem:[#allocation270_spill] sm:$0xff] }
0x14e9   :  { %10549 = vrot.lane.b32.xlu0 %v10505_v28, %s11137_s30  ;;  %v16610_v28 = vld [vmem:[#allocation32_spill] sm:$0xff]  ;;  %v7490_v30 = vsel %vm393_vm6, %v7489_v40, %v16630_v33  ;;  %v6133_v45 = vsel %vm391_vm5, %v6132_v48, %v16640_v29  ;;  %v10814_v7 = vcombine.high %v10810_v44, %v16171_v63  ;;  %v16653_v33 = vld [vmem:[#allocation155_spill] sm:$0xff]  ;;  %v16659_v63 = vld [vmem:[#allocation210_spill] sm:$0xff] }
0x14ea   :  { %v1076_v32 = vsel %vm383_vm1, %v16611_v9, %v16610_v28  ;;  %v16634_v9 = vld [vmem:[#allocation335_spill] sm:$0xff]  ;;  %v16650_v39 = vld [vmem:[#allocation268_spill] sm:$0xff]  ;;  %v16661_v52 = vld [vmem:[#allocation149_spill] sm:$0xff] }
0x14eb   :  { %10190 = vrot.lane.b32.xlu1 %v10132_v14, %s11130_s24  ;;  %v16644_v14 = vld [vmem:[#allocation334_spill] sm:$0xff]  ;;  %v6134_v8 = vsel %vm393_vm6, %v6133_v45, %v16650_v39  ;;  %v16666_v45 = vld [vmem:[#allocation35_spill] sm:$0xff]  ;;  %v16672_v56 = vld [vmem:[#allocation273_spill] sm:$0xff] }
0x14ec   :  { %v16676_v39 = vld [vmem:[#allocation280_spill] sm:$0xff] }
0x14ed   :  { %10186 = vrot.lane.b32.xlu0 %v10135_v18, %s11138_s2  ;;  %v1077_v18 = vsel %vm385_vm2, %v1076_v32, %v16621_v35  ;;  %v7491_v32 = vsel %vm395_vm7, %v7490_v30, %v16634_v9  ;;  %v16654_v30 = vld [vmem:[#allocation153_spill] sm:$0xff]  ;;  %v16658_v9 = vld [vmem:[#allocation146_spill] sm:$0xff] }
0x14ee   :  { %v1078_v41 = vsel %vm387_vm3, %v1077_v18, %v16631_v61  ;;  %v7492_v35 = vsel %vm397_vm8, %v7491_v32, %v16644_v14  ;;  %v16645_v18 = vld [vmem:[#allocation33_spill] sm:$0xff]  ;;  %v16655_v61 = vld [vmem:[#allocation271_spill] sm:$0xff]  ;;  %v3426_v32 = vsel %vm401_vm10, %v3425_v16, %v16658_v9  ;;  %v16684_v9 = vld [vmem:[#allocation272_spill] sm:$0xff] }
0x14ef   :  { %10860 = vrot.lane.b32.xlu1 %v15037_v50, %s11129_s23  ;;  %v1079_v22 = vsel %vm389_vm4, %v1078_v41, %v16645_v18  ;;  %v7493_v51 = vsel %vm399_vm9, %v7492_v35, %v16648_v20  ;;  %v6135_v41 = vsel %vm395_vm7, %v6134_v8, %v16655_v61  ;;  %v3427_v48 = vsel %vm403_vm11, %v3426_v32, %v16661_v52  ;;  %v16670_v35 = vld [vmem:[#allocation38_spill] sm:$0xff]  ;;  %v16671_v18 = vld [vmem:[#allocation157_spill] sm:$0xff]  ;;  %v16674_v20 = vld [vmem:[#allocation148_spill] sm:$0xff] }
0x14f0   :  { %v1080_v59 = vsel %vm391_vm5, %v1079_v22, %v16649_v15  ;;  %v7494_v12 = vsel %vm401_vm10, %v7493_v51, %v16660_v19  ;;  %v3428_v51 = vsel %vm405_vm12, %v3427_v48, %v16674_v20  ;;  %v16675_v15 = vld [vmem:[#allocation212_spill] sm:$0xff]  ;;  %v16681_v61 = vld [vmem:[#allocation341_spill] sm:$0xff]  ;;  %v16685_v32 = vld [vmem:[#allocation398_spill] sm:$0xff] }
0x14f1   :  { %10856 = vrot.lane.b32.xlu0 %v10812_v23, %s11137_s30  ;;  %v16633_v23 = vld [vmem:[#allocation209_spill] sm:$0xff]  ;;  %v16701_v20 = vld [vmem:[#allocation274_spill] sm:$0xff] }
0x14f2   :  { %v4781_v28 = vsel %vm399_vm9, %v4780_v3, %v16633_v23  ;;  %v2074_v3 = vsel %vm409_vm14, %v2073_v42, %v16652_v37  ;;  %v16657_v23 = vld [vmem:[#allocation88_spill] sm:$0xff]  ;;  %v16665_v42 = vld [vmem:[#allocation339_spill] sm:$0xff]  ;;  %v16688_v48 = vld [vmem:[#allocation401_spill] sm:$0xff] }
0x14f3   :  { %10561 = vrot.lane.b32.xlu1 %v10503_v47, %s11130_s24  ;;  %v16641_v47 = vld [vmem:[#allocation395_spill] sm:$0xff]  ;;  %v4782_v40 = vsel %vm401_vm10, %v4781_v28, %v16643_v11  ;;  %v2075_v28 = vsel %vm411_vm15, %v2074_v3, %v16657_v23  ;;  %v7495_v29 = vsel %vm403_vm11, %v7494_v12, %v16665_v42  ;;  %v6136_v11 = vsel %vm397_vm8, %v6135_v41, %v16668_v31  ;;  %v16679_v3 = vld [vmem:[#allocation214_spill] sm:$0xff]  ;;  %v16683_v23 = vld [vmem:[#allocation156_spill] sm:$0xff] }
0x14f4   :  { %v8843_v62 = vsel %vm387_vm3, %v8842_v0, %v16641_v47  ;;  %v1081_v47 = vsel %vm393_vm6, %v1080_v59, %v16666_v45  ;;  %v6137_v16 = vsel %vm399_vm9, %v6136_v11, %v16672_v56  ;;  %v16687_v12 = vld [vmem:[#allocation275_spill] sm:$0xff]  ;;  %v16695_v11 = vld [vmem:[#allocation48_spill] sm:$0xff]  ;;  %v16699_v56 = vld [vmem:[#allocation342_spill] sm:$0xff] }
0x14f5   :  { %10557 = vrot.lane.b32.xlu0 %v10506_v4, %s11138_s2  ;;  %v4783_v4 = vsel %vm403_vm11, %v4782_v40, %v16647_v57  ;;  %v8844_v46 = vsel %vm389_vm4, %v8843_v62, %v16651_v5  ;;  %v16667_v62 = vld [vmem:[#allocation154_spill] sm:$0xff]  ;;  %v16669_v40 = vld [vmem:[#allocation396_spill] sm:$0xff]  ;;  %v16673_v57 = vld [vmem:[#allocation399_spill] sm:$0xff] }
0x14f6   :  { %v8845_v17 = vsel %vm391_vm5, %v8844_v46, %v16656_v21  ;;  %v4784_v50 = vsel %vm405_vm12, %v4783_v4, %v16659_v63  ;;  %v16677_v5 = vld [vmem:[#allocation338_spill] sm:$0xff]  ;;  %v16682_v21 = vld [vmem:[#allocation37_spill] sm:$0xff] }
0x14f7   :  { %10565 = vrot.lane.b32.xlu1 %v10507_v6, %s11139_s3  ;;  %v3788_v6 = vsel %vm383_vm1, %v16654_v30, %v16653_v33  ;;  %v4785_v0 = vsel %vm407_vm13, %v4784_v50, %v16662_v24  ;;  %v8846_v14 = vsel %vm393_vm6, %v8845_v17, %v16669_v40  ;;  %v7496_v46 = vsel %vm405_vm12, %v7495_v29, %v16677_v5  ;;  %v16680_v30 = vld [vmem:[#allocation283_spill] sm:$0xff]  ;;  %v16692_v29 = vld [vmem:[#allocation150_spill] sm:$0xff] }
0x14f8   :  { %v3789_v13 = vsel %vm385_vm2, %v3788_v6, %v16667_v62  ;;  %v8847_v4 = vsel %vm395_vm7, %v8846_v14, %v16673_v57  ;;  %v4786_v59 = vsel %vm409_vm14, %v4785_v0, %v16675_v15  ;;  %v7497_v41 = vsel %vm407_vm13, %v7496_v46, %v16681_v61  ;;  %v16686_v50 = vld [vmem:[#allocation159_spill] sm:$0xff]  ;;  %v16689_v0 = vld [vmem:[#allocation409_spill] sm:$0xff]  ;;  %v16696_v40 = vld [vmem:[#allocation46_spill] sm:$0xff] }
0x14f9   :  { %10194 = vrot.lane.b32.xlu0 %v10136_v38, %s11139_s3  ;;  %v16663_v38 = vld [vmem:[#allocation281_spill] sm:$0xff]  ;;  %v3790_v22 = vsel %vm387_vm3, %v3789_v13, %v16671_v18  ;;  %v4787_v33 = vsel %vm411_vm15, %v4786_v59, %v16679_v3  ;;  %v8848_v63 = vsel %vm397_vm8, %v8847_v4, %v16685_v32  ;;  %v16694_v13 = vld [vmem:[#allocation340_spill] sm:$0xff]  ;;  %v1383_v14 = vsel %vm383_vm1, %v16696_v40, %v16695_v11  ;;  %v16700_v57 = vld [vmem:[#allocation158_spill] sm:$0xff] }
0x14fa   :  { %v6500_v34 = vsel %vm383_vm1, %v16664_v58, %v16663_v38  ;;  %v8849_v24 = vsel %vm399_vm9, %v8848_v63, %v16688_v48  ;;  %v16690_v38 = vld [vmem:[#allocation407_spill] sm:$0xff]  ;;  %v7498_v31 = vsel %vm409_vm14, %v7497_v41, %v16694_v13  ;;  %v16698_v18 = vld [vmem:[#allocation285_spill] sm:$0xff]  ;;  %v16703_v59 = vld [vmem:[#allocation408_spill] sm:$0xff] }
0x14fb   :  { %10872 = vrot.lane.b32.xlu1 %v10814_v7, %s11139_s3  ;;  %v1082_v7 = vsel %vm395_vm7, %v1081_v47, %v16670_v35  ;;  %v6501_v8 = vsel %vm385_vm2, %v6500_v34, %v16676_v39  ;;  %v9212_v58 = vsel %vm383_vm1, %v16690_v38, %v16689_v0  ;;  %v16691_v34 = vld [vmem:[#allocation40_spill] sm:$0xff]  ;;  %v16693_v47 = vld [vmem:[#allocation282_spill] sm:$0xff]  ;;  %v16705_v46 = vld [vmem:[#allocation277_spill] sm:$0xff] }
0x14fc   :  { %v6502_v6 = vsel %vm387_vm3, %v6501_v8, %v16680_v30  ;;  %v1083_v17 = vsel %vm397_vm8, %v1082_v7, %v16682_v21  ;;  %v16697_v35 = vld [vmem:[#allocation152_spill] sm:$0xff]  ;;  %v9213_v39 = vsel %vm385_vm2, %v9212_v58, %v16703_v59  ;;  %v16704_v8 = vld [vmem:[#allocation161_spill] sm:$0xff]  ;;  %v16709_v41 = vld [vmem:[#allocation47_spill] sm:$0xff] }
0x14fd   :  { %10864 = vrot.lane.b32.xlu0 %v10813_v25, %s11138_s2  ;;  %v16678_v25 = vld [vmem:[#allocation151_spill] sm:$0xff]  ;;  %v1084_v42 = vsel %vm399_vm9, %v1083_v17, %v16691_v34  ;;  %v6503_v62 = vsel %vm389_vm4, %v6502_v6, %v16693_v47  ;;  %v1384_v21 = vsel %vm385_vm2, %v1383_v14, %v16709_v41  ;;  %v16710_v17 = vld [vmem:[#allocation284_spill] sm:$0xff]  ;;  %v16718_v58 = vld [vmem:[#allocation402_spill] sm:$0xff] }
0x14fe   :  { %v3429_v37 = vsel %vm407_vm13, %v3428_v51, %v16678_v25  ;;  %v16708_v6 = vld [vmem:[#allocation39_spill] sm:$0xff]  ;;  %v16716_v48 = vld [vmem:[#allocation160_spill] sm:$0xff]  ;;  %v16723_v40 = vld [vmem:[#allocation413_spill] sm:$0xff] }
0x14ff   :  { %10903 = vrot.lane.b32.xlu1 %v2075_v28, %s11140_s4  ;;  %v3791_v28 = vsel %vm389_vm4, %v3790_v22, %v16683_v23  ;;  %v3430_v45 = vsel %vm409_vm14, %v3429_v37, %v16692_v29  ;;  %v6504_v22 = vsel %vm391_vm5, %v6503_v62, %v16698_v18  ;;  %v16706_v37 = vld [vmem:[#allocation403_spill] sm:$0xff]  ;;  %v1085_v61 = vsel %vm401_vm10, %v1084_v42, %v16708_v6  ;;  %v16717_v0 = vld [vmem:[#allocation276_spill] sm:$0xff]  ;;  %v16719_v42 = vld [vmem:[#allocation410_spill] sm:$0xff] }
0x1500   :  { %v3792_v19 = vsel %vm391_vm5, %v3791_v28, %v16686_v50  ;;  %v3431_v7 = vsel %vm411_vm15, %v3430_v45, %v16697_v35  ;;  %v6505_v23 = vsel %vm393_vm6, %v6504_v22, %v16710_v17  ;;  %v16711_v28 = vld [vmem:[#allocation42_spill] sm:$0xff]  ;;  %v16713_v63 = vld [vmem:[#allocation171_spill] sm:$0xff]  ;;  %v16714_v50 = vld [vmem:[#allocation169_spill] sm:$0xff] }
0x1501   :  { %10868 = vrot.lane.b32.xlu0 %v10810_v44, %s11130_s24  ;;  %v6138_v44 = vsel %vm401_vm10, %v6137_v16, %v16684_v9  ;;  %v7499_v16 = vsel %vm411_vm15, %v7498_v31, %v16699_v56  ;;  %v3793_v4 = vsel %vm393_vm6, %v3792_v19, %v16700_v57  ;;  %v1086_v9 = vsel %vm403_vm11, %v1085_v61, %v16711_v28  ;;  %v16720_v45 = vld [vmem:[#allocation163_spill] sm:$0xff]  ;;  %v16721_v62 = vld [vmem:[#allocation278_spill] sm:$0xff]  ;;  %v16722_v31 = vld [vmem:[#allocation405_spill] sm:$0xff] }
0x1502   :  { %v6139_v52 = vsel %vm403_vm11, %v6138_v44, %v16687_v12  ;;  %v3794_v5 = vsel %vm395_vm7, %v3793_v4, %v16704_v8  ;;  %v16712_v44 = vld [vmem:[#allocation50_spill] sm:$0xff]  ;;  %v4095_v19 = vsel %vm383_vm1, %v16714_v50, %v16713_v63  ;;  %v16715_v12 = vld [vmem:[#allocation287_spill] sm:$0xff]  ;;  %v16724_v35 = vld [vmem:[#allocation49_spill] sm:$0xff] }
0x1503   :  { %10927 = vrot.lane.b32.xlu1 %v4787_v33, %s11140_s4  ;;  %v6140_v51 = vsel %vm405_vm12, %v6139_v52, %v16701_v20  ;;  %v16707_v33 = vld [vmem:[#allocation411_spill] sm:$0xff]  ;;  %v1385_v32 = vsel %vm387_vm3, %v1384_v21, %v16712_v44  ;;  %v6506_v52 = vsel %vm395_vm7, %v6505_v23, %v16715_v12  ;;  %v16725_v18 = vld [vmem:[#allocation170_spill] sm:$0xff]  ;;  %v16727_v57 = vld [vmem:[#allocation41_spill] sm:$0xff] }
0x1504   :  { %v6141_v25 = vsel %vm407_vm13, %v6140_v51, %v16705_v46  ;;  %v9214_v30 = vsel %vm387_vm3, %v9213_v39, %v16707_v33  ;;  %v4096_v22 = vsel %vm385_vm2, %v4095_v19, %v16725_v18  ;;  %v16726_v56 = vld [vmem:[#allocation286_spill] sm:$0xff]  ;;  %v1087_v4 = vsel %vm405_vm12, %v1086_v9, %v16727_v57  ;;  %v16728_v20 = vld [vmem:[#allocation52_spill] sm:$0xff]  ;;  %v16730_v59 = vld [vmem:[#allocation289_spill] sm:$0xff] }
0x1505   :  { %10891 = vrot.lane.b32.xlu0 %v15120_v1, %s11140_s4  ;;  %v16702_v1 = vld [vmem:[#allocation400_spill] sm:$0xff]  ;;  %v6142_v38 = vsel %vm409_vm14, %v6141_v25, %v16717_v0  ;;  %v9215_v29 = vsel %vm389_vm4, %v9214_v30, %v16719_v42  ;;  %v16732_v46 = vld [vmem:[#allocation162_spill] sm:$0xff]  ;;  %v16735_v6 = vld [vmem:[#allocation165_spill] sm:$0xff] }
0x1506   :  { %v8850_v15 = vsel %vm401_vm10, %v8849_v24, %v16702_v1  ;;  %v3795_v24 = vsel %vm397_vm8, %v3794_v5, %v16716_v48  ;;  %v6143_v13 = vsel %vm411_vm15, %v6142_v38, %v16721_v62  ;;  %v9216_v14 = vsel %vm391_vm5, %v9215_v29, %v16723_v40  ;;  %v16729_v1 = vld [vmem:[#allocation173_spill] sm:$0xff]  ;;  %v16731_v8 = vld [vmem:[#allocation44_spill] sm:$0xff]  ;;  %v16737_v21 = vld [vmem:[#allocation295_spill] sm:$0xff] }
0x1507   :  { %10966 = vrot.lane.b32.xlu1 %v7499_v16, %s11140_s4  ;;  %v8851_v3 = vsel %vm403_vm11, %v8850_v15, %v16706_v37  ;;  %v3796_v47 = vsel %vm399_vm9, %v3795_v24, %v16720_v45  ;;  %v6507_v16 = vsel %vm397_vm8, %v6506_v52, %v16726_v56  ;;  %v4097_v15 = vsel %vm387_vm3, %v4096_v22, %v16729_v1  ;;  %v16733_v37 = vld [vmem:[#allocation404_spill] sm:$0xff]  ;;  %v16736_v41 = vld [vmem:[#allocation297_spill] sm:$0xff]  ;;  %v16738_v23 = vld [vmem:[#allocation406_spill] sm:$0xff] }
0x1508   :  { %v8852_v34 = vsel %vm405_vm12, %v8851_v3, %v16718_v58  ;;  %v6508_v39 = vsel %vm399_vm9, %v6507_v16, %v16730_v59  ;;  %v1088_v5 = vsel %vm407_vm13, %v1087_v4, %v16731_v8  ;;  %v3797_v25 = vsel %vm401_vm10, %v3796_v47, %v16732_v46  ;;  %v16734_v33 = vld [vmem:[#allocation412_spill] sm:$0xff]  ;;  %v16739_v9 = vld [vmem:[#allocation415_spill] sm:$0xff]  ;;  %v16744_v0 = vld [vmem:[#allocation54_spill] sm:$0xff] }
0x1509   :  { %10915 = vrot.lane.b32.xlu0 %v3431_v7, %s11140_s4  ;;  %v8853_v11 = vsel %vm407_vm13, %v8852_v34, %v16722_v31  ;;  %v1386_v7 = vsel %vm389_vm4, %v1385_v32, %v16724_v35  ;;  %v9217_v30 = vsel %vm393_vm6, %v9216_v14, %v16734_v33  ;;  %v3798_v61 = vsel %vm403_vm11, %v3797_v25, %v16735_v6  ;;  %v16740_v32 = vld [vmem:[#allocation51_spill] sm:$0xff]  ;;  %v16741_v50 = vld [vmem:[#allocation172_spill] sm:$0xff]  ;;  %v16747_v45 = vld [vmem:[#allocation45_spill] sm:$0xff]  ;;  %v15355_v35 = vpop.permute.xlu1 %10138 }
0x150a   :  { %v1387_v51 = vsel %vm391_vm5, %v1386_v7, %v16728_v20  ;;  %v8854_v3 = vsel %vm409_vm14, %v8853_v11, %v16733_v37  ;;  %v6807_v17 = vsel %vm383_vm1, %v16737_v21, %v16736_v41  ;;  %v9218_v44 = vsel %vm395_vm7, %v9217_v30, %v16739_v9  ;;  %v16742_v12 = vld [vmem:[#allocation288_spill] sm:$0xff]  ;;  %v16743_v48 = vld [vmem:[#allocation43_spill] sm:$0xff]  ;;  %v16750_v40 = vld [vmem:[#allocation414_spill] sm:$0xff] }
0x150b   :  { %v8855_v28 = vsel %vm411_vm15, %v8854_v3, %v16738_v23  ;;  %v1388_v63 = vsel %vm393_vm6, %v1387_v51, %v16740_v32  ;;  %v4098_v19 = vsel %vm389_vm4, %v4097_v15, %v16741_v50  ;;  %v6509_v52 = vsel %vm401_vm10, %v6508_v39, %v16742_v12  ;;  %v16745_v58 = vld [vmem:[#allocation175_spill] sm:$0xff]  ;;  %v16748_v62 = vld [vmem:[#allocation164_spill] sm:$0xff]  ;;  %v16753_v16 = vld [vmem:[#allocation417_spill] sm:$0xff] }
0x150c   :  { %v1089_v24 = vsel %vm409_vm14, %v1088_v5, %v16743_v48  ;;  %v1389_v38 = vsel %vm395_vm7, %v1388_v63, %v16744_v0  ;;  %v4099_v34 = vsel %vm391_vm5, %v4098_v19, %v16745_v58  ;;  %v16746_v42 = vld [vmem:[#allocation291_spill] sm:$0xff]  ;;  %v16749_v31 = vld [vmem:[#allocation296_spill] sm:$0xff]  ;;  %v9219_v14 = vsel %vm397_vm8, %v9218_v44, %v16750_v40  ;;  %v16754_v4 = vld [vmem:[#allocation425_spill] sm:$0xff] }
0x150d   :  { %10954 = vrot.lane.b32.xlu0 %v6143_v13, %s11140_s4  ;;  %v6510_v29 = vsel %vm403_vm11, %v6509_v52, %v16746_v42  ;;  %v1090_v47 = vsel %vm411_vm15, %v1089_v24, %v16747_v45  ;;  %v3799_v13 = vsel %vm405_vm12, %v3798_v61, %v16748_v62  ;;  %v6808_v11 = vsel %vm385_vm2, %v6807_v17, %v16749_v31  ;;  %v16751_v7 = vld [vmem:[#allocation167_spill] sm:$0xff]  ;;  %v16756_v1 = vld [vmem:[#allocation53_spill] sm:$0xff]  ;;  %v16757_v59 = vld [vmem:[#allocation174_spill] sm:$0xff] }
0x150e   :  { %v3800_v18 = vsel %vm407_vm13, %v3799_v13, %v16751_v7  ;;  %v16752_v22 = vld [vmem:[#allocation299_spill] sm:$0xff]  ;;  %v9220_v57 = vsel %vm399_vm9, %v9219_v14, %v16753_v16  ;;  %v1390_v15 = vsel %vm397_vm8, %v1389_v38, %v16756_v1  ;;  %v4100_v39 = vsel %vm393_vm6, %v4099_v34, %v16757_v59  ;;  %v16758_v8 = vld [vmem:[#allocation290_spill] sm:$0xff]  ;;  %v16759_v46 = vld [vmem:[#allocation56_spill] sm:$0xff] }
0x150f   :  { %v6809_v56 = vsel %vm387_vm3, %v6808_v11, %v16752_v22  ;;  %v16755_v20 = vld [vmem:[#allocation423_spill] sm:$0xff]  ;;  %v6511_v5 = vsel %vm405_vm12, %v6510_v29, %v16758_v8  ;;  %v1391_v25 = vsel %vm399_vm9, %v1390_v15, %v16759_v46  ;;  %v16760_v37 = vld [vmem:[#allocation177_spill] sm:$0xff]  ;;  %v16762_v6 = vld [vmem:[#allocation166_spill] sm:$0xff]  ;;  %v15425_v46 = vpop.permute.xlu0 %10142 }
0x1510   :  { %v9519_v51 = vsel %vm383_vm1, %v16755_v20, %v16754_v4  ;;  %v4101_v3 = vsel %vm395_vm7, %v4100_v39, %v16760_v37  ;;  %v16761_v33 = vld [vmem:[#allocation293_spill] sm:$0xff]  ;;  %v3801_v61 = vsel %vm409_vm14, %v3800_v18, %v16762_v6  ;;  %v16763_v41 = vld [vmem:[#allocation298_spill] sm:$0xff]  ;;  %v16764_v17 = vld [vmem:[#allocation416_spill] sm:$0xff] }
0x1511   :  { %10978 = vrot.lane.b32.xlu0 %v8855_v28, %s11140_s4  ;;  %v6512_v30 = vsel %vm407_vm13, %v6511_v5, %v16761_v33  ;;  %v6810_v21 = vsel %vm389_vm4, %v6809_v56, %v16763_v41  ;;  %v9221_v23 = vsel %vm401_vm10, %v9220_v57, %v16764_v17  ;;  %v16765_v28 = vld [vmem:[#allocation424_spill] sm:$0xff]  ;;  %v16767_v50 = vld [vmem:[#allocation301_spill] sm:$0xff]  ;;  %v16768_v12 = vld [vmem:[#allocation419_spill] sm:$0xff] }
0x1512   :  { %v9520_v9 = vsel %vm385_vm2, %v9519_v51, %v16765_v28  ;;  %v16766_v32 = vld [vmem:[#allocation168_spill] sm:$0xff]  ;;  %v6811_v19 = vsel %vm391_vm5, %v6810_v21, %v16767_v50  ;;  %v9222_v52 = vsel %vm403_vm11, %v9221_v23, %v16768_v12  ;;  %v16769_v48 = vld [vmem:[#allocation427_spill] sm:$0xff]  ;;  %v16773_v45 = vld [vmem:[#allocation58_spill] sm:$0xff] }
0x1513   :  { %v3802_v63 = vsel %vm411_vm15, %v3801_v61, %v16766_v32  ;;  %v9521_v24 = vsel %vm387_vm3, %v9520_v9, %v16769_v48  ;;  %v16770_v0 = vld [vmem:[#allocation55_spill] sm:$0xff]  ;;  %v16771_v58 = vld [vmem:[#allocation176_spill] sm:$0xff]  ;;  %v16775_v31 = vld [vmem:[#allocation294_spill] sm:$0xff] }
0x1514   :  { %v1392_v38 = vsel %vm401_vm10, %v1391_v25, %v16770_v0  ;;  %v4102_v34 = vsel %vm397_vm8, %v4101_v3, %v16771_v58  ;;  %v16772_v42 = vld [vmem:[#allocation292_spill] sm:$0xff]  ;;  %v16774_v62 = vld [vmem:[#allocation179_spill] sm:$0xff]  ;;  %v16777_v7 = vld [vmem:[#allocation418_spill] sm:$0xff] }
0x1515   :  { %10895 = vrot.lane.b32.xlu0 %v1090_v47, %s11141_s5  ;;  %v6513_v29 = vsel %vm409_vm14, %v6512_v30, %v16772_v42  ;;  %v1393_v47 = vsel %vm403_vm11, %v1392_v38, %v16773_v45  ;;  %v4103_v13 = vsel %vm399_vm9, %v4102_v34, %v16774_v62  ;;  %v16776_v40 = vld [vmem:[#allocation300_spill] sm:$0xff]  ;;  %v9223_v18 = vsel %vm405_vm12, %v9222_v52, %v16777_v7  ;;  %v16778_v22 = vld [vmem:[#allocation426_spill] sm:$0xff]  ;;  %v16779_v4 = vld [vmem:[#allocation303_spill] sm:$0xff]  ;;  %v10147_v42 = vpop.permute.xlu0 %10146 }
0x1516   :  { %v6514_v11 = vsel %vm411_vm15, %v6513_v29, %v16775_v31  ;;  %v6812_v14 = vsel %vm393_vm6, %v6811_v19, %v16776_v40  ;;  %v9522_v56 = vsel %vm389_vm4, %v9521_v24, %v16778_v22  ;;  %v16780_v51 = vld [vmem:[#allocation421_spill] sm:$0xff]  ;;  %v16784_v37 = vld [vmem:[#allocation178_spill] sm:$0xff]  ;;  %v16786_v6 = vld [vmem:[#allocation420_spill] sm:$0xff] }
0x1517   :  { %v10510_v44 = vpop.permute.xlu1 %10509  ;;  %v6813_v20 = vsel %vm395_vm7, %v6812_v14, %v16779_v4  ;;  %v9224_v1 = vsel %vm407_vm13, %v9223_v18, %v16780_v51  ;;  %v16781_v15 = vld [vmem:[#allocation429_spill] sm:$0xff]  ;;  %v4104_v3 = vsel %vm401_vm10, %v4103_v13, %v16784_v37  ;;  %v16785_v33 = vld [vmem:[#allocation302_spill] sm:$0xff]  ;;  %v16787_v41 = vld [vmem:[#allocation428_spill] sm:$0xff] }
0x1518   :  { %v10568_v16 = vsel %vm383_vm1, %v14795_v60, %v10510_v44  ;;  %v9523_v59 = vsel %vm391_vm5, %v9522_v56, %v16781_v15  ;;  %v16782_v8 = vld [vmem:[#allocation57_spill] sm:$0xff]  ;;  %v16783_v60 = vld [vmem:[#allocation60_spill] sm:$0xff]  ;;  %v6814_v30 = vsel %vm397_vm8, %v6813_v20, %v16785_v33  ;;  %v9225_v61 = vsel %vm409_vm14, %v9224_v1, %v16786_v6  ;;  %v16790_v44 = vld [vmem:[#allocation422_spill] sm:$0xff] }
0x1519   :  { %10919 = vrot.lane.b32.xlu0 %v3802_v63, %s11141_s5  ;;  %v1394_v5 = vsel %vm405_vm12, %v1393_v47, %v16782_v8  ;;  %v9524_v21 = vsel %vm393_vm6, %v9523_v59, %v16787_v41  ;;  %v16788_v17 = vld [vmem:[#allocation181_spill] sm:$0xff]  ;;  %v9226_v32 = vsel %vm411_vm15, %v9225_v61, %v16790_v44  ;;  %v16791_v63 = vld [vmem:[#allocation431_spill] sm:$0xff]  ;;  %v16793_v48 = vld [vmem:[#allocation180_spill] sm:$0xff] }
0x151a   :  { %v1395_v25 = vsel %vm407_vm13, %v1394_v5, %v16783_v60  ;;  %v4105_v23 = vsel %vm403_vm11, %v4104_v3, %v16788_v17  ;;  %v16789_v28 = vld [vmem:[#allocation305_spill] sm:$0xff]  ;;  %v9525_v50 = vsel %vm395_vm7, %v9524_v21, %v16791_v63  ;;  %v16792_v12 = vld [vmem:[#allocation59_spill] sm:$0xff]  ;;  %v16794_v0 = vld [vmem:[#allocation304_spill] sm:$0xff] }
0x151b   :  { %v10514_v57 = vpop.permute.xlu1 %10513  ;;  %v6815_v9 = vsel %vm399_vm9, %v6814_v30, %v16789_v28  ;;  %v1396_v52 = vsel %vm409_vm14, %v1395_v25, %v16792_v12  ;;  %v4106_v24 = vsel %vm405_vm12, %v4105_v23, %v16793_v48  ;;  %v16795_v58 = vld [vmem:[#allocation430_spill] sm:$0xff]  ;;  %v16796_v29 = vld [vmem:[#allocation61_spill] sm:$0xff]  ;;  %v16797_v47 = vld [vmem:[#allocation183_spill] sm:$0xff] }
0x151c   :  { %v10569_v39 = vsel %vm385_vm2, %v10568_v16, %v10514_v57  ;;  %v6816_v38 = vsel %vm401_vm10, %v6815_v9, %v16794_v0  ;;  %v9526_v34 = vsel %vm397_vm8, %v9525_v50, %v16795_v58  ;;  %v1397_v45 = vsel %vm411_vm15, %v1396_v52, %v16796_v29  ;;  %v16798_v13 = vld [vmem:[#allocation307_spill] sm:$0xff]  ;;  %v16800_v7 = vld [vmem:[#allocation182_spill] sm:$0xff]  ;;  %v16802_v16 = vld [vmem:[#allocation432_spill] sm:$0xff] }
0x151d   :  { %10958 = vrot.lane.b32.xlu0 %v6514_v11, %s11141_s5  ;;  %v4107_v62 = vsel %vm407_vm13, %v4106_v24, %v16797_v47  ;;  %v6817_v31 = vsel %vm403_vm11, %v6816_v38, %v16798_v13  ;;  %v16799_v11 = vld [vmem:[#allocation433_spill] sm:$0xff]  ;;  %v16801_v22 = vld [vmem:[#allocation306_spill] sm:$0xff]  ;;  %v16803_v20 = vld [vmem:[#allocation184_spill] sm:$0xff] }
0x151e   :  { %v9527_v40 = vsel %vm399_vm9, %v9526_v34, %v16799_v11  ;;  %v4108_v18 = vsel %vm409_vm14, %v4107_v62, %v16800_v7  ;;  %v6818_v56 = vsel %vm405_vm12, %v6817_v31, %v16801_v22  ;;  %v16804_v1 = vld [vmem:[#allocation309_spill] sm:$0xff]  ;;  %v16805_v59 = vld [vmem:[#allocation435_spill] sm:$0xff]  ;;  %v16806_v37 = vld [vmem:[#allocation308_spill] sm:$0xff]  ;;  %v10197_v7 = vsel %vm383_vm1, %v14779_v53, %v15355_v35 }
0x151f   :  { %v15446_v19 = vpop.permute.xlu1 %10150  ;;  %v9528_v57 = vsel %vm401_vm10, %v9527_v40, %v16802_v16  ;;  %v4109_v51 = vsel %vm411_vm15, %v4108_v18, %v16803_v20  ;;  %v6819_v15 = vsel %vm407_vm13, %v6818_v56, %v16804_v1  ;;  %v16807_v33 = vld [vmem:[#allocation434_spill] sm:$0xff]  ;;  %v16809_v21 = vld [vmem:[#allocation437_spill] sm:$0xff]  ;;  %v16810_v28 = vld [vmem:[#allocation436_spill] sm:$0xff]  ;;  %v10198_v16 = vsel %vm385_vm2, %v10197_v7, %v15425_v46 }
0x1520   :  { %v9529_v8 = vsel %vm403_vm11, %v9528_v57, %v16805_v59  ;;  %v6820_v3 = vsel %vm409_vm14, %v6819_v15, %v16806_v37  ;;  %v16808_v61 = vld [vmem:[#allocation310_spill] sm:$0xff]  ;;  %v16812_v18 = vld [vmem:[#allocation91_spill] sm:$0xff]  ;;  %v16813_v22 = vld [vmem:[#allocation89_spill] sm:$0xff]  ;;  %v10199_v59 = vsel %vm387_vm3, %v10198_v16, %v10147_v42 }
0x1521   :  { %10982 = vrot.lane.b32.xlu0 %v9226_v32, %s11141_s5  ;;  %v9530_v30 = vsel %vm405_vm12, %v9529_v8, %v16807_v33  ;;  %v6821_v41 = vsel %vm411_vm15, %v6820_v3, %v16808_v61  ;;  %v16811_v32 = vld [vmem:[#allocation438_spill] sm:$0xff]  ;;  %v2432_v56 = vsel %vm383_vm1, %v16813_v22, %v16812_v18  ;;  %v16815_v1 = vld [vmem:[#allocation93_spill] sm:$0xff]  ;;  %v10200_v35 = vsel %vm389_vm4, %v10199_v59, %v15446_v19  ;;  %v16818_v37 = vld [vmem:[#allocation92_spill] sm:$0xff] }
0x1522   :  { %v9531_v17 = vsel %vm407_vm13, %v9530_v30, %v16809_v21  ;;  %v16816_v8 = vld [vmem:[#allocation217_spill] sm:$0xff]  ;;  %v16819_v33 = vld [vmem:[#allocation95_spill] sm:$0xff]  ;;  %v16828_v18 = vld [vmem:[#allocation344_spill] sm:$0xff] }
0x1523   :  { %v9532_v9 = vsel %vm409_vm14, %v9531_v17, %v16810_v28  ;;  %v16821_v61 = vld [vmem:[#allocation219_spill] sm:$0xff]  ;;  %v16822_v28 = vld [vmem:[#allocation345_spill] sm:$0xff] }
0x1524   :  { %v9533_v63 = vsel %vm411_vm15, %v9532_v9, %v16811_v32  ;;  %v16823_v9 = vld [vmem:[#allocation343_spill] sm:$0xff] }
0x1525   :  { %v10821_v14 = vpop.permute.xlu1 %10820  ;;  %10899 = vrot.lane.b32.xlu0 %v1397_v45, %s11142_s6 }
0x1527   :  { %v10817_v4 = vpop.permute.xlu0 %10816 }
0x1528   :  { %v10875_v5 = vsel %vm383_vm1, %v14815_v27, %v10817_v4  ;;  %v16814_v4 = vld [vmem:[#allocation90_spill] sm:$0xff] }
0x1529   :  { %v15480_v60 = vpop.permute.xlu1 %10521  ;;  %10923 = vrot.lane.b32.xlu0 %v4109_v51, %s11142_s6  ;;  %v10876_v25 = vsel %vm385_vm2, %v10875_v5, %v10821_v14  ;;  %v2433_v20 = vsel %vm385_vm2, %v2432_v56, %v16814_v4  ;;  %v16817_v5 = vld [vmem:[#allocation215_spill] sm:$0xff] }
0x152a   :  { %v2434_v15 = vsel %vm387_vm3, %v2433_v20, %v16815_v1  ;;  %v5144_v53 = vsel %vm383_vm1, %v16817_v5, %v16816_v8  ;;  %v16829_v4 = vld [vmem:[#allocation347_spill] sm:$0xff]  ;;  %v16830_v1 = vld [vmem:[#allocation96_spill] sm:$0xff] }
0x152b   :  { %v10518_v6 = vpop.permute.xlu0 %10517  ;;  %v2435_v3 = vsel %vm389_vm4, %v2434_v15, %v16818_v37  ;;  %v16831_v8 = vld [vmem:[#allocation99_spill] sm:$0xff]  ;;  %v16834_v37 = vld [vmem:[#allocation220_spill] sm:$0xff] }
0x152c   :  { %v15493_v27 = vsel %vm387_vm3, %v10569_v39, %v10518_v6  ;;  %v2436_v30 = vsel %vm391_vm5, %v2435_v3, %v16819_v33  ;;  %v16820_v6 = vld [vmem:[#allocation216_spill] sm:$0xff]  ;;  %v16835_v3 = vld [vmem:[#allocation223_spill] sm:$0xff] }
0x152d   :  { %v10159_v23 = vpop.permute.xlu1 %10158  ;;  %10962 = vrot.lane.b32.xlu0 %v6821_v41, %s11142_s6  ;;  %v5145_v42 = vsel %vm385_vm2, %v5144_v53, %v16820_v6  ;;  %v16832_v53 = vld [vmem:[#allocation107_spill] sm:$0xff] }
0x152e   :  { %v5146_v41 = vsel %vm387_vm3, %v5145_v42, %v16821_v61  ;;  %v16837_v61 = vld [vmem:[#allocation349_spill] sm:$0xff] }
0x152f   :  { %v10155_v44 = vpop.permute.xlu0 %10154 }
0x1530   :  { %v10201_v46 = vsel %vm391_vm5, %v10200_v35, %v10155_v44  ;;  %v7856_v44 = vsel %vm383_vm1, %v16823_v9, %v16822_v28  ;;  %v16833_v35 = vld [vmem:[#allocation105_spill] sm:$0xff]  ;;  %v16838_v28 = vld [vmem:[#allocation98_spill] sm:$0xff] }
0x1531   :  { %v10829_v50 = vpop.permute.xlu1 %10828  ;;  %10986 = vrot.lane.b32.xlu0 %v9533_v63, %s11142_s6  ;;  %v10202_v21 = vsel %vm393_vm6, %v10201_v46, %v10159_v23  ;;  %v16824_v63 = vld [vmem:[#allocation94_spill] sm:$0xff]  ;;  %v16827_v23 = vld [vmem:[#allocation221_spill] sm:$0xff]  ;;  %v7857_v22 = vsel %vm385_vm2, %v7856_v44, %v16828_v18  ;;  %v2739_v46 = vsel %vm383_vm1, %v16833_v35, %v16832_v53  ;;  %v16844_v18 = vld [vmem:[#allocation348_spill] sm:$0xff] }
0x1532   :  { %v16839_v44 = vld [vmem:[#allocation106_spill] sm:$0xff]  ;;  %v16849_v53 = vld [vmem:[#allocation108_spill] sm:$0xff] }
0x1533   :  { %v10825_v12 = vpop.permute.xlu0 %10824 }
0x1534   :  { %v10877_v52 = vsel %vm387_vm3, %v10876_v25, %v10825_v12  ;;  %v16825_v12 = vld [vmem:[#allocation97_spill] sm:$0xff] }
0x1535   :  { %v15502_v48 = vpop.permute.xlu1 %10529  ;;  %v10878_v39 = vsel %vm389_vm4, %v10877_v52, %v10829_v50  ;;  %v2437_v50 = vsel %vm393_vm6, %v2436_v30, %v16824_v63  ;;  %v16836_v30 = vld [vmem:[#allocation346_spill] sm:$0xff]  ;;  %v10571_v63 = vsel %vm389_vm4, %v15493_v27, %v15480_v60 }
0x1536   :  { %v2438_v52 = vsel %vm395_vm7, %v2437_v50, %v16825_v12  ;;  %v16840_v50 = vld [vmem:[#allocation101_spill] sm:$0xff] }
0x1537   :  { %v10526_v24 = vpop.permute.xlu0 %10525  ;;  %v2439_v15 = vsel %vm397_vm8, %v2438_v52, %v16830_v1  ;;  %v16841_v12 = vld [vmem:[#allocation109_spill] sm:$0xff]  ;;  %v16847_v1 = vld [vmem:[#allocation351_spill] sm:$0xff] }
0x1538   :  { %v2440_v5 = vsel %vm399_vm9, %v2439_v15, %v16831_v8 }
0x1539   :  { %v10167_v0 = vpop.permute.xlu1 %10166  ;;  %v2441_v9 = vsel %vm401_vm10, %v2440_v5, %v16838_v28 }
0x153b   :  { %v10163_v38 = vpop.permute.xlu0 %10162 }
0x153c   :  { %v10203_v32 = vsel %vm395_vm7, %v10202_v21, %v10163_v38  ;;  %v7858_v38 = vsel %vm387_vm3, %v7857_v22, %v16829_v4  ;;  %v16845_v4 = vld [vmem:[#allocation233_spill] sm:$0xff] }
0x153d   :  { %v15505_v58 = vpop.permute.xlu1 %10836  ;;  %v10204_v56 = vsel %vm397_vm8, %v10203_v32, %v10167_v0  ;;  %v2740_v32 = vsel %vm385_vm2, %v2739_v46, %v16839_v44  ;;  %v16856_v44 = vld [vmem:[#allocation235_spill] sm:$0xff] }
0x153e   :  { %v2741_v52 = vsel %vm387_vm3, %v2740_v32, %v16841_v12 }
0x153f   :  { %v10833_v34 = vpop.permute.xlu0 %10832  ;;  %v2742_v35 = vsel %vm389_vm4, %v2741_v52, %v16849_v53 }
0x1540   :  { %v15508_v29 = vsel %vm391_vm5, %v10878_v39, %v10833_v34  ;;  %v16826_v39 = vld [vmem:[#allocation218_spill] sm:$0xff] }
0x1541   :  { %v15510_v45 = vpop.permute.xlu1 %10537  ;;  %v5147_v34 = vsel %vm389_vm4, %v5146_v41, %v16826_v39  ;;  %v16842_v39 = vld [vmem:[#allocation222_spill] sm:$0xff] }
0x1542   :  { %v5148_v7 = vsel %vm391_vm5, %v5147_v34, %v16827_v23  ;;  %v16843_v23 = vld [vmem:[#allocation225_spill] sm:$0xff] }
0x1543   :  { %v15512_v47 = vpop.permute.xlu0 %10533  ;;  %v5149_v0 = vsel %vm393_vm6, %v5148_v7, %v16834_v37 }
0x1544   :  { %v5150_v33 = vsel %vm395_vm7, %v5149_v0, %v16835_v3  ;;  %v16851_v0 = vld [vmem:[#allocation111_spill] sm:$0xff] }
0x1545   :  { %v10175_v62 = vpop.permute.xlu1 %10174  ;;  %v5151_v34 = vsel %vm397_vm8, %v5150_v33, %v16842_v39  ;;  %v2743_v3 = vsel %vm391_vm5, %v2742_v35, %v16851_v0  ;;  %v16852_v33 = vld [vmem:[#allocation224_spill] sm:$0xff]  ;;  %v16860_v39 = vld [vmem:[#allocation102_spill] sm:$0xff]  ;;  %v16868_v35 = vld [vmem:[#allocation229_spill] sm:$0xff] }
0x1546   :  { %v5152_v7 = vsel %vm399_vm9, %v5151_v34, %v16843_v23  ;;  %v16870_v0 = vld [vmem:[#allocation355_spill] sm:$0xff] }
0x1547   :  { %v10171_v13 = vpop.permute.xlu0 %10170 }
0x1548   :  { %v10205_v20 = vsel %vm399_vm9, %v10204_v56, %v10171_v13  ;;  %v7859_v13 = vsel %vm389_vm4, %v7858_v38, %v16836_v30  ;;  %v16846_v38 = vld [vmem:[#allocation231_spill] sm:$0xff]  ;;  %v5153_v30 = vsel %vm401_vm10, %v5152_v7, %v16852_v33 }
0x1549   :  { %v15514_v31 = vpop.permute.xlu1 %10844  ;;  %v10206_v6 = vsel %vm401_vm10, %v10205_v20, %v10175_v62  ;;  %v7860_v41 = vsel %vm391_vm5, %v7859_v13, %v16837_v61  ;;  %v2442_v62 = vsel %vm403_vm11, %v2441_v9, %v16840_v50  ;;  %v5451_v20 = vsel %vm383_vm1, %v16846_v38, %v16845_v4  ;;  %v16853_v13 = vld [vmem:[#allocation227_spill] sm:$0xff]  ;;  %v16854_v61 = vld [vmem:[#allocation232_spill] sm:$0xff] }
0x154a   :  { %v7861_v22 = vsel %vm393_vm6, %v7860_v41, %v16844_v18  ;;  %v5452_v41 = vsel %vm385_vm2, %v5451_v20, %v16854_v61  ;;  %v16864_v20 = vld [vmem:[#allocation226_spill] sm:$0xff] }
0x154b   :  { %v15516_v11 = vpop.permute.xlu0 %10840  ;;  %v7862_v15 = vsel %vm395_vm7, %v7861_v22, %v16847_v1  ;;  %v5453_v32 = vsel %vm387_vm3, %v5452_v41, %v16856_v44  ;;  %v16862_v22 = vld [vmem:[#allocation104_spill] sm:$0xff]  ;;  %v16876_v44 = vld [vmem:[#allocation354_spill] sm:$0xff] }
0x154d   :  { %v15518_v40 = vpop.permute.xlu1 %10545 }
0x154f   :  { %v15520_v14 = vpop.permute.xlu0 %10541 }
0x1551   :  { %v10183_v51 = vpop.permute.xlu1 %10182 }
0x1553   :  { %v10179_v57 = vpop.permute.xlu0 %10178 }
0x1554   :  { %v10207_v21 = vsel %vm403_vm11, %v10206_v6, %v10179_v57  ;;  %v10572_v57 = vsel %vm391_vm5, %v10571_v63, %v10526_v24  ;;  %v16848_v24 = vld [vmem:[#allocation100_spill] sm:$0xff]  ;;  %v5154_v6 = vsel %vm403_vm11, %v5153_v30, %v16853_v13  ;;  %v16857_v63 = vld [vmem:[#allocation353_spill] sm:$0xff] }
0x1555   :  { %v15552_v17 = vpop.permute.xlu1 %10852  ;;  %v10208_v60 = vsel %vm405_vm12, %v10207_v21, %v10183_v51  ;;  %v2443_v5 = vsel %vm405_vm12, %v2442_v62, %v16848_v24  ;;  %v10573_v46 = vsel %vm393_vm6, %v10572_v57, %v15502_v48  ;;  %v16850_v51 = vld [vmem:[#allocation103_spill] sm:$0xff]  ;;  %v16855_v21 = vld [vmem:[#allocation350_spill] sm:$0xff]  ;;  %v16858_v62 = vld [vmem:[#allocation361_spill] sm:$0xff]  ;;  %v5155_v1 = vsel %vm405_vm12, %v5154_v6, %v16864_v20 }
0x1556   :  { %v2444_v37 = vsel %vm407_vm13, %v2443_v5, %v16850_v51  ;;  %v7863_v48 = vsel %vm397_vm8, %v7862_v15, %v16855_v21  ;;  %v16861_v57 = vld [vmem:[#allocation110_spill] sm:$0xff]  ;;  %v16867_v5 = vld [vmem:[#allocation360_spill] sm:$0xff]  ;;  %v16869_v51 = vld [vmem:[#allocation237_spill] sm:$0xff] }
0x1557   :  { %v15540_v25 = vpop.permute.xlu0 %10848  ;;  %v7864_v50 = vsel %vm399_vm9, %v7863_v48, %v16857_v63  ;;  %v2445_v34 = vsel %vm409_vm14, %v2444_v37, %v16860_v39  ;;  %v2744_v23 = vsel %vm393_vm6, %v2743_v3, %v16861_v57  ;;  %v16865_v15 = vld [vmem:[#allocation234_spill] sm:$0xff]  ;;  %v16871_v3 = vld [vmem:[#allocation363_spill] sm:$0xff]  ;;  %v16872_v30 = vld [vmem:[#allocation112_spill] sm:$0xff] }
0x1558   :  { %v16873_v6 = vld [vmem:[#allocation115_spill] sm:$0xff]  ;;  %v16874_v21 = vld [vmem:[#allocation228_spill] sm:$0xff]  ;;  %v16877_v63 = vld [vmem:[#allocation362_spill] sm:$0xff] }
0x1559   :  { %v15576_v59 = vpop.permute.xlu1 %10553 }
0x155b   :  { %v15554_v19 = vpop.permute.xlu0 %10549 }
0x155d   :  { %v10191_v56 = vpop.permute.xlu1 %10190 }
0x155f   :  { %v10187_v16 = vpop.permute.xlu0 %10186 }
0x1560   :  { %v10209_v8 = vsel %vm407_vm13, %v10208_v60, %v10187_v16  ;;  %v10574_v16 = vsel %vm395_vm7, %v10573_v46, %v15512_v47  ;;  %v16859_v47 = vld [vmem:[#allocation359_spill] sm:$0xff]  ;;  %v16863_v60 = vld [vmem:[#allocation113_spill] sm:$0xff]  ;;  %v5156_v46 = vsel %vm407_vm13, %v5155_v1, %v16868_v35  ;;  %v16885_v1 = vld [vmem:[#allocation356_spill] sm:$0xff] }
0x1561   :  { %v10210_v28 = vsel %vm409_vm14, %v10209_v8, %v10191_v56  ;;  %v8163_v12 = vsel %vm383_vm1, %v16859_v47, %v16858_v62  ;;  %v10575_v7 = vsel %vm397_vm8, %v10574_v16, %v15510_v45  ;;  %v15655_v18 = vpop.permute.xlu1 %10860  ;;  %v2446_v56 = vsel %vm411_vm15, %v2445_v34, %v16862_v22  ;;  %v16866_v45 = vld [vmem:[#allocation352_spill] sm:$0xff]  ;;  %v16878_v62 = vld [vmem:[#allocation230_spill] sm:$0xff]  ;;  %v16881_v34 = vld [vmem:[#allocation365_spill] sm:$0xff] }
0x1562   :  { %v2745_v4 = vsel %vm395_vm7, %v2744_v23, %v16863_v60  ;;  %v10576_v38 = vsel %vm399_vm9, %v10575_v7, %v15520_v14  ;;  %v5454_v8 = vsel %vm389_vm4, %v5453_v32, %v16865_v15  ;;  %v7865_v24 = vsel %vm401_vm10, %v7864_v50, %v16866_v45  ;;  %v16882_v7 = vld [vmem:[#allocation114_spill] sm:$0xff]  ;;  %v16883_v60 = vld [vmem:[#allocation117_spill] sm:$0xff]  ;;  %v16889_v35 = vld [vmem:[#allocation367_spill] sm:$0xff] }
0x1563   :  { %v15590_v42 = vpop.permute.xlu0 %10856  ;;  %v8164_v53 = vsel %vm385_vm2, %v8163_v12, %v16867_v5  ;;  %v5455_v37 = vsel %vm391_vm5, %v5454_v8, %v16869_v51  ;;  %v7866_v14 = vsel %vm403_vm11, %v7865_v24, %v16870_v0  ;;  %v2746_v16 = vsel %vm397_vm8, %v2745_v4, %v16872_v30  ;;  %v16879_v12 = vld [vmem:[#allocation239_spill] sm:$0xff]  ;;  %v16886_v8 = vld [vmem:[#allocation364_spill] sm:$0xff]  ;;  %v16888_v5 = vld [vmem:[#allocation358_spill] sm:$0xff] }
0x1564   :  { %v8165_v33 = vsel %vm387_vm3, %v8164_v53, %v16871_v3  ;;  %v10577_v13 = vsel %vm401_vm10, %v10576_v38, %v15518_v40  ;;  %v2747_v61 = vsel %vm399_vm9, %v2746_v16, %v16873_v6  ;;  %v5157_v48 = vsel %vm409_vm14, %v5156_v46, %v16874_v21  ;;  %v16884_v38 = vld [vmem:[#allocation238_spill] sm:$0xff]  ;;  %v16895_v21 = vld [vmem:[#allocation369_spill] sm:$0xff] }
0x1565   :  { %v10578_v41 = vsel %vm403_vm11, %v10577_v13, %v15554_v19  ;;  %v7867_v32 = vsel %vm405_vm12, %v7866_v14, %v16876_v44  ;;  %v8166_v40 = vsel %vm389_vm4, %v8165_v33, %v16877_v63  ;;  %v10562_v50 = vpop.permute.xlu1 %10561  ;;  %v5158_v47 = vsel %vm411_vm15, %v5157_v48, %v16878_v62  ;;  %v16880_v19 = vld [vmem:[#allocation357_spill] sm:$0xff]  ;;  %v16891_v14 = vld [vmem:[#allocation119_spill] sm:$0xff]  ;;  %v16892_v33 = vld [vmem:[#allocation240_spill] sm:$0xff] }
0x1566   :  { %v7868_v39 = vsel %vm407_vm13, %v7867_v32, %v16880_v19  ;;  %v8167_v57 = vsel %vm391_vm5, %v8166_v40, %v16881_v34  ;;  %v10579_v23 = vsel %vm405_vm12, %v10578_v41, %v15576_v59  ;;  %v2748_v22 = vsel %vm401_vm10, %v2747_v61, %v16882_v7  ;;  %v16887_v59 = vld [vmem:[#allocation241_spill] sm:$0xff]  ;;  %v16893_v16 = vld [vmem:[#allocation366_spill] sm:$0xff]  ;;  %v16894_v61 = vld [vmem:[#allocation243_spill] sm:$0xff] }
0x1567   :  { %v10558_v27 = vpop.permute.xlu0 %10557  ;;  %v2749_v4 = vsel %vm403_vm11, %v2748_v22, %v16883_v60  ;;  %v7869_v15 = vsel %vm409_vm14, %v7868_v39, %v16885_v1  ;;  %v8168_v45 = vsel %vm393_vm6, %v8167_v57, %v16886_v8  ;;  %v10880_v6 = vsel %vm393_vm6, %v15508_v29, %v15505_v58  ;;  %v16896_v44 = vld [vmem:[#allocation118_spill] sm:$0xff]  ;;  %v16898_v58 = vld [vmem:[#allocation368_spill] sm:$0xff] }
0x1568   :  { %v7870_v53 = vsel %vm411_vm15, %v7869_v15, %v16888_v5  ;;  %v16897_v63 = vld [vmem:[#allocation242_spill] sm:$0xff]  ;;  %v16899_v62 = vld [vmem:[#allocation120_spill] sm:$0xff] }
0x1569   :  { %v10566_v46 = vpop.permute.xlu1 %10565  ;;  %v16902_v57 = vld [vmem:[#allocation244_spill] sm:$0xff]  ;;  %v16903_v7 = vld [vmem:[#allocation370_spill] sm:$0xff] }
0x156a   :  { %v16906_v1 = vld [vmem:[#allocation372_spill] sm:$0xff] }
0x156b   :  { %v10195_v9 = vpop.permute.xlu0 %10194 }
0x156c   :  { %v10211_v52 = vsel %vm411_vm15, %v10210_v28, %v10195_v9  ;;  %v16875_v28 = vld [vmem:[#allocation236_spill] sm:$0xff] }
0x156d   :  { %10990 = vrot.lane.b32.xlu1 %v10211_v52, %s11140_s4  ;;  %v5456_v9 = vsel %vm393_vm6, %v5455_v37, %v16875_v28  ;;  %v16890_v37 = vld [vmem:[#allocation116_spill] sm:$0xff]  ;;  %v10881_v28 = vsel %vm395_vm7, %v10880_v6, %v15516_v11  ;;  %v16900_v11 = vld [vmem:[#allocation245_spill] sm:$0xff]  ;;  %v10873_v5 = vpop.permute.xlu1 %10872 }
0x156e   :  { %v5457_v52 = vsel %vm395_vm7, %v5456_v9, %v16879_v12  ;;  %v2750_v0 = vsel %vm405_vm12, %v2749_v4, %v16890_v37  ;;  %v16905_v4 = vld [vmem:[#allocation373_spill] sm:$0xff]  ;;  %v16909_v37 = vld [vmem:[#allocation8_spill] sm:$0xff] }
0x156f   :  { %v5458_v20 = vsel %vm397_vm8, %v5457_v52, %v16884_v38  ;;  %v2751_v3 = vsel %vm407_vm13, %v2750_v0, %v16891_v14  ;;  %v16901_v52 = vld [vmem:[#allocation371_spill] sm:$0xff]  ;;  %v10865_v34 = vpop.permute.xlu0 %10864  ;;  %v16910_v14 = vld [vmem:[#allocation64_spill] sm:$0xff] }
0x1570   :  { %v5459_v24 = vsel %vm399_vm9, %v5458_v20, %v16887_v59  ;;  %v2752_v32 = vsel %vm409_vm14, %v2751_v3, %v16896_v44  ;;  %v16911_v3 = vld [vmem:[#allocation62_spill] sm:$0xff]  ;;  %v16913_v6 = vld [vmem:[#allocation20_spill] sm:$0xff] }
0x1571   :  { %10907 = vrot.lane.b32.xlu1 %v2446_v56, %s11141_s5  ;;  %v10580_v56 = vsel %vm407_vm13, %v10579_v23, %v10558_v27  ;;  %v8169_v27 = vsel %vm395_vm7, %v8168_v45, %v16889_v35  ;;  %v5460_v30 = vsel %vm401_vm10, %v5459_v24, %v16892_v33  ;;  %v16907_v45 = vld [vmem:[#allocation374_spill] sm:$0xff]  ;;  %v1754_v33 = vsel %vm383_vm1, %v16911_v3, %v16910_v14  ;;  %v16936_v14 = vld [vmem:[#allocation67_spill] sm:$0xff] }
0x1572   :  { %v10581_v51 = vsel %vm409_vm14, %v10580_v56, %v10562_v50  ;;  %v8170_v13 = vsel %vm397_vm8, %v8169_v27, %v16893_v16  ;;  %v5461_v41 = vsel %vm403_vm11, %v5460_v30, %v16894_v61  ;;  %v10882_v50 = vsel %vm397_vm8, %v10881_v28, %v15514_v31  ;;  %v16904_v56 = vld [vmem:[#allocation246_spill] sm:$0xff]  ;;  %v16912_v30 = vld [vmem:[#allocation9_spill] sm:$0xff]  ;;  %v16916_v28 = vld [vmem:[#allocation63_spill] sm:$0xff] }
0x1573   :  { %v8171_v48 = vsel %vm399_vm9, %v8170_v13, %v16895_v21  ;;  %v10582_v9 = vsel %vm411_vm15, %v10581_v51, %v10566_v46  ;;  %v5462_v40 = vsel %vm405_vm12, %v5461_v41, %v16897_v63  ;;  %v10883_v39 = vsel %vm399_vm9, %v10882_v50, %v15540_v25  ;;  %v10869_v20 = vpop.permute.xlu0 %10868  ;;  %v15795_v46 = vpop.permute.xlu1 %10903  ;;  %v16908_v51 = vld [vmem:[#allocation19_spill] sm:$0xff]  ;;  %v16915_v21 = vld [vmem:[#allocation121_spill] sm:$0xff]  ;;  %v16920_v50 = vld [vmem:[#allocation10_spill] sm:$0xff] }
0x1574   :  { %v8172_v29 = vsel %vm401_vm10, %v8171_v48, %v16898_v58  ;;  %v5463_v12 = vsel %vm407_vm13, %v5462_v40, %v16900_v11  ;;  %v10884_v22 = vsel %vm401_vm10, %v10883_v39, %v15552_v17  ;;  %v384_v0 = vsel %vm383_vm1, %v16909_v37, %v16908_v51  ;;  %v16914_v41 = vld [vmem:[#allocation123_spill] sm:$0xff]  ;;  %v16919_v58 = vld [vmem:[#allocation185_spill] sm:$0xff] }
0x1575   :  { %10931 = vrot.lane.b32.xlu1 %v5158_v47, %s11141_s5  ;;  %v2753_v47 = vsel %vm411_vm15, %v2752_v32, %v16899_v62  ;;  %v8173_v19 = vsel %vm403_vm11, %v8172_v29, %v16901_v52  ;;  %v5464_v23 = vsel %vm409_vm14, %v5463_v12, %v16902_v57  ;;  %v10885_v25 = vsel %vm403_vm11, %v10884_v22, %v15590_v42  ;;  %v16917_v32 = vld [vmem:[#allocation66_spill] sm:$0xff]  ;;  %v16918_v40 = vld [vmem:[#allocation187_spill] sm:$0xff]  ;;  %v16922_v12 = vld [vmem:[#allocation21_spill] sm:$0xff] }
0x1576   :  { %v8174_v31 = vsel %vm405_vm12, %v8173_v19, %v16903_v7  ;;  %v5465_v60 = vsel %vm411_vm15, %v5464_v23, %v16904_v56  ;;  %v10886_v8 = vsel %vm405_vm12, %v10885_v25, %v15655_v18  ;;  %v386_v16 = vsel %vm385_vm2, %v384_v0, %v16912_v30  ;;  %v16923_v19 = vld [vmem:[#allocation125_spill] sm:$0xff]  ;;  %v16925_v23 = vld [vmem:[#allocation186_spill] sm:$0xff]  ;;  %v16926_v22 = vld [vmem:[#allocation68_spill] sm:$0xff] }
0x1577   :  { %v8175_v38 = vsel %vm407_vm13, %v8174_v31, %v16905_v4  ;;  %v10887_v59 = vsel %vm407_vm13, %v10886_v8, %v10865_v34  ;;  %v388_v61 = vsel %vm387_vm3, %v386_v16, %v16913_v6  ;;  %v3110_v48 = vsel %vm383_vm1, %v16915_v21, %v16914_v41  ;;  %v15814_v44 = vpop.permute.xlu1 %10927  ;;  %v16924_v34 = vld [vmem:[#allocation65_spill] sm:$0xff]  ;;  %v16931_v8 = vld [vmem:[#allocation247_spill] sm:$0xff]  ;;  %v16938_v16 = vld [vmem:[#allocation70_spill] sm:$0xff] }
0x1578   :  { %v8176_v15 = vsel %vm409_vm14, %v8175_v38, %v16906_v1  ;;  %v10888_v24 = vsel %vm409_vm14, %v10887_v59, %v10869_v20  ;;  %v4466_v29 = vsel %vm383_vm1, %v16919_v58, %v16918_v40  ;;  %v390_v62 = vsel %vm389_vm4, %v388_v61, %v16920_v50  ;;  %v16928_v38 = vld [vmem:[#allocation11_spill] sm:$0xff]  ;;  %v16929_v20 = vld [vmem:[#allocation124_spill] sm:$0xff]  ;;  %v16943_v40 = vld [vmem:[#allocation126_spill] sm:$0xff] }
0x1579   :  { %10970 = vrot.lane.b32.xlu1 %v7870_v53, %s11141_s5  ;;  %v8177_v17 = vsel %vm411_vm15, %v8176_v15, %v16907_v45  ;;  %v10889_v42 = vsel %vm411_vm15, %v10888_v24, %v10873_v5  ;;  %v15787_v53 = vpop.permute.xlu0 %10891  ;;  %v392_v52 = vsel %vm391_vm5, %v390_v62, %v16922_v12  ;;  %v4467_v7 = vsel %vm385_vm2, %v4466_v29, %v16925_v23  ;;  %v16930_v15 = vld [vmem:[#allocation249_spill] sm:$0xff]  ;;  %v16933_v59 = vld [vmem:[#allocation311_spill] sm:$0xff]  ;;  %v16940_v21 = vld [vmem:[#allocation248_spill] sm:$0xff] }
0x157a   :  { %v394_v25 = vsel %vm393_vm6, %v392_v52, %v16928_v38  ;;  %v5822_v45 = vsel %vm383_vm1, %v16931_v8, %v16930_v15  ;;  %v16935_v37 = vld [vmem:[#allocation127_spill] sm:$0xff]  ;;  %v16946_v52 = vld [vmem:[#allocation24_spill] sm:$0xff]  ;;  %v9890_v38 = vsel %vm383_vm1, %v14642_v49, %v14730_v54  ;;  %v16954_v8 = vld [vmem:[#allocation250_spill] sm:$0xff] }
0x157b   :  { %v15849_v5 = vpop.permute.xlu1 %10966  ;;  %v16939_v61 = vld [vmem:[#allocation191_spill] sm:$0xff]  ;;  %v16959_v54 = vld [vmem:[#allocation317_spill] sm:$0xff] }
0x157c   :  { %v16944_v29 = vld [vmem:[#allocation251_spill] sm:$0xff] }
0x157d   :  { %10994 = vrot.lane.b32.xlu1 %v10582_v9, %s11141_s5  ;;  %v15789_v35 = vpop.permute.xlu0 %10915  ;;  %v1755_v9 = vsel %vm385_vm2, %v1754_v33, %v16916_v28  ;;  %v16937_v33 = vld [vmem:[#allocation188_spill] sm:$0xff]  ;;  %v16945_v62 = vld [vmem:[#allocation315_spill] sm:$0xff] }
0x157e   :  { %v1756_v63 = vsel %vm387_vm3, %v1755_v9, %v16917_v32  ;;  %v16941_v28 = vld [vmem:[#allocation312_spill] sm:$0xff] }
0x157f   :  { %v1757_v57 = vsel %vm389_vm4, %v1756_v63, %v16924_v34  ;;  %v16942_v32 = vld [vmem:[#allocation12_spill] sm:$0xff] }
0x1580   :  { %v1758_v56 = vsel %vm391_vm5, %v1757_v57, %v16926_v22  ;;  %v16948_v57 = vld [vmem:[#allocation69_spill] sm:$0xff] }
0x1581   :  { %10911 = vrot.lane.b32.xlu1 %v2753_v47, %s11142_s6  ;;  %v15791_v27 = vpop.permute.xlu0 %10954  ;;  %v16921_v47 = vld [vmem:[#allocation122_spill] sm:$0xff]  ;;  %v1759_v3 = vsel %vm393_vm6, %v1758_v56, %v16936_v14  ;;  %v16950_v56 = vld [vmem:[#allocation377_spill] sm:$0xff] }
0x1582   :  { %v3111_v11 = vsel %vm385_vm2, %v3110_v48, %v16921_v47  ;;  %v1760_v6 = vsel %vm395_vm7, %v1759_v3, %v16938_v16  ;;  %v5823_v48 = vsel %vm385_vm2, %v5822_v45, %v16940_v21  ;;  %v16961_v16 = vld [vmem:[#allocation131_spill] sm:$0xff]  ;;  %v9891_v21 = vsel %vm385_vm2, %v9890_v38, %v14728_v43 }
0x1583   :  { %v3112_v39 = vsel %vm387_vm3, %v3111_v11, %v16923_v19  ;;  %v5824_v50 = vsel %vm387_vm3, %v5823_v48, %v16944_v29  ;;  %v1761_v23 = vsel %vm397_vm8, %v1760_v6, %v16948_v57  ;;  %v16963_v48 = vld [vmem:[#allocation71_spill] sm:$0xff]  ;;  %v16970_v57 = vld [vmem:[#allocation14_spill] sm:$0xff] }
0x1584   :  { %v3113_v1 = vsel %vm389_vm4, %v3112_v39, %v16929_v20  ;;  %v16947_v39 = vld [vmem:[#allocation129_spill] sm:$0xff]  ;;  %v5825_v45 = vsel %vm389_vm4, %v5824_v50, %v16954_v8  ;;  %v16966_v50 = vld [vmem:[#allocation74_spill] sm:$0xff] }
0x1585   :  { %10935 = vrot.lane.b32.xlu1 %v5465_v60, %s11142_s6  ;;  %v15793_v18 = vpop.permute.xlu0 %10978  ;;  %v16927_v60 = vld [vmem:[#allocation189_spill] sm:$0xff]  ;;  %v3114_v0 = vsel %vm391_vm5, %v3113_v1, %v16935_v37  ;;  %v16976_v8 = vld [vmem:[#allocation378_spill] sm:$0xff] }
0x1586   :  { %v4468_v4 = vsel %vm387_vm3, %v4467_v7, %v16927_v60  ;;  %v3115_v58 = vsel %vm393_vm6, %v3114_v0, %v16943_v40  ;;  %v16949_v7 = vld [vmem:[#allocation190_spill] sm:$0xff]  ;;  %v16951_v60 = vld [vmem:[#allocation375_spill] sm:$0xff]  ;;  %v16953_v1 = vld [vmem:[#allocation193_spill] sm:$0xff] }
0x1587   :  { %v4469_v30 = vsel %vm389_vm4, %v4468_v4, %v16937_v33  ;;  %v3116_v34 = vsel %vm395_vm7, %v3115_v58, %v16947_v39  ;;  %v8534_v4 = vsel %vm383_vm1, %v16951_v60, %v16950_v56  ;;  %v16958_v0 = vld [vmem:[#allocation253_spill] sm:$0xff]  ;;  %v16960_v33 = vld [vmem:[#allocation26_spill] sm:$0xff]  ;;  %v9892_v58 = vsel %vm387_vm3, %v9891_v21, %v14734_v55  ;;  %v16969_v39 = vld [vmem:[#allocation316_spill] sm:$0xff] }
0x1588   :  { %v4470_v41 = vsel %vm391_vm5, %v4469_v30, %v16939_v61  ;;  %v5826_v49 = vsel %vm391_vm5, %v5825_v45, %v16958_v0  ;;  %v16962_v61 = vld [vmem:[#allocation376_spill] sm:$0xff]  ;;  %v16973_v60 = vld [vmem:[#allocation319_spill] sm:$0xff] }
0x1589   :  { %10974 = vrot.lane.b32.xlu1 %v8177_v17, %s11142_s6  ;;  %v15805_v13 = vpop.permute.xlu0 %10895  ;;  %v16932_v17 = vld [vmem:[#allocation313_spill] sm:$0xff]  ;;  %v4471_v22 = vsel %vm393_vm6, %v4470_v41, %v16949_v7  ;;  %v8535_v41 = vsel %vm385_vm2, %v8534_v4, %v16962_v61  ;;  %v16971_v7 = vld [vmem:[#allocation130_spill] sm:$0xff] }
0x158a   :  { %v7178_v24 = vsel %vm383_vm1, %v16933_v59, %v16932_v17  ;;  %v4472_v15 = vsel %vm395_vm7, %v4471_v22, %v16953_v1  ;;  %v16955_v17 = vld [vmem:[#allocation314_spill] sm:$0xff]  ;;  %v16972_v22 = vld [vmem:[#allocation255_spill] sm:$0xff]  ;;  %v16975_v1 = vld [vmem:[#allocation133_spill] sm:$0xff]  ;;  %vm10940_vm1 = vcmask 523264  }
0x158b   :  { %v7179_v9 = vsel %vm385_vm2, %v7178_v24, %v16941_v28  ;;  %v16956_v24 = vld [vmem:[#allocation13_spill] sm:$0xff]  ;;  %vm10942_vm2 = vcmask 785408  }
0x158c   :  { %v7180_v47 = vsel %vm387_vm3, %v7179_v9, %v16945_v62  ;;  %v16964_v9 = vld [vmem:[#allocation192_spill] sm:$0xff] }
0x158d   :  { %10998 = vrot.lane.b32.xlu1 %v10889_v42, %s11142_s6  ;;  %v15833_v31 = vpop.permute.xlu0 %10919  ;;  %v16934_v42 = vld [vmem:[#allocation23_spill] sm:$0xff]  ;;  %v7181_v59 = vsel %vm389_vm4, %v7180_v47, %v16955_v17  ;;  %v9893_v17 = vsel %vm389_vm4, %v9892_v58, %v14732_v2 }
0x158e   :  { %v396_v51 = vsel %vm395_vm7, %v394_v25, %v16934_v42  ;;  %v16952_v25 = vld [vmem:[#allocation72_spill] sm:$0xff]  ;;  %v7182_v14 = vsel %vm391_vm5, %v7181_v59, %v16959_v54  ;;  %v16967_v47 = vld [vmem:[#allocation195_spill] sm:$0xff]  ;;  %v16977_v59 = vld [vmem:[#allocation73_spill] sm:$0xff] }
0x158f   :  { %v398_v63 = vsel %vm397_vm8, %v396_v51, %v16942_v32  ;;  %v1762_v20 = vsel %vm399_vm9, %v1761_v23, %v16952_v25  ;;  %v16957_v51 = vld [vmem:[#allocation128_spill] sm:$0xff]  ;;  %v4473_v32 = vsel %vm397_vm8, %v4472_v15, %v16964_v9  ;;  %v16986_v9 = vld [vmem:[#allocation257_spill] sm:$0xff] }
0x1590   :  { %v400_v19 = vsel %vm399_vm9, %v398_v63, %v16946_v52  ;;  %v3117_v37 = vsel %vm397_vm8, %v3116_v34, %v16957_v51  ;;  %v1763_v28 = vsel %vm401_vm10, %v1762_v20, %v16963_v48  ;;  %v16965_v63 = vld [vmem:[#allocation379_spill] sm:$0xff]  ;;  %v4474_v43 = vsel %vm399_vm9, %v4473_v32, %v16967_v47  ;;  %v16968_v52 = vld [vmem:[#allocation252_spill] sm:$0xff]  ;;  %v16987_v32 = vld [vmem:[#allocation321_spill] sm:$0xff] }
0x1591   :  { %v15875_v11 = vpop.permute.xlu0 %10958  ;;  %v402_v42 = vsel %vm401_vm10, %v400_v19, %v16956_v24  ;;  %v3118_v6 = vsel %vm399_vm9, %v3117_v37, %v16961_v16  ;;  %v8536_v40 = vsel %vm387_vm3, %v8535_v41, %v16965_v63  ;;  %v1764_v62 = vsel %vm403_vm11, %v1763_v28, %v16966_v50  ;;  %v16974_v25 = vld [vmem:[#allocation28_spill] sm:$0xff]  ;;  %v16979_v37 = vld [vmem:[#allocation381_spill] sm:$0xff]  ;;  %v16982_v16 = vld [vmem:[#allocation254_spill] sm:$0xff] }
0x1592   :  { %v404_v30 = vsel %vm403_vm11, %v402_v42, %v16960_v33  ;;  %v5827_v19 = vsel %vm393_vm6, %v5826_v49, %v16968_v52  ;;  %v7183_v34 = vsel %vm393_vm6, %v7182_v14, %v16969_v39  ;;  %v3119_v55 = vsel %vm401_vm10, %v3118_v6, %v16971_v7  ;;  %v16978_v42 = vld [vmem:[#allocation194_spill] sm:$0xff]  ;;  %v16980_v54 = vld [vmem:[#allocation76_spill] sm:$0xff]  ;;  %v16981_v33 = vld [vmem:[#allocation197_spill] sm:$0xff] }
0x1593   :  { %v406_v23 = vsel %vm405_vm12, %v404_v30, %v16970_v57  ;;  %v5828_v56 = vsel %vm395_vm7, %v5827_v19, %v16972_v22  ;;  %v7184_v4 = vsel %vm395_vm7, %v7183_v34, %v16973_v60  ;;  %v3120_v15 = vsel %vm403_vm11, %v3119_v55, %v16975_v1  ;;  %v16983_v6 = vld [vmem:[#allocation318_spill] sm:$0xff]  ;;  %v16984_v41 = vld [vmem:[#allocation15_spill] sm:$0xff]  ;;  %v16985_v48 = vld [vmem:[#allocation132_spill] sm:$0xff] }
0x1594   :  { %v408_v20 = vsel %vm407_vm13, %v406_v23, %v16974_v25  ;;  %v8537_v45 = vsel %vm389_vm4, %v8536_v40, %v16976_v8  ;;  %v1765_v24 = vsel %vm405_vm12, %v1764_v62, %v16977_v59  ;;  %v4475_v51 = vsel %vm401_vm10, %v4474_v43, %v16978_v42  ;;  %v16988_v50 = vld [vmem:[#allocation29_spill] sm:$0xff]  ;;  %v16989_v47 = vld [vmem:[#allocation135_spill] sm:$0xff]  ;;  %v16990_v52 = vld [vmem:[#allocation380_spill] sm:$0xff] }
0x1595   :  { %v15927_v29 = vpop.permute.xlu0 %10982  ;;  %v8538_v0 = vsel %vm391_vm5, %v8537_v45, %v16979_v37  ;;  %v9894_v49 = vsel %vm391_vm5, %v9893_v17, %v14738_v36  ;;  %v1766_v14 = vsel %vm407_vm13, %v1765_v24, %v16980_v54  ;;  %v4476_v30 = vsel %vm403_vm11, %v4475_v51, %v16981_v33  ;;  %v16991_v34 = vld [vmem:[#allocation75_spill] sm:$0xff]  ;;  %v16992_v23 = vld [vmem:[#allocation196_spill] sm:$0xff]  ;;  %v16994_v60 = vld [vmem:[#allocation77_spill] sm:$0xff] }
0x1596   :  { %v5829_v2 = vsel %vm397_vm8, %v5828_v56, %v16982_v16  ;;  %v7185_v61 = vsel %vm397_vm8, %v7184_v4, %v16983_v6  ;;  %v410_v21 = vsel %vm409_vm14, %v408_v20, %v16984_v41  ;;  %v3121_v28 = vsel %vm405_vm12, %v3120_v15, %v16985_v48  ;;  %v16993_v55 = vld [vmem:[#allocation383_spill] sm:$0xff]  ;;  %v16996_v1 = vld [vmem:[#allocation256_spill] sm:$0xff]  ;;  %v16998_v45 = vld [vmem:[#allocation134_spill] sm:$0xff] }
0x1597   :  { %v5830_v36 = vsel %vm399_vm9, %v5829_v2, %v16986_v9  ;;  %v7186_v63 = vsel %vm399_vm9, %v7185_v61, %v16987_v32  ;;  %v412_v62 = vsel %vm411_vm15, %v410_v21, %v16988_v50  ;;  %v3122_v43 = vsel %vm407_vm13, %v3121_v28, %v16989_v47  ;;  %v16995_v25 = vld [vmem:[#allocation199_spill] sm:$0xff]  ;;  %v16997_v15 = vld [vmem:[#allocation320_spill] sm:$0xff]  ;;  %v17005_v2 = vld [vmem:[#allocation385_spill] sm:$0xff] }
0x1598   :  { %v8539_v19 = vsel %vm393_vm6, %v8538_v0, %v16990_v52  ;;  %v9895_v39 = vsel %vm393_vm6, %v9894_v49, %v14736_v26  ;;  %v1767_v57 = vsel %vm409_vm14, %v1766_v14, %v16991_v34  ;;  %v4477_v7 = vsel %vm405_vm12, %v4476_v30, %v16992_v23  ;;  %v16999_v59 = vld [vmem:[#allocation259_spill] sm:$0xff]  ;;  %v17001_v37 = vld [vmem:[#allocation136_spill] sm:$0xff]  ;;  %v17002_v49 = vld [vmem:[#allocation382_spill] sm:$0xff] }
0x1599   :  { %v10900_v40 = vpop.permute.xlu0 %10899  ;;  %v8540_v22 = vsel %vm395_vm7, %v8539_v19, %v16993_v55  ;;  %v9896_v56 = vsel %vm395_vm7, %v9895_v39, %v14742_v10  ;;  %v1768_v4 = vsel %vm411_vm15, %v1767_v57, %v16994_v60  ;;  %v4478_v20 = vsel %vm407_vm13, %v4477_v7, %v16995_v25  ;;  %v17000_v42 = vld [vmem:[#allocation323_spill] sm:$0xff]  ;;  %v17004_v30 = vld [vmem:[#allocation198_spill] sm:$0xff]  ;;  %v17006_v61 = vld [vmem:[#allocation441_spill] sm:$0xff] }
0x159a   :  { %v5831_v26 = vsel %vm401_vm10, %v5830_v36, %v16996_v1  ;;  %v7187_v8 = vsel %vm401_vm10, %v7186_v63, %v16997_v15  ;;  %v3123_v17 = vsel %vm409_vm14, %v3122_v43, %v16998_v45  ;;  %v8541_v54 = vsel %vm397_vm8, %v8540_v22, %v17002_v49  ;;  %v17003_v14 = vld [vmem:[#allocation439_spill] sm:$0xff]  ;;  %v17007_v48 = vld [vmem:[#allocation258_spill] sm:$0xff]  ;;  %v17009_v50 = vld [vmem:[#allocation261_spill] sm:$0xff] }
0x159b   :  { %v5832_v24 = vsel %vm403_vm11, %v5831_v26, %v16999_v59  ;;  %v7188_v10 = vsel %vm403_vm11, %v7187_v8, %v17000_v42  ;;  %v3124_v0 = vsel %vm411_vm15, %v3123_v17, %v17001_v37  ;;  %v9897_v33 = vsel %vm397_vm8, %v9896_v56, %v17003_v14  ;;  %v17008_v9 = vld [vmem:[#allocation322_spill] sm:$0xff]  ;;  %v17010_v43 = vld [vmem:[#allocation325_spill] sm:$0xff]  ;;  %v17011_v57 = vld [vmem:[#allocation384_spill] sm:$0xff] }
0x159c   :  { %v4479_v16 = vsel %vm409_vm14, %v4478_v20, %v17004_v30  ;;  %v8542_v6 = vsel %vm399_vm9, %v8541_v54, %v17005_v2  ;;  %v9898_v41 = vsel %vm399_vm9, %v9897_v33, %v17006_v61  ;;  %v5833_v28 = vsel %vm405_vm12, %v5832_v24, %v17007_v48  ;;  %v17013_v55 = vld [vmem:[#allocation200_spill] sm:$0xff]  ;;  %v17014_v56 = vld [vmem:[#allocation387_spill] sm:$0xff]  ;;  %v17017_v26 = vld [vmem:[#allocation262_spill] sm:$0xff] }
0x159d   :  { %v10924_v21 = vpop.permute.xlu0 %10923  ;;  %v7189_v36 = vsel %vm405_vm12, %v7188_v10, %v17008_v9  ;;  %v10944_v32 = vsel %vm10938_vm0, %v1768_v4, %v15795_v46  ;;  %v10939_v63 = vsel %vm10938_vm0, %v412_v62, %v15787_v53  ;;  %v5834_v47 = vsel %vm407_vm13, %v5833_v28, %v17009_v50  ;;  %v17012_v46 = vld [vmem:[#allocation440_spill] sm:$0xff]  ;;  %v17015_v60 = vld [vmem:[#allocation443_spill] sm:$0xff]  ;;  %v17019_v10 = vld [vmem:[#allocation386_spill] sm:$0xff] }
0x159e   :  { %v7190_v52 = vsel %vm407_vm13, %v7189_v36, %v17010_v43  ;;  %v10941_v19 = vsel %vm10940_vm1, %v10939_v63, %v15805_v13  ;;  %v8543_v23 = vsel %vm401_vm10, %v8542_v6, %v17011_v57  ;;  %v9899_v7 = vsel %vm401_vm10, %v9898_v41, %v17012_v46  ;;  %v17016_v25 = vld [vmem:[#allocation260_spill] sm:$0xff]  ;;  %v17020_v37 = vld [vmem:[#allocation442_spill] sm:$0xff]  ;;  %v17023_v30 = vld [vmem:[#allocation445_spill] sm:$0xff] }
0x159f   :  { %v10943_v53 = vsel %vm10942_vm2, %v10941_v19, %v10900_v40  ;;  %v4480_v22 = vsel %vm411_vm15, %v4479_v16, %v17013_v55  ;;  %v8544_v13 = vsel %vm403_vm11, %v8543_v23, %v17014_v56  ;;  %v5835_v20 = vsel %vm409_vm14, %v5834_v47, %v17016_v25  ;;  %v17018_v8 = vld [vmem:[#allocation324_spill] sm:$0xff]  ;;  %v17021_v54 = vld [vmem:[#allocation326_spill] sm:$0xff] }
0x15a0   :  { %v10950_v1 = vsel %vm10938_vm0, %v4480_v22, %v15814_v44  ;;  %v10947_v40 = vsel %vm10938_vm0, %v3124_v0, %v15789_v35  ;;  %v5836_v15 = vsel %vm411_vm15, %v5835_v20, %v17017_v26  ;;  %v7191_v45 = vsel %vm409_vm14, %v7190_v52, %v17018_v8  ;;  %v17024_v48 = vld [vmem:[#allocation388_spill] sm:$0xff]  ;;  %v17026_v63 = vld [vmem:[#allocation390_spill] sm:$0xff] }
0x15a1   :  { %v10948_v17 = vsel %vm10940_vm1, %v10947_v40, %v15833_v31  ;;  %v10963_v59 = vpop.permute.xlu0 %10962  ;;  %v8545_v44 = vsel %vm405_vm12, %v8544_v13, %v17019_v10  ;;  %v7192_v14 = vsel %vm411_vm15, %v7191_v45, %v17021_v54  ;;  %v17022_v31 = vld [vmem:[#allocation389_spill] sm:$0xff]  ;;  %v11001_v6 = vsel %vm10938_vm0, %v5836_v15, %v15791_v27  ;;  %v17025_v9 = vld [vmem:[#allocation444_spill] sm:$0xff]  ;;  %v17027_v50 = vld [vmem:[#allocation446_spill] sm:$0xff] }
0x15a2   :  { %v10949_v0 = vsel %vm10942_vm2, %v10948_v17, %v10924_v21  ;;  %v8546_v33 = vsel %vm407_vm13, %v8545_v44, %v17022_v31  ;;  %v11004_v2 = vsel %vm10938_vm0, %v7192_v14, %v15849_v5  ;;  %v11002_v61 = vsel %vm10940_vm1, %v11001_v6, %v15875_v11 }
0x15a3   :  { %v8547_v28 = vsel %vm409_vm14, %v8546_v33, %v17024_v48 }
0x15a4   :  { %v8548_v27 = vsel %vm411_vm15, %v8547_v28, %v17026_v63 }
0x15a5   :  { %v10987_v47 = vpop.permute.xlu0 %10986  ;;  %v11007_v43 = vsel %vm10938_vm0, %v8548_v27, %v15793_v18 }
0x15a6   :  { %v11008_v19 = vsel %vm10940_vm1, %v11007_v43, %v15927_v29 }
0x15a7   :  { %v11009_v57 = vsel %vm10942_vm2, %v11008_v19, %v10987_v47 }
0x15df   :  { %v15877_v12 = vpop.permute.xlu1 %10990 }
0x15e3   :  { %v15909_v3 = vpop.permute.xlu1 %10907 }
0x15e4   :  { %v10945_v39 = vsel %vm10940_vm1, %v10944_v32, %v15909_v3  ;;  %v9900_v3 = vsel %vm403_vm11, %v9899_v7, %v17015_v60  ;;  %v11003_v32 = vsel %vm10942_vm2, %v11002_v61, %v10963_v59 }
0x15e5   :  { %v9901_v35 = vsel %vm405_vm12, %v9900_v3, %v17020_v37 }
0x15e7   :  { %v15945_v38 = vpop.permute.xlu1 %10931 }
0x15e8   :  { %v10951_v24 = vsel %vm10940_vm1, %v10950_v1, %v15945_v38  ;;  %v9902_v38 = vsel %vm407_vm13, %v9901_v35, %v17023_v30 }
0x15e9   :  { %v9903_v36 = vsel %vm409_vm14, %v9902_v38, %v17025_v9 }
0x15ea   :  { %v9904_v11 = vsel %vm411_vm15, %v9903_v36, %v17027_v50 }
0x15eb   :  { %v15979_v58 = vpop.permute.xlu1 %10970  ;;  %v11010_v52 = vsel %vm10938_vm0, %v9904_v11, %v15877_v12 }
0x15ec   :  { %v11005_v41 = vsel %vm10940_vm1, %v11004_v2, %v15979_v58 }
0x15ef   :  { %v16011_v51 = vpop.permute.xlu1 %10994 }
0x15f3   :  { %v10912_v34 = vpop.permute.xlu1 %10911 }
0x15f4   :  { %v10946_v62 = vsel %vm10942_vm2, %v10945_v39, %v10912_v34  ;;  %v11011_v39 = vsel %vm10940_vm1, %v11010_v52, %v16011_v51 }
0x15f5   :  { %v11021_v4 = vcombine.low %v10943_v53, %v10946_v62 }
0x15f7   :  { %11029 = vst [vmem:[#allocation5] sm:$0xff] %v11021_v4  ;;  %v10936_v42 = vpop.permute.xlu1 %10935 }
0x15f8   :  { %v10952_v49 = vsel %vm10942_vm2, %v10951_v24, %v10936_v42 }
0x15f9   :  { %v11022_v16 = vcombine.low %v10949_v0, %v10952_v49 }
0x15fb   :  { %11030 = vst [vmem:[#allocation5 + $0x8] sm:$0xff] %v11022_v16  ;;  %v10975_v21 = vpop.permute.xlu1 %10974 }
0x15fc   :  { %v11006_v5 = vsel %vm10942_vm2, %v11005_v41, %v10975_v21 }
0x15fd   :  { %v11023_v58 = vcombine.low %v11003_v32, %v11006_v5 }
0x15ff   :  { %11031 = vst [vmem:[#allocation5 + $0x10] sm:$0xff] %v11023_v58  ;;  %v10999_v34 = vpop.permute.xlu1 %10998 }
0x1600   :  { %v11012_v23 = vsel %vm10942_vm2, %v11011_v39, %v10999_v34 }
0x1601   :  { %v11024_v46 = vcombine.low %v11009_v57, %v11012_v23 }
0x1603   :  { %11032 = vst [vmem:[#allocation5 + $0x18] sm:$0xff] %v11024_v46 }
0x1604   :  { %11105 = shalt.err (!%p11102_p12)
}
0x1605   :  { %s11106_s12 = scalar_lea.hbm %s16120_s1, 512 }
0x1606   :  { %p11107_p13 = scmp.ne.s32.totalorder %s16120_s1, %s11106_s12  ;;  %p11110_p0 = scmp.lt.u32.totalorder %s11106_s12, %s16120_s1 }
0x1608   :  { %p11112_p1 = pnand %p11110_p0, %p11107_p13 }
0x160a   :  { %11115 = shalt.err (!%p11112_p1)
}
0x160b   :  { %11042 = dma.vmem_to_hbm [thread:$0]  %s11040_s8, 512, %s16120_s1, [#allocation4]  }
0x160c   :  { %11118 = dma.done.wait [#allocation4], 512  }
0x160d   :  { %11119 = vsyncadd [#allocation4], 4294966784 }
0x160e   :  { %11046 = vsyncpa [#allocation3], 1 }
0x160f   :  { %11047 = vsyncpa [#allocation4], 1 }

</bundles_post_ra>
